<compile_context>
chip_gen: v7x
topology: tpu7x:2x2x1
jax: 0.10.0
libtpu: 0.0.40
codegen_flags: <defaults>
</compile_context>

<pallas_src>
from functools import partial

import numpy as np
import jax
import jax.numpy as jnp
from jax.experimental import pallas as pl
from jax.experimental.pallas import tpu as pltpu


# --------------------------------------------------------------------------
# Per-tap validity masks: 1.0 where the tapped pixel lies inside the image.
# Shared by every conv; tap order is (dy, dx) raster, matching the weights.
# --------------------------------------------------------------------------
def _tap_masks_np(H, W):
    y, x = np.mgrid[0:H, 0:W]
    rows = []
    for dy in range(3):
        for dx in range(3):
            oy, ox = dy - 1, dx - 1
            ok = (y + oy >= 0) & (y + oy < H) & (x + ox >= 0) & (x + ox < W)
            rows.append(ok.reshape(-1))
    return np.stack(rows).astype(np.float32)              # (9, H*W)


# --------------------------------------------------------------------------
# Weight packing: one (cout, 9*cin_pad + 16) matrix per conv.
#   [ 9*cin_pad tap columns | 9 noise-tap columns | bias column | 6 zero columns ]
# matching the patch-row layout (tap rows, n*mask rows, ones row, zero pad rows).
# --------------------------------------------------------------------------
def _flat_w(w, cin_pad):
    kh, kw, cin, cout = w.shape
    if cin_pad > cin:
        w = jnp.concatenate([w, jnp.zeros((kh, kw, cin_pad - cin, cout), w.dtype)], axis=2)
    return jnp.transpose(w, (3, 0, 1, 2)).reshape(cout, -1)   # (cout, 9*cin_pad)


def _pack_w(w, b, has_n, cin_pad):
    f32 = jnp.float32
    cout = w.shape[3]
    if has_n:                                   # last input channel is the constant-n channel
        cin = w.shape[2] - 1
        w_main, w_n = w[:, :, :cin, :], w[:, :, cin, :]
        n_cols = w_n.reshape(9, cout).T.astype(f32)            # (cout, 9)
    else:
        w_main = w
        n_cols = jnp.zeros((cout, 9), f32)
    return jnp.concatenate(
        [_flat_w(w_main.astype(f32), cin_pad), n_cols,
         b.reshape(cout, 1).astype(f32), jnp.zeros((cout, 6), f32)], axis=1)


# --------------------------------------------------------------------------
# Fused ResNet kernel: one grid step == one batch chunk, whole network.
# --------------------------------------------------------------------------
def _resnet_kernel(x_ref, mask_ref, nblk_ref, *refs, W, fd_pad, hid, n_layers):
    # refs = packed weights (embed, [w1, w2]*n_layers, out), then out ref, then patch scratch
    n_w = 2 + 2 * n_layers
    w_refs = refs[:n_w]
    o_ref = refs[n_w]
    patch_ref = refs[n_w + 1]

    N = x_ref.shape[-1]                                   # lanes = (chunk batch) * H * W
    offsets = [(dy - 1) * W + (dx - 1) for dy in range(3) for dx in range(3)]

    def im2col(act, cin):
        # One aligned full-width store per tap: XLU roll + VPU mask-mul -> single vst.
        # The masks zero every destination pixel whose tap falls outside its own image,
        # which also covers roll wrap-around and cross-image reads inside the chunk.
        for t, d in enumerate(offsets):
            rows = pl.ds(t * cin, cin)
            if d == 0:
                patch_ref[rows, :] = act
            else:
                patch_ref[rows, :] = (pltpu.roll(act, shift=(-d) % N, axis=1)
                                      * mask_ref[pl.ds(t, 1), :])

    def conv(act, cin, w_ref, silu=False, residual=None):
        # One MXU matmul per conv; bias and the constant-n channel ride along as the
        # trailing 16 patch rows / weight columns.
        im2col(act, cin)
        acc = jnp.dot(w_ref[...], patch_ref[pl.ds(0, 9 * cin + 16), :],
                      preferred_element_type=jnp.float32)
        if silu:
            acc = acc * jax.nn.sigmoid(acc)               # SiLU (EUP)
        if residual is not None:
            acc = acc + residual
        return acc

    # ---- embed: Conv(feature_dim [+ n] -> hidden) + SiLU
    patch_ref[pl.ds(9 * fd_pad, 16), :] = nblk_ref[...]       # n rows + ones row + zero pad
    h = conv(x_ref[...], fd_pad, w_refs[0], silu=True)

    # ---- residual blocks: h = h + conv2(SiLU(conv1([h, n])))
    patch_ref[pl.ds(9 * hid, 16), :] = nblk_ref[...]          # persists: taps only touch rows < 9*hid
    for i in range(n_layers):
        t_act = conv(h, hid, w_refs[1 + 2 * i], silu=True)
        h = conv(t_act, hid, w_refs[2 + 2 * i], residual=h)

    # ---- out: Conv(hidden -> feature_dim)
    o_ref[...] = conv(h, hid, w_refs[1 + 2 * n_layers]).astype(o_ref.dtype)


# --------------------------------------------------------------------------
# Wrapper. num_chunks=1 (default) for single-TensorCore chips (v5e/v6e);
# num_chunks=2 splits the batch over the two TensorCores of v7x.
# --------------------------------------------------------------------------
@partial(jax.jit, static_argnames=("num_chunks",))
def resnet_forward(params, z_nchw, n, num_chunks=1):
    """z_nchw: (B, feature_dim, H, W) f32; n: (B,) f32 -> (B, feature_dim, H, W)."""
    B, fd, H, W = z_nchw.shape
    hid = params["embed_b"].shape[0]
    n_layers = len(params["layers"])
    P = H * W
    assert B % num_chunks == 0 and P % 128 == 0 and fd <= 8
    Bc = B // num_chunks
    N = Bc * P                                   # lanes per grid step (lane-dense, mult of 128)
    fd_pad = 8                                   # pad embed input channels to a full sublane tile
    f32 = jnp.float32

    # Activations: channels on sublanes, (image, pixel) flattened on lanes (tiny transpose).
    x = jnp.transpose(z_nchw.astype(f32).reshape(B, fd, P), (1, 0, 2)).reshape(fd, B * P)
    x = jnp.concatenate([x, jnp.zeros((fd_pad - fd, B * P), f32)], axis=0)   # (fd_pad, B*P)

    masks_np = _tap_masks_np(H, W)                                  # (9, P) host-side
    masks = jnp.asarray(np.tile(masks_np, (1, Bc)))                 # (9, N) per chunk

    # Noise/bias patch rows: 9 rows of n*mask (per lane's image), 1 ones row, 6 zero rows.
    n_lane = jnp.repeat(n.astype(f32), P)[None, :]                  # (1, B*P)
    nblock = jnp.concatenate(
        [jnp.asarray(np.tile(masks_np, (1, B))) * n_lane,
         jnp.ones((1, B * P), f32),
         jnp.zeros((6, B * P), f32)], axis=0)                       # (16, B*P)

    # Packed, VMEM-resident weights (bias + n-channel folded in as trailing columns).
    wargs = [_pack_w(params["embed_w"], params["embed_b"], True, fd_pad)]
    for (w1, b1, w2, b2) in params["layers"]:
        wargs += [_pack_w(w1, b1, True, hid), _pack_w(w2, b2, False, hid)]
    wargs.append(_pack_w(params["out_w"], params["out_b"], False, hid))

    kernel = partial(_resnet_kernel, W=W, fd_pad=fd_pad, hid=hid, n_layers=n_layers)

    in_specs = [
        pl.BlockSpec((fd_pad, N), lambda c: (0, c)),                # x: chunk of lanes
        pl.BlockSpec((9, N), lambda c: (0, 0)),                     # tap masks (resident)
        pl.BlockSpec((16, N), lambda c: (0, c)),                    # noise/bias rows per chunk
    ]
    in_specs += [pl.BlockSpec(w.shape, lambda c: (0, 0)) for w in wargs]   # weights: resident

    out = pl.pallas_call(
        kernel,
        out_shape=jax.ShapeDtypeStruct((fd, B * P), f32),
        grid=(num_chunks,),
        in_specs=in_specs,
        out_specs=pl.BlockSpec((fd, N), lambda c: (0, c)),
        scratch_shapes=[pltpu.VMEM((max(9 * hid, 9 * fd_pad) + 16, N), f32)],   # im2col patch
        compiler_params=pltpu.CompilerParams(
            dimension_semantics=("parallel",),                      # 2 TCs on v7x w/ num_chunks=2
            vmem_limit_bytes=32 * 1024 * 1024),
    )(x, masks, nblock, *wargs)

    # (fd, B*P) -> (B, fd, H, W)
    return jnp.transpose(out.reshape(fd, B, P), (1, 0, 2)).reshape(B, fd, H, W)


# --------------------------------------------------------------------------
# Pure-JAX reference (correctness check only), NCHW like the PyTorch module
# --------------------------------------------------------------------------
def _conv_ref(x, w, b):
    y = jax.lax.conv_general_dilated(
        x, w, window_strides=(1, 1), padding="SAME",
        dimension_numbers=("NCHW", "HWIO", "NCHW"))
    return y + b[None, :, None, None]


def resnet_forward_ref(params, z, n):
    B, C, H, W = z.shape
    nmap = jnp.broadcast_to(n[:, None, None, None].astype(jnp.float32), (B, 1, H, W))
    h = jax.nn.silu(_conv_ref(jnp.concatenate([z, nmap], axis=1),
                              params["embed_w"], params["embed_b"]))
    for (w1, b1, w2, b2) in params["layers"]:
        t = jax.nn.silu(_conv_ref(jnp.concatenate([h, nmap], axis=1), w1, b1))
        h = h + _conv_ref(t, w2, b2)
    return _conv_ref(h, params["out_w"], params["out_b"])


# --------------------------------------------------------------------------
# Deterministic parameter init (shapes match the PyTorch module's __init__)
# --------------------------------------------------------------------------
def init_params(key, feature_dim, hidden_dim, n_layers):
    def conv_init(k, cin, cout):
        k1, k2 = jax.random.split(k)
        bound = 1.0 / np.sqrt(cin * 9)
        w = jax.random.uniform(k1, (3, 3, cin, cout), jnp.float32, -bound, bound)
        b = jax.random.uniform(k2, (cout,), jnp.float32, -bound, bound)
        return w, b

    keys = jax.random.split(key, 2 + 2 * n_layers)
    embed_w, embed_b = conv_init(keys[0], feature_dim + 1, hidden_dim)
    out_w, out_b = conv_init(keys[1], hidden_dim, feature_dim)
    layers = []
    for i in range(n_layers):
        w1, b1 = conv_init(keys[2 + 2 * i], hidden_dim + 1, hidden_dim)
        w2, b2 = conv_init(keys[3 + 2 * i], hidden_dim, hidden_dim)
        layers.append((w1, b1, w2, b2))
    return {"embed_w": embed_w, "embed_b": embed_b,
            "out_w": out_w, "out_b": out_b, "layers": layers}


if __name__ == "__main__":
    feature_dim, hidden_dim, n_layers = 4, 32, 2
    B, H, W = 2, 16, 16

    key = jax.random.PRNGKey(0)
    kp, kz, kn = jax.random.split(key, 3)
    params = init_params(kp, feature_dim, hidden_dim, n_layers)
    z = jax.random.normal(kz, (B, feature_dim, H, W), jnp.float32)
    n = jax.random.uniform(kn, (B,), jnp.float32)

    ref = jax.block_until_ready(resnet_forward_ref(params, z, n))

    # Default config (batch fully folded into lanes, grid=(1,)) — v5e/v6e path.
    out = jax.block_until_ready(resnet_forward(params, z, n))
    assert out.shape == (B, feature_dim, H, W)
    np.testing.assert_allclose(np.asarray(out), np.asarray(ref), rtol=1e-4, atol=1e-4)

    # v7x path: 2-step "parallel" grid, B/2 images per chunk (also validates chunked masks).
    if B % 2 == 0:
        out2 = jax.block_until_ready(resnet_forward(params, z, n, num_chunks=2))
        np.testing.assert_allclose(np.asarray(out2), np.asarray(ref), rtol=1e-4, atol=1e-4)

    print("KERNEL_OK")
</pallas_src>

<mosaic_0001>
module attributes {stable_mosaic.version = 11 : i64} {
  func.func @_resnet_kernel(%arg0: i32, %arg1: memref<8x512xf32, #tpu.memory_space<vmem>>, %arg2: memref<9x512xf32, #tpu.memory_space<vmem>>, %arg3: memref<16x512xf32, #tpu.memory_space<vmem>>, %arg4: memref<32x88xf32, #tpu.memory_space<vmem>>, %arg5: memref<32x304xf32, #tpu.memory_space<vmem>>, %arg6: memref<32x304xf32, #tpu.memory_space<vmem>>, %arg7: memref<32x304xf32, #tpu.memory_space<vmem>>, %arg8: memref<32x304xf32, #tpu.memory_space<vmem>>, %arg9: memref<4x304xf32, #tpu.memory_space<vmem>>, %arg10: memref<4x512xf32, #tpu.memory_space<vmem>>, %arg11: memref<304x512xf32, #tpu.memory_space<vmem>>) attributes {dimension_semantics = [#tpu.dimension_semantics<parallel>], iteration_bounds = array<i64: 1>, scalar_prefetch = 0 : i64, scratch_operands = 1 : i64, tpu.core_type = #tpu.core_type<tc>, window_params = [{transform_indices = @transform_0, window_bounds = array<i64: 8, 512>}, {pipeline_mode = #tpu.pipeline_mode<synchronous>, transform_indices = @transform_1, window_bounds = array<i64: 9, 512>}, {transform_indices = @transform_2, window_bounds = array<i64: 16, 512>}, {pipeline_mode = #tpu.pipeline_mode<synchronous>, transform_indices = @transform_3, window_bounds = array<i64: 32, 88>}, {pipeline_mode = #tpu.pipeline_mode<synchronous>, transform_indices = @transform_4, window_bounds = array<i64: 32, 304>}, {pipeline_mode = #tpu.pipeline_mode<synchronous>, transform_indices = @transform_5, window_bounds = array<i64: 32, 304>}, {pipeline_mode = #tpu.pipeline_mode<synchronous>, transform_indices = @transform_6, window_bounds = array<i64: 32, 304>}, {pipeline_mode = #tpu.pipeline_mode<synchronous>, transform_indices = @transform_7, window_bounds = array<i64: 32, 304>}, {pipeline_mode = #tpu.pipeline_mode<synchronous>, transform_indices = @transform_8, window_bounds = array<i64: 4, 304>}, {transform_indices = @transform_9, window_bounds = array<i64: 4, 512>}]} {
    %c0 = arith.constant 0 : index
    %c0_0 = arith.constant 0 : index
    %0 = vector.load %arg3[%c0, %c0_0] : memref<16x512xf32, #tpu.memory_space<vmem>>, vector<16x512xf32>
    %c72 = arith.constant 72 : index
    %c0_1 = arith.constant 0 : index
    %1 = vector.load %arg11[%c72, %c0_1] : memref<304x512xf32, #tpu.memory_space<vmem>>, vector<16x512xf32>
    tpu.vector_store %arg11[%c72, %c0_1], %0 {strides = array<i32>} : memref<304x512xf32, #tpu.memory_space<vmem>>, vector<16x512xf32>,
    %c0_2 = arith.constant 0 : index
    %c0_3 = arith.constant 0 : index
    %2 = vector.load %arg1[%c0_2, %c0_3] : memref<8x512xf32, #tpu.memory_space<vmem>>, vector<8x512xf32>
    %c17_i32 = arith.constant 17 : i32
    %3 = tpu.dynamic_rotate %2 by %c17_i32 dim 1 : vector<8x512xf32>, i32 -> vector<8x512xf32>
    %c0_4 = arith.constant 0 : index
    %c0_5 = arith.constant 0 : index
    %4 = vector.load %arg2[%c0_4, %c0_5] : memref<9x512xf32, #tpu.memory_space<vmem>>, vector<1x512xf32>
    %5 = vector.broadcast %4 : vector<1x512xf32> to vector<8x512xf32>
    %6 = arith.mulf %3, %5 : vector<8x512xf32>
    %c0_6 = arith.constant 0 : index
    %c0_7 = arith.constant 0 : index
    %7 = vector.load %arg11[%c0_6, %c0_7] : memref<304x512xf32, #tpu.memory_space<vmem>>, vector<8x512xf32>
    tpu.vector_store %arg11[%c0_6, %c0_7], %6 {strides = array<i32>} : memref<304x512xf32, #tpu.memory_space<vmem>>, vector<8x512xf32>,
    %c16_i32 = arith.constant 16 : i32
    %8 = tpu.dynamic_rotate %2 by %c16_i32 dim 1 : vector<8x512xf32>, i32 -> vector<8x512xf32>
    %c1 = arith.constant 1 : index
    %c0_8 = arith.constant 0 : index
    %9 = vector.load %arg2[%c1, %c0_8] : memref<9x512xf32, #tpu.memory_space<vmem>>, vector<1x512xf32>
    %10 = vector.broadcast %9 : vector<1x512xf32> to vector<8x512xf32>
    %11 = arith.mulf %8, %10 : vector<8x512xf32>
    %c8 = arith.constant 8 : index
    %c0_9 = arith.constant 0 : index
    %12 = vector.load %arg11[%c8, %c0_9] : memref<304x512xf32, #tpu.memory_space<vmem>>, vector<8x512xf32>
    tpu.vector_store %arg11[%c8, %c0_9], %11 {strides = array<i32>} : memref<304x512xf32, #tpu.memory_space<vmem>>, vector<8x512xf32>,
    %c15_i32 = arith.constant 15 : i32
    %13 = tpu.dynamic_rotate %2 by %c15_i32 dim 1 : vector<8x512xf32>, i32 -> vector<8x512xf32>
    %c2 = arith.constant 2 : index
    %c0_10 = arith.constant 0 : index
    %14 = vector.load %arg2[%c2, %c0_10] : memref<9x512xf32, #tpu.memory_space<vmem>>, vector<1x512xf32>
    %15 = vector.broadcast %14 : vector<1x512xf32> to vector<8x512xf32>
    %16 = arith.mulf %13, %15 : vector<8x512xf32>
    %c16 = arith.constant 16 : index
    %c0_11 = arith.constant 0 : index
    %17 = vector.load %arg11[%c16, %c0_11] : memref<304x512xf32, #tpu.memory_space<vmem>>, vector<8x512xf32>
    tpu.vector_store %arg11[%c16, %c0_11], %16 {strides = array<i32>} : memref<304x512xf32, #tpu.memory_space<vmem>>, vector<8x512xf32>,
    %c1_i32 = arith.constant 1 : i32
    %18 = tpu.dynamic_rotate %2 by %c1_i32 dim 1 : vector<8x512xf32>, i32 -> vector<8x512xf32>
    %c3 = arith.constant 3 : index
    %c0_12 = arith.constant 0 : index
    %19 = vector.load %arg2[%c3, %c0_12] : memref<9x512xf32, #tpu.memory_space<vmem>>, vector<1x512xf32>
    %20 = vector.broadcast %19 : vector<1x512xf32> to vector<8x512xf32>
    %21 = arith.mulf %18, %20 : vector<8x512xf32>
    %c24 = arith.constant 24 : index
    %c0_13 = arith.constant 0 : index
    %22 = vector.load %arg11[%c24, %c0_13] : memref<304x512xf32, #tpu.memory_space<vmem>>, vector<8x512xf32>
    tpu.vector_store %arg11[%c24, %c0_13], %21 {strides = array<i32>} : memref<304x512xf32, #tpu.memory_space<vmem>>, vector<8x512xf32>,
    %c32 = arith.constant 32 : index
    %c0_14 = arith.constant 0 : index
    %23 = vector.load %arg11[%c32, %c0_14] : memref<304x512xf32, #tpu.memory_space<vmem>>, vector<8x512xf32>
    tpu.vector_store %arg11[%c32, %c0_14], %2 {strides = array<i32>} : memref<304x512xf32, #tpu.memory_space<vmem>>, vector<8x512xf32>,
    %c511_i32 = arith.constant 511 : i32
    %24 = tpu.dynamic_rotate %2 by %c511_i32 dim 1 : vector<8x512xf32>, i32 -> vector<8x512xf32>
    %c5 = arith.constant 5 : index
    %c0_15 = arith.constant 0 : index
    %25 = vector.load %arg2[%c5, %c0_15] : memref<9x512xf32, #tpu.memory_space<vmem>>, vector<1x512xf32>
    %26 = vector.broadcast %25 : vector<1x512xf32> to vector<8x512xf32>
    %27 = arith.mulf %24, %26 : vector<8x512xf32>
    %c40 = arith.constant 40 : index
    %c0_16 = arith.constant 0 : index
    %28 = vector.load %arg11[%c40, %c0_16] : memref<304x512xf32, #tpu.memory_space<vmem>>, vector<8x512xf32>
    tpu.vector_store %arg11[%c40, %c0_16], %27 {strides = array<i32>} : memref<304x512xf32, #tpu.memory_space<vmem>>, vector<8x512xf32>,
    %c497_i32 = arith.constant 497 : i32
    %29 = tpu.dynamic_rotate %2 by %c497_i32 dim 1 : vector<8x512xf32>, i32 -> vector<8x512xf32>
    %c6 = arith.constant 6 : index
    %c0_17 = arith.constant 0 : index
    %30 = vector.load %arg2[%c6, %c0_17] : memref<9x512xf32, #tpu.memory_space<vmem>>, vector<1x512xf32>
    %31 = vector.broadcast %30 : vector<1x512xf32> to vector<8x512xf32>
    %32 = arith.mulf %29, %31 : vector<8x512xf32>
    %c48 = arith.constant 48 : index
    %c0_18 = arith.constant 0 : index
    %33 = vector.load %arg11[%c48, %c0_18] : memref<304x512xf32, #tpu.memory_space<vmem>>, vector<8x512xf32>
    tpu.vector_store %arg11[%c48, %c0_18], %32 {strides = array<i32>} : memref<304x512xf32, #tpu.memory_space<vmem>>, vector<8x512xf32>,
    %c496_i32 = arith.constant 496 : i32
    %34 = tpu.dynamic_rotate %2 by %c496_i32 dim 1 : vector<8x512xf32>, i32 -> vector<8x512xf32>
    %c7 = arith.constant 7 : index
    %c0_19 = arith.constant 0 : index
    %35 = vector.load %arg2[%c7, %c0_19] : memref<9x512xf32, #tpu.memory_space<vmem>>, vector<1x512xf32>
    %36 = vector.broadcast %35 : vector<1x512xf32> to vector<8x512xf32>
    %37 = arith.mulf %34, %36 : vector<8x512xf32>
    %c56 = arith.constant 56 : index
    %c0_20 = arith.constant 0 : index
    %38 = vector.load %arg11[%c56, %c0_20] : memref<304x512xf32, #tpu.memory_space<vmem>>, vector<8x512xf32>
    tpu.vector_store %arg11[%c56, %c0_20], %37 {strides = array<i32>} : memref<304x512xf32, #tpu.memory_space<vmem>>, vector<8x512xf32>,
    %c495_i32 = arith.constant 495 : i32
    %39 = tpu.dynamic_rotate %2 by %c495_i32 dim 1 : vector<8x512xf32>, i32 -> vector<8x512xf32>
    %c8_21 = arith.constant 8 : index
    %c0_22 = arith.constant 0 : index
    %40 = vector.load %arg2[%c8_21, %c0_22] : memref<9x512xf32, #tpu.memory_space<vmem>>, vector<1x512xf32>
    %41 = vector.broadcast %40 : vector<1x512xf32> to vector<8x512xf32>
    %42 = arith.mulf %39, %41 : vector<8x512xf32>
    %c64 = arith.constant 64 : index
    %c0_23 = arith.constant 0 : index
    %43 = vector.load %arg11[%c64, %c0_23] : memref<304x512xf32, #tpu.memory_space<vmem>>, vector<8x512xf32>
    tpu.vector_store %arg11[%c64, %c0_23], %42 {strides = array<i32>} : memref<304x512xf32, #tpu.memory_space<vmem>>, vector<8x512xf32>,
    %c0_24 = arith.constant 0 : index
    %c0_25 = arith.constant 0 : index
    %44 = vector.load %arg4[%c0_24, %c0_25] : memref<32x88xf32, #tpu.memory_space<vmem>>, vector<32x88xf32>
    %c0_26 = arith.constant 0 : index
    %c0_27 = arith.constant 0 : index
    %45 = vector.load %arg11[%c0_26, %c0_27] : memref<304x512xf32, #tpu.memory_space<vmem>>, vector<88x512xf32>
    %cst = arith.constant dense<0.000000e+00> : vector<32x512xf32>
    %46 = tpu.matmul %44, %45, %cst {dimension_numbers = #tpu.dot_dimension_numbers<[1], [0], [0], [1], [0, 0, 1, 1], [], []>} : vector<32x88xf32>, vector<88x512xf32>, vector<32x512xf32> -> vector<32x512xf32>
    %47 = arith.negf %46 : vector<32x512xf32>
    %48 = math.exp %47 : vector<32x512xf32>
    %cst_28 = arith.constant 1.000000e+00 : f32
    %49 = vector.broadcast %cst_28 : f32 to vector<32x512xf32>
    %50 = arith.addf %49, %48 : vector<32x512xf32>
    %51 = arith.divf %49, %50 : vector<32x512xf32>
    %52 = arith.mulf %46, %51 : vector<32x512xf32>
    %c0_29 = arith.constant 0 : index
    %c0_30 = arith.constant 0 : index
    %53 = vector.load %arg3[%c0_29, %c0_30] : memref<16x512xf32, #tpu.memory_space<vmem>>, vector<16x512xf32>
    %c288 = arith.constant 288 : index
    %c0_31 = arith.constant 0 : index
    %54 = vector.load %arg11[%c288, %c0_31] : memref<304x512xf32, #tpu.memory_space<vmem>>, vector<16x512xf32>
    tpu.vector_store %arg11[%c288, %c0_31], %53 {strides = array<i32>} : memref<304x512xf32, #tpu.memory_space<vmem>>, vector<16x512xf32>,
    %c17_i32_32 = arith.constant 17 : i32
    %55 = tpu.dynamic_rotate %52 by %c17_i32_32 dim 1 : vector<32x512xf32>, i32 -> vector<32x512xf32>
    %c0_33 = arith.constant 0 : index
    %c0_34 = arith.constant 0 : index
    %56 = vector.load %arg2[%c0_33, %c0_34] : memref<9x512xf32, #tpu.memory_space<vmem>>, vector<1x512xf32>
    %57 = vector.broadcast %56 : vector<1x512xf32> to vector<32x512xf32>
    %58 = arith.mulf %55, %57 : vector<32x512xf32>
    %c0_35 = arith.constant 0 : index
    %c0_36 = arith.constant 0 : index
    %59 = vector.load %arg11[%c0_35, %c0_36] : memref<304x512xf32, #tpu.memory_space<vmem>>, vector<32x512xf32>
    tpu.vector_store %arg11[%c0_35, %c0_36], %58 {strides = array<i32>} : memref<304x512xf32, #tpu.memory_space<vmem>>, vector<32x512xf32>,
    %c16_i32_37 = arith.constant 16 : i32
    %60 = tpu.dynamic_rotate %52 by %c16_i32_37 dim 1 : vector<32x512xf32>, i32 -> vector<32x512xf32>
    %c1_38 = arith.constant 1 : index
    %c0_39 = arith.constant 0 : index
    %61 = vector.load %arg2[%c1_38, %c0_39] : memref<9x512xf32, #tpu.memory_space<vmem>>, vector<1x512xf32>
    %62 = vector.broadcast %61 : vector<1x512xf32> to vector<32x512xf32>
    %63 = arith.mulf %60, %62 : vector<32x512xf32>
    %c32_40 = arith.constant 32 : index
    %c0_41 = arith.constant 0 : index
    %64 = vector.load %arg11[%c32_40, %c0_41] : memref<304x512xf32, #tpu.memory_space<vmem>>, vector<32x512xf32>
    tpu.vector_store %arg11[%c32_40, %c0_41], %63 {strides = array<i32>} : memref<304x512xf32, #tpu.memory_space<vmem>>, vector<32x512xf32>,
    %c15_i32_42 = arith.constant 15 : i32
    %65 = tpu.dynamic_rotate %52 by %c15_i32_42 dim 1 : vector<32x512xf32>, i32 -> vector<32x512xf32>
    %c2_43 = arith.constant 2 : index
    %c0_44 = arith.constant 0 : index
    %66 = vector.load %arg2[%c2_43, %c0_44] : memref<9x512xf32, #tpu.memory_space<vmem>>, vector<1x512xf32>
    %67 = vector.broadcast %66 : vector<1x512xf32> to vector<32x512xf32>
    %68 = arith.mulf %65, %67 : vector<32x512xf32>
    %c64_45 = arith.constant 64 : index
    %c0_46 = arith.constant 0 : index
    %69 = vector.load %arg11[%c64_45, %c0_46] : memref<304x512xf32, #tpu.memory_space<vmem>>, vector<32x512xf32>
    tpu.vector_store %arg11[%c64_45, %c0_46], %68 {strides = array<i32>} : memref<304x512xf32, #tpu.memory_space<vmem>>, vector<32x512xf32>,
    %c1_i32_47 = arith.constant 1 : i32
    %70 = tpu.dynamic_rotate %52 by %c1_i32_47 dim 1 : vector<32x512xf32>, i32 -> vector<32x512xf32>
    %c3_48 = arith.constant 3 : index
    %c0_49 = arith.constant 0 : index
    %71 = vector.load %arg2[%c3_48, %c0_49] : memref<9x512xf32, #tpu.memory_space<vmem>>, vector<1x512xf32>
    %72 = vector.broadcast %71 : vector<1x512xf32> to vector<32x512xf32>
    %73 = arith.mulf %70, %72 : vector<32x512xf32>
    %c96 = arith.constant 96 : index
    %c0_50 = arith.constant 0 : index
    %74 = vector.load %arg11[%c96, %c0_50] : memref<304x512xf32, #tpu.memory_space<vmem>>, vector<32x512xf32>
    tpu.vector_store %arg11[%c96, %c0_50], %73 {strides = array<i32>} : memref<304x512xf32, #tpu.memory_space<vmem>>, vector<32x512xf32>,
    %c128 = arith.constant 128 : index
    %c0_51 = arith.constant 0 : index
    %75 = vector.load %arg11[%c128, %c0_51] : memref<304x512xf32, #tpu.memory_space<vmem>>, vector<32x512xf32>
    tpu.vector_store %arg11[%c128, %c0_51], %52 {strides = array<i32>} : memref<304x512xf32, #tpu.memory_space<vmem>>, vector<32x512xf32>,
    %c511_i32_52 = arith.constant 511 : i32
    %76 = tpu.dynamic_rotate %52 by %c511_i32_52 dim 1 : vector<32x512xf32>, i32 -> vector<32x512xf32>
    %c5_53 = arith.constant 5 : index
    %c0_54 = arith.constant 0 : index
    %77 = vector.load %arg2[%c5_53, %c0_54] : memref<9x512xf32, #tpu.memory_space<vmem>>, vector<1x512xf32>
    %78 = vector.broadcast %77 : vector<1x512xf32> to vector<32x512xf32>
    %79 = arith.mulf %76, %78 : vector<32x512xf32>
    %c160 = arith.constant 160 : index
    %c0_55 = arith.constant 0 : index
    %80 = vector.load %arg11[%c160, %c0_55] : memref<304x512xf32, #tpu.memory_space<vmem>>, vector<32x512xf32>
    tpu.vector_store %arg11[%c160, %c0_55], %79 {strides = array<i32>} : memref<304x512xf32, #tpu.memory_space<vmem>>, vector<32x512xf32>,
    %c497_i32_56 = arith.constant 497 : i32
    %81 = tpu.dynamic_rotate %52 by %c497_i32_56 dim 1 : vector<32x512xf32>, i32 -> vector<32x512xf32>
    %c6_57 = arith.constant 6 : index
    %c0_58 = arith.constant 0 : index
    %82 = vector.load %arg2[%c6_57, %c0_58] : memref<9x512xf32, #tpu.memory_space<vmem>>, vector<1x512xf32>
    %83 = vector.broadcast %82 : vector<1x512xf32> to vector<32x512xf32>
    %84 = arith.mulf %81, %83 : vector<32x512xf32>
    %c192 = arith.constant 192 : index
    %c0_59 = arith.constant 0 : index
    %85 = vector.load %arg11[%c192, %c0_59] : memref<304x512xf32, #tpu.memory_space<vmem>>, vector<32x512xf32>
    tpu.vector_store %arg11[%c192, %c0_59], %84 {strides = array<i32>} : memref<304x512xf32, #tpu.memory_space<vmem>>, vector<32x512xf32>,
    %c496_i32_60 = arith.constant 496 : i32
    %86 = tpu.dynamic_rotate %52 by %c496_i32_60 dim 1 : vector<32x512xf32>, i32 -> vector<32x512xf32>
    %c7_61 = arith.constant 7 : index
    %c0_62 = arith.constant 0 : index
    %87 = vector.load %arg2[%c7_61, %c0_62] : memref<9x512xf32, #tpu.memory_space<vmem>>, vector<1x512xf32>
    %88 = vector.broadcast %87 : vector<1x512xf32> to vector<32x512xf32>
    %89 = arith.mulf %86, %88 : vector<32x512xf32>
    %c224 = arith.constant 224 : index
    %c0_63 = arith.constant 0 : index
    %90 = vector.load %arg11[%c224, %c0_63] : memref<304x512xf32, #tpu.memory_space<vmem>>, vector<32x512xf32>
    tpu.vector_store %arg11[%c224, %c0_63], %89 {strides = array<i32>} : memref<304x512xf32, #tpu.memory_space<vmem>>, vector<32x512xf32>,
    %c495_i32_64 = arith.constant 495 : i32
    %91 = tpu.dynamic_rotate %52 by %c495_i32_64 dim 1 : vector<32x512xf32>, i32 -> vector<32x512xf32>
    %c8_65 = arith.constant 8 : index
    %c0_66 = arith.constant 0 : index
    %92 = vector.load %arg2[%c8_65, %c0_66] : memref<9x512xf32, #tpu.memory_space<vmem>>, vector<1x512xf32>
    %93 = vector.broadcast %92 : vector<1x512xf32> to vector<32x512xf32>
    %94 = arith.mulf %91, %93 : vector<32x512xf32>
    %c256 = arith.constant 256 : index
    %c0_67 = arith.constant 0 : index
    %95 = vector.load %arg11[%c256, %c0_67] : memref<304x512xf32, #tpu.memory_space<vmem>>, vector<32x512xf32>
    tpu.vector_store %arg11[%c256, %c0_67], %94 {strides = array<i32>} : memref<304x512xf32, #tpu.memory_space<vmem>>, vector<32x512xf32>,
    %c0_68 = arith.constant 0 : index
    %c0_69 = arith.constant 0 : index
    %96 = vector.load %arg5[%c0_68, %c0_69] : memref<32x304xf32, #tpu.memory_space<vmem>>, vector<32x304xf32>
    %c0_70 = arith.constant 0 : index
    %c0_71 = arith.constant 0 : index
    %97 = vector.load %arg11[%c0_70, %c0_71] : memref<304x512xf32, #tpu.memory_space<vmem>>, vector<304x512xf32>
    %cst_72 = arith.constant dense<0.000000e+00> : vector<32x512xf32>
    %98 = tpu.matmul %96, %97, %cst_72 {dimension_numbers = #tpu.dot_dimension_numbers<[1], [0], [0], [1], [0, 0, 1, 1], [], []>} : vector<32x304xf32>, vector<304x512xf32>, vector<32x512xf32> -> vector<32x512xf32>
    %99 = arith.negf %98 : vector<32x512xf32>
    %100 = math.exp %99 : vector<32x512xf32>
    %cst_73 = arith.constant 1.000000e+00 : f32
    %101 = vector.broadcast %cst_73 : f32 to vector<32x512xf32>
    %102 = arith.addf %101, %100 : vector<32x512xf32>
    %103 = arith.divf %101, %102 : vector<32x512xf32>
    %104 = arith.mulf %98, %103 : vector<32x512xf32>
    %c17_i32_74 = arith.constant 17 : i32
    %105 = tpu.dynamic_rotate %104 by %c17_i32_74 dim 1 : vector<32x512xf32>, i32 -> vector<32x512xf32>
    %c0_75 = arith.constant 0 : index
    %c0_76 = arith.constant 0 : index
    %106 = vector.load %arg2[%c0_75, %c0_76] : memref<9x512xf32, #tpu.memory_space<vmem>>, vector<1x512xf32>
    %107 = vector.broadcast %106 : vector<1x512xf32> to vector<32x512xf32>
    %108 = arith.mulf %105, %107 : vector<32x512xf32>
    %c0_77 = arith.constant 0 : index
    %c0_78 = arith.constant 0 : index
    %109 = vector.load %arg11[%c0_77, %c0_78] : memref<304x512xf32, #tpu.memory_space<vmem>>, vector<32x512xf32>
    tpu.vector_store %arg11[%c0_77, %c0_78], %108 {strides = array<i32>} : memref<304x512xf32, #tpu.memory_space<vmem>>, vector<32x512xf32>,
    %c16_i32_79 = arith.constant 16 : i32
    %110 = tpu.dynamic_rotate %104 by %c16_i32_79 dim 1 : vector<32x512xf32>, i32 -> vector<32x512xf32>
    %c1_80 = arith.constant 1 : index
    %c0_81 = arith.constant 0 : index
    %111 = vector.load %arg2[%c1_80, %c0_81] : memref<9x512xf32, #tpu.memory_space<vmem>>, vector<1x512xf32>
    %112 = vector.broadcast %111 : vector<1x512xf32> to vector<32x512xf32>
    %113 = arith.mulf %110, %112 : vector<32x512xf32>
    %c32_82 = arith.constant 32 : index
    %c0_83 = arith.constant 0 : index
    %114 = vector.load %arg11[%c32_82, %c0_83] : memref<304x512xf32, #tpu.memory_space<vmem>>, vector<32x512xf32>
    tpu.vector_store %arg11[%c32_82, %c0_83], %113 {strides = array<i32>} : memref<304x512xf32, #tpu.memory_space<vmem>>, vector<32x512xf32>,
    %c15_i32_84 = arith.constant 15 : i32
    %115 = tpu.dynamic_rotate %104 by %c15_i32_84 dim 1 : vector<32x512xf32>, i32 -> vector<32x512xf32>
    %c2_85 = arith.constant 2 : index
    %c0_86 = arith.constant 0 : index
    %116 = vector.load %arg2[%c2_85, %c0_86] : memref<9x512xf32, #tpu.memory_space<vmem>>, vector<1x512xf32>
    %117 = vector.broadcast %116 : vector<1x512xf32> to vector<32x512xf32>
    %118 = arith.mulf %115, %117 : vector<32x512xf32>
    %c64_87 = arith.constant 64 : index
    %c0_88 = arith.constant 0 : index
    %119 = vector.load %arg11[%c64_87, %c0_88] : memref<304x512xf32, #tpu.memory_space<vmem>>, vector<32x512xf32>
    tpu.vector_store %arg11[%c64_87, %c0_88], %118 {strides = array<i32>} : memref<304x512xf32, #tpu.memory_space<vmem>>, vector<32x512xf32>,
    %c1_i32_89 = arith.constant 1 : i32
    %120 = tpu.dynamic_rotate %104 by %c1_i32_89 dim 1 : vector<32x512xf32>, i32 -> vector<32x512xf32>
    %c3_90 = arith.constant 3 : index
    %c0_91 = arith.constant 0 : index
    %121 = vector.load %arg2[%c3_90, %c0_91] : memref<9x512xf32, #tpu.memory_space<vmem>>, vector<1x512xf32>
    %122 = vector.broadcast %121 : vector<1x512xf32> to vector<32x512xf32>
    %123 = arith.mulf %120, %122 : vector<32x512xf32>
    %c96_92 = arith.constant 96 : index
    %c0_93 = arith.constant 0 : index
    %124 = vector.load %arg11[%c96_92, %c0_93] : memref<304x512xf32, #tpu.memory_space<vmem>>, vector<32x512xf32>
    tpu.vector_store %arg11[%c96_92, %c0_93], %123 {strides = array<i32>} : memref<304x512xf32, #tpu.memory_space<vmem>>, vector<32x512xf32>,
    %c128_94 = arith.constant 128 : index
    %c0_95 = arith.constant 0 : index
    %125 = vector.load %arg11[%c128_94, %c0_95] : memref<304x512xf32, #tpu.memory_space<vmem>>, vector<32x512xf32>
    tpu.vector_store %arg11[%c128_94, %c0_95], %104 {strides = array<i32>} : memref<304x512xf32, #tpu.memory_space<vmem>>, vector<32x512xf32>,
    %c511_i32_96 = arith.constant 511 : i32
    %126 = tpu.dynamic_rotate %104 by %c511_i32_96 dim 1 : vector<32x512xf32>, i32 -> vector<32x512xf32>
    %c5_97 = arith.constant 5 : index
    %c0_98 = arith.constant 0 : index
    %127 = vector.load %arg2[%c5_97, %c0_98] : memref<9x512xf32, #tpu.memory_space<vmem>>, vector<1x512xf32>
    %128 = vector.broadcast %127 : vector<1x512xf32> to vector<32x512xf32>
    %129 = arith.mulf %126, %128 : vector<32x512xf32>
    %c160_99 = arith.constant 160 : index
    %c0_100 = arith.constant 0 : index
    %130 = vector.load %arg11[%c160_99, %c0_100] : memref<304x512xf32, #tpu.memory_space<vmem>>, vector<32x512xf32>
    tpu.vector_store %arg11[%c160_99, %c0_100], %129 {strides = array<i32>} : memref<304x512xf32, #tpu.memory_space<vmem>>, vector<32x512xf32>,
    %c497_i32_101 = arith.constant 497 : i32
    %131 = tpu.dynamic_rotate %104 by %c497_i32_101 dim 1 : vector<32x512xf32>, i32 -> vector<32x512xf32>
    %c6_102 = arith.constant 6 : index
    %c0_103 = arith.constant 0 : index
    %132 = vector.load %arg2[%c6_102, %c0_103] : memref<9x512xf32, #tpu.memory_space<vmem>>, vector<1x512xf32>
    %133 = vector.broadcast %132 : vector<1x512xf32> to vector<32x512xf32>
    %134 = arith.mulf %131, %133 : vector<32x512xf32>
    %c192_104 = arith.constant 192 : index
    %c0_105 = arith.constant 0 : index
    %135 = vector.load %arg11[%c192_104, %c0_105] : memref<304x512xf32, #tpu.memory_space<vmem>>, vector<32x512xf32>
    tpu.vector_store %arg11[%c192_104, %c0_105], %134 {strides = array<i32>} : memref<304x512xf32, #tpu.memory_space<vmem>>, vector<32x512xf32>,
    %c496_i32_106 = arith.constant 496 : i32
    %136 = tpu.dynamic_rotate %104 by %c496_i32_106 dim 1 : vector<32x512xf32>, i32 -> vector<32x512xf32>
    %c7_107 = arith.constant 7 : index
    %c0_108 = arith.constant 0 : index
    %137 = vector.load %arg2[%c7_107, %c0_108] : memref<9x512xf32, #tpu.memory_space<vmem>>, vector<1x512xf32>
    %138 = vector.broadcast %137 : vector<1x512xf32> to vector<32x512xf32>
    %139 = arith.mulf %136, %138 : vector<32x512xf32>
    %c224_109 = arith.constant 224 : index
    %c0_110 = arith.constant 0 : index
    %140 = vector.load %arg11[%c224_109, %c0_110] : memref<304x512xf32, #tpu.memory_space<vmem>>, vector<32x512xf32>
    tpu.vector_store %arg11[%c224_109, %c0_110], %139 {strides = array<i32>} : memref<304x512xf32, #tpu.memory_space<vmem>>, vector<32x512xf32>,
    %c495_i32_111 = arith.constant 495 : i32
    %141 = tpu.dynamic_rotate %104 by %c495_i32_111 dim 1 : vector<32x512xf32>, i32 -> vector<32x512xf32>
    %c8_112 = arith.constant 8 : index
    %c0_113 = arith.constant 0 : index
    %142 = vector.load %arg2[%c8_112, %c0_113] : memref<9x512xf32, #tpu.memory_space<vmem>>, vector<1x512xf32>
    %143 = vector.broadcast %142 : vector<1x512xf32> to vector<32x512xf32>
    %144 = arith.mulf %141, %143 : vector<32x512xf32>
    %c256_114 = arith.constant 256 : index
    %c0_115 = arith.constant 0 : index
    %145 = vector.load %arg11[%c256_114, %c0_115] : memref<304x512xf32, #tpu.memory_space<vmem>>, vector<32x512xf32>
    tpu.vector_store %arg11[%c256_114, %c0_115], %144 {strides = array<i32>} : memref<304x512xf32, #tpu.memory_space<vmem>>, vector<32x512xf32>,
    %c0_116 = arith.constant 0 : index
    %c0_117 = arith.constant 0 : index
    %146 = vector.load %arg6[%c0_116, %c0_117] : memref<32x304xf32, #tpu.memory_space<vmem>>, vector<32x304xf32>
    %c0_118 = arith.constant 0 : index
    %c0_119 = arith.constant 0 : index
    %147 = vector.load %arg11[%c0_118, %c0_119] : memref<304x512xf32, #tpu.memory_space<vmem>>, vector<304x512xf32>
    %cst_120 = arith.constant dense<0.000000e+00> : vector<32x512xf32>
    %148 = tpu.matmul %146, %147, %cst_120 {dimension_numbers = #tpu.dot_dimension_numbers<[1], [0], [0], [1], [0, 0, 1, 1], [], []>} : vector<32x304xf32>, vector<304x512xf32>, vector<32x512xf32> -> vector<32x512xf32>
    %149 = arith.addf %148, %52 : vector<32x512xf32>
    %c17_i32_121 = arith.constant 17 : i32
    %150 = tpu.dynamic_rotate %149 by %c17_i32_121 dim 1 : vector<32x512xf32>, i32 -> vector<32x512xf32>
    %c0_122 = arith.constant 0 : index
    %c0_123 = arith.constant 0 : index
    %151 = vector.load %arg2[%c0_122, %c0_123] : memref<9x512xf32, #tpu.memory_space<vmem>>, vector<1x512xf32>
    %152 = vector.broadcast %151 : vector<1x512xf32> to vector<32x512xf32>
    %153 = arith.mulf %150, %152 : vector<32x512xf32>
    %c0_124 = arith.constant 0 : index
    %c0_125 = arith.constant 0 : index
    %154 = vector.load %arg11[%c0_124, %c0_125] : memref<304x512xf32, #tpu.memory_space<vmem>>, vector<32x512xf32>
    tpu.vector_store %arg11[%c0_124, %c0_125], %153 {strides = array<i32>} : memref<304x512xf32, #tpu.memory_space<vmem>>, vector<32x512xf32>,
    %c16_i32_126 = arith.constant 16 : i32
    %155 = tpu.dynamic_rotate %149 by %c16_i32_126 dim 1 : vector<32x512xf32>, i32 -> vector<32x512xf32>
    %c1_127 = arith.constant 1 : index
    %c0_128 = arith.constant 0 : index
    %156 = vector.load %arg2[%c1_127, %c0_128] : memref<9x512xf32, #tpu.memory_space<vmem>>, vector<1x512xf32>
    %157 = vector.broadcast %156 : vector<1x512xf32> to vector<32x512xf32>
    %158 = arith.mulf %155, %157 : vector<32x512xf32>
    %c32_129 = arith.constant 32 : index
    %c0_130 = arith.constant 0 : index
    %159 = vector.load %arg11[%c32_129, %c0_130] : memref<304x512xf32, #tpu.memory_space<vmem>>, vector<32x512xf32>
    tpu.vector_store %arg11[%c32_129, %c0_130], %158 {strides = array<i32>} : memref<304x512xf32, #tpu.memory_space<vmem>>, vector<32x512xf32>,
    %c15_i32_131 = arith.constant 15 : i32
    %160 = tpu.dynamic_rotate %149 by %c15_i32_131 dim 1 : vector<32x512xf32>, i32 -> vector<32x512xf32>
    %c2_132 = arith.constant 2 : index
    %c0_133 = arith.constant 0 : index
    %161 = vector.load %arg2[%c2_132, %c0_133] : memref<9x512xf32, #tpu.memory_space<vmem>>, vector<1x512xf32>
    %162 = vector.broadcast %161 : vector<1x512xf32> to vector<32x512xf32>
    %163 = arith.mulf %160, %162 : vector<32x512xf32>
    %c64_134 = arith.constant 64 : index
    %c0_135 = arith.constant 0 : index
    %164 = vector.load %arg11[%c64_134, %c0_135] : memref<304x512xf32, #tpu.memory_space<vmem>>, vector<32x512xf32>
    tpu.vector_store %arg11[%c64_134, %c0_135], %163 {strides = array<i32>} : memref<304x512xf32, #tpu.memory_space<vmem>>, vector<32x512xf32>,
    %c1_i32_136 = arith.constant 1 : i32
    %165 = tpu.dynamic_rotate %149 by %c1_i32_136 dim 1 : vector<32x512xf32>, i32 -> vector<32x512xf32>
    %c3_137 = arith.constant 3 : index
    %c0_138 = arith.constant 0 : index
    %166 = vector.load %arg2[%c3_137, %c0_138] : memref<9x512xf32, #tpu.memory_space<vmem>>, vector<1x512xf32>
    %167 = vector.broadcast %166 : vector<1x512xf32> to vector<32x512xf32>
    %168 = arith.mulf %165, %167 : vector<32x512xf32>
    %c96_139 = arith.constant 96 : index
    %c0_140 = arith.constant 0 : index
    %169 = vector.load %arg11[%c96_139, %c0_140] : memref<304x512xf32, #tpu.memory_space<vmem>>, vector<32x512xf32>
    tpu.vector_store %arg11[%c96_139, %c0_140], %168 {strides = array<i32>} : memref<304x512xf32, #tpu.memory_space<vmem>>, vector<32x512xf32>,
    %c128_141 = arith.constant 128 : index
    %c0_142 = arith.constant 0 : index
    %170 = vector.load %arg11[%c128_141, %c0_142] : memref<304x512xf32, #tpu.memory_space<vmem>>, vector<32x512xf32>
    tpu.vector_store %arg11[%c128_141, %c0_142], %149 {strides = array<i32>} : memref<304x512xf32, #tpu.memory_space<vmem>>, vector<32x512xf32>,
    %c511_i32_143 = arith.constant 511 : i32
    %171 = tpu.dynamic_rotate %149 by %c511_i32_143 dim 1 : vector<32x512xf32>, i32 -> vector<32x512xf32>
    %c5_144 = arith.constant 5 : index
    %c0_145 = arith.constant 0 : index
    %172 = vector.load %arg2[%c5_144, %c0_145] : memref<9x512xf32, #tpu.memory_space<vmem>>, vector<1x512xf32>
    %173 = vector.broadcast %172 : vector<1x512xf32> to vector<32x512xf32>
    %174 = arith.mulf %171, %173 : vector<32x512xf32>
    %c160_146 = arith.constant 160 : index
    %c0_147 = arith.constant 0 : index
    %175 = vector.load %arg11[%c160_146, %c0_147] : memref<304x512xf32, #tpu.memory_space<vmem>>, vector<32x512xf32>
    tpu.vector_store %arg11[%c160_146, %c0_147], %174 {strides = array<i32>} : memref<304x512xf32, #tpu.memory_space<vmem>>, vector<32x512xf32>,
    %c497_i32_148 = arith.constant 497 : i32
    %176 = tpu.dynamic_rotate %149 by %c497_i32_148 dim 1 : vector<32x512xf32>, i32 -> vector<32x512xf32>
    %c6_149 = arith.constant 6 : index
    %c0_150 = arith.constant 0 : index
    %177 = vector.load %arg2[%c6_149, %c0_150] : memref<9x512xf32, #tpu.memory_space<vmem>>, vector<1x512xf32>
    %178 = vector.broadcast %177 : vector<1x512xf32> to vector<32x512xf32>
    %179 = arith.mulf %176, %178 : vector<32x512xf32>
    %c192_151 = arith.constant 192 : index
    %c0_152 = arith.constant 0 : index
    %180 = vector.load %arg11[%c192_151, %c0_152] : memref<304x512xf32, #tpu.memory_space<vmem>>, vector<32x512xf32>
    tpu.vector_store %arg11[%c192_151, %c0_152], %179 {strides = array<i32>} : memref<304x512xf32, #tpu.memory_space<vmem>>, vector<32x512xf32>,
    %c496_i32_153 = arith.constant 496 : i32
    %181 = tpu.dynamic_rotate %149 by %c496_i32_153 dim 1 : vector<32x512xf32>, i32 -> vector<32x512xf32>
    %c7_154 = arith.constant 7 : index
    %c0_155 = arith.constant 0 : index
    %182 = vector.load %arg2[%c7_154, %c0_155] : memref<9x512xf32, #tpu.memory_space<vmem>>, vector<1x512xf32>
    %183 = vector.broadcast %182 : vector<1x512xf32> to vector<32x512xf32>
    %184 = arith.mulf %181, %183 : vector<32x512xf32>
    %c224_156 = arith.constant 224 : index
    %c0_157 = arith.constant 0 : index
    %185 = vector.load %arg11[%c224_156, %c0_157] : memref<304x512xf32, #tpu.memory_space<vmem>>, vector<32x512xf32>
    tpu.vector_store %arg11[%c224_156, %c0_157], %184 {strides = array<i32>} : memref<304x512xf32, #tpu.memory_space<vmem>>, vector<32x512xf32>,
    %c495_i32_158 = arith.constant 495 : i32
    %186 = tpu.dynamic_rotate %149 by %c495_i32_158 dim 1 : vector<32x512xf32>, i32 -> vector<32x512xf32>
    %c8_159 = arith.constant 8 : index
    %c0_160 = arith.constant 0 : index
    %187 = vector.load %arg2[%c8_159, %c0_160] : memref<9x512xf32, #tpu.memory_space<vmem>>, vector<1x512xf32>
    %188 = vector.broadcast %187 : vector<1x512xf32> to vector<32x512xf32>
    %189 = arith.mulf %186, %188 : vector<32x512xf32>
    %c256_161 = arith.constant 256 : index
    %c0_162 = arith.constant 0 : index
    %190 = vector.load %arg11[%c256_161, %c0_162] : memref<304x512xf32, #tpu.memory_space<vmem>>, vector<32x512xf32>
    tpu.vector_store %arg11[%c256_161, %c0_162], %189 {strides = array<i32>} : memref<304x512xf32, #tpu.memory_space<vmem>>, vector<32x512xf32>,
    %c0_163 = arith.constant 0 : index
    %c0_164 = arith.constant 0 : index
    %191 = vector.load %arg7[%c0_163, %c0_164] : memref<32x304xf32, #tpu.memory_space<vmem>>, vector<32x304xf32>
    %c0_165 = arith.constant 0 : index
    %c0_166 = arith.constant 0 : index
    %192 = vector.load %arg11[%c0_165, %c0_166] : memref<304x512xf32, #tpu.memory_space<vmem>>, vector<304x512xf32>
    %cst_167 = arith.constant dense<0.000000e+00> : vector<32x512xf32>
    %193 = tpu.matmul %191, %192, %cst_167 {dimension_numbers = #tpu.dot_dimension_numbers<[1], [0], [0], [1], [0, 0, 1, 1], [], []>} : vector<32x304xf32>, vector<304x512xf32>, vector<32x512xf32> -> vector<32x512xf32>
    %194 = arith.negf %193 : vector<32x512xf32>
    %195 = math.exp %194 : vector<32x512xf32>
    %cst_168 = arith.constant 1.000000e+00 : f32
    %196 = vector.broadcast %cst_168 : f32 to vector<32x512xf32>
    %197 = arith.addf %196, %195 : vector<32x512xf32>
    %198 = arith.divf %196, %197 : vector<32x512xf32>
    %199 = arith.mulf %193, %198 : vector<32x512xf32>
    %c17_i32_169 = arith.constant 17 : i32
    %200 = tpu.dynamic_rotate %199 by %c17_i32_169 dim 1 : vector<32x512xf32>, i32 -> vector<32x512xf32>
    %c0_170 = arith.constant 0 : index
    %c0_171 = arith.constant 0 : index
    %201 = vector.load %arg2[%c0_170, %c0_171] : memref<9x512xf32, #tpu.memory_space<vmem>>, vector<1x512xf32>
    %202 = vector.broadcast %201 : vector<1x512xf32> to vector<32x512xf32>
    %203 = arith.mulf %200, %202 : vector<32x512xf32>
    %c0_172 = arith.constant 0 : index
    %c0_173 = arith.constant 0 : index
    %204 = vector.load %arg11[%c0_172, %c0_173] : memref<304x512xf32, #tpu.memory_space<vmem>>, vector<32x512xf32>
    tpu.vector_store %arg11[%c0_172, %c0_173], %203 {strides = array<i32>} : memref<304x512xf32, #tpu.memory_space<vmem>>, vector<32x512xf32>,
    %c16_i32_174 = arith.constant 16 : i32
    %205 = tpu.dynamic_rotate %199 by %c16_i32_174 dim 1 : vector<32x512xf32>, i32 -> vector<32x512xf32>
    %c1_175 = arith.constant 1 : index
    %c0_176 = arith.constant 0 : index
    %206 = vector.load %arg2[%c1_175, %c0_176] : memref<9x512xf32, #tpu.memory_space<vmem>>, vector<1x512xf32>
    %207 = vector.broadcast %206 : vector<1x512xf32> to vector<32x512xf32>
    %208 = arith.mulf %205, %207 : vector<32x512xf32>
    %c32_177 = arith.constant 32 : index
    %c0_178 = arith.constant 0 : index
    %209 = vector.load %arg11[%c32_177, %c0_178] : memref<304x512xf32, #tpu.memory_space<vmem>>, vector<32x512xf32>
    tpu.vector_store %arg11[%c32_177, %c0_178], %208 {strides = array<i32>} : memref<304x512xf32, #tpu.memory_space<vmem>>, vector<32x512xf32>,
    %c15_i32_179 = arith.constant 15 : i32
    %210 = tpu.dynamic_rotate %199 by %c15_i32_179 dim 1 : vector<32x512xf32>, i32 -> vector<32x512xf32>
    %c2_180 = arith.constant 2 : index
    %c0_181 = arith.constant 0 : index
    %211 = vector.load %arg2[%c2_180, %c0_181] : memref<9x512xf32, #tpu.memory_space<vmem>>, vector<1x512xf32>
    %212 = vector.broadcast %211 : vector<1x512xf32> to vector<32x512xf32>
    %213 = arith.mulf %210, %212 : vector<32x512xf32>
    %c64_182 = arith.constant 64 : index
    %c0_183 = arith.constant 0 : index
    %214 = vector.load %arg11[%c64_182, %c0_183] : memref<304x512xf32, #tpu.memory_space<vmem>>, vector<32x512xf32>
    tpu.vector_store %arg11[%c64_182, %c0_183], %213 {strides = array<i32>} : memref<304x512xf32, #tpu.memory_space<vmem>>, vector<32x512xf32>,
    %c1_i32_184 = arith.constant 1 : i32
    %215 = tpu.dynamic_rotate %199 by %c1_i32_184 dim 1 : vector<32x512xf32>, i32 -> vector<32x512xf32>
    %c3_185 = arith.constant 3 : index
    %c0_186 = arith.constant 0 : index
    %216 = vector.load %arg2[%c3_185, %c0_186] : memref<9x512xf32, #tpu.memory_space<vmem>>, vector<1x512xf32>
    %217 = vector.broadcast %216 : vector<1x512xf32> to vector<32x512xf32>
    %218 = arith.mulf %215, %217 : vector<32x512xf32>
    %c96_187 = arith.constant 96 : index
    %c0_188 = arith.constant 0 : index
    %219 = vector.load %arg11[%c96_187, %c0_188] : memref<304x512xf32, #tpu.memory_space<vmem>>, vector<32x512xf32>
    tpu.vector_store %arg11[%c96_187, %c0_188], %218 {strides = array<i32>} : memref<304x512xf32, #tpu.memory_space<vmem>>, vector<32x512xf32>,
    %c128_189 = arith.constant 128 : index
    %c0_190 = arith.constant 0 : index
    %220 = vector.load %arg11[%c128_189, %c0_190] : memref<304x512xf32, #tpu.memory_space<vmem>>, vector<32x512xf32>
    tpu.vector_store %arg11[%c128_189, %c0_190], %199 {strides = array<i32>} : memref<304x512xf32, #tpu.memory_space<vmem>>, vector<32x512xf32>,
    %c511_i32_191 = arith.constant 511 : i32
    %221 = tpu.dynamic_rotate %199 by %c511_i32_191 dim 1 : vector<32x512xf32>, i32 -> vector<32x512xf32>
    %c5_192 = arith.constant 5 : index
    %c0_193 = arith.constant 0 : index
    %222 = vector.load %arg2[%c5_192, %c0_193] : memref<9x512xf32, #tpu.memory_space<vmem>>, vector<1x512xf32>
    %223 = vector.broadcast %222 : vector<1x512xf32> to vector<32x512xf32>
    %224 = arith.mulf %221, %223 : vector<32x512xf32>
    %c160_194 = arith.constant 160 : index
    %c0_195 = arith.constant 0 : index
    %225 = vector.load %arg11[%c160_194, %c0_195] : memref<304x512xf32, #tpu.memory_space<vmem>>, vector<32x512xf32>
    tpu.vector_store %arg11[%c160_194, %c0_195], %224 {strides = array<i32>} : memref<304x512xf32, #tpu.memory_space<vmem>>, vector<32x512xf32>,
    %c497_i32_196 = arith.constant 497 : i32
    %226 = tpu.dynamic_rotate %199 by %c497_i32_196 dim 1 : vector<32x512xf32>, i32 -> vector<32x512xf32>
    %c6_197 = arith.constant 6 : index
    %c0_198 = arith.constant 0 : index
    %227 = vector.load %arg2[%c6_197, %c0_198] : memref<9x512xf32, #tpu.memory_space<vmem>>, vector<1x512xf32>
    %228 = vector.broadcast %227 : vector<1x512xf32> to vector<32x512xf32>
    %229 = arith.mulf %226, %228 : vector<32x512xf32>
    %c192_199 = arith.constant 192 : index
    %c0_200 = arith.constant 0 : index
    %230 = vector.load %arg11[%c192_199, %c0_200] : memref<304x512xf32, #tpu.memory_space<vmem>>, vector<32x512xf32>
    tpu.vector_store %arg11[%c192_199, %c0_200], %229 {strides = array<i32>} : memref<304x512xf32, #tpu.memory_space<vmem>>, vector<32x512xf32>,
    %c496_i32_201 = arith.constant 496 : i32
    %231 = tpu.dynamic_rotate %199 by %c496_i32_201 dim 1 : vector<32x512xf32>, i32 -> vector<32x512xf32>
    %c7_202 = arith.constant 7 : index
    %c0_203 = arith.constant 0 : index
    %232 = vector.load %arg2[%c7_202, %c0_203] : memref<9x512xf32, #tpu.memory_space<vmem>>, vector<1x512xf32>
    %233 = vector.broadcast %232 : vector<1x512xf32> to vector<32x512xf32>
    %234 = arith.mulf %231, %233 : vector<32x512xf32>
    %c224_204 = arith.constant 224 : index
    %c0_205 = arith.constant 0 : index
    %235 = vector.load %arg11[%c224_204, %c0_205] : memref<304x512xf32, #tpu.memory_space<vmem>>, vector<32x512xf32>
    tpu.vector_store %arg11[%c224_204, %c0_205], %234 {strides = array<i32>} : memref<304x512xf32, #tpu.memory_space<vmem>>, vector<32x512xf32>,
    %c495_i32_206 = arith.constant 495 : i32
    %236 = tpu.dynamic_rotate %199 by %c495_i32_206 dim 1 : vector<32x512xf32>, i32 -> vector<32x512xf32>
    %c8_207 = arith.constant 8 : index
    %c0_208 = arith.constant 0 : index
    %237 = vector.load %arg2[%c8_207, %c0_208] : memref<9x512xf32, #tpu.memory_space<vmem>>, vector<1x512xf32>
    %238 = vector.broadcast %237 : vector<1x512xf32> to vector<32x512xf32>
    %239 = arith.mulf %236, %238 : vector<32x512xf32>
    %c256_209 = arith.constant 256 : index
    %c0_210 = arith.constant 0 : index
    %240 = vector.load %arg11[%c256_209, %c0_210] : memref<304x512xf32, #tpu.memory_space<vmem>>, vector<32x512xf32>
    tpu.vector_store %arg11[%c256_209, %c0_210], %239 {strides = array<i32>} : memref<304x512xf32, #tpu.memory_space<vmem>>, vector<32x512xf32>,
    %c0_211 = arith.constant 0 : index
    %c0_212 = arith.constant 0 : index
    %241 = vector.load %arg8[%c0_211, %c0_212] : memref<32x304xf32, #tpu.memory_space<vmem>>, vector<32x304xf32>
    %c0_213 = arith.constant 0 : index
    %c0_214 = arith.constant 0 : index
    %242 = vector.load %arg11[%c0_213, %c0_214] : memref<304x512xf32, #tpu.memory_space<vmem>>, vector<304x512xf32>
    %cst_215 = arith.constant dense<0.000000e+00> : vector<32x512xf32>
    %243 = tpu.matmul %241, %242, %cst_215 {dimension_numbers = #tpu.dot_dimension_numbers<[1], [0], [0], [1], [0, 0, 1, 1], [], []>} : vector<32x304xf32>, vector<304x512xf32>, vector<32x512xf32> -> vector<32x512xf32>
    %244 = arith.addf %243, %149 : vector<32x512xf32>
    %c17_i32_216 = arith.constant 17 : i32
    %245 = tpu.dynamic_rotate %244 by %c17_i32_216 dim 1 : vector<32x512xf32>, i32 -> vector<32x512xf32>
    %c0_217 = arith.constant 0 : index
    %c0_218 = arith.constant 0 : index
    %246 = vector.load %arg2[%c0_217, %c0_218] : memref<9x512xf32, #tpu.memory_space<vmem>>, vector<1x512xf32>
    %247 = vector.broadcast %246 : vector<1x512xf32> to vector<32x512xf32>
    %248 = arith.mulf %245, %247 : vector<32x512xf32>
    %c0_219 = arith.constant 0 : index
    %c0_220 = arith.constant 0 : index
    %249 = vector.load %arg11[%c0_219, %c0_220] : memref<304x512xf32, #tpu.memory_space<vmem>>, vector<32x512xf32>
    tpu.vector_store %arg11[%c0_219, %c0_220], %248 {strides = array<i32>} : memref<304x512xf32, #tpu.memory_space<vmem>>, vector<32x512xf32>,
    %c16_i32_221 = arith.constant 16 : i32
    %250 = tpu.dynamic_rotate %244 by %c16_i32_221 dim 1 : vector<32x512xf32>, i32 -> vector<32x512xf32>
    %c1_222 = arith.constant 1 : index
    %c0_223 = arith.constant 0 : index
    %251 = vector.load %arg2[%c1_222, %c0_223] : memref<9x512xf32, #tpu.memory_space<vmem>>, vector<1x512xf32>
    %252 = vector.broadcast %251 : vector<1x512xf32> to vector<32x512xf32>
    %253 = arith.mulf %250, %252 : vector<32x512xf32>
    %c32_224 = arith.constant 32 : index
    %c0_225 = arith.constant 0 : index
    %254 = vector.load %arg11[%c32_224, %c0_225] : memref<304x512xf32, #tpu.memory_space<vmem>>, vector<32x512xf32>
    tpu.vector_store %arg11[%c32_224, %c0_225], %253 {strides = array<i32>} : memref<304x512xf32, #tpu.memory_space<vmem>>, vector<32x512xf32>,
    %c15_i32_226 = arith.constant 15 : i32
    %255 = tpu.dynamic_rotate %244 by %c15_i32_226 dim 1 : vector<32x512xf32>, i32 -> vector<32x512xf32>
    %c2_227 = arith.constant 2 : index
    %c0_228 = arith.constant 0 : index
    %256 = vector.load %arg2[%c2_227, %c0_228] : memref<9x512xf32, #tpu.memory_space<vmem>>, vector<1x512xf32>
    %257 = vector.broadcast %256 : vector<1x512xf32> to vector<32x512xf32>
    %258 = arith.mulf %255, %257 : vector<32x512xf32>
    %c64_229 = arith.constant 64 : index
    %c0_230 = arith.constant 0 : index
    %259 = vector.load %arg11[%c64_229, %c0_230] : memref<304x512xf32, #tpu.memory_space<vmem>>, vector<32x512xf32>
    tpu.vector_store %arg11[%c64_229, %c0_230], %258 {strides = array<i32>} : memref<304x512xf32, #tpu.memory_space<vmem>>, vector<32x512xf32>,
    %c1_i32_231 = arith.constant 1 : i32
    %260 = tpu.dynamic_rotate %244 by %c1_i32_231 dim 1 : vector<32x512xf32>, i32 -> vector<32x512xf32>
    %c3_232 = arith.constant 3 : index
    %c0_233 = arith.constant 0 : index
    %261 = vector.load %arg2[%c3_232, %c0_233] : memref<9x512xf32, #tpu.memory_space<vmem>>, vector<1x512xf32>
    %262 = vector.broadcast %261 : vector<1x512xf32> to vector<32x512xf32>
    %263 = arith.mulf %260, %262 : vector<32x512xf32>
    %c96_234 = arith.constant 96 : index
    %c0_235 = arith.constant 0 : index
    %264 = vector.load %arg11[%c96_234, %c0_235] : memref<304x512xf32, #tpu.memory_space<vmem>>, vector<32x512xf32>
    tpu.vector_store %arg11[%c96_234, %c0_235], %263 {strides = array<i32>} : memref<304x512xf32, #tpu.memory_space<vmem>>, vector<32x512xf32>,
    %c128_236 = arith.constant 128 : index
    %c0_237 = arith.constant 0 : index
    %265 = vector.load %arg11[%c128_236, %c0_237] : memref<304x512xf32, #tpu.memory_space<vmem>>, vector<32x512xf32>
    tpu.vector_store %arg11[%c128_236, %c0_237], %244 {strides = array<i32>} : memref<304x512xf32, #tpu.memory_space<vmem>>, vector<32x512xf32>,
    %c511_i32_238 = arith.constant 511 : i32
    %266 = tpu.dynamic_rotate %244 by %c511_i32_238 dim 1 : vector<32x512xf32>, i32 -> vector<32x512xf32>
    %c5_239 = arith.constant 5 : index
    %c0_240 = arith.constant 0 : index
    %267 = vector.load %arg2[%c5_239, %c0_240] : memref<9x512xf32, #tpu.memory_space<vmem>>, vector<1x512xf32>
    %268 = vector.broadcast %267 : vector<1x512xf32> to vector<32x512xf32>
    %269 = arith.mulf %266, %268 : vector<32x512xf32>
    %c160_241 = arith.constant 160 : index
    %c0_242 = arith.constant 0 : index
    %270 = vector.load %arg11[%c160_241, %c0_242] : memref<304x512xf32, #tpu.memory_space<vmem>>, vector<32x512xf32>
    tpu.vector_store %arg11[%c160_241, %c0_242], %269 {strides = array<i32>} : memref<304x512xf32, #tpu.memory_space<vmem>>, vector<32x512xf32>,
    %c497_i32_243 = arith.constant 497 : i32
    %271 = tpu.dynamic_rotate %244 by %c497_i32_243 dim 1 : vector<32x512xf32>, i32 -> vector<32x512xf32>
    %c6_244 = arith.constant 6 : index
    %c0_245 = arith.constant 0 : index
    %272 = vector.load %arg2[%c6_244, %c0_245] : memref<9x512xf32, #tpu.memory_space<vmem>>, vector<1x512xf32>
    %273 = vector.broadcast %272 : vector<1x512xf32> to vector<32x512xf32>
    %274 = arith.mulf %271, %273 : vector<32x512xf32>
    %c192_246 = arith.constant 192 : index
    %c0_247 = arith.constant 0 : index
    %275 = vector.load %arg11[%c192_246, %c0_247] : memref<304x512xf32, #tpu.memory_space<vmem>>, vector<32x512xf32>
    tpu.vector_store %arg11[%c192_246, %c0_247], %274 {strides = array<i32>} : memref<304x512xf32, #tpu.memory_space<vmem>>, vector<32x512xf32>,
    %c496_i32_248 = arith.constant 496 : i32
    %276 = tpu.dynamic_rotate %244 by %c496_i32_248 dim 1 : vector<32x512xf32>, i32 -> vector<32x512xf32>
    %c7_249 = arith.constant 7 : index
    %c0_250 = arith.constant 0 : index
    %277 = vector.load %arg2[%c7_249, %c0_250] : memref<9x512xf32, #tpu.memory_space<vmem>>, vector<1x512xf32>
    %278 = vector.broadcast %277 : vector<1x512xf32> to vector<32x512xf32>
    %279 = arith.mulf %276, %278 : vector<32x512xf32>
    %c224_251 = arith.constant 224 : index
    %c0_252 = arith.constant 0 : index
    %280 = vector.load %arg11[%c224_251, %c0_252] : memref<304x512xf32, #tpu.memory_space<vmem>>, vector<32x512xf32>
    tpu.vector_store %arg11[%c224_251, %c0_252], %279 {strides = array<i32>} : memref<304x512xf32, #tpu.memory_space<vmem>>, vector<32x512xf32>,
    %c495_i32_253 = arith.constant 495 : i32
    %281 = tpu.dynamic_rotate %244 by %c495_i32_253 dim 1 : vector<32x512xf32>, i32 -> vector<32x512xf32>
    %c8_254 = arith.constant 8 : index
    %c0_255 = arith.constant 0 : index
    %282 = vector.load %arg2[%c8_254, %c0_255] : memref<9x512xf32, #tpu.memory_space<vmem>>, vector<1x512xf32>
    %283 = vector.broadcast %282 : vector<1x512xf32> to vector<32x512xf32>
    %284 = arith.mulf %281, %283 : vector<32x512xf32>
    %c256_256 = arith.constant 256 : index
    %c0_257 = arith.constant 0 : index
    %285 = vector.load %arg11[%c256_256, %c0_257] : memref<304x512xf32, #tpu.memory_space<vmem>>, vector<32x512xf32>
    tpu.vector_store %arg11[%c256_256, %c0_257], %284 {strides = array<i32>} : memref<304x512xf32, #tpu.memory_space<vmem>>, vector<32x512xf32>,
    %c0_258 = arith.constant 0 : index
    %c0_259 = arith.constant 0 : index
    %286 = vector.load %arg9[%c0_258, %c0_259] : memref<4x304xf32, #tpu.memory_space<vmem>>, vector<4x304xf32>
    %c0_260 = arith.constant 0 : index
    %c0_261 = arith.constant 0 : index
    %287 = vector.load %arg11[%c0_260, %c0_261] : memref<304x512xf32, #tpu.memory_space<vmem>>, vector<304x512xf32>
    %cst_262 = arith.constant dense<0.000000e+00> : vector<4x512xf32>
    %288 = tpu.matmul %286, %287, %cst_262 {dimension_numbers = #tpu.dot_dimension_numbers<[1], [0], [0], [1], [0, 0, 1, 1], [], []>} : vector<4x304xf32>, vector<304x512xf32>, vector<4x512xf32> -> vector<4x512xf32>
    %c0_263 = arith.constant 0 : index
    %c0_264 = arith.constant 0 : index
    %289 = vector.load %arg10[%c0_263, %c0_264] : memref<4x512xf32, #tpu.memory_space<vmem>>, vector<4x512xf32>
    tpu.vector_store %arg10[%c0_263, %c0_264], %288 {strides = array<i32>} : memref<4x512xf32, #tpu.memory_space<vmem>>, vector<4x512xf32>,
    return
  }
  func.func @transform_0(%arg0: i32) -> (i32, i32) {
    %c0_i32 = arith.constant 0 : i32
    %c0_i32_0 = arith.constant 0 : i32
    return %c0_i32, %arg0 : i32, i32
  }
  func.func @transform_1(%arg0: i32) -> (i32, i32) {
    %c0_i32 = arith.constant 0 : i32
    %c0_i32_0 = arith.constant 0 : i32
    %c0_i32_1 = arith.constant 0 : i32
    return %c0_i32, %c0_i32_0 : i32, i32
  }
  func.func @transform_2(%arg0: i32) -> (i32, i32) {
    %c0_i32 = arith.constant 0 : i32
    %c0_i32_0 = arith.constant 0 : i32
    return %c0_i32, %arg0 : i32, i32
  }
  func.func @transform_3(%arg0: i32) -> (i32, i32) {
    %c0_i32 = arith.constant 0 : i32
    %c0_i32_0 = arith.constant 0 : i32
    %c0_i32_1 = arith.constant 0 : i32
    return %c0_i32, %c0_i32_0 : i32, i32
  }
  func.func @transform_4(%arg0: i32) -> (i32, i32) {
    %c0_i32 = arith.constant 0 : i32
    %c0_i32_0 = arith.constant 0 : i32
    %c0_i32_1 = arith.constant 0 : i32
    return %c0_i32, %c0_i32_0 : i32, i32
  }
  func.func @transform_5(%arg0: i32) -> (i32, i32) {
    %c0_i32 = arith.constant 0 : i32
    %c0_i32_0 = arith.constant 0 : i32
    %c0_i32_1 = arith.constant 0 : i32
    return %c0_i32, %c0_i32_0 : i32, i32
  }
  func.func @transform_6(%arg0: i32) -> (i32, i32) {
    %c0_i32 = arith.constant 0 : i32
    %c0_i32_0 = arith.constant 0 : i32
    %c0_i32_1 = arith.constant 0 : i32
    return %c0_i32, %c0_i32_0 : i32, i32
  }
  func.func @transform_7(%arg0: i32) -> (i32, i32) {
    %c0_i32 = arith.constant 0 : i32
    %c0_i32_0 = arith.constant 0 : i32
    %c0_i32_1 = arith.constant 0 : i32
    return %c0_i32, %c0_i32_0 : i32, i32
  }
  func.func @transform_8(%arg0: i32) -> (i32, i32) {
    %c0_i32 = arith.constant 0 : i32
    %c0_i32_0 = arith.constant 0 : i32
    %c0_i32_1 = arith.constant 0 : i32
    return %c0_i32, %c0_i32_0 : i32, i32
  }
  func.func @transform_9(%arg0: i32) -> (i32, i32) {
    %c0_i32 = arith.constant 0 : i32
    %c0_i32_0 = arith.constant 0 : i32
    return %c0_i32, %arg0 : i32, i32
  }
}

</mosaic_0001>

<bundles_post_ra>
// kernel: squeeze.5
= control target key start
LH: loop header
LB: loop body
LE: loop exit
PB: predicated region body
PF: predicated region fallthrough
CT: control target
= control target key end

     0   :  { %vm16_vm0 = vcmask 261120   ;;  %s61_s0 = inlined_call_operand.vmem [shape: f32[3,3,32], index: 0, kind: input, shape index: {}]   ;;  %s62_s1 = inlined_call_operand.vmem [shape: f32[9,32], index: 1, kind: output, shape index: {}]  }
   0x1   :  { %v29_v0 = vld [vmem:[%s61_s0 + $0x8] sm:$0xf]  ;;  %v30_v1 = vld [vmem:[%s61_s0 + $0x4] sm:$0xf]  ;;  %v13_v2 = vld [vmem:[%s61_s0] sm:$0xf] }
   0x2   :  { %8 = vst [vmem:[#allocation0 + $0x10] sm:$0xf] %v29_v0  ;;  %12 = vst [vmem:[#allocation0 + $0x8] sm:$0xf] %v30_v1 }
   0x3   :  { %14 = vst [vmem:[#allocation0] sm:$0xf] %v13_v2 }
   0x9   :  { %v19_v4 = vld [vmem:[#allocation0 + $0x8] sm:$0x7]   ;;  %v24_v5 = vld [vmem:[#allocation0 + $0x10] sm:$0x7]  }
   0xa   :  { %v15_v3 = vld [vmem:[#allocation0] sm:$0x7]   ;;  %31 = vst.msk [vmem:[%s62_s1 + $0x3] sm:$0x7] %vm16_vm0, %v19_v4   ;;  %32 = vst.msk [vmem:[%s62_s1 + $0x6] sm:$0x7] %vm16_vm0, %v24_v5  }
   0xb   :  { %17 = vst.msk [vmem:[%s62_s1] sm:$0x7] %vm16_vm0, %v15_v3  }

// kernel: squeeze.3
= control target key start
LH: loop header
LB: loop body
LE: loop exit
PB: predicated region body
PF: predicated region fallthrough
CT: control target
= control target key end

     0   :  { %vm16_vm0 = vcmask 261120   ;;  %s61_s0 = inlined_call_operand.vmem [shape: f32[3,3,1,32], index: 0, kind: input, shape index: {}]   ;;  %s62_s1 = inlined_call_operand.vmem [shape: f32[9,32], index: 1, kind: output, shape index: {}]  }
   0x1   :  { %v29_v0 = vld [vmem:[%s61_s0 + $0x8] sm:$0xf]  ;;  %v30_v1 = vld [vmem:[%s61_s0 + $0x4] sm:$0xf]  ;;  %v13_v2 = vld [vmem:[%s61_s0] sm:$0xf] }
   0x2   :  { %8 = vst [vmem:[#allocation0 + $0x10] sm:$0xf] %v29_v0  ;;  %12 = vst [vmem:[#allocation0 + $0x8] sm:$0xf] %v30_v1 }
   0x3   :  { %14 = vst [vmem:[#allocation0] sm:$0xf] %v13_v2 }
   0x9   :  { %v19_v4 = vld [vmem:[#allocation0 + $0x8] sm:$0x7]   ;;  %v24_v5 = vld [vmem:[#allocation0 + $0x10] sm:$0x7]  }
   0xa   :  { %v15_v3 = vld [vmem:[#allocation0] sm:$0x7]   ;;  %31 = vst.msk [vmem:[%s62_s1 + $0x3] sm:$0x7] %vm16_vm0, %v19_v4   ;;  %32 = vst.msk [vmem:[%s62_s1 + $0x6] sm:$0x7] %vm16_vm0, %v24_v5  }
   0xb   :  { %17 = vst.msk [vmem:[%s62_s1] sm:$0x7] %vm16_vm0, %v15_v3  }

// kernel: resnet_forward.1
= control target key start
LH: loop header
LB: loop body
LE: loop exit
PB: predicated region body
PF: predicated region fallthrough
CT: control target
= control target key end

     0   :  { %s8981_s13 = smov 17   ;;  %s8982_s18 = smov 16   ;;  %v16574_v4 = vmov 0.0   ;;  %v60_v5 = vlaneseq  ;;  %vm457_vm8 = vcmask 719872   ;;  %vm1772_vm9 = vcmask 392192   ;;  %s16564_s0 = inlined_call_operand.vmem [shape: f32[8,512], index: 0, kind: input, shape index: {}]   ;;  %s16565_s1 = inlined_call_operand.vmem [shape: f32[9,512], index: 1, kind: input, shape index: {}]   ;;  %s16566_s2 = inlined_call_operand.vmem [shape: f32[16,512], index: 2, kind: input, shape index: {}]   ;;  %s16567_s3 = inlined_call_operand.vmem [shape: f32[32,88], index: 3, kind: input, shape index: {}]   ;;  %s16568_s4 = inlined_call_operand.vmem [shape: f32[32,304], index: 4, kind: input, shape index: {}]   ;;  %s16569_s5 = inlined_call_operand.vmem [shape: f32[32,304], index: 5, kind: input, shape index: {}]   ;;  %s16570_s6 = inlined_call_operand.vmem [shape: f32[32,304], index: 6, kind: input, shape index: {}]   ;;  %s16571_s7 = inlined_call_operand.vmem [shape: f32[32,304], index: 7, kind: input, shape index: {}]   ;;  %s16572_s8 = inlined_call_operand.vmem [shape: f32[4,304], index: 8, kind: input, shape index: {}]   ;;  %s16573_s9 = inlined_call_operand.vmem [shape: f32[4,512], index: 9, kind: output, shape index: {}]  }
   0x1   :  { %v9043_v0 = vld [vmem:[%s16564_s0 + $0x10] sm:$0xff]  ;;  %v9048_v1 = vld [vmem:[%s16564_s0] sm:$0xff]  ;;  %v9057_v2 = vld [vmem:[%s16564_s0 + $0x18] sm:$0xff]  ;;  %s8984_s19 = smov 1   ;;  %s8985_s20 = smov 127   ;;  %534 = vmatprep.mubr.f32.mxu0 %v16574_v4  ;;  %623 = vmatprep.mubr.f32.mxu1 %v16574_v4 }
   0x2   :  { %56 = vrot.lane.b32.xlu1 %v9043_v0, %s8981_s13  ;;  %52 = vrot.lane.b32.xlu0 %v9048_v1, %s8981_s13  ;;  %v9062_v3 = vld [vmem:[%s16564_s0 + $0x8] sm:$0xff]  ;;  %s8983_s0 = smov 15   ;;  %s8986_s21 = smov 113   ;;  %v70_v6 = vshrl.u32 %v60_v5, 7  ;;  %v9126_v9 = vand.u32 127, %v60_v5 }
   0x3   :  { %s8987_s22 = smov 112   ;;  %s8988_s23 = smov 111   ;;  %v67_v11 = vld [vmem:[%s16565_s1] ss:$8 sm:$0xf] }
   0x4   :  { %v9128_v10 = vsub.s32 1, %v70_v6  ;;  %v7747_v12 = vld [vmem:[%s16565_s1 + $0x1] ss:$8 sm:$0xf]  ;;  %vm62_vm0 = vcmp.lt.s32.totalorder %v9126_v9, 17  ;;  %v9137_v15 = vsub.s32 0, %v70_v6 }
   0x5   :  { %v9139_v16 = vsub.s32 3, %v70_v6  ;;  %v9141_v17 = vsub.s32 2, %v70_v6  ;;  %vm105_vm1 = vcmp.lt.s32.totalorder %v9126_v9, 16  ;;  %v7748_v52 = vld [vmem:[%s16565_s1 + $0x2] ss:$8 sm:$0xf] }
   0x6   :  { %58 = vrot.lane.b32.xlu1 %v9057_v2, %s8981_s13  ;;  %54 = vrot.lane.b32.xlu0 %v9062_v3, %s8981_s13  ;;  %17072 = vst [vmem:[#allocation3_spill] sm:$0xff] %v9128_v10  ;;  %17073 = vst [vmem:[#allocation4_spill] sm:$0xff] %v9137_v15  ;;  %v76_v18 = vrot.slane %v67_v11, %v9128_v10  ;;  %v120_v19 = vrot.slane %v7747_v12, %v9128_v10  ;;  %v7749_v53 = vld [vmem:[%s16565_s1 + $0x3] ss:$8 sm:$0xf]  ;;  %vm149_vm2 = vcmp.lt.s32.totalorder %v9126_v9, 15 }
   0x7   :  { %17074 = vst [vmem:[#allocation5_spill] sm:$0xff] %v9139_v16  ;;  %17075 = vst [vmem:[#allocation6_spill] sm:$0xff] %v9141_v17  ;;  %v72_v23 = vrot.slane %v67_v11, %v9137_v15  ;;  %v116_v24 = vrot.slane %v7747_v12, %v9137_v15  ;;  %v84_v25 = vrot.slane %v67_v11, %v9139_v16  ;;  %vm193_vm3 = vcmp.lt.s32.totalorder %v9126_v9, 1 }
   0x8   :  { %v128_v28 = vrot.slane %v7747_v12, %v9139_v16  ;;  %v80_v29 = vrot.slane %v67_v11, %v9141_v17  ;;  %v124_v33 = vrot.slane %v7747_v12, %v9141_v17  ;;  %v164_v56 = vrot.slane %v7748_v52, %v9128_v10 }
   0x9   :  { %v208_v57 = vrot.slane %v7749_v53, %v9128_v10  ;;  %v160_v59 = vrot.slane %v7748_v52, %v9137_v15  ;;  %v168_v60 = vrot.slane %v7748_v52, %v9141_v17  ;;  %v172_v61 = vrot.slane %v7748_v52, %v9139_v16 }
   0xa   :  { %99 = vrot.lane.b32.xlu1 %v9062_v3, %s8982_s18  ;;  %97 = vrot.lane.b32.xlu0 %v9048_v1, %s8982_s18  ;;  %vm241_vm4 = vcmp.lt.s32.totalorder %v9126_v9, 127  ;;  %vm329_vm5 = vcmp.lt.s32.totalorder %v9126_v9, 112  ;;  %vm285_vm6 = vcmp.lt.s32.totalorder %v9126_v9, 113  ;;  %vm373_vm7 = vcmp.lt.s32.totalorder %v9126_v9, 111 }
   0xe   :  { %103 = vrot.lane.b32.xlu1 %v9057_v2, %s8982_s18  ;;  %101 = vrot.lane.b32.xlu0 %v9043_v0, %s8982_s18 }
  0x12   :  { %143 = vrot.lane.b32.xlu1 %v9062_v3, %s8983_s0  ;;  %141 = vrot.lane.b32.xlu0 %v9048_v1, %s8983_s0 }
  0x16   :  { %147 = vrot.lane.b32.xlu1 %v9057_v2, %s8983_s0  ;;  %145 = vrot.lane.b32.xlu0 %v9043_v0, %s8983_s0 }
  0x1a   :  { %187 = vrot.lane.b32.xlu1 %v9062_v3, %s8984_s19  ;;  %185 = vrot.lane.b32.xlu0 %v9048_v1, %s8984_s19 }
  0x1e   :  { %191 = vrot.lane.b32.xlu1 %v9057_v2, %s8984_s19  ;;  %189 = vrot.lane.b32.xlu0 %v9043_v0, %s8984_s19 }
  0x22   :  { %235 = vrot.lane.b32.xlu1 %v9062_v3, %s8985_s20  ;;  %233 = vrot.lane.b32.xlu0 %v9048_v1, %s8985_s20 }
  0x26   :  { %239 = vrot.lane.b32.xlu1 %v9057_v2, %s8985_s20  ;;  %237 = vrot.lane.b32.xlu0 %v9043_v0, %s8985_s20 }
  0x2a   :  { %279 = vrot.lane.b32.xlu1 %v9062_v3, %s8986_s21  ;;  %277 = vrot.lane.b32.xlu0 %v9048_v1, %s8986_s21 }
  0x2e   :  { %283 = vrot.lane.b32.xlu1 %v9057_v2, %s8986_s21  ;;  %281 = vrot.lane.b32.xlu0 %v9043_v0, %s8986_s21 }
  0x32   :  { %323 = vrot.lane.b32.xlu1 %v9062_v3, %s8987_s22  ;;  %321 = vrot.lane.b32.xlu0 %v9048_v1, %s8987_s22 }
  0x36   :  { %327 = vrot.lane.b32.xlu1 %v9057_v2, %s8987_s22  ;;  %325 = vrot.lane.b32.xlu0 %v9043_v0, %s8987_s22 }
  0x3a   :  { %367 = vrot.lane.b32.xlu1 %v9062_v3, %s8988_s23  ;;  %365 = vrot.lane.b32.xlu0 %v9048_v1, %s8988_s23 }
  0x3e   :  { %371 = vrot.lane.b32.xlu1 %v9057_v2, %s8988_s23  ;;  %369 = vrot.lane.b32.xlu0 %v9043_v0, %s8988_s23 }
  0x74   :  { %v57_v7 = vpop.permute.xlu1 %56  ;;  %v53_v8 = vpop.permute.xlu0 %52 }
  0x78   :  { %v59_v13 = vpop.permute.xlu1 %58  ;;  %v55_v14 = vpop.permute.xlu0 %54 }
  0x79   :  { %v65_v20 = vsel %vm62_vm0, %v53_v8, %v55_v14  ;;  %v66_v26 = vsel %vm62_vm0, %v59_v13, %v53_v8  ;;  %v63_v32 = vsel %vm62_vm0, %v57_v7, %v59_v13  ;;  %v64_v34 = vsel %vm62_vm0, %v55_v14, %v57_v7 }
  0x7a   :  { %v90_v30 = vmul.f32 %v76_v18, %v65_v20  ;;  %v89_v38 = vmul.f32 %v72_v23, %v66_v26  ;;  %v92_v41 = vmul.f32 %v84_v25, %v63_v32  ;;  %v91_v45 = vmul.f32 %v80_v29, %v64_v34 }
  0x7b   :  { %v204_v7 = vrot.slane %v7749_v53, %v9137_v15  ;;  %v212_v8 = vrot.slane %v7749_v53, %v9141_v17  ;;  %v216_v14 = vrot.slane %v7749_v53, %v9139_v16 }
  0x7c   :  { %v100_v21 = vpop.permute.xlu1 %99  ;;  %v98_v22 = vpop.permute.xlu0 %97 }
  0x7d   :  { %v108_v27 = vsel %vm105_vm1, %v98_v22, %v100_v21 }
  0x7e   :  { %v134_v31 = vmul.f32 %v120_v19, %v108_v27 }
  0x80   :  { %v104_v35 = vpop.permute.xlu1 %103  ;;  %v102_v36 = vpop.permute.xlu0 %101  ;;  %v7879_v37 = vpack.c.bf16 %v134_v31, %v90_v30  ;;  %v7750_v31 = vld [vmem:[%s16565_s1 + $0x5] ss:$8 sm:$0xf] }
  0x81   :  { %v109_v39 = vsel %vm105_vm1, %v104_v35, %v98_v22  ;;  %v107_v40 = vsel %vm105_vm1, %v100_v21, %v102_v36  ;;  %v106_v42 = vsel %vm105_vm1, %v102_v36, %v104_v35 }
  0x82   :  { %7880 = vmatprep.subr.bf16.mxu0 %v7879_v37  ;;  %v133_v43 = vmul.f32 %v116_v24, %v109_v39  ;;  %v136_v44 = vmul.f32 %v128_v28, %v106_v42  ;;  %v135_v46 = vmul.f32 %v124_v33, %v107_v40  ;;  %v252_v37 = vrot.slane %v7750_v31, %v9137_v15 }
  0x83   :  { %v256_v40 = vrot.slane %v7750_v31, %v9128_v10 }
  0x84   :  { %v144_v47 = vpop.permute.xlu1 %143  ;;  %v142_v48 = vpop.permute.xlu0 %141  ;;  %v7881_v49 = vpack.c.bf16 %v133_v43, %v89_v38  ;;  %v7899_v50 = vpack.c.bf16 %v136_v44, %v92_v41  ;;  %v7901_v51 = vpack.c.bf16 %v135_v46, %v91_v45  ;;  %v264_v38 = vrot.slane %v7750_v31, %v9139_v16 }
  0x85   :  { %v152_v58 = vsel %vm149_vm2, %v142_v48, %v144_v47  ;;  %v260_v41 = vrot.slane %v7750_v31, %v9141_v17 }
  0x86   :  { %7882 = vmatpush1.bf16.msra.mxu0 %v7881_v49  ;;  %7900 = vmatprep.subr.bf16.mxu1 %v7899_v50  ;;  %v178_v11 = vmul.f32 %v164_v56, %v152_v58 }
  0x87   :  { %7902 = vmatpush1.bf16.msra.mxu1 %v7901_v51 }
  0x88   :  { %v148_v54 = vpop.permute.xlu1 %147  ;;  %v146_v55 = vpop.permute.xlu0 %145 }
  0x89   :  { %v153_v5 = vsel %vm149_vm2, %v148_v54, %v142_v48  ;;  %v151_v12 = vsel %vm149_vm2, %v144_v47, %v146_v55  ;;  %v150_v18 = vsel %vm149_vm2, %v146_v55, %v148_v54 }
  0x8a   :  { %v177_v19 = vmul.f32 %v160_v59, %v153_v5  ;;  %v179_v23 = vmul.f32 %v168_v60, %v151_v12  ;;  %v180_v27 = vmul.f32 %v172_v61, %v150_v18  ;;  %v7752_v59 = vld [vmem:[%s16565_s1 + $0x7] ss:$8 sm:$0xf] }
  0x8b   :  { %v340_v5 = vrot.slane %v7752_v59, %v9137_v15 }
  0x8c   :  { %v188_v62 = vpop.permute.xlu1 %187  ;;  %v186_v63 = vpop.permute.xlu0 %185 }
  0x8d   :  { %v196_v6 = vsel %vm193_vm3, %v186_v63, %v188_v62 }
  0x8e   :  { %v222_v13 = vmul.f32 %v208_v57, %v196_v6 }
  0x90   :  { %v192_v20 = vpop.permute.xlu1 %191  ;;  %v190_v21 = vpop.permute.xlu0 %189  ;;  %v7883_v22 = vpack.c.bf16 %v222_v13, %v178_v11  ;;  %v348_v11 = vrot.slane %v7752_v59, %v9141_v17 }
  0x91   :  { %v197_v24 = vsel %vm193_vm3, %v192_v20, %v186_v63  ;;  %v194_v25 = vsel %vm193_vm3, %v190_v21, %v192_v20  ;;  %v195_v26 = vsel %vm193_vm3, %v188_v62, %v190_v21 }
  0x92   :  { %v221_v28 = vmul.f32 %v204_v7, %v197_v24  ;;  %v223_v29 = vmul.f32 %v212_v8, %v195_v26  ;;  %v224_v30 = vmul.f32 %v216_v14, %v194_v25  ;;  %7884 = vmatprep.subr.bf16.mxu0 %v7883_v22  ;;  %v352_v7 = vrot.slane %v7752_v59, %v9139_v16 }
  0x93   :  { %v344_v8 = vrot.slane %v7752_v59, %v9128_v10 }
  0x94   :  { %v236_v32 = vpop.permute.xlu1 %235  ;;  %v234_v33 = vpop.permute.xlu0 %233  ;;  %v7885_v34 = vpack.c.bf16 %v221_v28, %v177_v19  ;;  %v7903_v35 = vpack.c.bf16 %v224_v30, %v180_v27  ;;  %v7905_v36 = vpack.c.bf16 %v223_v29, %v179_v23  ;;  %v7753_v30 = vld [vmem:[%s16565_s1 + $0x20] ss:$8 sm:$0xf] }
  0x95   :  { %v244_v39 = vsel %vm241_vm4, %v234_v33, %v236_v32 }
  0x96   :  { %7886 = vmatpush1.bf16.msra.mxu0 %v7885_v34  ;;  %7904 = vmatprep.subr.bf16.mxu1 %v7903_v35  ;;  %v269_v44 = vmul.f32 %v252_v37, %v244_v39  ;;  %v384_v37 = vrot.slane %v7753_v30, %v9137_v15  ;;  %v396_v39 = vrot.slane %v7753_v30, %v9139_v16 }
  0x97   :  { %7906 = vmatpush1.bf16.msra.mxu1 %v7905_v36 }
  0x98   :  { %v240_v42 = vpop.permute.xlu1 %239  ;;  %v238_v43 = vpop.permute.xlu0 %237  ;;  %v7889_v56 = vpack.c.bf16 %v269_v44, %v9048_v1 }
  0x99   :  { %v245_v45 = vsel %vm241_vm4, %v240_v42, %v234_v33  ;;  %v242_v46 = vsel %vm241_vm4, %v238_v43, %v240_v42  ;;  %v243_v47 = vsel %vm241_vm4, %v236_v32, %v238_v43  ;;  %v392_v42 = vrot.slane %v7753_v30, %v9141_v17 }
  0x9a   :  { %v272_v48 = vmul.f32 %v264_v38, %v245_v45  ;;  %v270_v49 = vmul.f32 %v256_v40, %v243_v47  ;;  %v271_v50 = vmul.f32 %v260_v41, %v242_v46  ;;  %v388_v41 = vrot.slane %v7753_v30, %v9128_v10 }
  0x9c   :  { %v280_v51 = vpop.permute.xlu1 %279  ;;  %v278_v52 = vpop.permute.xlu0 %277  ;;  %v7887_v53 = vpack.c.bf16 %v270_v49, %v9062_v3  ;;  %v7907_v54 = vpack.c.bf16 %v272_v48, %v9057_v2  ;;  %v7909_v55 = vpack.c.bf16 %v271_v50, %v9043_v0  ;;  %v7751_v2 = vld [vmem:[%s16565_s1 + $0x6] ss:$8 sm:$0xf] }
  0x9d   :  { %v308_v0 = vrot.slane %v7751_v2, %v9139_v16  ;;  %v300_v1 = vrot.slane %v7751_v2, %v9128_v10  ;;  %v304_v62 = vrot.slane %v7751_v2, %v9141_v17  ;;  %v296_v12 = vrot.slane %v7751_v2, %v9137_v15  ;;  %v33_v49 = vld [vmem:[%s16566_s2 + $0x8] sm:$0xff]  ;;  %v35_v50 = vld [vmem:[%s16566_s2 + $0x18] sm:$0xff] }
  0x9e   :  { %7888 = vmatprep.subr.bf16.mxu0 %v7887_v53  ;;  %7908 = vmatprep.subr.bf16.mxu1 %v7907_v54  ;;  %v288_v14 = vsel %vm285_vm6, %v278_v52, %v280_v51  ;;  %v37_v2 = vld [vmem:[%s16566_s2 + $0x28] sm:$0xff] }
  0x9f   :  { %7890 = vmatpush1.bf16.msra.mxu0 %v7889_v56  ;;  %7910 = vmatpush1.bf16.msra.mxu1 %v7909_v55  ;;  %v313_v31 = vmul.f32 %v296_v12, %v288_v14  ;;  %v32_v55 = vld [vmem:[%s16566_s2] sm:$0xff] }
  0xa0   :  { %v284_v57 = vpop.permute.xlu1 %283  ;;  %v282_v58 = vpop.permute.xlu0 %281 }
  0xa1   :  { %v289_v61 = vsel %vm285_vm6, %v284_v57, %v278_v52  ;;  %v287_v63 = vsel %vm285_vm6, %v280_v51, %v282_v58  ;;  %v286_v13 = vsel %vm285_vm6, %v282_v58, %v284_v57  ;;  %v34_v51 = vld [vmem:[%s16566_s2 + $0x10] sm:$0xff] }
  0xa2   :  { %v316_v18 = vmul.f32 %v308_v0, %v289_v61  ;;  %v314_v19 = vmul.f32 %v300_v1, %v287_v63  ;;  %v315_v26 = vmul.f32 %v304_v62, %v286_v13  ;;  %v39_v0 = vld [vmem:[%s16566_s2 + $0x38] sm:$0xff]  ;;  %v36_v1 = vld [vmem:[%s16566_s2 + $0x20] sm:$0xff]  ;;  %v410_v61 = vld [vmem:[%s16567_s3 + $0x8] sm:$0xff] }
  0xa3   :  { %v411_v62 = vld [vmem:[%s16567_s3 + $0x10] sm:$0xff]  ;;  %v412_v63 = vld [vmem:[%s16567_s3 + $0x18] sm:$0xff] }
  0xa4   :  { %v324_v3 = vpop.permute.xlu1 %323  ;;  %v322_v60 = vpop.permute.xlu0 %321 }
  0xa5   :  { %v332_v6 = vsel %vm329_vm5, %v322_v60, %v324_v3 }
  0xa6   :  { %v357_v22 = vmul.f32 %v340_v5, %v332_v6 }
  0xa8   :  { %v328_v20 = vpop.permute.xlu1 %327  ;;  %v326_v21 = vpop.permute.xlu0 %325  ;;  %v7893_v38 = vpack.c.bf16 %v357_v22, %v313_v31 }
  0xa9   :  { %v333_v23 = vsel %vm329_vm5, %v328_v20, %v322_v60  ;;  %v330_v24 = vsel %vm329_vm5, %v326_v21, %v328_v20  ;;  %v331_v25 = vsel %vm329_vm5, %v324_v3, %v326_v21  ;;  %v38_v3 = vld [vmem:[%s16566_s2 + $0x30] sm:$0xff]  ;;  %v409_v60 = vld [vmem:[%s16567_s3] sm:$0xff] }
  0xaa   :  { %v360_v27 = vmul.f32 %v352_v7, %v333_v23  ;;  %v358_v28 = vmul.f32 %v344_v8, %v331_v25  ;;  %v359_v29 = vmul.f32 %v348_v11, %v330_v24 }
  0xac   :  { %v368_v32 = vpop.permute.xlu1 %367  ;;  %v366_v33 = vpop.permute.xlu0 %365  ;;  %v7891_v34 = vpack.c.bf16 %v358_v28, %v314_v19  ;;  %v7911_v35 = vpack.c.bf16 %v360_v27, %v316_v18  ;;  %v7913_v36 = vpack.c.bf16 %v359_v29, %v315_v26 }
  0xad   :  { %v376_v40 = vsel %vm373_vm7, %v366_v33, %v368_v32 }
  0xae   :  { %7892 = vmatprep.subr.bf16.mxu0 %v7891_v34  ;;  %7912 = vmatprep.subr.bf16.mxu1 %v7911_v35  ;;  %v401_v45 = vmul.f32 %v384_v37, %v376_v40 }
  0xaf   :  { %7894 = vmatpush1.bf16.msra.mxu0 %v7893_v38  ;;  %7914 = vmatpush1.bf16.msra.mxu1 %v7913_v36 }
  0xb0   :  { %v372_v43 = vpop.permute.xlu1 %371  ;;  %v370_v44 = vpop.permute.xlu0 %369  ;;  %v7897_v59 = vpack.c.bf16 %v32_v55, %v401_v45 }
  0xb1   :  { %v377_v46 = vsel %vm373_vm7, %v372_v43, %v366_v33  ;;  %v374_v47 = vsel %vm373_vm7, %v370_v44, %v372_v43  ;;  %v375_v48 = vsel %vm373_vm7, %v368_v32, %v370_v44 }
  0xb2   :  { %v404_v52 = vmul.f32 %v396_v39, %v377_v46  ;;  %v402_v53 = vmul.f32 %v388_v41, %v375_v48  ;;  %v403_v54 = vmul.f32 %v392_v42, %v374_v47 }
  0xb4   :  { %v7895_v56 = vpack.c.bf16 %v33_v49, %v402_v53  ;;  %v7915_v57 = vpack.c.bf16 %v35_v50, %v404_v52  ;;  %v7917_v58 = vpack.c.bf16 %v34_v51, %v403_v54 }
  0xb6   :  { %7896 = vmatprep.subr.bf16.mxu0 %v7895_v56  ;;  %7916 = vmatprep.subr.bf16.mxu1 %v7915_v57 }
  0xb7   :  { %7898 = vmatpush1.bf16.msra.mxu0 %v7897_v59  ;;  %7918 = vmatpush1.bf16.msra.mxu1 %v7917_v58 }
  0xb8   :  { %490 = vmatprep.subr.mxu0 %v37_v2  ;;  %579 = vmatprep.subr.mxu1 %v39_v0 }
  0xbb   :  { %491 = vmatpush1.msra.mxu0 %v36_v1  ;;  %580 = vmatpush1.msra.mxu1 %v38_v3 }
  0xbc   :  { %7754 = vmatmul.mubr.msk.f32.vlgmr.msra.gmra.mrb[0].mxu0 %vm457_vm8, %v409_v60  ;;  %7758 = vmatmul.mubr.msk.f32.vlgmr.msra.gmra.mrb[0].mxu1 %vm457_vm8, %v409_v60 }
  0xbd   :  { %540 = vmatprep.mubr.f32.mxu0 %v16574_v4  ;;  %629 = vmatprep.mubr.f32.mxu1 %v16574_v4 }
  0xc0   :  { %7755 = vmatmul.mubr.msk.f32.gmra.mrb[2].mxu0 %vm457_vm8, %v410_v61  ;;  %7759 = vmatmul.mubr.msk.f32.gmra.mrb[2].mxu1 %vm457_vm8, %v410_v61 }
  0xc1   :  { %546 = vmatprep.mubr.f32.mxu0 %v16574_v4  ;;  %635 = vmatprep.mubr.f32.mxu1 %v16574_v4 }
  0xc4   :  { %7756 = vmatmul.mubr.msk.f32.gmra.mrb[4].mxu0 %vm457_vm8, %v411_v62  ;;  %7760 = vmatmul.mubr.msk.f32.gmra.mrb[4].mxu1 %vm457_vm8, %v411_v62 }
  0xc5   :  { %552 = vmatprep.mubr.f32.mxu0 %v16574_v4  ;;  %641 = vmatprep.mubr.f32.mxu1 %v16574_v4 }
  0xc8   :  { %7757 = vmatmul.mubr.msk.f32.gmra.mrb[6].mxu0 %vm457_vm8, %v412_v63  ;;  %7761 = vmatmul.mubr.msk.f32.gmra.mrb[6].mxu1 %vm457_vm8, %v412_v63 }
 0x18f   :  { %v536_v5 = vpop.f32.mrb[0].mxu0  ;;  %v625_v6 = vpop.f32.mrb[0].mxu1 }
 0x190   :  { %v7762_v7 = vmul.f32 -1.442695, %v536_v5  ;;  %v7764_v8 = vmul.f32 -1.442695, %v625_v6  ;;  %v9318_v11 = vpop.f32.mrb[1].mxu0  ;;  %v9320_v12 = vpop.f32.mrb[1].mxu1 }
 0x191   :  { %v7763_v46 = vmul.f32 -1.442695, %v9318_v11  ;;  %v7765_v47 = vmul.f32 -1.442695, %v9320_v12 }
 0x192   :  { %8789 = vpow2.f32 %v7762_v7 }
 0x193   :  { %8791 = vpow2.f32 %v7764_v8  ;;  %v542_v13 = vpop.f32.mrb[2].mxu0  ;;  %v631_v14 = vpop.f32.mrb[2].mxu1 }
 0x194   :  { %v7766_v18 = vmul.f32 -1.442695, %v542_v13  ;;  %v7768_v19 = vmul.f32 -1.442695, %v631_v14  ;;  %v9322_v20 = vpop.f32.mrb[3].mxu0  ;;  %v9324_v21 = vpop.f32.mrb[3].mxu1 }
 0x195   :  { %v7767_v48 = vmul.f32 -1.442695, %v9322_v20  ;;  %v7769_v49 = vmul.f32 -1.442695, %v9324_v21 }
 0x196   :  { %8793 = vpow2.f32 %v7766_v18 }
 0x197   :  { %8795 = vpow2.f32 %v7768_v19  ;;  %v9326_v22 = vpop.f32.mrb[4].mxu0  ;;  %v9328_v23 = vpop.f32.mrb[4].mxu1 }
 0x198   :  { %v9330_v24 = vpop.f32.mrb[5].mxu0  ;;  %v9332_v25 = vpop.f32.mrb[5].mxu1  ;;  %v7770_v62 = vmul.f32 -1.442695, %v9326_v22  ;;  %v7772_v63 = vmul.f32 -1.442695, %v9328_v23 }
 0x19b   :  { %v9334_v26 = vpop.f32.mrb[6].mxu0  ;;  %v9336_v27 = vpop.f32.mrb[6].mxu1 }
 0x19c   :  { %v8790_v28 = vpop.eup %8789  ;;  %v9338_v29 = vpop.f32.mrb[7].mxu0 }
 0x19d   :  { %v9340_v30 = vpop.f32.mrb[7].mxu1  ;;  %v8792_v31 = vpop.eup %8791  ;;  %v696_v32 = vadd.f32 1.0, %v8790_v28 }
 0x19e   :  { %v698_v33 = vadd.f32 1.0, %v8792_v31 }
 0x19f   :  { %8797 = vrcp.f32 %v696_v32 }
 0x1a0   :  { %v8794_v34 = vpop.eup %8793  ;;  %8799 = vrcp.f32 %v698_v33 }
 0x1a1   :  { %v8796_v35 = vpop.eup %8795  ;;  %v700_v36 = vadd.f32 1.0, %v8794_v34 }
 0x1a2   :  { %v702_v37 = vadd.f32 1.0, %v8796_v35 }
 0x1a3   :  { %8801 = vrcp.f32 %v700_v36 }
 0x1a4   :  { %8803 = vrcp.f32 %v702_v37 }
 0x1a5   :  { %8805 = vpow2.f32 %v7763_v46 }
 0x1a6   :  { %8807 = vpow2.f32 %v7765_v47 }
 0x1a7   :  { %8809 = vpow2.f32 %v7767_v48 }
 0x1a8   :  { %8811 = vpow2.f32 %v7769_v49 }
 0x1a9   :  { %v8798_v38 = vpop.eup %8797 }
 0x1aa   :  { %v9342_v39 = vmul.f32 %v8798_v38, %v536_v5  ;;  %v8800_v40 = vpop.eup %8799  ;;  %v7774_v5 = vmul.f32 -1.442695, %v9334_v26 }
 0x1ab   :  { %v9346_v42 = vmul.f32 %v8800_v40, %v625_v6  ;;  %v7776_v6 = vmul.f32 -1.442695, %v9336_v27 }
 0x1ac   :  { %17076 = vst [vmem:[#allocation7_spill] sm:$0xff] %v9342_v39  ;;  %776 = vrot.lane.b32.xlu0 %v9342_v39, %s8981_s13 }
 0x1ad   :  { %v8802_v41 = vpop.eup %8801  ;;  %17077 = vst [vmem:[#allocation8_spill] sm:$0xff] %v9346_v42 }
 0x1ae   :  { %v9348_v43 = vmul.f32 %v8802_v41, %v542_v13  ;;  %v8804_v44 = vpop.eup %8803 }
 0x1af   :  { %v9354_v45 = vmul.f32 %v8804_v44, %v631_v14  ;;  %v8806_v50 = vpop.eup %8805 }
 0x1b0   :  { %17078 = vst [vmem:[#allocation9_spill] sm:$0xff] %v9348_v43  ;;  %778 = vrot.lane.b32.xlu1 %v9348_v43, %s8981_s13  ;;  %792 = vrot.lane.b32.xlu0 %v9346_v42, %s8981_s13  ;;  %v8808_v51 = vpop.eup %8807  ;;  %v697_v52 = vadd.f32 1.0, %v8806_v50 }
 0x1b1   :  { %17079 = vst [vmem:[#allocation10_spill] sm:$0xff] %v9354_v45  ;;  %v8810_v53 = vpop.eup %8809  ;;  %v699_v54 = vadd.f32 1.0, %v8808_v51  ;;  %v7771_v51 = vmul.f32 -1.442695, %v9330_v24 }
 0x1b2   :  { %8813 = vrcp.f32 %v697_v52  ;;  %v701_v55 = vadd.f32 1.0, %v8810_v53  ;;  %v8812_v56 = vpop.eup %8811 }
 0x1b3   :  { %8815 = vrcp.f32 %v699_v54  ;;  %v703_v57 = vadd.f32 1.0, %v8812_v56  ;;  %v7773_v54 = vmul.f32 -1.442695, %v9332_v25 }
 0x1b4   :  { %878 = vrot.lane.b32.xlu0 %v9342_v39, %s8982_s18  ;;  %794 = vrot.lane.b32.xlu1 %v9354_v45, %s8981_s13  ;;  %8817 = vrcp.f32 %v701_v55  ;;  %v7775_v55 = vmul.f32 -1.442695, %v9338_v29 }
 0x1b5   :  { %8819 = vrcp.f32 %v703_v57 }
 0x1b6   :  { %8821 = vpow2.f32 %v7770_v62 }
 0x1b7   :  { %8823 = vpow2.f32 %v7772_v63 }
 0x1b8   :  { %894 = vrot.lane.b32.xlu0 %v9346_v42, %s8982_s18  ;;  %880 = vrot.lane.b32.xlu1 %v9348_v43, %s8982_s18  ;;  %8825 = vpow2.f32 %v7774_v5 }
 0x1b9   :  { %8827 = vpow2.f32 %v7776_v6 }
 0x1bc   :  { %980 = vrot.lane.b32.xlu0 %v9342_v39, %s8983_s0  ;;  %896 = vrot.lane.b32.xlu1 %v9354_v45, %s8982_s18  ;;  %v8814_v58 = vpop.eup %8813 }
 0x1bd   :  { %v8816_v59 = vpop.eup %8815  ;;  %v9417_v2 = vmul.f32 %v8814_v58, %v9318_v11  ;;  %v7777_v58 = vmul.f32 -1.442695, %v9340_v30 }
 0x1be   :  { %v8818_v0 = vpop.eup %8817  ;;  %v9424_v1 = vmul.f32 %v8816_v59, %v9320_v12 }
 0x1bf   :  { %17080 = vst [vmem:[#allocation11_spill] sm:$0xff] %v9417_v2  ;;  %v9427_v3 = vmul.f32 %v8818_v0, %v9322_v20  ;;  %v8820_v60 = vpop.eup %8819 }
 0x1c0   :  { %996 = vrot.lane.b32.xlu0 %v9346_v42, %s8983_s0  ;;  %982 = vrot.lane.b32.xlu1 %v9348_v43, %s8983_s0  ;;  %17081 = vst [vmem:[#allocation12_spill] sm:$0xff] %v9424_v1  ;;  %v9434_v61 = vmul.f32 %v8820_v60, %v9324_v21  ;;  %v8822_v7 = vpop.eup %8821 }
 0x1c1   :  { %17082 = vst [vmem:[#allocation13_spill] sm:$0xff] %v9427_v3  ;;  %v8824_v8 = vpop.eup %8823  ;;  %v704_v11 = vadd.f32 1.0, %v8822_v7 }
 0x1c2   :  { %17083 = vst [vmem:[#allocation14_spill] sm:$0xff] %v9434_v61  ;;  %v8826_v12 = vpop.eup %8825  ;;  %v706_v13 = vadd.f32 1.0, %v8824_v8 }
 0x1c3   :  { %8829 = vrcp.f32 %v704_v11  ;;  %v708_v14 = vadd.f32 1.0, %v8826_v12  ;;  %v8828_v18 = vpop.eup %8827 }
 0x1c4   :  { %1082 = vrot.lane.b32.xlu0 %v9342_v39, %s8984_s19  ;;  %998 = vrot.lane.b32.xlu1 %v9354_v45, %s8983_s0  ;;  %8831 = vrcp.f32 %v706_v13  ;;  %v710_v19 = vadd.f32 1.0, %v8828_v18 }
 0x1c5   :  { %8833 = vrcp.f32 %v708_v14 }
 0x1c6   :  { %8835 = vrcp.f32 %v710_v19 }
 0x1c7   :  { %8837 = vpow2.f32 %v7771_v51 }
 0x1c8   :  { %1098 = vrot.lane.b32.xlu0 %v9346_v42, %s8984_s19  ;;  %1084 = vrot.lane.b32.xlu1 %v9348_v43, %s8984_s19  ;;  %8839 = vpow2.f32 %v7773_v54 }
 0x1c9   :  { %8841 = vpow2.f32 %v7775_v55  ;;  %v824_v55 = vld [vmem:[%s16565_s1] ss:$8 sm:$0xf] }
 0x1ca   :  { %8843 = vpow2.f32 %v7777_v58 }
 0x1cc   :  { %1200 = vrot.lane.b32.xlu0 %v9342_v39, %s8985_s20  ;;  %1100 = vrot.lane.b32.xlu1 %v9354_v45, %s8984_s19 }
 0x1cd   :  { %v8830_v31 = vpop.eup %8829 }
 0x1ce   :  { %v8832_v32 = vpop.eup %8831  ;;  %v9499_v33 = vmul.f32 %v8830_v31, %v9326_v22 }
 0x1cf   :  { %v8834_v36 = vpop.eup %8833  ;;  %v9513_v38 = vmul.f32 %v8832_v32, %v9328_v23 }
 0x1d0   :  { %1216 = vrot.lane.b32.xlu0 %v9346_v42, %s8985_s20  ;;  %1202 = vrot.lane.b32.xlu1 %v9348_v43, %s8985_s20  ;;  %17084 = vst [vmem:[#allocation15_spill] sm:$0xff] %v9499_v33  ;;  %v9510_v37 = vmul.f32 %v8834_v36, %v9334_v26  ;;  %v8836_v41 = vpop.eup %8835 }
 0x1d1   :  { %17086 = vst [vmem:[#allocation17_spill] sm:$0xff] %v9513_v38  ;;  %v9524_v44 = vmul.f32 %v8836_v41, %v9336_v27  ;;  %v8838_v60 = vpop.eup %8837 }
 0x1d2   :  { %17085 = vst [vmem:[#allocation16_spill] sm:$0xff] %v9510_v37  ;;  %v705_v5 = vadd.f32 1.0, %v8838_v60  ;;  %v8840_v6 = vpop.eup %8839 }
 0x1d3   :  { %17087 = vst [vmem:[#allocation18_spill] sm:$0xff] %v9524_v44  ;;  %v8842_v11 = vpop.eup %8841  ;;  %v707_v12 = vadd.f32 1.0, %v8840_v6 }
 0x1d4   :  { %1302 = vrot.lane.b32.xlu0 %v9342_v39, %s8986_s21  ;;  %1218 = vrot.lane.b32.xlu1 %v9354_v45, %s8985_s20  ;;  %8845 = vrcp.f32 %v705_v5  ;;  %v8844_v13 = vpop.eup %8843  ;;  %v709_v14 = vadd.f32 1.0, %v8842_v11 }
 0x1d5   :  { %8847 = vrcp.f32 %v707_v12  ;;  %v711_v31 = vadd.f32 1.0, %v8844_v13  ;;  %v9635_v12 = vrot.slane %v824_v55, %v9128_v10 }
 0x1d6   :  { %8849 = vrcp.f32 %v709_v14 }
 0x1d7   :  { %8851 = vrcp.f32 %v711_v31 }
 0x1d8   :  { %1318 = vrot.lane.b32.xlu0 %v9346_v42, %s8986_s21  ;;  %1304 = vrot.lane.b32.xlu1 %v9348_v43, %s8986_s21 }
 0x1dc   :  { %1404 = vrot.lane.b32.xlu0 %v9342_v39, %s8987_s22  ;;  %1320 = vrot.lane.b32.xlu1 %v9354_v45, %s8986_s21 }
 0x1de   :  { %v8846_v54 = vpop.eup %8845 }
 0x1df   :  { %v9630_v58 = vmul.f32 %v8846_v54, %v9330_v24  ;;  %v8848_v6 = vpop.eup %8847 }
 0x1e0   :  { %1420 = vrot.lane.b32.xlu0 %v9346_v42, %s8987_s22  ;;  %1406 = vrot.lane.b32.xlu1 %v9348_v43, %s8987_s22  ;;  %v8850_v11 = vpop.eup %8849  ;;  %v9645_v24 = vmul.f32 %v8848_v6, %v9332_v25 }
 0x1e1   :  { %17103 = vst [vmem:[#allocation34_spill] sm:$0xff] %v9630_v58  ;;  %v8852_v54 = vpop.eup %8851  ;;  %v9648_v4 = vmul.f32 %v8850_v11, %v9338_v29 }
 0x1e2   :  { %17105 = vst [vmem:[#allocation36_spill] sm:$0xff] %v9645_v24 }
 0x1e3   :  { %17106 = vst [vmem:[#allocation37_spill] sm:$0xff] %v9648_v4 }
 0x1e4   :  { %1506 = vrot.lane.b32.xlu0 %v9342_v39, %s8988_s23  ;;  %1422 = vrot.lane.b32.xlu1 %v9354_v45, %s8987_s22 }
 0x1e8   :  { %1522 = vrot.lane.b32.xlu0 %v9346_v42, %s8988_s23  ;;  %1508 = vrot.lane.b32.xlu1 %v9348_v43, %s8988_s23 }
 0x1ec   :  { %784 = vrot.lane.b32.xlu0 %v9417_v2, %s8981_s13  ;;  %1524 = vrot.lane.b32.xlu1 %v9354_v45, %s8988_s23 }
 0x1f0   :  { %800 = vrot.lane.b32.xlu0 %v9424_v1, %s8981_s13  ;;  %786 = vrot.lane.b32.xlu1 %v9427_v3, %s8981_s13 }
 0x1f4   :  { %886 = vrot.lane.b32.xlu0 %v9417_v2, %s8982_s18  ;;  %802 = vrot.lane.b32.xlu1 %v9434_v61, %s8981_s13 }
 0x1f8   :  { %902 = vrot.lane.b32.xlu0 %v9424_v1, %s8982_s18  ;;  %888 = vrot.lane.b32.xlu1 %v9427_v3, %s8982_s18 }
 0x1fc   :  { %988 = vrot.lane.b32.xlu0 %v9417_v2, %s8983_s0  ;;  %904 = vrot.lane.b32.xlu1 %v9434_v61, %s8982_s18 }
 0x200   :  { %1004 = vrot.lane.b32.xlu0 %v9424_v1, %s8983_s0  ;;  %990 = vrot.lane.b32.xlu1 %v9427_v3, %s8983_s0 }
 0x204   :  { %1090 = vrot.lane.b32.xlu0 %v9417_v2, %s8984_s19  ;;  %1006 = vrot.lane.b32.xlu1 %v9434_v61, %s8983_s0 }
 0x208   :  { %1106 = vrot.lane.b32.xlu0 %v9424_v1, %s8984_s19  ;;  %1092 = vrot.lane.b32.xlu1 %v9427_v3, %s8984_s19 }
 0x20c   :  { %1208 = vrot.lane.b32.xlu0 %v9417_v2, %s8985_s20  ;;  %1108 = vrot.lane.b32.xlu1 %v9434_v61, %s8984_s19 }
 0x210   :  { %1224 = vrot.lane.b32.xlu0 %v9424_v1, %s8985_s20  ;;  %1210 = vrot.lane.b32.xlu1 %v9427_v3, %s8985_s20 }
 0x214   :  { %1310 = vrot.lane.b32.xlu0 %v9417_v2, %s8986_s21  ;;  %1226 = vrot.lane.b32.xlu1 %v9434_v61, %s8985_s20 }
 0x218   :  { %1326 = vrot.lane.b32.xlu0 %v9424_v1, %s8986_s21  ;;  %1312 = vrot.lane.b32.xlu1 %v9427_v3, %s8986_s21 }
 0x21c   :  { %1412 = vrot.lane.b32.xlu0 %v9417_v2, %s8987_s22  ;;  %1328 = vrot.lane.b32.xlu1 %v9434_v61, %s8986_s21 }
 0x21e   :  { %v9484_v20 = vpop.permute.xlu0 %776 }
 0x220   :  { %1428 = vrot.lane.b32.xlu0 %v9424_v1, %s8987_s22  ;;  %1414 = vrot.lane.b32.xlu1 %v9427_v3, %s8987_s22 }
 0x222   :  { %v9490_v21 = vpop.permute.xlu1 %778  ;;  %v9492_v28 = vpop.permute.xlu0 %792 }
 0x224   :  { %1514 = vrot.lane.b32.xlu0 %v9417_v2, %s8988_s23  ;;  %1430 = vrot.lane.b32.xlu1 %v9434_v61, %s8987_s22  ;;  %v7784_v2 = vld [vmem:[%s16565_s1 + $0x20] ss:$8 sm:$0xf] }
 0x226   :  { %v9501_v34 = vpop.permute.xlu0 %878  ;;  %v9503_v35 = vpop.permute.xlu1 %794 }
 0x228   :  { %780 = vrot.lane.b32.xlu0 %v9499_v33, %s8981_s13  ;;  %1516 = vrot.lane.b32.xlu1 %v9427_v3, %s8988_s23 }
 0x22a   :  { %v9515_v40 = vpop.permute.xlu0 %894  ;;  %v9517_v22 = vpop.permute.xlu1 %880 }
 0x22c   :  { %782 = vrot.lane.b32.xlu1 %v9510_v37, %s8981_s13  ;;  %796 = vrot.lane.b32.xlu0 %v9513_v38, %s8981_s13 }
 0x22e   :  { %v9526_v46 = vpop.permute.xlu0 %980  ;;  %v9528_v26 = vpop.permute.xlu1 %896 }
 0x230   :  { %882 = vrot.lane.b32.xlu0 %v9499_v33, %s8982_s18  ;;  %798 = vrot.lane.b32.xlu1 %v9524_v44, %s8981_s13 }
 0x232   :  { %v9534_v23 = vpop.permute.xlu0 %996  ;;  %v9536_v47 = vpop.permute.xlu1 %982 }
 0x234   :  { %898 = vrot.lane.b32.xlu0 %v9513_v38, %s8982_s18  ;;  %884 = vrot.lane.b32.xlu1 %v9510_v37, %s8982_s18 }
 0x236   :  { %v9542_v27 = vpop.permute.xlu0 %1082  ;;  %v9544_v48 = vpop.permute.xlu1 %998 }
 0x238   :  { %984 = vrot.lane.b32.xlu0 %v9499_v33, %s8983_s0  ;;  %900 = vrot.lane.b32.xlu1 %v9524_v44, %s8982_s18 }
 0x23a   :  { %v9550_v49 = vpop.permute.xlu0 %1098  ;;  %v9552_v50 = vpop.permute.xlu1 %1084 }
 0x23c   :  { %1000 = vrot.lane.b32.xlu0 %v9513_v38, %s8983_s0  ;;  %986 = vrot.lane.b32.xlu1 %v9510_v37, %s8983_s0 }
 0x23e   :  { %v9559_v52 = vpop.permute.xlu0 %1200  ;;  %v9561_v53 = vpop.permute.xlu1 %1100 }
 0x23f   :  { %17088 = vst [vmem:[#allocation19_spill] sm:$0xff] %v9559_v52 }
 0x240   :  { %1086 = vrot.lane.b32.xlu0 %v9499_v33, %s8984_s19  ;;  %1002 = vrot.lane.b32.xlu1 %v9524_v44, %s8983_s0 }
 0x242   :  { %v9569_v56 = vpop.permute.xlu0 %1216  ;;  %v9571_v57 = vpop.permute.xlu1 %1202 }
 0x243   :  { %17089 = vst [vmem:[#allocation20_spill] sm:$0xff] %v9569_v56  ;;  %17090 = vst [vmem:[#allocation21_spill] sm:$0xff] %v9571_v57 }
 0x244   :  { %1102 = vrot.lane.b32.xlu0 %v9513_v38, %s8984_s19  ;;  %1088 = vrot.lane.b32.xlu1 %v9510_v37, %s8984_s19 }
 0x246   :  { %v9578_v59 = vpop.permute.xlu0 %1302  ;;  %v9580_v0 = vpop.permute.xlu1 %1218 }
 0x247   :  { %17091 = vst [vmem:[#allocation22_spill] sm:$0xff] %v9578_v59  ;;  %17092 = vst [vmem:[#allocation23_spill] sm:$0xff] %v9580_v0 }
 0x248   :  { %1204 = vrot.lane.b32.xlu0 %v9499_v33, %s8985_s20  ;;  %1104 = vrot.lane.b32.xlu1 %v9524_v44, %s8984_s19 }
 0x24a   :  { %v9586_v62 = vpop.permute.xlu0 %1318  ;;  %v9588_v63 = vpop.permute.xlu1 %1304 }
 0x24b   :  { %17093 = vst [vmem:[#allocation24_spill] sm:$0xff] %v9586_v62  ;;  %17094 = vst [vmem:[#allocation25_spill] sm:$0xff] %v9588_v63 }
 0x24c   :  { %1220 = vrot.lane.b32.xlu0 %v9513_v38, %s8985_s20  ;;  %1206 = vrot.lane.b32.xlu1 %v9510_v37, %s8985_s20 }
 0x24e   :  { %v9594_v7 = vpop.permute.xlu0 %1404  ;;  %v9596_v8 = vpop.permute.xlu1 %1320 }
 0x24f   :  { %17095 = vst [vmem:[#allocation26_spill] sm:$0xff] %v9594_v7  ;;  %17096 = vst [vmem:[#allocation27_spill] sm:$0xff] %v9596_v8 }
 0x250   :  { %1306 = vrot.lane.b32.xlu0 %v9499_v33, %s8986_s21  ;;  %1222 = vrot.lane.b32.xlu1 %v9524_v44, %s8985_s20 }
 0x252   :  { %v9602_v18 = vpop.permute.xlu0 %1420  ;;  %v9604_v19 = vpop.permute.xlu1 %1406 }
 0x253   :  { %17097 = vst [vmem:[#allocation28_spill] sm:$0xff] %v9602_v18  ;;  %17098 = vst [vmem:[#allocation29_spill] sm:$0xff] %v9604_v19 }
 0x254   :  { %1322 = vrot.lane.b32.xlu0 %v9513_v38, %s8986_s21  ;;  %1308 = vrot.lane.b32.xlu1 %v9510_v37, %s8986_s21 }
 0x256   :  { %v9610_v32 = vpop.permute.xlu0 %1506  ;;  %v9612_v36 = vpop.permute.xlu1 %1422 }
 0x257   :  { %17099 = vst [vmem:[#allocation30_spill] sm:$0xff] %v9610_v32  ;;  %17100 = vst [vmem:[#allocation31_spill] sm:$0xff] %v9612_v36 }
 0x258   :  { %1408 = vrot.lane.b32.xlu0 %v9499_v33, %s8987_s22  ;;  %1324 = vrot.lane.b32.xlu1 %v9524_v44, %s8986_s21 }
 0x25a   :  { %v9618_v41 = vpop.permute.xlu0 %1522  ;;  %v9620_v51 = vpop.permute.xlu1 %1508 }
 0x25b   :  { %17101 = vst [vmem:[#allocation32_spill] sm:$0xff] %v9618_v41  ;;  %17102 = vst [vmem:[#allocation33_spill] sm:$0xff] %v9620_v51  ;;  %v9651_v51 = vrot.slane %v824_v55, %v9137_v15  ;;  %v9658_v41 = vrot.slane %v824_v55, %v9139_v16 }
 0x25c   :  { %1424 = vrot.lane.b32.xlu0 %v9513_v38, %s8987_s22  ;;  %1410 = vrot.lane.b32.xlu1 %v9510_v37, %s8987_s22 }
 0x25e   :  { %v785_v60 = vpop.permute.xlu0 %784  ;;  %v9632_v5 = vpop.permute.xlu1 %1524 }
 0x25f   :  { %17104 = vst [vmem:[#allocation35_spill] sm:$0xff] %v9632_v5  ;;  %v816_v13 = vsel %vm62_vm0, %v9484_v20, %v785_v60 }
 0x260   :  { %788 = vrot.lane.b32.xlu0 %v9630_v58, %s8981_s13  ;;  %1426 = vrot.lane.b32.xlu1 %v9524_v44, %s8987_s22  ;;  %v847_v32 = vmul.f32 %v9635_v12, %v816_v13  ;;  %v9675_v13 = vmul.f32 %v8852_v54, %v9340_v30 }
 0x262   :  { %v801_v14 = vpop.permute.xlu0 %800  ;;  %v787_v31 = vpop.permute.xlu1 %786  ;;  %17107 = vst [vmem:[#allocation38_spill] sm:$0xff] %v9675_v13 }
 0x263   :  { %v817_v5 = vsel %vm62_vm0, %v9490_v21, %v787_v31  ;;  %v820_v25 = vsel %vm62_vm0, %v801_v14, %v9484_v20  ;;  %v808_v29 = vsel %vm62_vm0, %v9492_v28, %v801_v14  ;;  %v813_v11 = vsel %vm62_vm0, %v787_v31, %v9503_v35 }
 0x264   :  { %v851_v6 = vmul.f32 %v9635_v12, %v817_v5  ;;  %804 = vrot.lane.b32.xlu0 %v9645_v24, %s8981_s13  ;;  %790 = vrot.lane.b32.xlu1 %v9648_v4, %s8981_s13  ;;  %v9678_v20 = vrot.slane %v824_v55, %v9141_v17  ;;  %v812_v14 = vsel %vm62_vm0, %v785_v60, %v9492_v28 }
 0x265   :  { %v846_v18 = vmul.f32 %v9651_v51, %v820_v25  ;;  %v849_v55 = vmul.f32 %v9658_v41, %v808_v29 }
 0x266   :  { %v9680_v5 = vpop.permute.xlu0 %886  ;;  %v803_v36 = vpop.permute.xlu1 %802  ;;  %v7919_v19 = vpack.c.bf16 %v851_v6, %v847_v32  ;;  %v852_v54 = vmul.f32 %v9678_v20, %v813_v11  ;;  %v848_v28 = vmul.f32 %v9678_v20, %v812_v14 }
 0x267   :  { %v809_v31 = vsel %vm62_vm0, %v9503_v35, %v803_v36  ;;  %v821_v30 = vsel %vm62_vm0, %v803_v36, %v9490_v21 }
 0x268   :  { %v850_v32 = vmul.f32 %v9651_v51, %v821_v30  ;;  %v853_v6 = vmul.f32 %v9658_v41, %v809_v31  ;;  %7920 = vmatprep.subr.bf16.mxu0 %v7919_v19  ;;  %890 = vrot.lane.b32.xlu0 %v9630_v58, %s8982_s18  ;;  %v7997_v25 = vpack.c.bf16 %v852_v54, %v848_v28 }
 0x269   :  { %806 = vrot.lane.b32.xlu1 %v9675_v13, %s8981_s13 }
 0x26a   :  { %v7921_v35 = vpack.c.bf16 %v850_v32, %v846_v18  ;;  %v9701_v60 = vpop.permute.xlu0 %902  ;;  %v9703_v21 = vpop.permute.xlu1 %888  ;;  %v7995_v36 = vpack.c.bf16 %v853_v6, %v849_v55 }
 0x26b   :  { %v919_v3 = vsel %vm105_vm1, %v9517_v22, %v9703_v21 }
 0x26c   :  { %7922 = vmatpush1.bf16.msra.mxu0 %v7921_v35  ;;  %7996 = vmatprep.subr.bf16.mxu1 %v7995_v36 }
 0x26d   :  { %906 = vrot.lane.b32.xlu0 %v9645_v24, %s8982_s18  ;;  %892 = vrot.lane.b32.xlu1 %v9648_v4, %s8982_s18 }
 0x26e   :  { %7998 = vmatpush1.bf16.msra.mxu1 %v7997_v25  ;;  %v9709_v19 = vpop.permute.xlu0 %988  ;;  %v9711_v29 = vpop.permute.xlu1 %904 }
 0x271   :  { %992 = vrot.lane.b32.xlu0 %v9630_v58, %s8983_s0  ;;  %908 = vrot.lane.b32.xlu1 %v9675_v13, %s8982_s18 }
 0x272   :  { %v9717_v18 = vpop.permute.xlu0 %1004  ;;  %v9719_v11 = vpop.permute.xlu1 %990 }
 0x275   :  { %1008 = vrot.lane.b32.xlu0 %v9645_v24, %s8983_s0  ;;  %994 = vrot.lane.b32.xlu1 %v9648_v4, %s8983_s0 }
 0x276   :  { %v9725_v14 = vpop.permute.xlu0 %1090  ;;  %v9727_v31 = vpop.permute.xlu1 %1006 }
 0x279   :  { %1094 = vrot.lane.b32.xlu0 %v9630_v58, %s8984_s19  ;;  %1010 = vrot.lane.b32.xlu1 %v9675_v13, %s8983_s0 }
 0x27a   :  { %v9733_v30 = vpop.permute.xlu0 %1106  ;;  %v9735_v55 = vpop.permute.xlu1 %1092 }
 0x27d   :  { %1110 = vrot.lane.b32.xlu0 %v9645_v24, %s8984_s19  ;;  %1096 = vrot.lane.b32.xlu1 %v9648_v4, %s8984_s19 }
 0x27e   :  { %v9741_v54 = vpop.permute.xlu0 %1208  ;;  %v9743_v32 = vpop.permute.xlu1 %1108 }
 0x27f   :  { %17108 = vst [vmem:[#allocation39_spill] sm:$0xff] %v9741_v54  ;;  %17109 = vst [vmem:[#allocation40_spill] sm:$0xff] %v9743_v32 }
 0x281   :  { %1530 = vrot.lane.b32.xlu0 %v9424_v1, %s8988_s23  ;;  %1112 = vrot.lane.b32.xlu1 %v9675_v13, %s8984_s19 }
 0x282   :  { %v9749_v6 = vpop.permute.xlu0 %1224  ;;  %v9751_v28 = vpop.permute.xlu1 %1210 }
 0x283   :  { %17110 = vst [vmem:[#allocation41_spill] sm:$0xff] %v9749_v6  ;;  %17111 = vst [vmem:[#allocation42_spill] sm:$0xff] %v9751_v28 }
 0x285   :  { %1212 = vrot.lane.b32.xlu0 %v9630_v58, %s8985_s20  ;;  %1532 = vrot.lane.b32.xlu1 %v9434_v61, %s8988_s23 }
 0x286   :  { %v9757_v35 = vpop.permute.xlu0 %1310  ;;  %v9759_v36 = vpop.permute.xlu1 %1226 }
 0x287   :  { %17112 = vst [vmem:[#allocation43_spill] sm:$0xff] %v9757_v35  ;;  %17113 = vst [vmem:[#allocation44_spill] sm:$0xff] %v9759_v36 }
 0x289   :  { %1228 = vrot.lane.b32.xlu0 %v9645_v24, %s8985_s20  ;;  %1512 = vrot.lane.b32.xlu1 %v9510_v37, %s8988_s23 }
 0x28a   :  { %v9765_v25 = vpop.permute.xlu0 %1326  ;;  %v9767_v7 = vpop.permute.xlu1 %1312 }
 0x28b   :  { %17114 = vst [vmem:[#allocation45_spill] sm:$0xff] %v9765_v25  ;;  %17115 = vst [vmem:[#allocation46_spill] sm:$0xff] %v9767_v7 }
 0x28d   :  { %1314 = vrot.lane.b32.xlu0 %v9630_v58, %s8986_s21  ;;  %1214 = vrot.lane.b32.xlu1 %v9648_v4, %s8985_s20 }
 0x28e   :  { %v9773_v62 = vpop.permute.xlu0 %1412  ;;  %v9775_v8 = vpop.permute.xlu1 %1328 }
 0x28f   :  { %17116 = vst [vmem:[#allocation47_spill] sm:$0xff] %v9773_v62  ;;  %17117 = vst [vmem:[#allocation48_spill] sm:$0xff] %v9775_v8 }
 0x291   :  { %1330 = vrot.lane.b32.xlu0 %v9645_v24, %s8986_s21  ;;  %1230 = vrot.lane.b32.xlu1 %v9675_v13, %s8985_s20 }
 0x292   :  { %v9781_v59 = vpop.permute.xlu0 %1428  ;;  %v9783_v25 = vpop.permute.xlu1 %1414 }
 0x293   :  { %17118 = vst [vmem:[#allocation49_spill] sm:$0xff] %v9781_v59  ;;  %17119 = vst [vmem:[#allocation50_spill] sm:$0xff] %v9783_v25  ;;  %v1609_v25 = vld [vmem:[%s16568_s4 + $0x8] sm:$0xff] }
 0x294   :  { %1849 = vmatprep.mubr.f32.mxu0 %v1609_v25  ;;  %2027 = vmatprep.mubr.f32.mxu1 %v1609_v25 }
 0x295   :  { %1416 = vrot.lane.b32.xlu0 %v9630_v58, %s8987_s22  ;;  %1316 = vrot.lane.b32.xlu1 %v9648_v4, %s8986_s21 }
 0x296   :  { %v9789_v35 = vpop.permute.xlu0 %1514  ;;  %v9791_v62 = vpop.permute.xlu1 %1430 }
 0x297   :  { %17120 = vst [vmem:[#allocation51_spill] sm:$0xff] %v9789_v35  ;;  %17121 = vst [vmem:[#allocation52_spill] sm:$0xff] %v9791_v62 }
 0x299   :  { %1432 = vrot.lane.b32.xlu0 %v9645_v24, %s8987_s22  ;;  %1332 = vrot.lane.b32.xlu1 %v9675_v13, %s8986_s21 }
 0x29a   :  { %v9797_v8 = vpop.permute.xlu0 %780  ;;  %v9799_v59 = vpop.permute.xlu1 %1516 }
 0x29b   :  { %17122 = vst [vmem:[#allocation53_spill] sm:$0xff] %v9799_v59 }
 0x29d   :  { %1510 = vrot.lane.b32.xlu0 %v9499_v33, %s8988_s23  ;;  %1418 = vrot.lane.b32.xlu1 %v9648_v4, %s8987_s22 }
 0x29e   :  { %v9808_v35 = vpop.permute.xlu1 %782  ;;  %v9810_v62 = vpop.permute.xlu0 %796 }
 0x2a1   :  { %1518 = vrot.lane.b32.xlu0 %v9630_v58, %s8988_s23  ;;  %1434 = vrot.lane.b32.xlu1 %v9675_v13, %s8987_s22  ;;  %v7783_v58 = vld [vmem:[%s16565_s1 + $0x7] ss:$8 sm:$0xf] }
 0x2a2   :  { %v9816_v59 = vpop.permute.xlu0 %882  ;;  %v9818_v63 = vpop.permute.xlu1 %798 }
 0x2a5   :  { %1526 = vrot.lane.b32.xlu0 %v9513_v38, %s8988_s23  ;;  %1528 = vrot.lane.b32.xlu1 %v9524_v44, %s8988_s23 }
 0x2a6   :  { %v9824_v25 = vpop.permute.xlu0 %898  ;;  %v9826_v7 = vpop.permute.xlu1 %884 }
 0x2a7   :  { %17123 = vst [vmem:[#allocation54_spill] sm:$0xff] %v9824_v25  ;;  %17124 = vst [vmem:[#allocation55_spill] sm:$0xff] %v9826_v7 }
 0x2a9   :  { %1534 = vrot.lane.b32.xlu0 %v9645_v24, %s8988_s23  ;;  %1520 = vrot.lane.b32.xlu1 %v9648_v4, %s8988_s23 }
 0x2aa   :  { %v9832_v36 = vpop.permute.xlu0 %984  ;;  %v9834_v0 = vpop.permute.xlu1 %900 }
 0x2ab   :  { %17125 = vst [vmem:[#allocation56_spill] sm:$0xff] %v9832_v36  ;;  %17126 = vst [vmem:[#allocation57_spill] sm:$0xff] %v9834_v0 }
 0x2ad   :  { %1536 = vrot.lane.b32.xlu1 %v9675_v13, %s8988_s23 }
 0x2ae   :  { %v9838_v57 = vpop.permute.xlu0 %1000  ;;  %v9840_v28 = vpop.permute.xlu1 %986 }
 0x2af   :  { %17127 = vst [vmem:[#allocation58_spill] sm:$0xff] %v9838_v57 }
 0x2b2   :  { %v9842_v6 = vpop.permute.xlu0 %1086  ;;  %v9844_v32 = vpop.permute.xlu1 %1002 }
 0x2b3   :  { %17128 = vst [vmem:[#allocation59_spill] sm:$0xff] %v9842_v6  ;;  %17129 = vst [vmem:[#allocation60_spill] sm:$0xff] %v9844_v32  ;;  %v7778_v6 = vld [vmem:[%s16565_s1 + $0x1] ss:$8 sm:$0xf] }
 0x2b4   :  { %v9898_v42 = vrot.slane %v7778_v6, %v9137_v15 }
 0x2b6   :  { %v9846_v52 = vpop.permute.xlu0 %1102  ;;  %v9848_v54 = vpop.permute.xlu1 %1088 }
 0x2b7   :  { %17130 = vst [vmem:[#allocation61_spill] sm:$0xff] %v9846_v52 }
 0x2ba   :  { %v9850_v56 = vpop.permute.xlu0 %1204  ;;  %v9852_v36 = vpop.permute.xlu1 %1104 }
 0x2bb   :  { %17131 = vst [vmem:[#allocation62_spill] sm:$0xff] %v9850_v56  ;;  %17132 = vst [vmem:[#allocation63_spill] sm:$0xff] %v9852_v36  ;;  %v7779_v56 = vld [vmem:[%s16565_s1 + $0x2] ss:$8 sm:$0xf] }
 0x2bc   :  { %v7781_v36 = vld [vmem:[%s16565_s1 + $0x5] ss:$8 sm:$0xf]  ;;  %v9913_v38 = vrot.slane %v7779_v56, %v9137_v15  ;;  %v9916_v44 = vrot.slane %v7779_v56, %v9139_v16 }
 0x2bd   :  { %v9947_v4 = vrot.slane %v7781_v36, %v9141_v17  ;;  %v9950_v39 = vrot.slane %v7781_v36, %v9139_v16 }
 0x2be   :  { %v9854_v25 = vpop.permute.xlu0 %1220  ;;  %v9856_v0 = vpop.permute.xlu1 %1206 }
 0x2bf   :  { %17133 = vst [vmem:[#allocation64_spill] sm:$0xff] %v9854_v25  ;;  %17134 = vst [vmem:[#allocation65_spill] sm:$0xff] %v9856_v0  ;;  %v9892_v0 = vrot.slane %v7778_v6, %v9128_v10  ;;  %v9907_v25 = vrot.slane %v7779_v56, %v9128_v10 }
 0x2c0   :  { %17141 = vst [vmem:[#allocation72_spill] sm:$0xff] %v9950_v39  ;;  %v9994_v39 = vrot.slane %v7783_v58, %v9141_v17 }
 0x2c2   :  { %v9858_v7 = vpop.permute.xlu0 %1306  ;;  %v9860_v57 = vpop.permute.xlu1 %1222 }
 0x2c3   :  { %17135 = vst [vmem:[#allocation66_spill] sm:$0xff] %v9858_v7  ;;  %17136 = vst [vmem:[#allocation67_spill] sm:$0xff] %v9860_v57  ;;  %v9895_v57 = vrot.slane %v7778_v6, %v9141_v17  ;;  %v9910_v7 = vrot.slane %v7779_v56, %v9141_v17 }
 0x2c6   :  { %v9865_v32 = vpop.permute.xlu0 %1322  ;;  %v9867_v52 = vpop.permute.xlu1 %1308 }
 0x2c7   :  { %17137 = vst [vmem:[#allocation68_spill] sm:$0xff] %v9865_v32  ;;  %17138 = vst [vmem:[#allocation69_spill] sm:$0xff] %v9867_v52  ;;  %v7780_v52 = vld [vmem:[%s16565_s1 + $0x3] ss:$8 sm:$0xf]  ;;  %v9901_v32 = vrot.slane %v7778_v6, %v9139_v16 }
 0x2c8   :  { %v7782_v6 = vld [vmem:[%s16565_s1 + $0x6] ss:$8 sm:$0xf]  ;;  %v9926_v24 = vrot.slane %v7780_v52, %v9128_v10  ;;  %v9929_v13 = vrot.slane %v7780_v52, %v9141_v17  ;;  %v9932_v45 = vrot.slane %v7780_v52, %v9137_v15  ;;  %v9935_v56 = vrot.slane %v7780_v52, %v9139_v16 }
 0x2c9   :  { %v9953_v43 = vrot.slane %v7782_v6, %v9137_v15  ;;  %v9956_v52 = vrot.slane %v7782_v6, %v9128_v10  ;;  %v9959_v1 = vrot.slane %v7782_v6, %v9141_v17  ;;  %v9962_v61 = vrot.slane %v7782_v6, %v9139_v16 }
 0x2ca   :  { %v9921_v33 = vpop.permute.xlu0 %1408  ;;  %v9923_v37 = vpop.permute.xlu1 %1324  ;;  %v9979_v6 = vrot.slane %v7783_v58, %v9128_v10 }
 0x2cb   :  { %17139 = vst [vmem:[#allocation70_spill] sm:$0xff] %v9921_v33  ;;  %17140 = vst [vmem:[#allocation71_spill] sm:$0xff] %v9923_v37  ;;  %v9941_v33 = vrot.slane %v7781_v36, %v9137_v15  ;;  %v9944_v37 = vrot.slane %v7781_v36, %v9128_v10  ;;  %v915_v36 = vsel %vm105_vm1, %v9703_v21, %v9528_v26 }
 0x2cc   :  { %17142 = vst [vmem:[#allocation73_spill] sm:$0xff] %v9953_v43  ;;  %17143 = vst [vmem:[#allocation74_spill] sm:$0xff] %v9956_v52  ;;  %v9976_v52 = vrot.slane %v7783_v58, %v9137_v15  ;;  %v918_v43 = vsel %vm105_vm1, %v9501_v34, %v9680_v5  ;;  %v923_v21 = vsel %vm105_vm1, %v9711_v29, %v9517_v22 }
 0x2cd   :  { %17144 = vst [vmem:[#allocation75_spill] sm:$0xff] %v9959_v1  ;;  %17145 = vst [vmem:[#allocation76_spill] sm:$0xff] %v9962_v61  ;;  %v10011_v22 = vrot.slane %v7784_v2, %v9128_v10 }
 0x2ce   :  { %17146 = vst [vmem:[#allocation77_spill] sm:$0xff] %v9976_v52  ;;  %17147 = vst [vmem:[#allocation78_spill] sm:$0xff] %v9979_v6  ;;  %v9981_v61 = vpop.permute.xlu0 %1424  ;;  %v9983_v1 = vpop.permute.xlu1 %1410  ;;  %v9997_v52 = vrot.slane %v7783_v58, %v9139_v16  ;;  %v10008_v6 = vrot.slane %v7784_v2, %v9137_v15  ;;  %v910_v58 = vsel %vm105_vm1, %v9515_v40, %v9701_v60 }
 0x2cf   :  { %17148 = vst [vmem:[#allocation79_spill] sm:$0xff] %v9981_v61  ;;  %17149 = vst [vmem:[#allocation80_spill] sm:$0xff] %v9983_v1  ;;  %v914_v1 = vsel %vm105_vm1, %v9680_v5, %v9515_v40  ;;  %v911_v61 = vsel %vm105_vm1, %v9528_v26, %v9711_v29  ;;  %v922_v5 = vsel %vm105_vm1, %v9701_v60, %v9501_v34 }
 0x2d0   :  { %17150 = vst [vmem:[#allocation81_spill] sm:$0xff] %v9997_v52  ;;  %17151 = vst [vmem:[#allocation82_spill] sm:$0xff] %v10008_v6  ;;  %v10022_v52 = vmul.f32 %v9892_v0, %v919_v3  ;;  %v10025_v26 = vmul.f32 %v9895_v57, %v915_v36  ;;  %v10028_v29 = vmul.f32 %v9892_v0, %v918_v43 }
 0x2d1   :  { %17152 = vst [vmem:[#allocation83_spill] sm:$0xff] %v10011_v22  ;;  %v1020_v15 = vsel %vm149_vm2, %v9526_v46, %v9709_v19  ;;  %v10035_v40 = vmul.f32 %v9898_v42, %v923_v21  ;;  %v1017_v3 = vsel %vm149_vm2, %v9719_v11, %v9544_v48  ;;  %v10044_v36 = vmul.f32 %v9895_v57, %v914_v1 }
 0x2d2   :  { %v789_v34 = vpop.permute.xlu0 %788  ;;  %v10041_v60 = vpop.permute.xlu1 %1426  ;;  %v1016_v43 = vsel %vm149_vm2, %v9709_v19, %v9534_v23  ;;  %v10051_v10 = vmul.f32 %v9901_v32, %v911_v61  ;;  %v1021_v21 = vsel %vm149_vm2, %v9536_v47, %v9719_v11  ;;  %v10058_v6 = vmul.f32 %v9898_v42, %v922_v5 }
 0x2d3   :  { %17153 = vst [vmem:[#allocation84_spill] sm:$0xff] %v10041_v60  ;;  %v10061_v60 = vmul.f32 %v9901_v32, %v910_v58  ;;  %v1012_v1 = vsel %vm149_vm2, %v9534_v23, %v9717_v18  ;;  %v1024_v61 = vsel %vm149_vm2, %v9717_v18, %v9526_v46  ;;  %v10074_v11 = vmul.f32 %v9907_v25, %v1020_v15 }
 0x2d4   :  { %v10077_v5 = vmul.f32 %v9910_v7, %v1017_v3  ;;  %v7927_v58 = vpack.c.bf16 %v10022_v52, %v10028_v29  ;;  %v10082_v22 = vmul.f32 %v9910_v7, %v1016_v43  ;;  %v10087_v46 = vmul.f32 %v9907_v25, %v1021_v21 }
 0x2d5   :  { %v818_v15 = vsel %vm62_vm0, %v9797_v8, %v789_v34  ;;  %v10093_v3 = vmul.f32 %v9913_v38, %v1024_v61  ;;  %v10096_v19 = vmul.f32 %v9916_v44, %v1012_v1  ;;  %v10101_v43 = vrot.slane %v7784_v2, %v9141_v17 }
 0x2d6   :  { %v805_v18 = vpop.permute.xlu0 %804  ;;  %v791_v52 = vpop.permute.xlu1 %790  ;;  %v1013_v21 = vsel %vm149_vm2, %v9544_v48, %v9727_v31  ;;  %v1025_v61 = vsel %vm149_vm2, %v9727_v31, %v9536_v47  ;;  %v10115_v23 = vrot.slane %v7784_v2, %v9139_v16  ;;  %v855_v17 = vmul.f32 %v9635_v12, %v818_v15 }
 0x2d7   :  { %17154 = vst [vmem:[#allocation85_spill] sm:$0xff] %v10101_v43  ;;  %v819_v1 = vsel %vm62_vm0, %v9808_v35, %v791_v52  ;;  %v822_v48 = vsel %vm62_vm0, %v805_v18, %v9797_v8  ;;  %v1118_v47 = vsel %vm193_vm3, %v9725_v14, %v9550_v49  ;;  %v810_v2 = vsel %vm62_vm0, %v9810_v62, %v805_v18 }
 0x2d8   :  { %17155 = vst [vmem:[#allocation86_spill] sm:$0xff] %v10115_v23  ;;  %v859_v43 = vmul.f32 %v9635_v12, %v819_v1  ;;  %v815_v31 = vsel %vm62_vm0, %v791_v52, %v9818_v63  ;;  %v1122_v8 = vsel %vm193_vm3, %v9542_v27, %v9725_v14  ;;  %v10141_v12 = vmul.f32 %v9913_v38, %v1025_v61 }
 0x2d9   :  { %v10144_v1 = vmul.f32 %v9916_v44, %v1013_v21  ;;  %v814_v52 = vsel %vm62_vm0, %v789_v34, %v9810_v62  ;;  %v854_v15 = vmul.f32 %v9651_v51, %v822_v48  ;;  %v857_v21 = vmul.f32 %v9658_v41, %v810_v2 }
 0x2da   :  { %v891_v29 = vpop.permute.xlu0 %890  ;;  %v7923_v16 = vpack.c.bf16 %v859_v43, %v855_v17  ;;  %v860_v61 = vmul.f32 %v9678_v20, %v815_v31  ;;  %v10161_v62 = vmul.f32 %v9926_v24, %v1122_v8  ;;  %v10164_v34 = vmul.f32 %v9929_v13, %v1118_v47  ;;  %v17156_v8 = vld [vmem:[#allocation55_spill] sm:$0xff] }
 0x2db   :  { %v807_v18 = vpop.permute.xlu1 %806  ;;  %v7937_v47 = vpack.c.bf16 %v10141_v12, %v10093_v3 }
 0x2dc   :  { %v811_v23 = vsel %vm62_vm0, %v9818_v63, %v807_v18  ;;  %v823_v14 = vsel %vm62_vm0, %v807_v18, %v9808_v35  ;;  %7924 = vmatprep.subr.bf16.mxu0 %v7923_v16  ;;  %v1114_v63 = vsel %vm193_vm3, %v9550_v49, %v9733_v30  ;;  %v1126_v35 = vsel %vm193_vm3, %v9733_v30, %v9542_v27 }
 0x2dd   :  { %v858_v17 = vmul.f32 %v9651_v51, %v823_v14  ;;  %v861_v43 = vmul.f32 %v9658_v41, %v811_v23  ;;  %v856_v51 = vmul.f32 %v9678_v20, %v814_v52  ;;  %v920_v16 = vsel %vm105_vm1, %v9816_v59, %v891_v29  ;;  %v17157_v14 = vld [vmem:[#allocation57_spill] sm:$0xff] }
 0x2de   :  { %v1119_v49 = vsel %vm193_vm3, %v9735_v55, %v9561_v53  ;;  %v1123_v27 = vsel %vm193_vm3, %v9552_v50, %v9735_v55  ;;  %v8011_v30 = vpack.c.bf16 %v10144_v1, %v10096_v19  ;;  %v10191_v2 = vmul.f32 %v9932_v45, %v1126_v35 }
 0x2df   :  { %v7925_v41 = vpack.c.bf16 %v858_v17, %v854_v15  ;;  %v907_v23 = vpop.permute.xlu0 %906  ;;  %v7999_v48 = vpack.c.bf16 %v861_v43, %v857_v21  ;;  %v893_v20 = vpop.permute.xlu1 %892  ;;  %v10194_v31 = vmul.f32 %v9935_v56, %v1114_v63  ;;  %v8001_v15 = vpack.c.bf16 %v860_v61, %v856_v51  ;;  %v17158_v43 = vld [vmem:[#allocation54_spill] sm:$0xff] }
 0x2e0   :  { %v921_v18 = vsel %vm105_vm1, %v17156_v8, %v893_v20  ;;  %v957_v52 = vmul.f32 %v9892_v0, %v920_v16  ;;  %v917_v55 = vsel %vm105_vm1, %v893_v20, %v17157_v14  ;;  %v10205_v17 = vmul.f32 %v9926_v24, %v1123_v27  ;;  %v17159_v16 = vld [vmem:[#allocation20_spill] sm:$0xff] }
 0x2e1   :  { %7926 = vmatpush1.bf16.msra.mxu0 %v7925_v41  ;;  %v961_v21 = vmul.f32 %v9892_v0, %v921_v18  ;;  %8000 = vmatprep.subr.bf16.mxu1 %v7999_v48  ;;  %v10208_v61 = vmul.f32 %v9929_v13, %v1119_v49  ;;  %v912_v63 = vsel %vm105_vm1, %v17158_v43, %v907_v23  ;;  %v17160_v0 = vld [vmem:[#allocation39_spill] sm:$0xff]  ;;  %v17163_v20 = vld [vmem:[#allocation40_spill] sm:$0xff] }
 0x2e2   :  { %7928 = vmatprep.subr.bf16.mxu0 %v7927_v58  ;;  %v924_v35 = vsel %vm105_vm1, %v907_v23, %v9816_v59  ;;  %8002 = vmatpush1.bf16.msra.mxu1 %v8001_v15  ;;  %v1236_v58 = vsel %vm241_vm4, %v17160_v0, %v17159_v16  ;;  %v17161_v41 = vld [vmem:[#allocation19_spill] sm:$0xff]  ;;  %v916_v49 = vsel %vm105_vm1, %v891_v29, %v17158_v43  ;;  %v17165_v43 = vld [vmem:[#allocation56_spill] sm:$0xff] }
 0x2e3   :  { %v993_v51 = vpop.permute.xlu0 %992  ;;  %v1240_v48 = vsel %vm241_vm4, %v17161_v41, %v17160_v0  ;;  %v17162_v27 = vpack.c.bf16 %v10051_v10, %v10061_v60  ;;  %v909_v59 = vpop.permute.xlu1 %908  ;;  %v7931_v23 = vpack.c.bf16 %v961_v21, %v957_v52  ;;  %v1127_v15 = vsel %vm193_vm3, %v17163_v20, %v9552_v50 }
 0x2e4   :  { %v962_v18 = vmul.f32 %v9895_v57, %v917_v55  ;;  %v913_v0 = vsel %vm105_vm1, %v17157_v14, %v909_v59  ;;  %v925_v29 = vsel %vm105_vm1, %v909_v59, %v17156_v8  ;;  %v17164_v10 = vpack.c.bf16 %v10035_v40, %v10058_v6 }
 0x2e5   :  { %8004 = vmatprep.subr.bf16.mxu1 %v17162_v27  ;;  %v956_v60 = vmul.f32 %v9898_v42, %v924_v35  ;;  %v959_v52 = vmul.f32 %v9901_v32, %v912_v63  ;;  %v960_v50 = vmul.f32 %v9898_v42, %v925_v29  ;;  %v963_v55 = vmul.f32 %v9901_v32, %v913_v0  ;;  %v17170_v29 = vld [vmem:[#allocation41_spill] sm:$0xff] }
 0x2e6   :  { %7930 = vmatpush1.bf16.msra.mxu0 %v17164_v10  ;;  %v8021_v14 = vpack.c.bf16 %v10208_v61, %v10164_v34  ;;  %v958_v21 = vmul.f32 %v9895_v57, %v916_v49  ;;  %v1022_v8 = vsel %vm149_vm2, %v17165_v43, %v993_v51  ;;  %v17166_v6 = vpack.c.bf16 %v10025_v26, %v10044_v36  ;;  %v17185_v34 = vld [vmem:[#allocation48_spill] sm:$0xff] }
 0x2e7   :  { %7932 = vmatprep.subr.bf16.mxu0 %v7931_v23  ;;  %v1009_v40 = vpop.permute.xlu0 %1008  ;;  %v7943_v42 = vpack.c.bf16 %v10205_v17, %v10161_v62  ;;  %v1115_v32 = vsel %vm193_vm3, %v9561_v53, %v17163_v20  ;;  %v10264_v63 = vmul.f32 %v9932_v45, %v1127_v15  ;;  %v7933_v57 = vpack.c.bf16 %v960_v50, %v956_v60  ;;  %v995_v35 = vpop.permute.xlu1 %994  ;;  %v17167_v53 = vld [vmem:[#allocation60_spill] sm:$0xff]  ;;  %v17168_v20 = vld [vmem:[#allocation58_spill] sm:$0xff]  ;;  %v17172_v50 = vld [vmem:[#allocation21_spill] sm:$0xff] }
 0x2e8   :  { %8006 = vmatpush1.bf16.msra.mxu1 %v17166_v6  ;;  %v8007_v49 = vpack.c.bf16 %v963_v55, %v959_v52  ;;  %v10267_v27 = vmul.f32 %v9941_v33, %v1240_v48  ;;  %v10270_v26 = vmul.f32 %v9944_v37, %v1236_v58  ;;  %v8009_v36 = vpack.c.bf16 %v962_v18, %v958_v21  ;;  %v17171_v52 = vld [vmem:[#allocation42_spill] sm:$0xff] }
 0x2e9   :  { %v1023_v62 = vsel %vm149_vm2, %v9840_v28, %v995_v35  ;;  %v1059_v17 = vmul.f32 %v9907_v25, %v1022_v8  ;;  %v1019_v59 = vsel %vm149_vm2, %v995_v35, %v17167_v53  ;;  %v1159_v48 = vmul.f32 %v9935_v56, %v1115_v32  ;;  %v17173_v8 = vld [vmem:[#allocation59_spill] sm:$0xff] }
 0x2ea   :  { %v1063_v23 = vmul.f32 %v9907_v25, %v1023_v62  ;;  %7934 = vmatpush1.bf16.msra.mxu0 %v7933_v57  ;;  %8008 = vmatprep.subr.bf16.mxu1 %v8007_v49  ;;  %v1014_v58 = vsel %vm149_vm2, %v17168_v20, %v1009_v40  ;;  %v1026_v15 = vsel %vm149_vm2, %v1009_v40, %v17165_v43  ;;  %v17176_v57 = vld [vmem:[#allocation63_spill] sm:$0xff] }
 0x2eb   :  { %v17169_v18 = vpack.c.bf16 %v10087_v46, %v10074_v11  ;;  %v1095_v0 = vpop.permute.xlu0 %1094  ;;  %v7945_v25 = vpack.c.bf16 %v10264_v63, %v10191_v2  ;;  %v1232_v10 = vsel %vm241_vm4, %v17159_v16, %v17170_v29  ;;  %v1018_v60 = vsel %vm149_vm2, %v993_v51, %v17168_v20  ;;  %v1011_v11 = vpop.permute.xlu1 %1010  ;;  %v17175_v63 = vld [vmem:[#allocation23_spill] sm:$0xff] }
 0x2ec   :  { %8010 = vmatpush1.bf16.msra.mxu1 %v8009_v36  ;;  %v7939_v46 = vpack.c.bf16 %v1063_v23, %v1059_v17  ;;  %v1241_v2 = vsel %vm241_vm4, %v17172_v50, %v17171_v52  ;;  %v1064_v55 = vmul.f32 %v9910_v7, %v1019_v59  ;;  %v1015_v16 = vsel %vm149_vm2, %v17167_v53, %v1011_v11  ;;  %v17177_v36 = vld [vmem:[#allocation72_spill] sm:$0xff]  ;;  %v17178_v17 = vld [vmem:[#allocation61_spill] sm:$0xff] }
 0x2ed   :  { %7936 = vmatprep.subr.bf16.mxu0 %v17169_v18  ;;  %8012 = vmatprep.subr.bf16.mxu1 %v8011_v30  ;;  %v1027_v51 = vsel %vm149_vm2, %v1011_v11, %v9840_v28  ;;  %v1058_v19 = vmul.f32 %v9913_v38, %v1026_v15  ;;  %v1061_v1 = vmul.f32 %v9916_v44, %v1014_v58  ;;  %v17179_v18 = vld [vmem:[#allocation44_spill] sm:$0xff] }
 0x2ee   :  { %v1062_v30 = vmul.f32 %v9913_v38, %v1027_v51  ;;  %v1065_v21 = vmul.f32 %v9916_v44, %v1015_v16  ;;  %7938 = vmatpush1.bf16.msra.mxu0 %v7937_v47  ;;  %v1060_v43 = vmul.f32 %v9910_v7, %v1018_v60  ;;  %v1124_v6 = vsel %vm193_vm3, %v17173_v8, %v1095_v0  ;;  %v17181_v16 = vld [vmem:[#allocation25_spill] sm:$0xff] }
 0x2ef   :  { %7940 = vmatprep.subr.bf16.mxu0 %v7939_v46  ;;  %v17174_v28 = vpack.c.bf16 %v10077_v5, %v10082_v22  ;;  %v1111_v40 = vpop.permute.xlu0 %1110  ;;  %v8019_v38 = vpack.c.bf16 %v1159_v48, %v10194_v31  ;;  %v1244_v44 = vsel %vm241_vm4, %v17170_v29, %v17161_v41  ;;  %v10333_v3 = vmul.f32 %v9941_v33, %v1241_v2  ;;  %v1097_v12 = vpop.permute.xlu1 %1096 }
 0x2f0   :  { %v7941_v7 = vpack.c.bf16 %v1062_v30, %v1058_v19  ;;  %v8015_v47 = vpack.c.bf16 %v1065_v21, %v1061_v1  ;;  %v10336_v32 = vmul.f32 %v9947_v4, %v1232_v10  ;;  %v1237_v22 = vsel %vm241_vm4, %v17171_v52, %v17175_v63  ;;  %v17184_v1 = vld [vmem:[#allocation27_spill] sm:$0xff] }
 0x2f1   :  { %8014 = vmatpush1.bf16.msra.mxu1 %v17174_v28  ;;  %v8017_v5 = vpack.c.bf16 %v1064_v55, %v1060_v43  ;;  %v1125_v31 = vsel %vm193_vm3, %v9848_v54, %v1097_v12  ;;  %v1161_v41 = vmul.f32 %v9926_v24, %v1124_v6  ;;  %v1121_v35 = vsel %vm193_vm3, %v1097_v12, %v17176_v57  ;;  %v17180_v55 = vld [vmem:[#allocation46_spill] sm:$0xff]  ;;  %v17186_v6 = vld [vmem:[#allocation24_spill] sm:$0xff] }
 0x2f2   :  { %v1165_v49 = vmul.f32 %v9926_v24, %v1125_v31  ;;  %7942 = vmatpush1.bf16.msra.mxu0 %v7941_v7  ;;  %8016 = vmatprep.subr.bf16.mxu1 %v8015_v47  ;;  %v10351_v62 = vmul.f32 %v17177_v36, %v1244_v44  ;;  %v1116_v53 = vsel %vm193_vm3, %v17178_v17, %v1111_v40  ;;  %v17188_v7 = vld [vmem:[#allocation45_spill] sm:$0xff]  ;;  %v17191_v31 = vld [vmem:[#allocation11_spill] sm:$0xff] }
 0x2f3   :  { %v1128_v59 = vsel %vm193_vm3, %v1111_v40, %v17173_v8  ;;  %7944 = vmatprep.subr.bf16.mxu0 %v7943_v42  ;;  %v10359_v23 = vpop.permute.xlu0 %1530  ;;  %v10362_v48 = vmul.f32 %v9944_v37, %v1237_v22  ;;  %v1120_v20 = vsel %vm193_vm3, %v1095_v0, %v17178_v17  ;;  %v1113_v58 = vpop.permute.xlu1 %1112  ;;  %v1233_v42 = vsel %vm241_vm4, %v17175_v63, %v17179_v18  ;;  %v17189_v63 = vld [vmem:[#allocation74_spill] sm:$0xff]  ;;  %v17224_v24 = vld [vmem:[#allocation15_spill] sm:$0xff] }
 0x2f4   :  { %v7947_v15 = vpack.c.bf16 %v1165_v49, %v1161_v41  ;;  %v1166_v29 = vmul.f32 %v9929_v13, %v1121_v35  ;;  %v1117_v10 = vsel %vm193_vm3, %v17176_v57, %v1113_v58  ;;  %v1129_v60 = vsel %vm193_vm3, %v1113_v58, %v9848_v54  ;;  %v17193_v49 = vld [vmem:[#allocation47_spill] sm:$0xff]  ;;  %v17194_v17 = vld [vmem:[#allocation26_spill] sm:$0xff]  ;;  %v17196_v58 = vld [vmem:[#allocation76_spill] sm:$0xff] }
 0x2f5   :  { %8018 = vmatpush1.bf16.msra.mxu1 %v8017_v5  ;;  %v1160_v0 = vmul.f32 %v9932_v45, %v1128_v59  ;;  %v1163_v11 = vmul.f32 %v9935_v56, %v1116_v53  ;;  %v1164_v46 = vmul.f32 %v9932_v45, %v1129_v60  ;;  %v1167_v52 = vmul.f32 %v9935_v56, %v1117_v10  ;;  %v17182_v56 = vld [vmem:[#allocation43_spill] sm:$0xff]  ;;  %v17190_v5 = vld [vmem:[#allocation13_spill] sm:$0xff] }
 0x2f6   :  { %8020 = vmatprep.subr.bf16.mxu1 %v8019_v38  ;;  %7946 = vmatpush1.bf16.msra.mxu0 %v7945_v25  ;;  %v1245_v2 = vsel %vm241_vm4, %v17179_v18, %v17172_v50  ;;  %v1343_v51 = vsel %vm285_vm6, %v17181_v16, %v17180_v55  ;;  %v1162_v54 = vmul.f32 %v9929_v13, %v1120_v20  ;;  %v17183_v25 = vld [vmem:[#allocation22_spill] sm:$0xff]  ;;  %v17187_v38 = vld [vmem:[#allocation73_spill] sm:$0xff]  ;;  %v17195_v59 = vld [vmem:[#allocation75_spill] sm:$0xff] }
 0x2f7   :  { %7948 = vmatprep.subr.bf16.mxu0 %v7947_v15  ;;  %v1213_v45 = vpop.permute.xlu0 %1212  ;;  %v1342_v19 = vsel %vm285_vm6, %v17183_v25, %v17182_v56  ;;  %v1339_v50 = vsel %vm285_vm6, %v17180_v55, %v17184_v1  ;;  %v7949_v30 = vpack.c.bf16 %v1164_v46, %v1160_v0  ;;  %v10404_v21 = vpop.permute.xlu1 %1532  ;;  %v8023_v13 = vpack.c.bf16 %v1167_v52, %v1163_v11  ;;  %v17197_v18 = vld [vmem:[#allocation14_spill] sm:$0xff]  ;;  %v17200_v11 = vld [vmem:[#allocation28_spill] sm:$0xff] }
 0x2f8   :  { %v10407_v43 = vmul.f32 %v9947_v4, %v1233_v42  ;;  %v1335_v61 = vsel %vm285_vm6, %v17184_v1, %v17185_v34  ;;  %v8025_v8 = vpack.c.bf16 %v1166_v29, %v1162_v54  ;;  %v1338_v28 = vsel %vm285_vm6, %v17182_v56, %v17186_v6  ;;  %v17198_v42 = vld [vmem:[#allocation12_spill] sm:$0xff]  ;;  %v17202_v54 = vld [vmem:[#allocation7_spill] sm:$0xff] }
 0x2f9   :  { %8022 = vmatpush1.bf16.msra.mxu1 %v8021_v14  ;;  %v1347_v14 = vsel %vm285_vm6, %v17185_v34, %v17181_v16  ;;  %v1277_v40 = vmul.f32 %v17177_v36, %v1245_v2  ;;  %v10423_v44 = vmul.f32 %v17187_v38, %v1343_v51  ;;  %v1334_v12 = vsel %vm285_vm6, %v17186_v6, %v17188_v7  ;;  %v17201_v51 = vld [vmem:[#allocation9_spill] sm:$0xff]  ;;  %v17205_v1 = vld [vmem:[#allocation64_spill] sm:$0xff] }
 0x2fa   :  { %7950 = vmatpush1.bf16.msra.mxu0 %v7949_v30  ;;  %8024 = vmatprep.subr.bf16.mxu1 %v8023_v13  ;;  %v1346_v47 = vsel %vm285_vm6, %v17188_v7, %v17183_v25  ;;  %v10434_v22 = vmul.f32 %v17189_v63, %v1339_v50  ;;  %v17192_v41 = vpack.c.bf16 %v17190_v5, %v17191_v31  ;;  %v17204_v25 = vld [vmem:[#allocation77_spill] sm:$0xff]  ;;  %v17207_v50 = vld [vmem:[#allocation34_spill] sm:$0xff]  ;;  %v17223_v16 = vld [vmem:[#allocation16_spill] sm:$0xff] }
 0x2fb   :  { %v1229_v57 = vpop.permute.xlu0 %1228  ;;  %v10440_v35 = vmul.f32 %v17187_v38, %v1342_v19  ;;  %v1444_v53 = vsel %vm329_vm5, %v17194_v17, %v17193_v49  ;;  %v10447_v20 = vmul.f32 %v17195_v59, %v1335_v61  ;;  %v10450_v15 = vmul.f32 %v17196_v58, %v1347_v14  ;;  %v10455_v10 = vpop.permute.xlu1 %1512  ;;  %v17209_v13 = vld [vmem:[#allocation10_spill] sm:$0xff] }
 0x2fc   :  { %7952 = vmatprep.subr.bf16.mxu0 %v17192_v41  ;;  %v17199_v29 = vpack.c.bf16 %v17197_v18, %v17198_v42  ;;  %v10458_v60 = vmul.f32 %v17189_v63, %v1338_v28  ;;  %v8037_v0 = vpack.c.bf16 %v10407_v43, %v10336_v32  ;;  %v1440_v46 = vsel %vm329_vm5, %v17193_v49, %v17200_v11  ;;  %v17210_v43 = vld [vmem:[#allocation8_spill] sm:$0xff]  ;;  %v17213_v28 = vld [vmem:[#allocation50_spill] sm:$0xff] }
 0x2fd   :  { %8026 = vmatpush1.bf16.msra.mxu1 %v8025_v8  ;;  %v7959_v52 = vpack.c.bf16 %v10362_v48, %v10270_v26  ;;  %v10469_v2 = vmul.f32 %v17195_v59, %v1334_v12  ;;  %v10472_v55 = vmul.f32 %v17196_v58, %v1346_v47  ;;  %v17203_v32 = vpack.c.bf16 %v17201_v51, %v17202_v54  ;;  %v17206_v48 = vld [vmem:[#allocation37_spill] sm:$0xff]  ;;  %v17215_v47 = vld [vmem:[#allocation38_spill] sm:$0xff]  ;;  %v17216_v41 = vld [vmem:[#allocation36_spill] sm:$0xff] }
 0x2fe   :  { %8028 = vmatprep.subr.bf16.mxu1 %v17199_v29  ;;  %v8035_v56 = vpack.c.bf16 %v1277_v40, %v10351_v62  ;;  %v10481_v19 = vmul.f32 %v17204_v25, %v1444_v53  ;;  %v1238_v26 = vsel %vm241_vm4, %v1213_v45, %v17205_v1  ;;  %v17208_v30 = vpack.c.bf16 %v17206_v48, %v17207_v50  ;;  %v17212_v62 = vld [vmem:[#allocation78_spill] sm:$0xff]  ;;  %v17214_v40 = vld [vmem:[#allocation29_spill] sm:$0xff]  ;;  %v17229_v50 = vld [vmem:[#allocation52_spill] sm:$0xff] }
 0x2ff   :  { %7954 = vmatpush1.bf16.msra.mxu0 %v17203_v32  ;;  %v17211_v34 = vpack.c.bf16 %v17209_v13, %v17210_v43  ;;  %v1315_v61 = vpop.permute.xlu0 %1314  ;;  %v7967_v14 = vpack.c.bf16 %v10434_v22, %v10458_v60  ;;  %v10495_v8 = vmul.f32 %v17212_v62, %v1440_v46  ;;  %v1445_v7 = vsel %vm329_vm5, %v17214_v40, %v17213_v28  ;;  %v1215_v12 = vpop.permute.xlu1 %1214  ;;  %v17218_v22 = vld [vmem:[#allocation49_spill] sm:$0xff]  ;;  %v17219_v60 = vld [vmem:[#allocation31_spill] sm:$0xff] }
 0x300   :  { %7956 = vmatprep.subr.bf16.mxu0 %v17208_v30  ;;  %v17217_v49 = vpack.c.bf16 %v17215_v47, %v17216_v41  ;;  %v8043_v53 = vpack.c.bf16 %v10450_v15, %v10472_v55  ;;  %v1436_v29 = vsel %vm329_vm5, %v17200_v11, %v17218_v22  ;;  %v1441_v46 = vsel %vm329_vm5, %v17213_v28, %v17219_v60  ;;  %v17220_v32 = vld [vmem:[#allocation67_spill] sm:$0xff]  ;;  %v17222_v55 = vld [vmem:[#allocation62_spill] sm:$0xff] }
 0x301   :  { %8030 = vmatpush1.bf16.msra.mxu1 %v17211_v34  ;;  %v1239_v30 = vsel %vm241_vm4, %v1215_v12, %v17220_v32  ;;  %v17221_v34 = vld [vmem:[#allocation65_spill] sm:$0xff]  ;;  %v1448_v15 = vsel %vm329_vm5, %v17218_v22, %v17194_v17  ;;  %v1242_v11 = vsel %vm241_vm4, %v17222_v55, %v1213_v45  ;;  %v1279_v6 = vmul.f32 %v9944_v37, %v1238_v26  ;;  %v17226_v45 = vld [vmem:[#allocation18_spill] sm:$0xff]  ;;  %v17285_v13 = vld [vmem:[#allocation3_spill] sm:$0xff] }
 0x302   :  { %8032 = vmatprep.subr.bf16.mxu1 %v17217_v49  ;;  %v1243_v49 = vsel %vm241_vm4, %v17221_v34, %v1215_v12  ;;  %v1283_v28 = vmul.f32 %v9944_v37, %v1239_v30  ;;  %v17225_v47 = vpack.c.bf16 %v17223_v16, %v17224_v24  ;;  %v10535_v41 = vmul.f32 %v17204_v25, %v1445_v7  ;;  %v17227_v26 = vld [vmem:[#allocation17_spill] sm:$0xff] }
 0x303   :  { %v1234_v12 = vsel %vm241_vm4, %v17205_v1, %v1229_v57  ;;  %v1246_v17 = vsel %vm241_vm4, %v1229_v57, %v17222_v55  ;;  %v17228_v22 = vpack.c.bf16 %v17226_v45, %v17227_v26  ;;  %v1331_v37 = vpop.permute.xlu0 %1330  ;;  %v10547_v30 = vmul.f32 %v9994_v39, %v1436_v29  ;;  %v1231_v48 = vpop.permute.xlu1 %1230 }
 0x304   :  { %7958 = vmatpush1.bf16.msra.mxu0 %v17225_v47  ;;  %v10550_v7 = vmul.f32 %v17212_v62, %v1441_v46  ;;  %v1282_v47 = vmul.f32 %v9941_v33, %v1243_v49  ;;  %v7963_v1 = vpack.c.bf16 %v1283_v28, %v1279_v6  ;;  %v1437_v57 = vsel %vm329_vm5, %v17219_v60, %v17229_v50  ;;  %v17232_v28 = vld [vmem:[#allocation68_spill] sm:$0xff] }
 0x305   :  { %7960 = vmatprep.subr.bf16.mxu0 %v7959_v52  ;;  %8034 = vmatpush1.bf16.msra.mxu1 %v17228_v22  ;;  %v1278_v52 = vmul.f32 %v9941_v33, %v1242_v11  ;;  %v1235_v29 = vsel %vm241_vm4, %v17220_v32, %v1231_v48  ;;  %v1247_v46 = vsel %vm241_vm4, %v1231_v48, %v17221_v34  ;;  %v17231_v33 = vld [vmem:[#allocation81_spill] sm:$0xff] }
 0x306   :  { %8036 = vmatprep.subr.bf16.mxu1 %v8035_v56  ;;  %v1280_v49 = vmul.f32 %v9947_v4, %v1234_v12  ;;  %v1281_v56 = vmul.f32 %v17177_v36, %v1246_v17  ;;  %v1284_v6 = vmul.f32 %v9947_v4, %v1235_v29  ;;  %v1285_v55 = vmul.f32 %v17177_v36, %v1247_v46  ;;  %v17233_v17 = vld [vmem:[#allocation71_spill] sm:$0xff]  ;;  %v17234_v29 = vld [vmem:[#allocation69_spill] sm:$0xff]  ;;  %v17235_v46 = vld [vmem:[#allocation66_spill] sm:$0xff] }
 0x307   :  { %v17230_v60 = vpack.c.bf16 %v10333_v3, %v10267_v27  ;;  %v10572_v11 = vmul.f32 %v17231_v33, %v1448_v15  ;;  %v7977_v32 = vpack.c.bf16 %v10535_v41, %v10481_v19  ;;  %v1340_v48 = vsel %vm285_vm6, %v1315_v61, %v17232_v28  ;;  %v1417_v34 = vpop.permute.xlu0 %1416  ;;  %v1317_v36 = vpop.permute.xlu1 %1316 }
 0x308   :  { %v1449_v4 = vsel %vm329_vm5, %v17229_v50, %v17214_v40  ;;  %v7965_v27 = vpack.c.bf16 %v1282_v47, %v1278_v52  ;;  %v8041_v3 = vpack.c.bf16 %v1284_v6, %v1280_v49  ;;  %v8039_v15 = vpack.c.bf16 %v1285_v55, %v1281_v56  ;;  %v17237_v49 = vld [vmem:[#allocation51_spill] sm:$0xff]  ;;  %v17238_v56 = vld [vmem:[#allocation30_spill] sm:$0xff] }
 0x309   :  { %7962 = vmatpush1.bf16.msra.mxu0 %v17230_v60  ;;  %8038 = vmatpush1.bf16.msra.mxu1 %v8037_v0  ;;  %v10584_v12 = vmul.f32 %v9994_v39, %v1437_v57  ;;  %v1341_v22 = vsel %vm285_vm6, %v1317_v36, %v17233_v17  ;;  %v1345_v0 = vsel %vm285_vm6, %v17234_v29, %v1317_v36 }
 0x30a   :  { %7964 = vmatprep.subr.bf16.mxu0 %v7963_v1  ;;  %v7975_v1 = vpack.c.bf16 %v10550_v7, %v10495_v8  ;;  %v1344_v50 = vsel %vm285_vm6, %v17235_v46, %v1315_v61  ;;  %v1381_v40 = vmul.f32 %v17189_v63, %v1340_v48  ;;  %v1385_v47 = vmul.f32 %v17189_v63, %v1341_v22  ;;  %v17236_v61 = vld [vmem:[#allocation32_spill] sm:$0xff] }
 0x30b   :  { %8040 = vmatprep.subr.bf16.mxu1 %v8039_v15  ;;  %v1481_v57 = vmul.f32 %v17231_v33, %v1449_v4  ;;  %v1336_v52 = vsel %vm285_vm6, %v17232_v28, %v1331_v37  ;;  %v1348_v8 = vsel %vm285_vm6, %v1331_v37, %v17235_v46  ;;  %v1433_v7 = vpop.permute.xlu0 %1432  ;;  %v1542_v63 = vsel %vm373_vm7, %v17237_v49, %v17236_v61  ;;  %v1333_v60 = vpop.permute.xlu1 %1332  ;;  %v17239_v37 = vld [vmem:[#allocation35_spill] sm:$0xff] }
 0x30c   :  { %v10614_v6 = vsel %vm373_vm7, %v17238_v56, %v17237_v49  ;;  %v1384_v55 = vmul.f32 %v17187_v38, %v1345_v0  ;;  %v7971_v28 = vpack.c.bf16 %v1385_v47, %v1381_v40  ;;  %v1380_v4 = vmul.f32 %v17187_v38, %v1344_v50  ;;  %v17245_v47 = vld [vmem:[#allocation83_spill] sm:$0xff]  ;;  %v17248_v49 = vld [vmem:[#allocation70_spill] sm:$0xff] }
 0x30d   :  { %7966 = vmatpush1.bf16.msra.mxu0 %v7965_v27  ;;  %8042 = vmatpush1.bf16.msra.mxu1 %v8041_v3  ;;  %v1337_v27 = vsel %vm285_vm6, %v17233_v17, %v1333_v60  ;;  %v1349_v3 = vsel %vm285_vm6, %v1333_v60, %v17234_v29  ;;  %v1382_v36 = vmul.f32 %v17195_v59, %v1336_v52  ;;  %v17242_v17 = vld [vmem:[#allocation79_spill] sm:$0xff] }
 0x30e   :  { %7968 = vmatprep.subr.bf16.mxu0 %v7967_v14  ;;  %8044 = vmatprep.subr.bf16.mxu1 %v8043_v53  ;;  %v17240_v14 = vld [vmem:[#allocation53_spill] sm:$0xff]  ;;  %v1383_v53 = vmul.f32 %v17196_v58, %v1348_v8  ;;  %v1386_v15 = vmul.f32 %v17195_v59, %v1337_v27  ;;  %v1387_v22 = vmul.f32 %v17196_v58, %v1349_v3 }
 0x30f   :  { %v1543_v48 = vsel %vm373_vm7, %v17240_v14, %v17239_v37  ;;  %v17241_v0 = vpack.c.bf16 %v10423_v44, %v10440_v35  ;;  %v8053_v38 = vpack.c.bf16 %v10584_v12, %v10547_v30  ;;  %v1442_v46 = vsel %vm329_vm5, %v1417_v34, %v17242_v17  ;;  %v10643_v50 = vpop.permute.xlu0 %1510  ;;  %v17244_v58 = vld [vmem:[#allocation33_spill] sm:$0xff]  ;;  %v1419_v12 = vpop.permute.xlu1 %1418 }
 0x310   :  { %v17243_v29 = vpack.c.bf16 %v10447_v20, %v10469_v2  ;;  %v8051_v59 = vpack.c.bf16 %v1481_v57, %v10572_v11  ;;  %v1547_v44 = vsel %vm373_vm7, %v17244_v58, %v17240_v14  ;;  %v7973_v35 = vpack.c.bf16 %v1384_v55, %v1380_v4  ;;  %v17246_v2 = vld [vmem:[#allocation84_spill] sm:$0xff] }
 0x311   :  { %7970 = vmatpush1.bf16.msra.mxu0 %v17241_v0  ;;  %v8049_v30 = vpack.c.bf16 %v1386_v15, %v1382_v36  ;;  %v8047_v40 = vpack.c.bf16 %v1387_v22, %v1383_v53  ;;  %v1581_v52 = vmul.f32 %v17245_v47, %v1543_v48  ;;  %v1551_v20 = vsel %vm373_vm7, %v10404_v21, %v17244_v58  ;;  %v17247_v57 = vld [vmem:[#allocation80_spill] sm:$0xff]  ;;  %v17249_v53 = vld [vmem:[#allocation86_spill] sm:$0xff] }
 0x312   :  { %7972 = vmatprep.subr.bf16.mxu0 %v7971_v28  ;;  %8046 = vmatpush1.bf16.msra.mxu1 %v17243_v29  ;;  %v1443_v11 = vsel %vm329_vm5, %v1419_v12, %v17246_v2  ;;  %v1447_v8 = vsel %vm329_vm5, %v17247_v57, %v1419_v12  ;;  %v1446_v55 = vsel %vm329_vm5, %v17248_v49, %v1417_v34  ;;  %v17250_v0 = vld [vmem:[#allocation82_spill] sm:$0xff] }
 0x313   :  { %v1483_v60 = vmul.f32 %v17212_v62, %v1442_v46  ;;  %v1487_v28 = vmul.f32 %v17212_v62, %v1443_v11  ;;  %8048 = vmatprep.subr.bf16.mxu1 %v8047_v40  ;;  %v1538_v14 = vsel %vm373_vm7, %v17236_v61, %v10359_v23  ;;  %v1438_v48 = vsel %vm329_vm5, %v17242_v17, %v1433_v7  ;;  %v1519_v34 = vpop.permute.xlu0 %1518  ;;  %v1435_v3 = vpop.permute.xlu1 %1434 }
 0x314   :  { %v1450_v4 = vsel %vm329_vm5, %v1433_v7, %v17248_v49  ;;  %v1550_v62 = vsel %vm373_vm7, %v10359_v23, %v17238_v56  ;;  %v1539_v61 = vsel %vm373_vm7, %v17239_v37, %v10404_v21  ;;  %v1486_v27 = vmul.f32 %v17204_v25, %v1447_v8 }
 0x315   :  { %7974 = vmatpush1.bf16.msra.mxu0 %v7973_v35  ;;  %v7979_v36 = vpack.c.bf16 %v1487_v28, %v1483_v60  ;;  %v1583_v7 = vmul.f32 %v17249_v53, %v1551_v20  ;;  %v1439_v15 = vsel %vm329_vm5, %v17246_v2, %v1435_v3  ;;  %v1451_v23 = vsel %vm329_vm5, %v1435_v3, %v17247_v57  ;;  %v1612_v2 = vld [vmem:[%s16568_s4 + $0x20] sm:$0xff]  ;;  %v765_v60 = vld [vmem:[%s16566_s2 + $0x28] sm:$0xff] }
 0x316   :  { %7976 = vmatprep.subr.bf16.mxu0 %v7975_v1  ;;  %8050 = vmatpush1.bf16.msra.mxu1 %v8049_v30  ;;  %v1482_v1 = vmul.f32 %v17204_v25, %v1446_v55  ;;  %v1484_v56 = vmul.f32 %v9994_v39, %v1438_v48  ;;  %v1485_v21 = vmul.f32 %v17231_v33, %v1450_v4  ;;  %v761_v55 = vld [vmem:[%s16566_s2 + $0x8] sm:$0xff]  ;;  %v1611_v4 = vld [vmem:[%s16568_s4 + $0x18] sm:$0xff] }
 0x317   :  { %8052 = vmatprep.subr.bf16.mxu1 %v8051_v59  ;;  %v1488_v37 = vmul.f32 %v9994_v39, %v1439_v15  ;;  %v1489_v22 = vmul.f32 %v17231_v33, %v1451_v23  ;;  %v1577_v25 = vmul.f32 %v17245_v47, %v1542_v63  ;;  %v1580_v17 = vmul.f32 %v17250_v0, %v1547_v44  ;;  %v1527_v29 = vpop.permute.xlu0 %1526  ;;  %v17251_v59 = vld [vmem:[#allocation85_spill] sm:$0xff]  ;;  %v1529_v39 = vpop.permute.xlu1 %1528  ;;  %v1608_v44 = vld [vmem:[%s16568_s4] sm:$0xff] }
 0x318   :  { %v1579_v46 = vmul.f32 %v17249_v53, %v1550_v62  ;;  %v1582_v58 = vmul.f32 %v17251_v59, %v1539_v61  ;;  %v7981_v35 = vpack.c.bf16 %v1486_v27, %v1482_v1  ;;  %v1576_v33 = vmul.f32 %v17250_v0, %v10614_v6  ;;  %v760_v1 = vld [vmem:[%s16566_s2] sm:$0xff] }
 0x319   :  { %7978 = vmatpush1.bf16.msra.mxu0 %v7977_v32  ;;  %v8057_v30 = vpack.c.bf16 %v1488_v37, %v1484_v56  ;;  %v8055_v12 = vpack.c.bf16 %v1489_v22, %v1485_v21  ;;  %v1578_v19 = vmul.f32 %v17251_v59, %v1538_v14  ;;  %v7983_v41 = vpack.c.bf16 %v1581_v52, %v1577_v25  ;;  %v764_v15 = vld [vmem:[%s16566_s2 + $0x20] sm:$0xff]  ;;  %v763_v37 = vld [vmem:[%s16566_s2 + $0x18] sm:$0xff] }
 0x31a   :  { %7980 = vmatprep.subr.bf16.mxu0 %v7979_v36  ;;  %8054 = vmatpush1.bf16.msra.mxu1 %v8053_v38  ;;  %v1548_v32 = vsel %vm373_vm7, %v10643_v50, %v1519_v34  ;;  %v1544_v63 = vsel %vm373_vm7, %v1519_v34, %v1527_v29  ;;  %v8059_v38 = vpack.c.bf16 %v1583_v7, %v1579_v46  ;;  %v767_v22 = vld [vmem:[%s16566_s2 + $0x38] sm:$0xff]  ;;  %v762_v46 = vld [vmem:[%s16566_s2 + $0x10] sm:$0xff] }
 0x31b   :  { %8056 = vmatprep.subr.bf16.mxu1 %v8055_v12  ;;  %v1535_v6 = vpop.permute.xlu0 %1534  ;;  %v7985_v40 = vpack.c.bf16 %v1580_v17, %v1576_v33  ;;  %v8061_v20 = vpack.c.bf16 %v1582_v58, %v1578_v19  ;;  %v1521_v52 = vpop.permute.xlu1 %1520  ;;  %v1584_v11 = vmul.f32 %v17250_v0, %v1548_v32  ;;  %v1585_v57 = vmul.f32 %v17245_v47, %v1544_v63  ;;  %v1617_v58 = vld [vmem:[%s16568_s4 + $0x48] sm:$0xff]  ;;  %v1616_v33 = vld [vmem:[%s16568_s4 + $0x40] sm:$0xff]  ;;  %v1619_v19 = vld [vmem:[%s16568_s4 + $0x58] sm:$0xff] }
 0x31c   :  { %v1545_v8 = vsel %vm373_vm7, %v1521_v52, %v1529_v39  ;;  %v1549_v49 = vsel %vm373_vm7, %v10455_v10, %v1521_v52  ;;  %v1540_v28 = vsel %vm373_vm7, %v1527_v29, %v1535_v6  ;;  %v1552_v34 = vsel %vm373_vm7, %v1535_v6, %v10643_v50  ;;  %v766_v29 = vld [vmem:[%s16566_s2 + $0x30] sm:$0xff]  ;;  %v1613_v12 = vld [vmem:[%s16568_s4 + $0x28] sm:$0xff] }
 0x31d   :  { %7982 = vmatpush1.bf16.msra.mxu0 %v7981_v35  ;;  %v1588_v14 = vmul.f32 %v17250_v0, %v1549_v49  ;;  %v1589_v48 = vmul.f32 %v17245_v47, %v1545_v8  ;;  %v1615_v47 = vld [vmem:[%s16568_s4 + $0x38] sm:$0xff]  ;;  %v10744_v3 = vpack.c.bf16 %v765_v60, %v761_v55  ;;  %v1586_v36 = vmul.f32 %v17251_v59, %v1540_v28 }
 0x31e   :  { %7984 = vmatprep.subr.bf16.mxu0 %v7983_v41  ;;  %8058 = vmatpush1.bf16.msra.mxu1 %v8057_v30  ;;  %v1587_v23 = vmul.f32 %v17249_v53, %v1552_v34  ;;  %v10774_v17 = vpack.c.bf16 %v764_v15, %v760_v1  ;;  %v10787_v35 = vpack.c.bf16 %v766_v29, %v762_v46  ;;  %v17256_v30 = vmov 0.0  }
 0x31f   :  { %8060 = vmatprep.subr.bf16.mxu1 %v8059_v38  ;;  %v7989_v62 = vpack.c.bf16 %v1588_v14, %v1584_v11  ;;  %v1537_v61 = vpop.permute.xlu1 %1536  ;;  %v7987_v27 = vpack.c.bf16 %v1589_v48, %v1585_v57  ;;  %17252 = vst [vmem:[#allocation55_spill] sm:$0xff] %v10744_v3 }
 0x320   :  { %1850 = vmatmul.mubr.f32.vlgmr.msra.gmra.mrb[8].mxu0 %v1608_v44  ;;  %v1541_v7 = vsel %vm373_vm7, %v1529_v39, %v1537_v61  ;;  %v1553_v50 = vsel %vm373_vm7, %v1537_v61, %v10455_v10  ;;  %v1614_v10 = vld [vmem:[%s16568_s4 + $0x30] sm:$0xff]  ;;  %17253 = vst [vmem:[#allocation57_spill] sm:$0xff] %v10774_v17  ;;  %17255 = vst [vmem:[#allocation20_spill] sm:$0xff] %v10787_v35 }
 0x321   :  { %7986 = vmatpush1.bf16.msra.mxu0 %v7985_v40  ;;  %2028 = vmatmul.mubr.f32.vlgmr.msra.gmra.mrb[8].mxu1 %v1608_v44  ;;  %v1590_v56 = vmul.f32 %v17251_v59, %v1541_v7  ;;  %v1591_v21 = vmul.f32 %v17249_v53, %v1553_v50  ;;  %v1618_v53 = vld [vmem:[%s16568_s4 + $0x50] sm:$0xff]  ;;  %v10782_v59 = vpack.c.bf16 %v767_v22, %v763_v37 }
 0x322   :  { %8062 = vmatpush1.bf16.msra.mxu1 %v8061_v20  ;;  %1855 = vmatprep.mubr.f32.mxu0 %v1612_v2  ;;  %v1610_v39 = vld [vmem:[%s16568_s4 + $0x10] sm:$0xff] }
 0x323   :  { %2033 = vmatprep.mubr.f32.mxu1 %v1612_v2  ;;  %7988 = vmatprep.subr.bf16.mxu0 %v7987_v27  ;;  %v8065_v25 = vpack.c.bf16 %v1590_v56, %v1586_v36  ;;  %v8063_v0 = vpack.c.bf16 %v1591_v21, %v1587_v23  ;;  %17254 = vst [vmem:[#allocation54_spill] sm:$0xff] %v10782_v59 }
 0x324   :  { %1856 = vmatmul.mubr.f32.gmra.mrb[10].mxu0 %v1611_v4 }
 0x325   :  { %2034 = vmatmul.mubr.f32.gmra.mrb[10].mxu1 %v1611_v4  ;;  %7990 = vmatpush1.bf16.msra.mxu0 %v7989_v62 }
 0x326   :  { %1861 = vmatprep.mubr.f32.mxu0 %v1615_v47  ;;  %2039 = vmatprep.mubr.f32.mxu1 %v1615_v47 }
 0x327   :  { %7992 = vmatprep.subr.bf16.mxu0 %v10744_v3  ;;  %8064 = vmatprep.subr.bf16.mxu1 %v8063_v0 }
 0x328   :  { %1862 = vmatmul.mubr.f32.gmra.mrb[12].mxu0 %v1614_v10  ;;  %8066 = vmatpush1.bf16.msra.mxu1 %v8065_v25 }
 0x329   :  { %2040 = vmatmul.mubr.f32.gmra.mrb[12].mxu1 %v1614_v10  ;;  %1867 = vmatprep.mubr.f32.mxu0 %v1618_v53 }
 0x32a   :  { %7994 = vmatpush1.bf16.msra.mxu0 %v10774_v17  ;;  %2045 = vmatprep.mubr.f32.mxu1 %v1618_v53 }
 0x32b   :  { %8068 = vmatprep.subr.bf16.mxu1 %v10782_v59  ;;  %v17288_v59 = vld [vmem:[#allocation4_spill] sm:$0xff] }
 0x32c   :  { %1868 = vmatmul.mubr.f32.gmra.mrb[14].mxu0 %v1617_v58  ;;  %8070 = vmatpush1.bf16.msra.mxu1 %v10787_v35 }
 0x32d   :  { %2046 = vmatmul.mubr.f32.gmra.mrb[14].mxu1 %v1617_v58  ;;  %1938 = vmatprep.mubr.f32.mxu0 %v17256_v30 }
 0x32e   :  { %2116 = vmatprep.mubr.f32.mxu1 %v17256_v30 }
 0x330   :  { %7785 = vmatmul.mubr.msk.f32.vlgmr.msra.gmra.mrb[8].mxu0 %vm1772_vm9, %v1610_v39 }
 0x331   :  { %7789 = vmatmul.mubr.msk.f32.vlgmr.msra.gmra.mrb[8].mxu1 %vm1772_vm9, %v1610_v39  ;;  %1944 = vmatprep.mubr.f32.mxu0 %v17256_v30 }
 0x332   :  { %2122 = vmatprep.mubr.f32.mxu1 %v17256_v30 }
 0x334   :  { %7786 = vmatmul.mubr.msk.f32.gmra.mrb[10].mxu0 %vm1772_vm9, %v1613_v12 }
 0x335   :  { %7790 = vmatmul.mubr.msk.f32.gmra.mrb[10].mxu1 %vm1772_vm9, %v1613_v12  ;;  %1950 = vmatprep.mubr.f32.mxu0 %v17256_v30 }
 0x336   :  { %2128 = vmatprep.mubr.f32.mxu1 %v17256_v30 }
 0x338   :  { %7787 = vmatmul.mubr.msk.f32.gmra.mrb[12].mxu0 %vm1772_vm9, %v1616_v33 }
 0x339   :  { %7791 = vmatmul.mubr.msk.f32.gmra.mrb[12].mxu1 %vm1772_vm9, %v1616_v33  ;;  %1956 = vmatprep.mubr.f32.mxu0 %v17256_v30 }
 0x33a   :  { %2134 = vmatprep.mubr.f32.mxu1 %v17256_v30 }
 0x33c   :  { %7788 = vmatmul.mubr.msk.f32.gmra.mrb[14].mxu0 %vm1772_vm9, %v1619_v19 }
 0x33d   :  { %7792 = vmatmul.mubr.msk.f32.gmra.mrb[14].mxu1 %vm1772_vm9, %v1619_v19 }
 0x403   :  { %v1940_v41 = vpop.f32.mrb[8].mxu0 }
 0x404   :  { %v7793_v32 = vmul.f32 -1.442695, %v1940_v41  ;;  %v10820_v63 = vpop.f32.mrb[9].mxu0  ;;  %v2118_v38 = vpop.f32.mrb[8].mxu1 }
 0x405   :  { %v7795_v44 = vmul.f32 -1.442695, %v2118_v38  ;;  %v10822_v6 = vpop.f32.mrb[9].mxu1  ;;  %v7794_v53 = vmul.f32 -1.442695, %v10820_v63 }
 0x406   :  { %8853 = vpow2.f32 %v7793_v32  ;;  %v7796_v46 = vmul.f32 -1.442695, %v10822_v6 }
 0x407   :  { %v1946_v40 = vpop.f32.mrb[10].mxu0  ;;  %8855 = vpow2.f32 %v7795_v44 }
 0x408   :  { %v7797_v20 = vmul.f32 -1.442695, %v1946_v40  ;;  %v10824_v52 = vpop.f32.mrb[11].mxu0  ;;  %v2124_v2 = vpop.f32.mrb[10].mxu1 }
 0x409   :  { %v7799_v11 = vmul.f32 -1.442695, %v2124_v2  ;;  %v10826_v57 = vpop.f32.mrb[11].mxu1  ;;  %v7798_v29 = vmul.f32 -1.442695, %v10824_v52 }
 0x40a   :  { %8857 = vpow2.f32 %v7797_v20  ;;  %v7800_v58 = vmul.f32 -1.442695, %v10826_v57 }
 0x40b   :  { %v10828_v8 = vpop.f32.mrb[12].mxu0  ;;  %8859 = vpow2.f32 %v7799_v11 }
 0x40c   :  { %v10830_v49 = vpop.f32.mrb[13].mxu0  ;;  %v10832_v55 = vpop.f32.mrb[12].mxu1 }
 0x40d   :  { %v10834_v60 = vpop.f32.mrb[13].mxu1 }
 0x40f   :  { %v10836_v28 = vpop.f32.mrb[14].mxu0 }
 0x410   :  { %v8854_v14 = vpop.eup %8853  ;;  %v10838_v48 = vpop.f32.mrb[15].mxu0 }
 0x411   :  { %v10840_v4 = vpop.f32.mrb[14].mxu1  ;;  %v2189_v34 = vadd.f32 1.0, %v8854_v14  ;;  %v8856_v61 = vpop.eup %8855 }
 0x412   :  { %v10842_v62 = vpop.f32.mrb[15].mxu1  ;;  %v2191_v27 = vadd.f32 1.0, %v8856_v61 }
 0x413   :  { %8861 = vrcp.f32 %v2189_v34 }
 0x414   :  { %v8858_v47 = vpop.eup %8857  ;;  %8863 = vrcp.f32 %v2191_v27  ;;  %v7807_v27 = vmul.f32 -1.442695, %v10840_v4 }
 0x415   :  { %v2193_v36 = vadd.f32 1.0, %v8858_v47  ;;  %v8860_v7 = vpop.eup %8859 }
 0x416   :  { %v2195_v50 = vadd.f32 1.0, %v8860_v7 }
 0x417   :  { %8865 = vrcp.f32 %v2193_v36 }
 0x418   :  { %8867 = vrcp.f32 %v2195_v50 }
 0x419   :  { %8869 = vpow2.f32 %v7794_v53 }
 0x41a   :  { %8871 = vpow2.f32 %v7796_v46 }
 0x41b   :  { %8873 = vpow2.f32 %v7798_v29 }
 0x41c   :  { %8875 = vpow2.f32 %v7800_v58 }
 0x41d   :  { %v8862_v1 = vpop.eup %8861 }
 0x41e   :  { %v10844_v15 = vmul.f32 %v8862_v1, %v1940_v41  ;;  %v8864_v23 = vpop.eup %8863 }
 0x41f   :  { %v10848_v21 = vmul.f32 %v8864_v23, %v2118_v38 }
 0x420   :  { %17257 = vst [vmem:[#allocation39_spill] sm:$0xff] %v10844_v15  ;;  %2253 = vrot.lane.b32.xlu0 %v10844_v15, %s8981_s13 }
 0x421   :  { %v8866_v56 = vpop.eup %8865  ;;  %17258 = vst [vmem:[#allocation19_spill] sm:$0xff] %v10848_v21 }
 0x422   :  { %v10850_v10 = vmul.f32 %v8866_v56, %v1946_v40  ;;  %v8868_v37 = vpop.eup %8867 }
 0x423   :  { %v10852_v22 = vmul.f32 %v8868_v37, %v2124_v2  ;;  %v8870_v39 = vpop.eup %8869 }
 0x424   :  { %17259 = vst [vmem:[#allocation40_spill] sm:$0xff] %v10850_v10  ;;  %2255 = vrot.lane.b32.xlu1 %v10850_v10, %s8981_s13  ;;  %2269 = vrot.lane.b32.xlu0 %v10848_v21, %s8981_s13  ;;  %v8872_v12 = vpop.eup %8871  ;;  %v2190_v33 = vadd.f32 1.0, %v8870_v39 }
 0x425   :  { %17260 = vst [vmem:[#allocation56_spill] sm:$0xff] %v10852_v22  ;;  %v8874_v19 = vpop.eup %8873  ;;  %v2192_v41 = vadd.f32 1.0, %v8872_v12 }
 0x426   :  { %8877 = vrcp.f32 %v2190_v33  ;;  %v2194_v32 = vadd.f32 1.0, %v8874_v19  ;;  %v8876_v38 = vpop.eup %8875 }
 0x427   :  { %8879 = vrcp.f32 %v2192_v41  ;;  %v2196_v44 = vadd.f32 1.0, %v8876_v38 }
 0x428   :  { %2355 = vrot.lane.b32.xlu0 %v10844_v15, %s8982_s18  ;;  %2271 = vrot.lane.b32.xlu1 %v10852_v22, %s8981_s13  ;;  %8881 = vrcp.f32 %v2194_v32 }
 0x429   :  { %8883 = vrcp.f32 %v2196_v44 }
 0x42c   :  { %2371 = vrot.lane.b32.xlu0 %v10848_v21, %s8982_s18  ;;  %2357 = vrot.lane.b32.xlu1 %v10850_v10, %s8982_s18 }
 0x430   :  { %2457 = vrot.lane.b32.xlu0 %v10844_v15, %s8983_s0  ;;  %2373 = vrot.lane.b32.xlu1 %v10852_v22, %s8982_s18  ;;  %v8878_v40 = vpop.eup %8877 }
 0x431   :  { %v8880_v20 = vpop.eup %8879  ;;  %v10923_v2 = vmul.f32 %v8878_v40, %v10820_v63 }
 0x432   :  { %v8882_v11 = vpop.eup %8881  ;;  %v10930_v14 = vmul.f32 %v8880_v20, %v10822_v6  ;;  %v7801_v6 = vmul.f32 -1.442695, %v10828_v8 }
 0x433   :  { %17261 = vst [vmem:[#allocation60_spill] sm:$0xff] %v10923_v2  ;;  %v10933_v34 = vmul.f32 %v8882_v11, %v10824_v52  ;;  %v8884_v61 = vpop.eup %8883  ;;  %v7803_v52 = vmul.f32 -1.442695, %v10832_v55 }
 0x434   :  { %2473 = vrot.lane.b32.xlu0 %v10848_v21, %s8983_s0  ;;  %2459 = vrot.lane.b32.xlu1 %v10850_v10, %s8983_s0  ;;  %17262 = vst [vmem:[#allocation58_spill] sm:$0xff] %v10930_v14  ;;  %v10940_v63 = vmul.f32 %v8884_v61, %v10826_v57  ;;  %8885 = vpow2.f32 %v7801_v6  ;;  %v7805_v57 = vmul.f32 -1.442695, %v10836_v28 }
 0x435   :  { %17263 = vst [vmem:[#allocation41_spill] sm:$0xff] %v10933_v34  ;;  %8887 = vpow2.f32 %v7803_v52 }
 0x436   :  { %17264 = vst [vmem:[#allocation42_spill] sm:$0xff] %v10940_v63  ;;  %8889 = vpow2.f32 %v7805_v57 }
 0x437   :  { %8891 = vpow2.f32 %v7807_v27  ;;  %v7802_v27 = vmul.f32 -1.442695, %v10830_v49 }
 0x438   :  { %2559 = vrot.lane.b32.xlu0 %v10844_v15, %s8984_s19  ;;  %2475 = vrot.lane.b32.xlu1 %v10852_v22, %s8983_s0 }
 0x43c   :  { %2575 = vrot.lane.b32.xlu0 %v10848_v21, %s8984_s19  ;;  %2561 = vrot.lane.b32.xlu1 %v10850_v10, %s8984_s19 }
 0x43e   :  { %v8886_v47 = vpop.eup %8885 }
 0x43f   :  { %v8888_v36 = vpop.eup %8887  ;;  %v2197_v7 = vadd.f32 1.0, %v8886_v47 }
 0x440   :  { %2677 = vrot.lane.b32.xlu0 %v10844_v15, %s8985_s20  ;;  %2577 = vrot.lane.b32.xlu1 %v10852_v22, %s8984_s19  ;;  %v8890_v50 = vpop.eup %8889  ;;  %v2199_v1 = vadd.f32 1.0, %v8888_v36 }
 0x441   :  { %8893 = vrcp.f32 %v2197_v7  ;;  %v2201_v23 = vadd.f32 1.0, %v8890_v50  ;;  %v8892_v56 = vpop.eup %8891  ;;  %v7804_v7 = vmul.f32 -1.442695, %v10834_v60  ;;  %v7806_v50 = vmul.f32 -1.442695, %v10838_v48 }
 0x442   :  { %8895 = vrcp.f32 %v2199_v1  ;;  %v2203_v37 = vadd.f32 1.0, %v8892_v56  ;;  %v7808_v56 = vmul.f32 -1.442695, %v10842_v62 }
 0x443   :  { %8897 = vrcp.f32 %v2201_v23 }
 0x444   :  { %2693 = vrot.lane.b32.xlu0 %v10848_v21, %s8985_s20  ;;  %2679 = vrot.lane.b32.xlu1 %v10850_v10, %s8985_s20  ;;  %8899 = vrcp.f32 %v2203_v37 }
 0x445   :  { %8901 = vpow2.f32 %v7802_v27 }
 0x446   :  { %8903 = vpow2.f32 %v7804_v7 }
 0x447   :  { %8905 = vpow2.f32 %v7806_v50 }
 0x448   :  { %2779 = vrot.lane.b32.xlu0 %v10844_v15, %s8986_s21  ;;  %2695 = vrot.lane.b32.xlu1 %v10852_v22, %s8985_s20  ;;  %8907 = vpow2.f32 %v7808_v56 }
 0x44b   :  { %v8894_v58 = vpop.eup %8893 }
 0x44c   :  { %2795 = vrot.lane.b32.xlu0 %v10848_v21, %s8986_s21  ;;  %2781 = vrot.lane.b32.xlu1 %v10850_v10, %s8986_s21  ;;  %v8896_v39 = vpop.eup %8895  ;;  %v11005_v12 = vmul.f32 %v8894_v58, %v10828_v8 }
 0x44d   :  { %v8898_v41 = vpop.eup %8897  ;;  %v11016_v32 = vmul.f32 %v8896_v39, %v10832_v55 }
 0x44e   :  { %17265 = vst [vmem:[#allocation21_spill] sm:$0xff] %v11005_v12  ;;  %v11019_v38 = vmul.f32 %v8898_v41, %v10836_v28  ;;  %v8900_v40 = vpop.eup %8899 }
 0x44f   :  { %17266 = vst [vmem:[#allocation59_spill] sm:$0xff] %v11016_v32  ;;  %v11030_v20 = vmul.f32 %v8900_v40, %v10840_v4  ;;  %v8902_v39 = vpop.eup %8901 }
 0x450   :  { %2881 = vrot.lane.b32.xlu0 %v10844_v15, %s8987_s22  ;;  %2797 = vrot.lane.b32.xlu1 %v10852_v22, %s8986_s21  ;;  %17267 = vst [vmem:[#allocation23_spill] sm:$0xff] %v11019_v38  ;;  %v2198_v27 = vadd.f32 1.0, %v8902_v39  ;;  %v8904_v7 = vpop.eup %8903 }
 0x451   :  { %17268 = vst [vmem:[#allocation63_spill] sm:$0xff] %v11030_v20  ;;  %v8906_v0 = vpop.eup %8905  ;;  %v2200_v25 = vadd.f32 1.0, %v8904_v7 }
 0x452   :  { %8909 = vrcp.f32 %v2198_v27  ;;  %v8908_v45 = vpop.eup %8907  ;;  %v2202_v16 = vadd.f32 1.0, %v8906_v0 }
 0x453   :  { %8911 = vrcp.f32 %v2200_v25  ;;  %v2204_v39 = vadd.f32 1.0, %v8908_v45 }
 0x454   :  { %2897 = vrot.lane.b32.xlu0 %v10848_v21, %s8987_s22  ;;  %2883 = vrot.lane.b32.xlu1 %v10850_v10, %s8987_s22  ;;  %8913 = vrcp.f32 %v2202_v16  ;;  %v2301_v16 = vld [vmem:[%s16565_s1] ss:$8 sm:$0xf] }
 0x455   :  { %8915 = vrcp.f32 %v2204_v39  ;;  %v11141_v51 = vrot.slane %v2301_v16, %v17285_v13  ;;  %v11157_v17 = vrot.slane %v2301_v16, %v17288_v59 }
 0x458   :  { %2983 = vrot.lane.b32.xlu0 %v10844_v15, %s8988_s23  ;;  %2899 = vrot.lane.b32.xlu1 %v10852_v22, %s8987_s22 }
 0x45c   :  { %2999 = vrot.lane.b32.xlu0 %v10848_v21, %s8988_s23  ;;  %2985 = vrot.lane.b32.xlu1 %v10850_v10, %s8988_s23  ;;  %v8910_v7 = vpop.eup %8909 }
 0x45d   :  { %v11136_v45 = vmul.f32 %v8910_v7, %v10830_v49  ;;  %v8912_v42 = vpop.eup %8911 }
 0x45e   :  { %v8914_v31 = vpop.eup %8913  ;;  %v11151_v49 = vmul.f32 %v8912_v42, %v10834_v60 }
 0x45f   :  { %17283 = vst [vmem:[#allocation26_spill] sm:$0xff] %v11136_v45  ;;  %v8916_v35 = vpop.eup %8915  ;;  %v11154_v30 = vmul.f32 %v8914_v31, %v10838_v48 }
 0x460   :  { %2261 = vrot.lane.b32.xlu0 %v10923_v2, %s8981_s13  ;;  %3001 = vrot.lane.b32.xlu1 %v10852_v22, %s8988_s23  ;;  %17286 = vst [vmem:[#allocation76_spill] sm:$0xff] %v11151_v49  ;;  %v11181_v48 = vmul.f32 %v8916_v35, %v10842_v62 }
 0x461   :  { %17287 = vst [vmem:[#allocation28_spill] sm:$0xff] %v11154_v30 }
 0x462   :  { %17290 = vst [vmem:[#allocation77_spill] sm:$0xff] %v11181_v48 }
 0x464   :  { %2277 = vrot.lane.b32.xlu0 %v10930_v14, %s8981_s13  ;;  %2263 = vrot.lane.b32.xlu1 %v10933_v34, %s8981_s13 }
 0x468   :  { %2363 = vrot.lane.b32.xlu0 %v10923_v2, %s8982_s18  ;;  %2279 = vrot.lane.b32.xlu1 %v10940_v63, %s8981_s13 }
 0x46c   :  { %2379 = vrot.lane.b32.xlu0 %v10930_v14, %s8982_s18  ;;  %2365 = vrot.lane.b32.xlu1 %v10933_v34, %s8982_s18 }
 0x470   :  { %2465 = vrot.lane.b32.xlu0 %v10923_v2, %s8983_s0  ;;  %2381 = vrot.lane.b32.xlu1 %v10940_v63, %s8982_s18 }
 0x474   :  { %2481 = vrot.lane.b32.xlu0 %v10930_v14, %s8983_s0  ;;  %2467 = vrot.lane.b32.xlu1 %v10933_v34, %s8983_s0 }
 0x478   :  { %2567 = vrot.lane.b32.xlu0 %v10923_v2, %s8984_s19  ;;  %2483 = vrot.lane.b32.xlu1 %v10940_v63, %s8983_s0 }
 0x47c   :  { %2583 = vrot.lane.b32.xlu0 %v10930_v14, %s8984_s19  ;;  %2569 = vrot.lane.b32.xlu1 %v10933_v34, %s8984_s19 }
 0x480   :  { %2685 = vrot.lane.b32.xlu0 %v10923_v2, %s8985_s20  ;;  %2585 = vrot.lane.b32.xlu1 %v10940_v63, %s8984_s19 }
 0x484   :  { %2701 = vrot.lane.b32.xlu0 %v10930_v14, %s8985_s20  ;;  %2687 = vrot.lane.b32.xlu1 %v10933_v34, %s8985_s20 }
 0x488   :  { %2787 = vrot.lane.b32.xlu0 %v10923_v2, %s8986_s21  ;;  %2703 = vrot.lane.b32.xlu1 %v10940_v63, %s8985_s20 }
 0x48c   :  { %2803 = vrot.lane.b32.xlu0 %v10930_v14, %s8986_s21  ;;  %2789 = vrot.lane.b32.xlu1 %v10933_v34, %s8986_s21 }
 0x490   :  { %2889 = vrot.lane.b32.xlu0 %v10923_v2, %s8987_s22  ;;  %2805 = vrot.lane.b32.xlu1 %v10940_v63, %s8986_s21 }
 0x492   :  { %v10990_v53 = vpop.permute.xlu0 %2253 }
 0x494   :  { %2905 = vrot.lane.b32.xlu0 %v10930_v14, %s8987_s22  ;;  %2891 = vrot.lane.b32.xlu1 %v10933_v34, %s8987_s22 }
 0x496   :  { %v10996_v46 = vpop.permute.xlu1 %2255  ;;  %v10998_v29 = vpop.permute.xlu0 %2269 }
 0x498   :  { %2991 = vrot.lane.b32.xlu0 %v10923_v2, %s8988_s23  ;;  %2907 = vrot.lane.b32.xlu1 %v10940_v63, %s8987_s22 }
 0x49a   :  { %v11007_v33 = vpop.permute.xlu0 %2355  ;;  %v11009_v19 = vpop.permute.xlu1 %2271 }
 0x49c   :  { %2257 = vrot.lane.b32.xlu0 %v11005_v12, %s8981_s13  ;;  %2993 = vrot.lane.b32.xlu1 %v10933_v34, %s8988_s23 }
 0x49e   :  { %v11021_v44 = vpop.permute.xlu0 %2371  ;;  %v11023_v8 = vpop.permute.xlu1 %2357 }
 0x4a0   :  { %2259 = vrot.lane.b32.xlu1 %v11019_v38, %s8981_s13  ;;  %2273 = vrot.lane.b32.xlu0 %v11016_v32, %s8981_s13 }
 0x4a2   :  { %v11032_v11 = vpop.permute.xlu0 %2457  ;;  %v11034_v55 = vpop.permute.xlu1 %2373 }
 0x4a4   :  { %2359 = vrot.lane.b32.xlu0 %v11005_v12, %s8982_s18  ;;  %2275 = vrot.lane.b32.xlu1 %v11030_v20, %s8981_s13 }
 0x4a6   :  { %v11040_v28 = vpop.permute.xlu0 %2473  ;;  %v11042_v61 = vpop.permute.xlu1 %2459 }
 0x4a8   :  { %2375 = vrot.lane.b32.xlu0 %v11016_v32, %s8982_s18  ;;  %2361 = vrot.lane.b32.xlu1 %v11019_v38, %s8982_s18 }
 0x4aa   :  { %v11048_v4 = vpop.permute.xlu0 %2559  ;;  %v11050_v6 = vpop.permute.xlu1 %2475 }
 0x4ac   :  { %2461 = vrot.lane.b32.xlu0 %v11005_v12, %s8983_s0  ;;  %2377 = vrot.lane.b32.xlu1 %v11030_v20, %s8982_s18 }
 0x4ae   :  { %v11056_v52 = vpop.permute.xlu0 %2575  ;;  %v11058_v57 = vpop.permute.xlu1 %2561 }
 0x4b0   :  { %2477 = vrot.lane.b32.xlu0 %v11016_v32, %s8983_s0  ;;  %2463 = vrot.lane.b32.xlu1 %v11019_v38, %s8983_s0 }
 0x4b2   :  { %v11065_v47 = vpop.permute.xlu0 %2677  ;;  %v11067_v36 = vpop.permute.xlu1 %2577 }
 0x4b3   :  { %17269 = vst [vmem:[#allocation72_spill] sm:$0xff] %v11065_v47 }
 0x4b4   :  { %2563 = vrot.lane.b32.xlu0 %v11005_v12, %s8984_s19  ;;  %2479 = vrot.lane.b32.xlu1 %v11030_v20, %s8983_s0 }
 0x4b6   :  { %v11075_v1 = vpop.permute.xlu0 %2693  ;;  %v11077_v23 = vpop.permute.xlu1 %2679 }
 0x4b7   :  { %17270 = vst [vmem:[#allocation61_spill] sm:$0xff] %v11077_v23 }
 0x4b8   :  { %2579 = vrot.lane.b32.xlu0 %v11016_v32, %s8984_s19  ;;  %2565 = vrot.lane.b32.xlu1 %v11019_v38, %s8984_s19 }
 0x4ba   :  { %v11084_v37 = vpop.permute.xlu0 %2779  ;;  %v11086_v58 = vpop.permute.xlu1 %2695 }
 0x4bb   :  { %17271 = vst [vmem:[#allocation44_spill] sm:$0xff] %v11084_v37  ;;  %17272 = vst [vmem:[#allocation46_spill] sm:$0xff] %v11086_v58 }
 0x4bc   :  { %2681 = vrot.lane.b32.xlu0 %v11005_v12, %s8985_s20  ;;  %2581 = vrot.lane.b32.xlu1 %v11030_v20, %s8984_s19 }
 0x4be   :  { %v11092_v41 = vpop.permute.xlu0 %2795  ;;  %v11094_v40 = vpop.permute.xlu1 %2781 }
 0x4bf   :  { %17273 = vst [vmem:[#allocation25_spill] sm:$0xff] %v11092_v41  ;;  %17274 = vst [vmem:[#allocation43_spill] sm:$0xff] %v11094_v40 }
 0x4c0   :  { %2697 = vrot.lane.b32.xlu0 %v11016_v32, %s8985_s20  ;;  %2683 = vrot.lane.b32.xlu1 %v11019_v38, %s8985_s20 }
 0x4c2   :  { %v11100_v50 = vpop.permute.xlu0 %2881  ;;  %v11102_v56 = vpop.permute.xlu1 %2797 }
 0x4c3   :  { %17275 = vst [vmem:[#allocation22_spill] sm:$0xff] %v11100_v50  ;;  %17276 = vst [vmem:[#allocation27_spill] sm:$0xff] %v11102_v56 }
 0x4c4   :  { %2783 = vrot.lane.b32.xlu0 %v11005_v12, %s8986_s21  ;;  %2699 = vrot.lane.b32.xlu1 %v11030_v20, %s8985_s20 }
 0x4c6   :  { %v11108_v26 = vpop.permute.xlu0 %2897  ;;  %v11110_v24 = vpop.permute.xlu1 %2883 }
 0x4c7   :  { %17277 = vst [vmem:[#allocation48_spill] sm:$0xff] %v11108_v26  ;;  %17278 = vst [vmem:[#allocation24_spill] sm:$0xff] %v11110_v24 }
 0x4c8   :  { %2799 = vrot.lane.b32.xlu0 %v11016_v32, %s8986_s21  ;;  %2785 = vrot.lane.b32.xlu1 %v11019_v38, %s8986_s21 }
 0x4ca   :  { %v11116_v18 = vpop.permute.xlu0 %2983  ;;  %v11118_v5 = vpop.permute.xlu1 %2899 }
 0x4cb   :  { %17279 = vst [vmem:[#allocation73_spill] sm:$0xff] %v11116_v18  ;;  %17280 = vst [vmem:[#allocation45_spill] sm:$0xff] %v11118_v5 }
 0x4cc   :  { %2885 = vrot.lane.b32.xlu0 %v11005_v12, %s8987_s22  ;;  %2801 = vrot.lane.b32.xlu1 %v11030_v20, %s8986_s21 }
 0x4ce   :  { %v11124_v0 = vpop.permute.xlu0 %2999  ;;  %v11126_v27 = vpop.permute.xlu1 %2985 }
 0x4cf   :  { %17281 = vst [vmem:[#allocation74_spill] sm:$0xff] %v11124_v0  ;;  %17282 = vst [vmem:[#allocation47_spill] sm:$0xff] %v11126_v27 }
 0x4d0   :  { %2901 = vrot.lane.b32.xlu0 %v11016_v32, %s8987_s22  ;;  %2887 = vrot.lane.b32.xlu1 %v11019_v38, %s8987_s22 }
 0x4d2   :  { %v2262_v25 = vpop.permute.xlu0 %2261  ;;  %v11138_v39 = vpop.permute.xlu1 %3001 }
 0x4d3   :  { %17284 = vst [vmem:[#allocation75_spill] sm:$0xff] %v11138_v39  ;;  %v2293_v43 = vsel %vm62_vm0, %v10990_v53, %v2262_v25  ;;  %v17289_v39 = vld [vmem:[#allocation5_spill] sm:$0xff] }
 0x4d4   :  { %2265 = vrot.lane.b32.xlu0 %v11136_v45, %s8981_s13  ;;  %2903 = vrot.lane.b32.xlu1 %v11030_v20, %s8987_s22  ;;  %v2324_v27 = vmul.f32 %v11141_v51, %v2293_v43  ;;  %v11164_v18 = vrot.slane %v2301_v16, %v17289_v39 }
 0x4d6   :  { %v2278_v7 = vpop.permute.xlu0 %2277  ;;  %v2264_v54 = vpop.permute.xlu1 %2263 }
 0x4d7   :  { %v2294_v3 = vsel %vm62_vm0, %v10996_v46, %v2264_v54  ;;  %v2297_v42 = vsel %vm62_vm0, %v2278_v7, %v10990_v53  ;;  %v2285_v31 = vsel %vm62_vm0, %v10998_v29, %v2278_v7  ;;  %v2290_v43 = vsel %vm62_vm0, %v2264_v54, %v11009_v19  ;;  %v17291_v53 = vld [vmem:[#allocation6_spill] sm:$0xff] }
 0x4d8   :  { %v2328_v60 = vmul.f32 %v11141_v51, %v2294_v3  ;;  %2281 = vrot.lane.b32.xlu0 %v11151_v49, %s8981_s13  ;;  %2267 = vrot.lane.b32.xlu1 %v11154_v30, %s8981_s13  ;;  %v11184_v0 = vrot.slane %v2301_v16, %v17291_v53  ;;  %v2289_v7 = vsel %vm62_vm0, %v2262_v25, %v10998_v29 }
 0x4d9   :  { %v2323_v21 = vmul.f32 %v11157_v17, %v2297_v42  ;;  %v2326_v62 = vmul.f32 %v11164_v18, %v2285_v31 }
 0x4da   :  { %v11186_v3 = vpop.permute.xlu0 %2363  ;;  %v2280_v5 = vpop.permute.xlu1 %2279  ;;  %v8071_v24 = vpack.c.bf16 %v2328_v60, %v2324_v27  ;;  %v2329_v16 = vmul.f32 %v11184_v0, %v2290_v43  ;;  %v2325_v29 = vmul.f32 %v11184_v0, %v2289_v7 }
 0x4db   :  { %v2286_v54 = vsel %vm62_vm0, %v11009_v19, %v2280_v5  ;;  %v2298_v35 = vsel %vm62_vm0, %v2280_v5, %v10996_v46 }
 0x4dc   :  { %v2327_v27 = vmul.f32 %v11157_v17, %v2298_v35  ;;  %v2330_v60 = vmul.f32 %v11164_v18, %v2286_v54  ;;  %8072 = vmatprep.subr.bf16.mxu0 %v8071_v24  ;;  %2367 = vrot.lane.b32.xlu0 %v11136_v45, %s8982_s18  ;;  %v8149_v42 = vpack.c.bf16 %v2329_v16, %v2325_v29 }
 0x4dd   :  { %2283 = vrot.lane.b32.xlu1 %v11181_v48, %s8981_s13 }
 0x4de   :  { %v8073_v19 = vpack.c.bf16 %v2327_v27, %v2323_v21  ;;  %v11207_v25 = vpop.permute.xlu0 %2379  ;;  %v11209_v5 = vpop.permute.xlu1 %2365  ;;  %v8147_v46 = vpack.c.bf16 %v2330_v60, %v2326_v62 }
 0x4e0   :  { %8074 = vmatpush1.bf16.msra.mxu0 %v8073_v19  ;;  %8148 = vmatprep.subr.bf16.mxu1 %v8147_v46 }
 0x4e1   :  { %2383 = vrot.lane.b32.xlu0 %v11151_v49, %s8982_s18  ;;  %2369 = vrot.lane.b32.xlu1 %v11154_v30, %s8982_s18 }
 0x4e2   :  { %8150 = vmatpush1.bf16.msra.mxu1 %v8149_v42  ;;  %v11215_v24 = vpop.permute.xlu0 %2465  ;;  %v11217_v31 = vpop.permute.xlu1 %2381 }
 0x4e5   :  { %2469 = vrot.lane.b32.xlu0 %v11136_v45, %s8983_s0  ;;  %2385 = vrot.lane.b32.xlu1 %v11181_v48, %s8982_s18 }
 0x4e6   :  { %v11223_v21 = vpop.permute.xlu0 %2481  ;;  %v11225_v43 = vpop.permute.xlu1 %2467 }
 0x4e9   :  { %2485 = vrot.lane.b32.xlu0 %v11151_v49, %s8983_s0  ;;  %2471 = vrot.lane.b32.xlu1 %v11154_v30, %s8983_s0 }
 0x4ea   :  { %v11231_v7 = vpop.permute.xlu0 %2567  ;;  %v11233_v54 = vpop.permute.xlu1 %2483 }
 0x4ed   :  { %2571 = vrot.lane.b32.xlu0 %v11136_v45, %s8984_s19  ;;  %2487 = vrot.lane.b32.xlu1 %v11181_v48, %s8983_s0 }
 0x4ee   :  { %v11239_v35 = vpop.permute.xlu0 %2583  ;;  %v11241_v62 = vpop.permute.xlu1 %2569 }
 0x4f1   :  { %2587 = vrot.lane.b32.xlu0 %v11151_v49, %s8984_s19  ;;  %2573 = vrot.lane.b32.xlu1 %v11154_v30, %s8984_s19 }
 0x4f2   :  { %v11247_v16 = vpop.permute.xlu0 %2685  ;;  %v11249_v27 = vpop.permute.xlu1 %2585 }
 0x4f3   :  { %17292 = vst [vmem:[#allocation64_spill] sm:$0xff] %v11247_v16  ;;  %17293 = vst [vmem:[#allocation78_spill] sm:$0xff] %v11249_v27 }
 0x4f5   :  { %3007 = vrot.lane.b32.xlu0 %v10930_v14, %s8988_s23  ;;  %2589 = vrot.lane.b32.xlu1 %v11181_v48, %s8984_s19 }
 0x4f6   :  { %v11255_v60 = vpop.permute.xlu0 %2701  ;;  %v11257_v29 = vpop.permute.xlu1 %2687 }
 0x4f7   :  { %17294 = vst [vmem:[#allocation50_spill] sm:$0xff] %v11255_v60  ;;  %17295 = vst [vmem:[#allocation29_spill] sm:$0xff] %v11257_v29 }
 0x4f9   :  { %2689 = vrot.lane.b32.xlu0 %v11136_v45, %s8985_s20  ;;  %3009 = vrot.lane.b32.xlu1 %v10940_v63, %s8988_s23 }
 0x4fa   :  { %v11263_v19 = vpop.permute.xlu0 %2787  ;;  %v11265_v46 = vpop.permute.xlu1 %2703 }
 0x4fb   :  { %17296 = vst [vmem:[#allocation49_spill] sm:$0xff] %v11263_v19  ;;  %17297 = vst [vmem:[#allocation31_spill] sm:$0xff] %v11265_v46 }
 0x4fd   :  { %2705 = vrot.lane.b32.xlu0 %v11151_v49, %s8985_s20  ;;  %2989 = vrot.lane.b32.xlu1 %v11019_v38, %s8988_s23 }
 0x4fe   :  { %v11271_v42 = vpop.permute.xlu0 %2803  ;;  %v11273_v22 = vpop.permute.xlu1 %2789 }
 0x4ff   :  { %17298 = vst [vmem:[#allocation67_spill] sm:$0xff] %v11271_v42  ;;  %17299 = vst [vmem:[#allocation65_spill] sm:$0xff] %v11273_v22 }
 0x501   :  { %2791 = vrot.lane.b32.xlu0 %v11136_v45, %s8986_s21  ;;  %2691 = vrot.lane.b32.xlu1 %v11154_v30, %s8985_s20 }
 0x502   :  { %v11279_v15 = vpop.permute.xlu0 %2889  ;;  %v11281_v10 = vpop.permute.xlu1 %2805 }
 0x503   :  { %17300 = vst [vmem:[#allocation62_spill] sm:$0xff] %v11279_v15  ;;  %17301 = vst [vmem:[#allocation52_spill] sm:$0xff] %v11281_v10 }
 0x505   :  { %2807 = vrot.lane.b32.xlu0 %v11151_v49, %s8986_s21  ;;  %2707 = vrot.lane.b32.xlu1 %v11181_v48, %s8985_s20 }
 0x506   :  { %v11287_v26 = vpop.permute.xlu0 %2905  ;;  %v11289_v50 = vpop.permute.xlu1 %2891 }
 0x507   :  { %17302 = vst [vmem:[#allocation81_spill] sm:$0xff] %v11287_v26  ;;  %17303 = vst [vmem:[#allocation68_spill] sm:$0xff] %v11289_v50  ;;  %v3086_v50 = vld [vmem:[%s16569_s5 + $0x8] sm:$0xff] }
 0x508   :  { %3325 = vmatprep.mubr.f32.mxu0 %v3086_v50  ;;  %3503 = vmatprep.mubr.f32.mxu1 %v3086_v50 }
 0x509   :  { %2893 = vrot.lane.b32.xlu0 %v11136_v45, %s8987_s22  ;;  %2793 = vrot.lane.b32.xlu1 %v11154_v30, %s8986_s21 }
 0x50a   :  { %v11295_v42 = vpop.permute.xlu0 %2991  ;;  %v11297_v15 = vpop.permute.xlu1 %2907 }
 0x50b   :  { %17304 = vst [vmem:[#allocation71_spill] sm:$0xff] %v11295_v42  ;;  %17305 = vst [vmem:[#allocation69_spill] sm:$0xff] %v11297_v15 }
 0x50d   :  { %2909 = vrot.lane.b32.xlu0 %v11151_v49, %s8987_s22  ;;  %2809 = vrot.lane.b32.xlu1 %v11181_v48, %s8986_s21 }
 0x50e   :  { %v11303_v41 = vpop.permute.xlu0 %2257  ;;  %v11305_v26 = vpop.permute.xlu1 %2993 }
 0x50f   :  { %17306 = vst [vmem:[#allocation66_spill] sm:$0xff] %v11305_v26 }
 0x511   :  { %2987 = vrot.lane.b32.xlu0 %v11005_v12, %s8988_s23  ;;  %2895 = vrot.lane.b32.xlu1 %v11154_v30, %s8987_s22 }
 0x512   :  { %v11314_v42 = vpop.permute.xlu1 %2259  ;;  %v11316_v15 = vpop.permute.xlu0 %2273 }
 0x515   :  { %2995 = vrot.lane.b32.xlu0 %v11136_v45, %s8988_s23  ;;  %2911 = vrot.lane.b32.xlu1 %v11181_v48, %s8987_s22 }
 0x516   :  { %v11322_v26 = vpop.permute.xlu0 %2359  ;;  %v11324_v10 = vpop.permute.xlu1 %2275 }
 0x519   :  { %3003 = vrot.lane.b32.xlu0 %v11016_v32, %s8988_s23  ;;  %3005 = vrot.lane.b32.xlu1 %v11030_v20, %s8988_s23 }
 0x51a   :  { %v11330_v56 = vpop.permute.xlu0 %2375  ;;  %v11332_v37 = vpop.permute.xlu1 %2361 }
 0x51d   :  { %3011 = vrot.lane.b32.xlu0 %v11151_v49, %s8988_s23  ;;  %2997 = vrot.lane.b32.xlu1 %v11154_v30, %s8988_s23  ;;  %v7814_v30 = vld [vmem:[%s16565_s1 + $0x7] ss:$8 sm:$0xf] }
 0x51e   :  { %v11338_v50 = vpop.permute.xlu0 %2461  ;;  %v11340_v19 = vpop.permute.xlu1 %2377 }
 0x51f   :  { %17307 = vst [vmem:[#allocation32_spill] sm:$0xff] %v11338_v50 }
 0x521   :  { %3013 = vrot.lane.b32.xlu1 %v11181_v48, %s8988_s23 }
 0x522   :  { %v11344_v40 = vpop.permute.xlu0 %2477  ;;  %v11346_v22 = vpop.permute.xlu1 %2463 }
 0x523   :  { %17308 = vst [vmem:[#allocation51_spill] sm:$0xff] %v11344_v40  ;;  %17309 = vst [vmem:[#allocation30_spill] sm:$0xff] %v11346_v22 }
 0x526   :  { %v11348_v46 = vpop.permute.xlu0 %2563  ;;  %v11350_v58 = vpop.permute.xlu1 %2479 }
 0x527   :  { %17310 = vst [vmem:[#allocation35_spill] sm:$0xff] %v11348_v46  ;;  %17311 = vst [vmem:[#allocation53_spill] sm:$0xff] %v11350_v58  ;;  %v7809_v46 = vld [vmem:[%s16565_s1 + $0x1] ss:$8 sm:$0xf] }
 0x528   :  { %v11400_v14 = vrot.slane %v7809_v46, %v17288_v59 }
 0x52a   :  { %v11352_v23 = vpop.permute.xlu0 %2579  ;;  %v11354_v29 = vpop.permute.xlu1 %2565 }
 0x52b   :  { %17312 = vst [vmem:[#allocation79_spill] sm:$0xff] %v11352_v23  ;;  %17313 = vst [vmem:[#allocation33_spill] sm:$0xff] %v11354_v29 }
 0x52e   :  { %v11356_v60 = vpop.permute.xlu0 %2681  ;;  %v11358_v50 = vpop.permute.xlu1 %2581 }
 0x52f   :  { %17314 = vst [vmem:[#allocation83_spill] sm:$0xff] %v11356_v60  ;;  %17315 = vst [vmem:[#allocation84_spill] sm:$0xff] %v11358_v50  ;;  %v7810_v60 = vld [vmem:[%s16565_s1 + $0x2] ss:$8 sm:$0xf] }
 0x530   :  { %v11412_v50 = vrot.slane %v7810_v60, %v17291_v53  ;;  %v11415_v32 = vrot.slane %v7810_v60, %v17288_v59  ;;  %v11418_v20 = vrot.slane %v7810_v60, %v17289_v39 }
 0x532   :  { %v11360_v27 = vpop.permute.xlu0 %2697  ;;  %v11362_v47 = vpop.permute.xlu1 %2683 }
 0x533   :  { %17316 = vst [vmem:[#allocation80_spill] sm:$0xff] %v11360_v27  ;;  %17317 = vst [vmem:[#allocation70_spill] sm:$0xff] %v11362_v47  ;;  %v7811_v47 = vld [vmem:[%s16565_s1 + $0x3] ss:$8 sm:$0xf]  ;;  %v11394_v27 = vrot.slane %v7809_v46, %v17285_v13 }
 0x534   :  { %v11428_v49 = vrot.slane %v7811_v47, %v17285_v13  ;;  %v11431_v48 = vrot.slane %v7811_v47, %v17291_v53  ;;  %v11434_v45 = vrot.slane %v7811_v47, %v17288_v59 }
 0x536   :  { %v11364_v16 = vpop.permute.xlu0 %2783  ;;  %v11366_v40 = vpop.permute.xlu1 %2699 }
 0x537   :  { %17318 = vst [vmem:[#allocation86_spill] sm:$0xff] %v11364_v16  ;;  %17319 = vst [vmem:[#allocation82_spill] sm:$0xff] %v11366_v40  ;;  %v11397_v16 = vrot.slane %v7809_v46, %v17291_v53  ;;  %v11403_v40 = vrot.slane %v7809_v46, %v17289_v39  ;;  %v7813_v46 = vld [vmem:[%s16565_s1 + $0x6] ss:$8 sm:$0xf] }
 0x538   :  { %v11455_v34 = vrot.slane %v7813_v46, %v17288_v59  ;;  %v11461_v29 = vrot.slane %v7813_v46, %v17291_v53  ;;  %v11464_v22 = vrot.slane %v7813_v46, %v17289_v39 }
 0x53a   :  { %v11371_v58 = vpop.permute.xlu0 %2799  ;;  %v11373_v23 = vpop.permute.xlu1 %2785  ;;  %17327 = vst [vmem:[#allocation93_spill] sm:$0xff] %v11455_v34  ;;  %17329 = vst [vmem:[#allocation95_spill] sm:$0xff] %v11461_v29  ;;  %v11478_v34 = vrot.slane %v7814_v30, %v17288_v59 }
 0x53b   :  { %17320 = vst [vmem:[#allocation85_spill] sm:$0xff] %v11371_v58  ;;  %17321 = vst [vmem:[#allocation87_spill] sm:$0xff] %v11373_v23  ;;  %v7812_v23 = vld [vmem:[%s16565_s1 + $0x5] ss:$8 sm:$0xf]  ;;  %v11409_v58 = vrot.slane %v7810_v60, %v17285_v13  ;;  %v11437_v60 = vrot.slane %v7811_v47, %v17289_v39  ;;  %v11458_v47 = vrot.slane %v7813_v46, %v17285_v13 }
 0x53c   :  { %v11449_v63 = vrot.slane %v7812_v23, %v17291_v53  ;;  %v11452_v2 = vrot.slane %v7812_v23, %v17289_v39  ;;  %17330 = vst [vmem:[#allocation96_spill] sm:$0xff] %v11464_v22  ;;  %17331 = vst [vmem:[#allocation97_spill] sm:$0xff] %v11478_v34  ;;  %v11481_v46 = vrot.slane %v7814_v30, %v17285_v13 }
 0x53d   :  { %17328 = vst [vmem:[#allocation94_spill] sm:$0xff] %v11458_v47  ;;  %v2396_v47 = vsel %vm105_vm1, %v11023_v8, %v11209_v5  ;;  %v11499_v34 = vrot.slane %v7814_v30, %v17289_v39 }
 0x53e   :  { %v11423_v12 = vpop.permute.xlu0 %2885  ;;  %v11425_v38 = vpop.permute.xlu1 %2801  ;;  %17325 = vst [vmem:[#allocation91_spill] sm:$0xff] %v11449_v63  ;;  %17326 = vst [vmem:[#allocation92_spill] sm:$0xff] %v11452_v2  ;;  %v2395_v2 = vsel %vm105_vm1, %v11007_v33, %v11186_v3  ;;  %v11496_v63 = vrot.slane %v7814_v30, %v17291_v53  ;;  %v2387_v30 = vsel %vm105_vm1, %v11021_v44, %v11207_v25 }
 0x53f   :  { %17322 = vst [vmem:[#allocation88_spill] sm:$0xff] %v11423_v12  ;;  %17323 = vst [vmem:[#allocation89_spill] sm:$0xff] %v11425_v38  ;;  %v11443_v12 = vrot.slane %v7812_v23, %v17288_v59  ;;  %v11446_v38 = vrot.slane %v7812_v23, %v17285_v13  ;;  %v2392_v23 = vsel %vm105_vm1, %v11209_v5, %v11034_v55 }
 0x540   :  { %17332 = vst [vmem:[#allocation98_spill] sm:$0xff] %v11481_v46  ;;  %v2400_v5 = vsel %vm105_vm1, %v11217_v31, %v11023_v8  ;;  %17335 = vst [vmem:[#allocation101_spill] sm:$0xff] %v11499_v34  ;;  %v11524_v34 = vmul.f32 %v11394_v27, %v2396_v47 }
 0x541   :  { %17324 = vst [vmem:[#allocation90_spill] sm:$0xff] %v11446_v38  ;;  %v7815_v38 = vld [vmem:[%s16565_s1 + $0x20] ss:$8 sm:$0xf] }
 0x542   :  { %v11483_v22 = vpop.permute.xlu0 %2901  ;;  %v11485_v29 = vpop.permute.xlu1 %2887  ;;  %v11510_v46 = vrot.slane %v7815_v38, %v17288_v59  ;;  %v11513_v8 = vrot.slane %v7815_v38, %v17285_v13  ;;  %v2497_v59 = vsel %vm149_vm2, %v11032_v11, %v11215_v24 }
 0x543   :  { %17333 = vst [vmem:[#allocation99_spill] sm:$0xff] %v11483_v22  ;;  %17334 = vst [vmem:[#allocation100_spill] sm:$0xff] %v11485_v29  ;;  %v2391_v29 = vsel %vm105_vm1, %v11186_v3, %v11021_v44  ;;  %v2388_v22 = vsel %vm105_vm1, %v11034_v55, %v11217_v31  ;;  %v2399_v3 = vsel %vm105_vm1, %v11207_v25, %v11007_v33 }
 0x544   :  { %17336 = vst [vmem:[#allocation102_spill] sm:$0xff] %v11510_v46  ;;  %17337 = vst [vmem:[#allocation103_spill] sm:$0xff] %v11513_v8  ;;  %v11527_v55 = vmul.f32 %v11397_v16, %v2392_v23  ;;  %v11530_v31 = vmul.f32 %v11394_v27, %v2395_v2  ;;  %v11537_v44 = vmul.f32 %v11400_v14, %v2400_v5 }
 0x545   :  { %v2494_v33 = vsel %vm149_vm2, %v11225_v43, %v11050_v6  ;;  %v11546_v23 = vmul.f32 %v11397_v16, %v2391_v29  ;;  %v2493_v2 = vsel %vm149_vm2, %v11215_v24, %v11040_v28  ;;  %v11553_v13 = vmul.f32 %v11403_v40, %v2388_v22 }
 0x546   :  { %v2266_v25 = vpop.permute.xlu0 %2265  ;;  %v11543_v47 = vpop.permute.xlu1 %2903  ;;  %v2498_v5 = vsel %vm149_vm2, %v11042_v61, %v11225_v43  ;;  %v11560_v46 = vmul.f32 %v11400_v14, %v2399_v3  ;;  %v2489_v29 = vsel %vm149_vm2, %v11040_v28, %v11223_v21  ;;  %v2501_v22 = vsel %vm149_vm2, %v11223_v21, %v11032_v11 }
 0x547   :  { %17338 = vst [vmem:[#allocation104_spill] sm:$0xff] %v11543_v47  ;;  %v11563_v47 = vmul.f32 %v11403_v40, %v2387_v30  ;;  %v11576_v43 = vmul.f32 %v11409_v58, %v2497_v59  ;;  %v11579_v3 = vmul.f32 %v11412_v50, %v2494_v33  ;;  %v8079_v30 = vpack.c.bf16 %v11524_v34, %v11530_v31 }
 0x548   :  { %v11584_v8 = vmul.f32 %v11412_v50, %v2493_v2  ;;  %v11589_v11 = vmul.f32 %v11409_v58, %v2498_v5  ;;  %v2295_v59 = vsel %vm62_vm0, %v11303_v41, %v2266_v25  ;;  %v11595_v33 = vmul.f32 %v11415_v32, %v2501_v22 }
 0x549   :  { %v11598_v24 = vmul.f32 %v11418_v20, %v2489_v29  ;;  %v11603_v2 = vrot.slane %v7815_v38, %v17291_v53  ;;  %v2490_v5 = vsel %vm149_vm2, %v11050_v6, %v11233_v54  ;;  %v2502_v22 = vsel %vm149_vm2, %v11233_v54, %v11042_v61 }
 0x54a   :  { %v2282_v21 = vpop.permute.xlu0 %2281  ;;  %v2268_v34 = vpop.permute.xlu1 %2267  ;;  %v11617_v28 = vrot.slane %v7815_v38, %v17289_v39  ;;  %v2332_v53 = vmul.f32 %v11141_v51, %v2295_v59  ;;  %v2595_v61 = vsel %vm193_vm3, %v11231_v7, %v11056_v52 }
 0x54b   :  { %17339 = vst [vmem:[#allocation105_spill] sm:$0xff] %v11603_v2  ;;  %v2296_v29 = vsel %vm62_vm0, %v11314_v42, %v2268_v34  ;;  %v2299_v6 = vsel %vm62_vm0, %v2282_v21, %v11303_v41  ;;  %v2287_v38 = vsel %vm62_vm0, %v11316_v15, %v2282_v21  ;;  %v2292_v54 = vsel %vm62_vm0, %v2268_v34, %v11324_v10 }
 0x54c   :  { %17340 = vst [vmem:[#allocation106_spill] sm:$0xff] %v11617_v28  ;;  %v2336_v2 = vmul.f32 %v11141_v51, %v2296_v29  ;;  %v2599_v51 = vsel %vm193_vm3, %v11048_v4, %v11231_v7  ;;  %v11643_v41 = vmul.f32 %v11415_v32, %v2502_v22  ;;  %v11646_v29 = vmul.f32 %v11418_v20, %v2490_v5 }
 0x54d   :  { %v2291_v34 = vsel %vm62_vm0, %v2266_v25, %v11316_v15  ;;  %v2331_v59 = vmul.f32 %v11157_v17, %v2299_v6  ;;  %v2334_v5 = vmul.f32 %v11164_v18, %v2287_v38  ;;  %v2337_v22 = vmul.f32 %v11184_v0, %v2292_v54 }
 0x54e   :  { %v2368_v31 = vpop.permute.xlu0 %2367  ;;  %v8075_v39 = vpack.c.bf16 %v2336_v2, %v2332_v53  ;;  %v11663_v15 = vmul.f32 %v11428_v49, %v2599_v51  ;;  %v11666_v25 = vmul.f32 %v11431_v48, %v2595_v61  ;;  %v8089_v61 = vpack.c.bf16 %v11643_v41, %v11595_v33 }
 0x54f   :  { %v2284_v21 = vpop.permute.xlu1 %2283 }
 0x550   :  { %v2288_v28 = vsel %vm62_vm0, %v11324_v10, %v2284_v21  ;;  %v2300_v7 = vsel %vm62_vm0, %v2284_v21, %v11314_v42  ;;  %8076 = vmatprep.subr.bf16.mxu0 %v8075_v39  ;;  %v2591_v10 = vsel %vm193_vm3, %v11056_v52, %v11239_v35  ;;  %v2603_v42 = vsel %vm193_vm3, %v11239_v35, %v11048_v4 }
 0x551   :  { %v2335_v53 = vmul.f32 %v11157_v17, %v2300_v7  ;;  %v2338_v2 = vmul.f32 %v11164_v18, %v2288_v28  ;;  %v2333_v17 = vmul.f32 %v11184_v0, %v2291_v34  ;;  %v2397_v18 = vsel %vm105_vm1, %v11322_v26, %v2368_v31 }
 0x552   :  { %v2596_v52 = vsel %vm193_vm3, %v11241_v62, %v11067_v36  ;;  %v2600_v4 = vsel %vm193_vm3, %v11058_v57, %v11241_v62  ;;  %v8163_v35 = vpack.c.bf16 %v11646_v29, %v11598_v24  ;;  %v11693_v38 = vmul.f32 %v11434_v45, %v2603_v42 }
 0x553   :  { %v8077_v39 = vpack.c.bf16 %v2335_v53, %v2331_v59  ;;  %v2384_v28 = vpop.permute.xlu0 %2383  ;;  %v8151_v6 = vpack.c.bf16 %v2338_v2, %v2334_v5  ;;  %v2370_v0 = vpop.permute.xlu1 %2369  ;;  %v11696_v54 = vmul.f32 %v11437_v60, %v2591_v10  ;;  %v8153_v59 = vpack.c.bf16 %v2337_v22, %v2333_v17  ;;  %v17342_v10 = vld [vmem:[#allocation72_spill] sm:$0xff] }
 0x554   :  { %v2398_v51 = vsel %vm105_vm1, %v11332_v37, %v2370_v0  ;;  %v2434_v21 = vmul.f32 %v11394_v27, %v2397_v18  ;;  %v2394_v62 = vsel %vm105_vm1, %v2370_v0, %v11340_v19  ;;  %v11707_v7 = vmul.f32 %v11428_v49, %v2600_v4 }
 0x555   :  { %8078 = vmatpush1.bf16.msra.mxu0 %v8077_v39  ;;  %v2438_v34 = vmul.f32 %v11394_v27, %v2398_v51  ;;  %8152 = vmatprep.subr.bf16.mxu1 %v8151_v6  ;;  %v11710_v5 = vmul.f32 %v11431_v48, %v2596_v52  ;;  %v2389_v22 = vsel %vm105_vm1, %v11330_v56, %v2384_v28  ;;  %v17341_v27 = vld [vmem:[#allocation64_spill] sm:$0xff] }
 0x556   :  { %8080 = vmatprep.subr.bf16.mxu0 %v8079_v30  ;;  %v2401_v53 = vsel %vm105_vm1, %v2384_v28, %v11322_v26  ;;  %8154 = vmatpush1.bf16.msra.mxu1 %v8153_v59  ;;  %v2713_v30 = vsel %vm241_vm4, %v17341_v27, %v11075_v1  ;;  %v2717_v42 = vsel %vm241_vm4, %v17342_v10, %v17341_v27  ;;  %v17344_v28 = vld [vmem:[#allocation78_spill] sm:$0xff]  ;;  %v17346_v51 = vld [vmem:[#allocation32_spill] sm:$0xff] }
 0x557   :  { %v2470_v2 = vpop.permute.xlu0 %2469  ;;  %v2393_v17 = vsel %vm105_vm1, %v2368_v31, %v11330_v56  ;;  %v17343_v18 = vpack.c.bf16 %v11553_v13, %v11563_v47  ;;  %v2386_v26 = vpop.permute.xlu1 %2385  ;;  %v8083_v39 = vpack.c.bf16 %v2438_v34, %v2434_v21  ;;  %v2604_v6 = vsel %vm193_vm3, %v17344_v28, %v11058_v57  ;;  %v17349_v27 = vld [vmem:[#allocation30_spill] sm:$0xff] }
 0x558   :  { %v2439_v52 = vmul.f32 %v11397_v16, %v2394_v62  ;;  %v2390_v4 = vsel %vm105_vm1, %v11340_v19, %v2386_v26  ;;  %v2402_v56 = vsel %vm105_vm1, %v2386_v26, %v11332_v37  ;;  %v17345_v13 = vpack.c.bf16 %v11537_v44, %v11560_v46  ;;  %v17351_v26 = vld [vmem:[#allocation51_spill] sm:$0xff] }
 0x559   :  { %8156 = vmatprep.subr.bf16.mxu1 %v17343_v18  ;;  %v2433_v47 = vmul.f32 %v11400_v14, %v2401_v53  ;;  %v2436_v31 = vmul.f32 %v11403_v40, %v2389_v22  ;;  %v2437_v57 = vmul.f32 %v11400_v14, %v2402_v56  ;;  %v2440_v0 = vmul.f32 %v11403_v40, %v2390_v4 }
 0x55a   :  { %8082 = vmatpush1.bf16.msra.mxu0 %v17345_v13  ;;  %v8173_v19 = vpack.c.bf16 %v11710_v5, %v11666_v25  ;;  %v2435_v59 = vmul.f32 %v11397_v16, %v2393_v17  ;;  %v2499_v37 = vsel %vm149_vm2, %v17346_v51, %v2470_v2  ;;  %v17347_v46 = vpack.c.bf16 %v11527_v55, %v11546_v23  ;;  %v17348_v55 = vld [vmem:[#allocation90_spill] sm:$0xff]  ;;  %v17354_v13 = vld [vmem:[#allocation29_spill] sm:$0xff]  ;;  %v17370_v25 = vld [vmem:[#allocation52_spill] sm:$0xff] }
 0x55b   :  { %8084 = vmatprep.subr.bf16.mxu0 %v8083_v39  ;;  %v2486_v44 = vpop.permute.xlu0 %2485  ;;  %v8095_v14 = vpack.c.bf16 %v11707_v7, %v11663_v15  ;;  %v2592_v40 = vsel %vm193_vm3, %v11067_v36, %v17344_v28  ;;  %v11766_v21 = vmul.f32 %v11434_v45, %v2604_v6  ;;  %v8085_v16 = vpack.c.bf16 %v2437_v57, %v2433_v47  ;;  %v2472_v62 = vpop.permute.xlu1 %2471  ;;  %v17350_v36 = vld [vmem:[#allocation53_spill] sm:$0xff] }
 0x55c   :  { %8158 = vmatpush1.bf16.msra.mxu1 %v17347_v46  ;;  %v8159_v34 = vpack.c.bf16 %v2440_v0, %v2436_v31  ;;  %v11769_v22 = vmul.f32 %v11443_v12, %v2717_v42  ;;  %v11772_v23 = vmul.f32 %v17348_v55, %v2713_v30  ;;  %v8161_v53 = vpack.c.bf16 %v2439_v52, %v2435_v59  ;;  %v17353_v52 = vld [vmem:[#allocation50_spill] sm:$0xff]  ;;  %v17355_v47 = vld [vmem:[#allocation61_spill] sm:$0xff]  ;;  %v17356_v59 = vld [vmem:[#allocation35_spill] sm:$0xff] }
 0x55d   :  { %v2500_v15 = vsel %vm149_vm2, %v17349_v27, %v2472_v62  ;;  %v2536_v7 = vmul.f32 %v11409_v58, %v2499_v37  ;;  %v2496_v17 = vsel %vm149_vm2, %v2472_v62, %v17350_v36  ;;  %v2636_v42 = vmul.f32 %v11437_v60, %v2592_v40  ;;  %v17361_v62 = vld [vmem:[#allocation84_spill] sm:$0xff] }
 0x55e   :  { %v2540_v18 = vmul.f32 %v11409_v58, %v2500_v15  ;;  %8086 = vmatpush1.bf16.msra.mxu0 %v8085_v16  ;;  %8160 = vmatprep.subr.bf16.mxu1 %v8159_v34  ;;  %v2491_v30 = vsel %vm149_vm2, %v17351_v26, %v2486_v44  ;;  %v2503_v39 = vsel %vm149_vm2, %v2486_v44, %v17346_v51  ;;  %v17358_v44 = vld [vmem:[#allocation91_spill] sm:$0xff] }
 0x55f   :  { %v17352_v28 = vpack.c.bf16 %v11589_v11, %v11576_v43  ;;  %v2572_v6 = vpop.permute.xlu0 %2571  ;;  %v8097_v58 = vpack.c.bf16 %v11766_v21, %v11693_v38  ;;  %v2709_v4 = vsel %vm241_vm4, %v11075_v1, %v17353_v52  ;;  %v2495_v56 = vsel %vm149_vm2, %v2470_v2, %v17351_v26  ;;  %v2488_v43 = vpop.permute.xlu1 %2487  ;;  %v17359_v21 = vld [vmem:[#allocation46_spill] sm:$0xff] }
 0x560   :  { %8162 = vmatpush1.bf16.msra.mxu1 %v8161_v53  ;;  %v8091_v11 = vpack.c.bf16 %v2540_v18, %v2536_v7  ;;  %v2718_v38 = vsel %vm241_vm4, %v17355_v47, %v17354_v13  ;;  %v2541_v31 = vmul.f32 %v11412_v50, %v2496_v17  ;;  %v2492_v1 = vsel %vm149_vm2, %v17350_v36, %v2488_v43  ;;  %v17363_v7 = vld [vmem:[#allocation79_spill] sm:$0xff] }
 0x561   :  { %8088 = vmatprep.subr.bf16.mxu0 %v17352_v28  ;;  %8164 = vmatprep.subr.bf16.mxu1 %v8163_v35  ;;  %v2504_v2 = vsel %vm149_vm2, %v2488_v43, %v17349_v27  ;;  %v2535_v24 = vmul.f32 %v11415_v32, %v2503_v39  ;;  %v2538_v29 = vmul.f32 %v11418_v20, %v2491_v30  ;;  %v17362_v27 = vld [vmem:[#allocation92_spill] sm:$0xff]  ;;  %v17364_v28 = vld [vmem:[#allocation31_spill] sm:$0xff] }
 0x562   :  { %v2539_v35 = vmul.f32 %v11415_v32, %v2504_v2  ;;  %v2542_v57 = vmul.f32 %v11418_v20, %v2492_v1  ;;  %8090 = vmatpush1.bf16.msra.mxu0 %v8089_v61  ;;  %v2537_v0 = vmul.f32 %v11412_v50, %v2495_v56  ;;  %v2601_v51 = vsel %vm193_vm3, %v17356_v59, %v2572_v6  ;;  %v17366_v1 = vld [vmem:[#allocation43_spill] sm:$0xff] }
 0x563   :  { %8092 = vmatprep.subr.bf16.mxu0 %v8091_v11  ;;  %v17357_v37 = vpack.c.bf16 %v11579_v3, %v11584_v8  ;;  %v2588_v46 = vpop.permute.xlu0 %2587  ;;  %v8171_v32 = vpack.c.bf16 %v2636_v42, %v11696_v54  ;;  %v2721_v20 = vsel %vm241_vm4, %v17353_v52, %v17342_v10  ;;  %v11835_v33 = vmul.f32 %v11443_v12, %v2718_v38  ;;  %v2574_v41 = vpop.permute.xlu1 %2573  ;;  %v17360_v54 = vld [vmem:[#allocation33_spill] sm:$0xff] }
 0x564   :  { %v8093_v50 = vpack.c.bf16 %v2539_v35, %v2535_v24  ;;  %v8167_v61 = vpack.c.bf16 %v2542_v57, %v2538_v29  ;;  %v11838_v40 = vmul.f32 %v17358_v44, %v2709_v4  ;;  %v2714_v8 = vsel %vm241_vm4, %v17354_v13, %v17359_v21  ;;  %v17369_v35 = vld [vmem:[#allocation27_spill] sm:$0xff] }
 0x565   :  { %8166 = vmatpush1.bf16.msra.mxu1 %v17357_v37  ;;  %v8169_v3 = vpack.c.bf16 %v2541_v31, %v2537_v0  ;;  %v2602_v16 = vsel %vm193_vm3, %v17360_v54, %v2574_v41  ;;  %v2638_v10 = vmul.f32 %v11428_v49, %v2601_v51  ;;  %v2598_v34 = vsel %vm193_vm3, %v2574_v41, %v17361_v62  ;;  %v17365_v31 = vld [vmem:[#allocation65_spill] sm:$0xff]  ;;  %v17373_v41 = vld [vmem:[#allocation67_spill] sm:$0xff] }
 0x566   :  { %v2642_v53 = vmul.f32 %v11428_v49, %v2602_v16  ;;  %8094 = vmatpush1.bf16.msra.mxu0 %v8093_v50  ;;  %8168 = vmatprep.subr.bf16.mxu1 %v8167_v61  ;;  %v11853_v15 = vmul.f32 %v17362_v27, %v2721_v20  ;;  %v2593_v36 = vsel %vm193_vm3, %v17363_v7, %v2588_v46  ;;  %v17371_v37 = vld [vmem:[#allocation25_spill] sm:$0xff]  ;;  %v17376_v16 = vld [vmem:[#allocation60_spill] sm:$0xff] }
 0x567   :  { %v2605_v17 = vsel %vm193_vm3, %v2588_v46, %v17356_v59  ;;  %8096 = vmatprep.subr.bf16.mxu0 %v8095_v14  ;;  %v11861_v18 = vpop.permute.xlu0 %3007  ;;  %v11864_v42 = vmul.f32 %v17348_v55, %v2714_v8  ;;  %v8113_v49 = vpack.c.bf16 %v11835_v33, %v11769_v22  ;;  %v2597_v26 = vsel %vm193_vm3, %v2572_v6, %v17363_v7  ;;  %v2590_v30 = vpop.permute.xlu1 %2589  ;;  %v17372_v20 = vld [vmem:[#allocation93_spill] sm:$0xff]  ;;  %v17374_v8 = vld [vmem:[#allocation94_spill] sm:$0xff] }
 0x568   :  { %v8099_v39 = vpack.c.bf16 %v2642_v53, %v2638_v10  ;;  %v2710_v14 = vsel %vm241_vm4, %v17359_v21, %v17364_v28  ;;  %v2643_v52 = vmul.f32 %v11431_v48, %v2598_v34  ;;  %v2594_v4 = vsel %vm193_vm3, %v17361_v62, %v2590_v30  ;;  %v17378_v53 = vld [vmem:[#allocation62_spill] sm:$0xff] }
 0x569   :  { %8170 = vmatpush1.bf16.msra.mxu1 %v8169_v3  ;;  %v2606_v56 = vsel %vm193_vm3, %v2590_v30, %v17360_v54  ;;  %v2637_v6 = vmul.f32 %v11434_v45, %v2605_v17  ;;  %v2640_v43 = vmul.f32 %v11437_v60, %v2593_v36  ;;  %v2644_v13 = vmul.f32 %v11437_v60, %v2594_v4  ;;  %v17367_v60 = vld [vmem:[#allocation49_spill] sm:$0xff]  ;;  %v17379_v7 = vld [vmem:[#allocation22_spill] sm:$0xff]  ;;  %v17380_v17 = vld [vmem:[#allocation95_spill] sm:$0xff] }
 0x56a   :  { %8172 = vmatprep.subr.bf16.mxu1 %v8171_v32  ;;  %v2641_v11 = vmul.f32 %v11434_v45, %v2606_v56  ;;  %8098 = vmatpush1.bf16.msra.mxu0 %v8097_v58  ;;  %v2722_v38 = vsel %vm241_vm4, %v17364_v28, %v17355_v47  ;;  %v2820_v2 = vsel %vm285_vm6, %v17366_v1, %v17365_v31  ;;  %v17368_v58 = vld [vmem:[#allocation44_spill] sm:$0xff]  ;;  %v17375_v54 = vld [vmem:[#allocation41_spill] sm:$0xff]  ;;  %v17382_v28 = vld [vmem:[#allocation42_spill] sm:$0xff] }
 0x56b   :  { %v2639_v24 = vmul.f32 %v11431_v48, %v2597_v26  ;;  %8100 = vmatprep.subr.bf16.mxu0 %v8099_v39  ;;  %v2690_v45 = vpop.permute.xlu0 %2689  ;;  %v2819_v29 = vsel %vm285_vm6, %v17368_v58, %v17367_v60  ;;  %v2816_v47 = vsel %vm285_vm6, %v17365_v31, %v17369_v35  ;;  %v11906_v0 = vpop.permute.xlu1 %3009  ;;  %v8175_v48 = vpack.c.bf16 %v2644_v13, %v2640_v43  ;;  %v17381_v30 = vld [vmem:[#allocation96_spill] sm:$0xff] }
 0x56c   :  { %v8101_v57 = vpack.c.bf16 %v2641_v11, %v2637_v6  ;;  %v11909_v59 = vmul.f32 %v17358_v44, %v2710_v14  ;;  %v2812_v5 = vsel %vm285_vm6, %v17369_v35, %v17370_v25  ;;  %v2815_v46 = vsel %vm285_vm6, %v17367_v60, %v17371_v37  ;;  %v17383_v14 = vld [vmem:[#allocation58_spill] sm:$0xff]  ;;  %v17385_v43 = vld [vmem:[#allocation48_spill] sm:$0xff] }
 0x56d   :  { %8174 = vmatpush1.bf16.msra.mxu1 %v8173_v19  ;;  %v2824_v19 = vsel %vm285_vm6, %v17370_v25, %v17366_v1  ;;  %v8177_v51 = vpack.c.bf16 %v2643_v52, %v2639_v24  ;;  %v2754_v32 = vmul.f32 %v17362_v27, %v2722_v38  ;;  %v11925_v50 = vmul.f32 %v17372_v20, %v2820_v2  ;;  %v17386_v2 = vld [vmem:[#allocation40_spill] sm:$0xff]  ;;  %v17387_v24 = vld [vmem:[#allocation39_spill] sm:$0xff] }
 0x56e   :  { %8102 = vmatpush1.bf16.msra.mxu0 %v8101_v57  ;;  %8176 = vmatprep.subr.bf16.mxu1 %v8175_v48  ;;  %v2811_v61 = vsel %vm285_vm6, %v17371_v37, %v17373_v41  ;;  %v2823_v21 = vsel %vm285_vm6, %v17373_v41, %v17368_v58  ;;  %v11936_v3 = vmul.f32 %v17374_v8, %v2816_v47  ;;  %v17389_v58 = vld [vmem:[#allocation97_spill] sm:$0xff]  ;;  %v17390_v35 = vld [vmem:[#allocation80_spill] sm:$0xff]  ;;  %v17392_v47 = vld [vmem:[#allocation26_spill] sm:$0xff] }
 0x56f   :  { %v17377_v10 = vpack.c.bf16 %v17375_v54, %v17376_v16  ;;  %v2706_v62 = vpop.permute.xlu0 %2705  ;;  %v11942_v34 = vmul.f32 %v17372_v20, %v2819_v29  ;;  %v2921_v36 = vsel %vm329_vm5, %v17379_v7, %v17378_v53  ;;  %v11949_v26 = vmul.f32 %v17380_v17, %v2812_v5  ;;  %v11957_v4 = vpop.permute.xlu1 %2989  ;;  %v17394_v48 = vld [vmem:[#allocation56_spill] sm:$0xff] }
 0x570   :  { %v11952_v39 = vmul.f32 %v17381_v30, %v2824_v19  ;;  %v17384_v52 = vpack.c.bf16 %v17382_v28, %v17383_v14  ;;  %v11960_v56 = vmul.f32 %v17374_v8, %v2815_v46  ;;  %v8189_v6 = vpack.c.bf16 %v11909_v59, %v11838_v40  ;;  %v17395_v59 = vld [vmem:[#allocation19_spill] sm:$0xff]  ;;  %v17398_v46 = vld [vmem:[#allocation68_spill] sm:$0xff]  ;;  %v17405_v14 = vld [vmem:[#allocation82_spill] sm:$0xff] }
 0x571   :  { %8104 = vmatprep.subr.bf16.mxu0 %v17377_v10  ;;  %8178 = vmatpush1.bf16.msra.mxu1 %v8177_v51  ;;  %v2917_v11 = vsel %vm329_vm5, %v17378_v53, %v17385_v43  ;;  %v8111_v13 = vpack.c.bf16 %v11864_v42, %v11772_v23  ;;  %v11971_v38 = vmul.f32 %v17380_v17, %v2811_v61  ;;  %v17391_v42 = vld [vmem:[#allocation28_spill] sm:$0xff] }
 0x572   :  { %8180 = vmatprep.subr.bf16.mxu1 %v17384_v52  ;;  %v11974_v31 = vmul.f32 %v17381_v30, %v2823_v21  ;;  %v8121_v1 = vpack.c.bf16 %v11925_v50, %v11942_v34  ;;  %v17388_v40 = vpack.c.bf16 %v17386_v2, %v17387_v24  ;;  %v8187_v60 = vpack.c.bf16 %v2754_v32, %v11853_v15  ;;  %v17397_v15 = vld [vmem:[#allocation98_spill] sm:$0xff]  ;;  %v17399_v32 = vld [vmem:[#allocation24_spill] sm:$0xff]  ;;  %v17400_v21 = vld [vmem:[#allocation77_spill] sm:$0xff] }
 0x573   :  { %v11983_v29 = vmul.f32 %v17389_v58, %v2921_v36  ;;  %v2715_v23 = vsel %vm241_vm4, %v2690_v45, %v17390_v35  ;;  %v17393_v57 = vpack.c.bf16 %v17391_v42, %v17392_v47  ;;  %v17396_v25 = vpack.c.bf16 %v17394_v48, %v17395_v59  ;;  %v2792_v5 = vpop.permute.xlu0 %2791  ;;  %v2692_v61 = vpop.permute.xlu1 %2691  ;;  %v17401_v54 = vld [vmem:[#allocation76_spill] sm:$0xff]  ;;  %v17404_v36 = vld [vmem:[#allocation45_spill] sm:$0xff] }
 0x574   :  { %8106 = vmatpush1.bf16.msra.mxu0 %v17388_v40  ;;  %v8119_v19 = vpack.c.bf16 %v11936_v3, %v11960_v56  ;;  %v11997_v51 = vmul.f32 %v17397_v15, %v2917_v11  ;;  %v8197_v37 = vpack.c.bf16 %v11949_v26, %v11971_v38  ;;  %v2922_v41 = vsel %vm329_vm5, %v17399_v32, %v17398_v46  ;;  %v17403_v3 = vld [vmem:[#allocation81_spill] sm:$0xff]  ;;  %v17406_v56 = vld [vmem:[#allocation70_spill] sm:$0xff]  ;;  %v17408_v40 = vld [vmem:[#allocation23_spill] sm:$0xff] }
 0x575   :  { %8108 = vmatprep.subr.bf16.mxu0 %v17393_v57  ;;  %8182 = vmatpush1.bf16.msra.mxu1 %v17396_v25  ;;  %v17402_v16 = vpack.c.bf16 %v17400_v21, %v17401_v54  ;;  %v8195_v10 = vpack.c.bf16 %v11952_v39, %v11974_v31  ;;  %v2913_v53 = vsel %vm329_vm5, %v17385_v43, %v17403_v3  ;;  %v17407_v31 = vld [vmem:[#allocation83_spill] sm:$0xff]  ;;  %v17409_v42 = vld [vmem:[#allocation21_spill] sm:$0xff]  ;;  %v17428_v38 = vld [vmem:[#allocation104_spill] sm:$0xff] }
 0x576   :  { %v2918_v28 = vsel %vm329_vm5, %v17398_v46, %v17404_v36  ;;  %v2716_v52 = vsel %vm241_vm4, %v2692_v61, %v17405_v14  ;;  %v2720_v11 = vsel %vm241_vm4, %v17406_v56, %v2692_v61  ;;  %v2925_v39 = vsel %vm329_vm5, %v17403_v3, %v17379_v7  ;;  %v17414_v21 = vld [vmem:[#allocation69_spill] sm:$0xff] }
 0x577   :  { %8184 = vmatprep.subr.bf16.mxu1 %v17402_v16  ;;  %v2719_v43 = vsel %vm241_vm4, %v17407_v31, %v2690_v45  ;;  %v2756_v2 = vmul.f32 %v17348_v55, %v2715_v23  ;;  %v2760_v24 = vmul.f32 %v17348_v55, %v2716_v52  ;;  %v17410_v47 = vpack.c.bf16 %v17408_v40, %v17409_v42  ;;  %v17411_v45 = vld [vmem:[#allocation63_spill] sm:$0xff]  ;;  %v2808_v55 = vpop.permute.xlu0 %2807  ;;  %v2708_v61 = vpop.permute.xlu1 %2707  ;;  %v17416_v52 = vld [vmem:[#allocation85_spill] sm:$0xff]  ;;  %v17419_v40 = vld [vmem:[#allocation86_spill] sm:$0xff] }
 0x578   :  { %v12037_v57 = vmul.f32 %v17389_v58, %v2922_v41  ;;  %v2711_v48 = vsel %vm241_vm4, %v17390_v35, %v2706_v62  ;;  %v2723_v7 = vsel %vm241_vm4, %v2706_v62, %v17407_v31  ;;  %v17412_v23 = vld [vmem:[#allocation59_spill] sm:$0xff]  ;;  %v12049_v25 = vmul.f32 %v11496_v63, %v2913_v53  ;;  %v17417_v31 = vld [vmem:[#allocation89_spill] sm:$0xff] }
 0x579   :  { %8110 = vmatpush1.bf16.msra.mxu0 %v17410_v47  ;;  %v17413_v59 = vpack.c.bf16 %v17411_v45, %v17412_v23  ;;  %v12052_v46 = vmul.f32 %v17397_v15, %v2918_v28  ;;  %v2759_v41 = vmul.f32 %v11443_v12, %v2720_v11  ;;  %v8115_v35 = vpack.c.bf16 %v2760_v24, %v2756_v2  ;;  %v17418_v2 = vld [vmem:[#allocation87_spill] sm:$0xff] }
 0x57a   :  { %8112 = vmatprep.subr.bf16.mxu0 %v8111_v13  ;;  %v2914_v62 = vsel %vm329_vm5, %v17404_v36, %v17414_v21  ;;  %v2755_v13 = vmul.f32 %v11443_v12, %v2719_v43  ;;  %v2712_v54 = vsel %vm241_vm4, %v17405_v14, %v2708_v61  ;;  %v2724_v16 = vsel %vm241_vm4, %v2708_v61, %v17406_v56  ;;  %v17415_v12 = vld [vmem:[#allocation101_spill] sm:$0xff]  ;;  %v17421_v23 = vld [vmem:[#allocation71_spill] sm:$0xff] }
 0x57b   :  { %8186 = vmatpush1.bf16.msra.mxu1 %v17413_v59  ;;  %v2757_v3 = vmul.f32 %v17358_v44, %v2711_v48  ;;  %v2761_v53 = vmul.f32 %v17358_v44, %v2712_v54  ;;  %v2762_v28 = vmul.f32 %v17362_v27, %v2724_v16  ;;  %v12074_v36 = vmul.f32 %v17415_v12, %v2925_v39  ;;  %v2894_v11 = vpop.permute.xlu0 %2893  ;;  %v17422_v59 = vld [vmem:[#allocation73_spill] sm:$0xff] }
 0x57c   :  { %8188 = vmatprep.subr.bf16.mxu1 %v8187_v60  ;;  %v2758_v60 = vmul.f32 %v17362_v27, %v2723_v7  ;;  %v8129_v14 = vpack.c.bf16 %v12037_v57, %v11983_v29  ;;  %v2817_v56 = vsel %vm285_vm6, %v2792_v5, %v17416_v52  ;;  %v2926_v44 = vsel %vm329_vm5, %v17414_v21, %v17399_v32  ;;  %v2794_v27 = vpop.permute.xlu1 %2793 }
 0x57d   :  { %8114 = vmatpush1.bf16.msra.mxu0 %v8113_v49  ;;  %v8117_v22 = vpack.c.bf16 %v2759_v41, %v2755_v13  ;;  %v8193_v33 = vpack.c.bf16 %v2761_v53, %v2757_v3  ;;  %v12086_v39 = vmul.f32 %v11496_v63, %v2914_v62  ;;  %v2818_v43 = vsel %vm285_vm6, %v2794_v27, %v17417_v31  ;;  %v17425_v53 = vld [vmem:[#allocation99_spill] sm:$0xff] }
 0x57e   :  { %8116 = vmatprep.subr.bf16.mxu0 %v8115_v35  ;;  %v8191_v49 = vpack.c.bf16 %v2762_v28, %v2758_v60  ;;  %v8127_v24 = vpack.c.bf16 %v12052_v46, %v11997_v51  ;;  %v2821_v32 = vsel %vm285_vm6, %v17419_v40, %v2792_v5  ;;  %v2858_v42 = vmul.f32 %v17374_v8, %v2817_v56  ;;  %v17420_v5 = vld [vmem:[#allocation74_spill] sm:$0xff] }
 0x57f   :  { %8190 = vmatpush1.bf16.msra.mxu1 %v8189_v6  ;;  %v2822_v6 = vsel %vm285_vm6, %v17418_v2, %v2794_v27  ;;  %v2862_v47 = vmul.f32 %v17374_v8, %v2818_v43  ;;  %v2958_v48 = vmul.f32 %v17415_v12, %v2926_v44  ;;  %v2813_v7 = vsel %vm285_vm6, %v17416_v52, %v2808_v55  ;;  %v2910_v45 = vpop.permute.xlu0 %2909  ;;  %v17427_v44 = vld [vmem:[#allocation103_spill] sm:$0xff]  ;;  %v17430_v27 = vld [vmem:[#allocation88_spill] sm:$0xff] }
 0x580   :  { %8192 = vmatprep.subr.bf16.mxu1 %v8191_v49  ;;  %v2825_v51 = vsel %vm285_vm6, %v2808_v55, %v17419_v40  ;;  %v3019_v8 = vsel %vm373_vm7, %v17421_v23, %v17420_v5  ;;  %v12116_v46 = vsel %vm373_vm7, %v17422_v59, %v17421_v23  ;;  %v2861_v41 = vmul.f32 %v17372_v20, %v2822_v6  ;;  %v2810_v61 = vpop.permute.xlu1 %2809  ;;  %v17423_v55 = vld [vmem:[#allocation75_spill] sm:$0xff] }
 0x581   :  { %8118 = vmatpush1.bf16.msra.mxu0 %v8117_v22  ;;  %v8123_v35 = vpack.c.bf16 %v2862_v47, %v2858_v42  ;;  %v2857_v62 = vmul.f32 %v17372_v20, %v2821_v32  ;;  %v2814_v13 = vsel %vm285_vm6, %v17417_v31, %v2810_v61  ;;  %v2826_v54 = vsel %vm285_vm6, %v2810_v61, %v17418_v2 }
 0x582   :  { %8120 = vmatprep.subr.bf16.mxu0 %v8119_v19  ;;  %v17424_v19 = vld [vmem:[#allocation66_spill] sm:$0xff]  ;;  %v2859_v16 = vmul.f32 %v17380_v17, %v2813_v7  ;;  %v2863_v3 = vmul.f32 %v17380_v17, %v2814_v13  ;;  %v2864_v60 = vmul.f32 %v17381_v30, %v2826_v54  ;;  %v8205_v20 = vpack.c.bf16 %v12086_v39, %v12049_v25 }
 0x583   :  { %8194 = vmatpush1.bf16.msra.mxu1 %v8193_v33  ;;  %v3020_v21 = vsel %vm373_vm7, %v17424_v19, %v17423_v55  ;;  %v2919_v28 = vsel %vm329_vm5, %v2894_v11, %v17425_v53  ;;  %v12145_v52 = vpop.permute.xlu0 %2987  ;;  %v8203_v17 = vpack.c.bf16 %v2958_v48, %v12074_v36  ;;  %v8125_v34 = vpack.c.bf16 %v2861_v41, %v2857_v62  ;;  %v17429_v36 = vld [vmem:[#allocation100_spill] sm:$0xff]  ;;  %v17431_v48 = vld [vmem:[#allocation106_spill] sm:$0xff] }
 0x584   :  { %8196 = vmatprep.subr.bf16.mxu1 %v8195_v10  ;;  %v2860_v10 = vmul.f32 %v17381_v30, %v2825_v51  ;;  %v17426_v30 = vld [vmem:[#allocation47_spill] sm:$0xff]  ;;  %v2896_v25 = vpop.permute.xlu1 %2895  ;;  %v3058_v22 = vmul.f32 %v17427_v44, %v3020_v21  ;;  %v2923_v49 = vsel %vm329_vm5, %v17430_v27, %v2894_v11  ;;  %v2960_v39 = vmul.f32 %v17397_v15, %v2919_v28 }
 0x585   :  { %8122 = vmatpush1.bf16.msra.mxu0 %v8121_v1  ;;  %v3024_v50 = vsel %vm373_vm7, %v17426_v30, %v17424_v19  ;;  %v8201_v1 = vpack.c.bf16 %v2863_v3, %v2859_v16  ;;  %v3028_v26 = vsel %vm373_vm7, %v11906_v0, %v17426_v30  ;;  %v2924_v33 = vsel %vm329_vm5, %v17429_v36, %v2896_v25  ;;  %v3085_v16 = vld [vmem:[%s16569_s5] sm:$0xff] }
 0x586   :  { %8124 = vmatprep.subr.bf16.mxu0 %v8123_v35  ;;  %v8199_v56 = vpack.c.bf16 %v2864_v60, %v2860_v10  ;;  %v3015_v43 = vsel %vm373_vm7, %v17420_v5, %v11861_v18  ;;  %v2915_v2 = vsel %vm329_vm5, %v17425_v53, %v2910_v45  ;;  %v2927_v6 = vsel %vm329_vm5, %v2910_v45, %v17430_v27 }
 0x587   :  { %8198 = vmatpush1.bf16.msra.mxu1 %v8197_v37  ;;  %v2920_v37 = vsel %vm329_vm5, %v2896_v25, %v17428_v38  ;;  %v2996_v11 = vpop.permute.xlu0 %2995  ;;  %v3016_v40 = vsel %vm373_vm7, %v17423_v55, %v11906_v0  ;;  %v2963_v32 = vmul.f32 %v17389_v58, %v2924_v33  ;;  %v3060_v7 = vmul.f32 %v17431_v48, %v3028_v26  ;;  %v17433_v55 = vld [vmem:[#allocation105_spill] sm:$0xff]  ;;  %v3088_v25 = vld [vmem:[%s16569_s5 + $0x18] sm:$0xff] }
 0x588   :  { %v2964_v31 = vmul.f32 %v17397_v15, %v2920_v37  ;;  %8200 = vmatprep.subr.bf16.mxu1 %v8199_v56  ;;  %v3027_v15 = vsel %vm373_vm7, %v11861_v18, %v17422_v59  ;;  %v2912_v42 = vpop.permute.xlu1 %2911  ;;  %v2961_v45 = vmul.f32 %v11496_v63, %v2915_v2  ;;  %v2962_v0 = vmul.f32 %v17415_v12, %v2927_v6  ;;  %v17432_v59 = vld [vmem:[#allocation102_spill] sm:$0xff]  ;;  %v17434_v2 = vld [vmem:[#allocation55_spill] sm:$0xff]  ;;  %v3094_v6 = vld [vmem:[%s16569_s5 + $0x48] sm:$0xff] }
 0x589   :  { %8126 = vmatpush1.bf16.msra.mxu0 %v8125_v34  ;;  %v2916_v51 = vsel %vm329_vm5, %v17428_v38, %v2912_v42  ;;  %v2928_v18 = vsel %vm329_vm5, %v2912_v42, %v17429_v36  ;;  %v3057_v41 = vmul.f32 %v17432_v59, %v3024_v50  ;;  %v3056_v61 = vmul.f32 %v17431_v48, %v3027_v15  ;;  %v17436_v15 = vld [vmem:[#allocation54_spill] sm:$0xff]  ;;  %v17438_v42 = vld [vmem:[#allocation20_spill] sm:$0xff] }
 0x58a   :  { %8128 = vmatprep.subr.bf16.mxu0 %v8127_v24  ;;  %v8131_v47 = vpack.c.bf16 %v2964_v31, %v2960_v39  ;;  %v2959_v24 = vmul.f32 %v17389_v58, %v2923_v49  ;;  %v2965_v5 = vmul.f32 %v11496_v63, %v2916_v51  ;;  %v2966_v23 = vmul.f32 %v17415_v12, %v2928_v18  ;;  %v3091_v39 = vld [vmem:[%s16569_s5 + $0x30] sm:$0xff]  ;;  %v17440_v51 = vld [vmem:[#allocation7_spill] sm:$0xff] }
 0x58b   :  { %8202 = vmatpush1.bf16.msra.mxu1 %v8201_v1  ;;  %v3054_v58 = vmul.f32 %v17427_v44, %v3019_v8  ;;  %v3004_v35 = vpop.permute.xlu0 %3003  ;;  %v3059_v19 = vmul.f32 %v17433_v55, %v3016_v40  ;;  %v3053_v12 = vmul.f32 %v17432_v59, %v12116_v46  ;;  %v3055_v29 = vmul.f32 %v17433_v55, %v3015_v43 }
 0x58c   :  { %8204 = vmatprep.subr.bf16.mxu1 %v8203_v17  ;;  %v8133_v21 = vpack.c.bf16 %v2963_v32, %v2959_v24  ;;  %v8209_v62 = vpack.c.bf16 %v2965_v5, %v2961_v45  ;;  %v3006_v63 = vpop.permute.xlu1 %3005  ;;  %v8207_v13 = vpack.c.bf16 %v2966_v23, %v2962_v0  ;;  %v3021_v8 = vsel %vm373_vm7, %v2996_v11, %v3004_v35  ;;  %v3087_v32 = vld [vmem:[%s16569_s5 + $0x10] sm:$0xff] }
 0x58d   :  { %8130 = vmatpush1.bf16.msra.mxu0 %v8129_v14  ;;  %v8135_v57 = vpack.c.bf16 %v3058_v22, %v3054_v58  ;;  %v3025_v14 = vsel %vm373_vm7, %v12145_v52, %v2996_v11  ;;  %v8211_v54 = vpack.c.bf16 %v3060_v7, %v3056_v61  ;;  %v8137_v10 = vpack.c.bf16 %v3057_v41, %v3053_v12  ;;  %v17435_v11 = vld [vmem:[#allocation57_spill] sm:$0xff]  ;;  %v3096_v7 = vld [vmem:[%s16569_s5 + $0x58] sm:$0xff]  ;;  %v17446_v58 = vld [vmem:[#allocation8_spill] sm:$0xff] }
 0x58e   :  { %8132 = vmatprep.subr.bf16.mxu0 %v8131_v47  ;;  %v8213_v3 = vpack.c.bf16 %v3059_v19, %v3055_v29  ;;  %v3061_v53 = vmul.f32 %v17432_v59, %v3025_v14  ;;  %v3062_v28 = vmul.f32 %v17427_v44, %v3021_v8  ;;  %v17437_v40 = vmov 0.0   ;;  %v3090_v47 = vld [vmem:[%s16569_s5 + $0x28] sm:$0xff]  ;;  %v17448_v41 = vld [vmem:[#allocation9_spill] sm:$0xff]  ;;  %v17452_v19 = vld [vmem:[#allocation10_spill] sm:$0xff] }
 0x58f   :  { %8206 = vmatpush1.bf16.msra.mxu1 %v8205_v20  ;;  %v3012_v46 = vpop.permute.xlu0 %3011  ;;  %v3089_v20 = vld [vmem:[%s16569_s5 + $0x20] sm:$0xff] }
 0x590   :  { %8208 = vmatprep.subr.bf16.mxu1 %v8207_v13  ;;  %v2998_v60 = vpop.permute.xlu1 %2997  ;;  %v3017_v50 = vsel %vm373_vm7, %v3004_v35, %v3012_v46  ;;  %v3029_v56 = vsel %vm373_vm7, %v3012_v46, %v12145_v52 }
 0x591   :  { %8134 = vmatpush1.bf16.msra.mxu0 %v8133_v21  ;;  %v3022_v17 = vsel %vm373_vm7, %v2998_v60, %v3006_v63  ;;  %v3026_v30 = vsel %vm373_vm7, %v11957_v4, %v2998_v60  ;;  %v3063_v37 = vmul.f32 %v17433_v55, %v3017_v50  ;;  %v3064_v52 = vmul.f32 %v17431_v48, %v3029_v56  ;;  %v17465_v60 = vld [vmem:[#allocation12_spill] sm:$0xff] }
 0x592   :  { %8136 = vmatprep.subr.bf16.mxu0 %v8135_v57  ;;  %v3065_v34 = vmul.f32 %v17432_v59, %v3026_v30  ;;  %v3066_v1 = vmul.f32 %v17427_v44, %v3022_v17  ;;  %v3092_v44 = vld [vmem:[%s16569_s5 + $0x38] sm:$0xff] }
 0x593   :  { %8210 = vmatpush1.bf16.msra.mxu1 %v8209_v62  ;;  %v17469_v17 = vld [vmem:[#allocation14_spill] sm:$0xff] }
 0x594   :  { %8212 = vmatprep.subr.bf16.mxu1 %v8211_v54  ;;  %3326 = vmatmul.mubr.f32.vlgmr.msra.gmra.mrb[16].mxu0 %v3085_v16  ;;  %v8141_v22 = vpack.c.bf16 %v3065_v34, %v3061_v53  ;;  %v3014_v26 = vpop.permute.xlu1 %3013  ;;  %v8139_v38 = vpack.c.bf16 %v3066_v1, %v3062_v28  ;;  %v17467_v53 = vld [vmem:[#allocation13_spill] sm:$0xff] }
 0x595   :  { %8138 = vmatpush1.bf16.msra.mxu0 %v8137_v10  ;;  %3331 = vmatprep.mubr.f32.mxu0 %v3089_v20  ;;  %v3018_v36 = vsel %vm373_vm7, %v3006_v63, %v3014_v26  ;;  %v3030_v33 = vsel %vm373_vm7, %v3014_v26, %v11957_v4  ;;  %v3095_v4 = vld [vmem:[%s16569_s5 + $0x50] sm:$0xff]  ;;  %v17463_v10 = vld [vmem:[#allocation11_spill] sm:$0xff] }
 0x596   :  { %3504 = vmatmul.mubr.f32.vlgmr.msra.gmra.mrb[16].mxu1 %v3085_v16  ;;  %v3067_v27 = vmul.f32 %v17433_v55, %v3018_v36  ;;  %v3068_v49 = vmul.f32 %v17431_v48, %v3030_v33  ;;  %8140 = vmatprep.subr.bf16.mxu0 %v8139_v38  ;;  %v3093_v48 = vld [vmem:[%s16569_s5 + $0x40] sm:$0xff]  ;;  %v17473_v38 = vld [vmem:[#allocation17_spill] sm:$0xff] }
 0x597   :  { %8214 = vmatpush1.bf16.msra.mxu1 %v8213_v3  ;;  %3509 = vmatprep.mubr.f32.mxu1 %v3089_v20 }
 0x598   :  { %3332 = vmatmul.mubr.f32.gmra.mrb[18].mxu0 %v3088_v25  ;;  %v8217_v31 = vpack.c.bf16 %v3067_v27, %v3063_v37  ;;  %v8215_v43 = vpack.c.bf16 %v3068_v49, %v3064_v52  ;;  %v17475_v37 = vld [vmem:[#allocation16_spill] sm:$0xff]  ;;  %v17477_v27 = vld [vmem:[#allocation18_spill] sm:$0xff] }
 0x599   :  { %8142 = vmatpush1.bf16.msra.mxu0 %v8141_v22  ;;  %3337 = vmatprep.mubr.f32.mxu0 %v3092_v44 }
 0x59a   :  { %3510 = vmatmul.mubr.f32.gmra.mrb[18].mxu1 %v3088_v25  ;;  %8144 = vmatprep.subr.bf16.mxu0 %v17434_v2  ;;  %v17471_v25 = vld [vmem:[#allocation15_spill] sm:$0xff]  ;;  %v17502_v2 = vld [vmem:[#allocation4_spill] sm:$0xff] }
 0x59b   :  { %3515 = vmatprep.mubr.f32.mxu1 %v3092_v44  ;;  %8216 = vmatprep.subr.bf16.mxu1 %v8215_v43 }
 0x59c   :  { %3338 = vmatmul.mubr.f32.gmra.mrb[20].mxu0 %v3091_v39  ;;  %8218 = vmatpush1.bf16.msra.mxu1 %v8217_v31 }
 0x59d   :  { %3343 = vmatprep.mubr.f32.mxu0 %v3095_v4  ;;  %8146 = vmatpush1.bf16.msra.mxu0 %v17435_v11 }
 0x59e   :  { %3516 = vmatmul.mubr.f32.gmra.mrb[20].mxu1 %v3091_v39  ;;  %8220 = vmatprep.subr.bf16.mxu1 %v17436_v15 }
 0x59f   :  { %3521 = vmatprep.mubr.f32.mxu1 %v3095_v4 }
 0x5a0   :  { %3344 = vmatmul.mubr.f32.gmra.mrb[22].mxu0 %v3094_v6  ;;  %8222 = vmatpush1.bf16.msra.mxu1 %v17438_v42 }
 0x5a1   :  { %3414 = vmatprep.mubr.f32.mxu0 %v17437_v40 }
 0x5a2   :  { %3522 = vmatmul.mubr.f32.gmra.mrb[22].mxu1 %v3094_v6 }
 0x5a3   :  { %3592 = vmatprep.mubr.f32.mxu1 %v17437_v40 }
 0x5a4   :  { %7816 = vmatmul.mubr.msk.f32.vlgmr.msra.gmra.mrb[16].mxu0 %vm1772_vm9, %v3087_v32 }
 0x5a5   :  { %3420 = vmatprep.mubr.f32.mxu0 %v17437_v40 }
 0x5a6   :  { %7820 = vmatmul.mubr.msk.f32.vlgmr.msra.gmra.mrb[16].mxu1 %vm1772_vm9, %v3087_v32 }
 0x5a7   :  { %3598 = vmatprep.mubr.f32.mxu1 %v17437_v40 }
 0x5a8   :  { %7817 = vmatmul.mubr.msk.f32.gmra.mrb[18].mxu0 %vm1772_vm9, %v3090_v47 }
 0x5a9   :  { %3426 = vmatprep.mubr.f32.mxu0 %v17437_v40 }
 0x5aa   :  { %7821 = vmatmul.mubr.msk.f32.gmra.mrb[18].mxu1 %vm1772_vm9, %v3090_v47 }
 0x5ab   :  { %3604 = vmatprep.mubr.f32.mxu1 %v17437_v40 }
 0x5ac   :  { %7818 = vmatmul.mubr.msk.f32.gmra.mrb[20].mxu0 %vm1772_vm9, %v3093_v48 }
 0x5ad   :  { %3432 = vmatprep.mubr.f32.mxu0 %v17437_v40 }
 0x5ae   :  { %7822 = vmatmul.mubr.msk.f32.gmra.mrb[20].mxu1 %vm1772_vm9, %v3093_v48 }
 0x5af   :  { %3610 = vmatprep.mubr.f32.mxu1 %v17437_v40 }
 0x5b0   :  { %7819 = vmatmul.mubr.msk.f32.gmra.mrb[22].mxu0 %vm1772_vm9, %v3096_v7 }
 0x5b2   :  { %7823 = vmatmul.mubr.msk.f32.gmra.mrb[22].mxu1 %vm1772_vm9, %v3096_v7 }
 0x677   :  { %v12290_v24 = vpop.f32.mrb[16].mxu0 }
 0x678   :  { %17439 = vst [vmem:[#allocation64_spill] sm:$0xff] %v12290_v24  ;;  %v12294_v18 = vadd.f32 %v12290_v24, %v17440_v51  ;;  %v12296_v45 = vpop.f32.mrb[17].mxu0  ;;  %v17500_v51 = vld [vmem:[#allocation36_spill] sm:$0xff] }
 0x679   :  { %17442 = vst [vmem:[#allocation78_spill] sm:$0xff] %v12296_v45  ;;  %v12298_v0 = vpop.f32.mrb[16].mxu1  ;;  %v12406_v3 = vadd.f32 %v12296_v45, %v17463_v10  ;;  %v17497_v45 = vld [vmem:[#allocation3_spill] sm:$0xff] }
 0x67a   :  { %17441 = vst [vmem:[#allocation72_spill] sm:$0xff] %v12294_v18  ;;  %17443 = vst [vmem:[#allocation32_spill] sm:$0xff] %v12298_v0  ;;  %v12300_v5 = vpop.f32.mrb[17].mxu1  ;;  %3617 = vrot.lane.b32.xlu0 %v12294_v18, %s8981_s13  ;;  %v12308_v59 = vadd.f32 %v12298_v0, %v17446_v58  ;;  %v17498_v58 = vld [vmem:[#allocation37_spill] sm:$0xff] }
 0x67b   :  { %17444 = vst [vmem:[#allocation90_spill] sm:$0xff] %v12300_v5  ;;  %v12304_v23 = vpop.f32.mrb[18].mxu0  ;;  %17464 = vst [vmem:[#allocation43_spill] sm:$0xff] %v12406_v3  ;;  %v12414_v20 = vadd.f32 %v12300_v5, %v17465_v60 }
 0x67c   :  { %17445 = vst [vmem:[#allocation30_spill] sm:$0xff] %v12304_v23  ;;  %17447 = vst [vmem:[#allocation53_spill] sm:$0xff] %v12308_v59  ;;  %v12312_v61 = vadd.f32 %v12304_v23, %v17448_v41  ;;  %v12314_v35 = vpop.f32.mrb[19].mxu0 }
 0x67d   :  { %17450 = vst [vmem:[#allocation50_spill] sm:$0xff] %v12314_v35  ;;  %v12316_v55 = vpop.f32.mrb[18].mxu1  ;;  %17466 = vst [vmem:[#allocation49_spill] sm:$0xff] %v12414_v20  ;;  %v12418_v28 = vadd.f32 %v12314_v35, %v17467_v53  ;;  %v17494_v53 = vld [vmem:[#allocation34_spill] sm:$0xff] }
 0x67e   :  { %17449 = vst [vmem:[#allocation51_spill] sm:$0xff] %v12312_v61  ;;  %17451 = vst [vmem:[#allocation29_spill] sm:$0xff] %v12316_v55  ;;  %v12320_v21 = vadd.f32 %v12316_v55, %v17452_v19  ;;  %v12322_v62 = vpop.f32.mrb[19].mxu1  ;;  %3619 = vrot.lane.b32.xlu1 %v12312_v61, %s8981_s13  ;;  %3633 = vrot.lane.b32.xlu0 %v12308_v59, %s8981_s13  ;;  %v3665_v19 = vld [vmem:[%s16565_s1] ss:$8 sm:$0xf] }
 0x67f   :  { %17454 = vst [vmem:[#allocation35_spill] sm:$0xff] %v12322_v62  ;;  %v12330_v13 = vpop.f32.mrb[20].mxu0  ;;  %17468 = vst [vmem:[#allocation44_spill] sm:$0xff] %v12418_v28  ;;  %v12426_v30 = vadd.f32 %v12322_v62, %v17469_v17  ;;  %v12624_v60 = vrot.slane %v3665_v19, %v17497_v45 }
 0x680   :  { %17453 = vst [vmem:[#allocation61_spill] sm:$0xff] %v12320_v21  ;;  %17455 = vst [vmem:[#allocation91_spill] sm:$0xff] %v12330_v13  ;;  %v12334_v29 = vpop.f32.mrb[21].mxu0  ;;  %v12488_v56 = vadd.f32 %v12330_v13, %v17471_v25 }
 0x681   :  { %17456 = vst [vmem:[#allocation46_spill] sm:$0xff] %v12334_v29  ;;  %v12336_v57 = vpop.f32.mrb[20].mxu1  ;;  %17470 = vst [vmem:[#allocation27_spill] sm:$0xff] %v12426_v30  ;;  %v12619_v41 = vadd.f32 %v12334_v29, %v17494_v53 }
 0x682   :  { %17457 = vst [vmem:[#allocation33_spill] sm:$0xff] %v12336_v57  ;;  %v12338_v14 = vpop.f32.mrb[21].mxu1  ;;  %3635 = vrot.lane.b32.xlu1 %v12320_v21, %s8981_s13  ;;  %3719 = vrot.lane.b32.xlu0 %v12294_v18, %s8982_s18  ;;  %17472 = vst [vmem:[#allocation52_spill] sm:$0xff] %v12488_v56  ;;  %v12500_v44 = vadd.f32 %v12336_v57, %v17473_v38 }
 0x683   :  { %17458 = vst [vmem:[#allocation84_spill] sm:$0xff] %v12338_v14  ;;  %v12344_v8 = vpop.f32.mrb[22].mxu0  ;;  %17495 = vst [vmem:[#allocation26_spill] sm:$0xff] %v12619_v41  ;;  %v12639_v42 = vadd.f32 %v12338_v14, %v17500_v51 }
 0x684   :  { %17459 = vst [vmem:[#allocation92_spill] sm:$0xff] %v12344_v8  ;;  %v12346_v54 = vpop.f32.mrb[23].mxu0  ;;  %17474 = vst [vmem:[#allocation25_spill] sm:$0xff] %v12500_v44  ;;  %v12504_v36 = vadd.f32 %v12344_v8, %v17475_v37 }
 0x685   :  { %17460 = vst [vmem:[#allocation79_spill] sm:$0xff] %v12346_v54  ;;  %v12348_v16 = vpop.f32.mrb[22].mxu1  ;;  %v12635_v29 = vadd.f32 %v12346_v54, %v17498_v58  ;;  %17501 = vst [vmem:[#allocation98_spill] sm:$0xff] %v12639_v42 }
 0x686   :  { %17461 = vst [vmem:[#allocation31_spill] sm:$0xff] %v12348_v16  ;;  %v12350_v46 = vpop.f32.mrb[23].mxu1  ;;  %3721 = vrot.lane.b32.xlu1 %v12312_v61, %s8982_s18  ;;  %3735 = vrot.lane.b32.xlu0 %v12308_v59, %s8982_s18  ;;  %17476 = vst [vmem:[#allocation93_spill] sm:$0xff] %v12504_v36  ;;  %v12516_v49 = vadd.f32 %v12348_v16, %v17477_v27 }
 0x687   :  { %17462 = vst [vmem:[#allocation65_spill] sm:$0xff] %v12350_v46  ;;  %17499 = vst [vmem:[#allocation19_spill] sm:$0xff] %v12635_v29 }
 0x688   :  { %17478 = vst [vmem:[#allocation67_spill] sm:$0xff] %v12516_v49 }
 0x68a   :  { %3737 = vrot.lane.b32.xlu1 %v12320_v21, %s8982_s18  ;;  %3821 = vrot.lane.b32.xlu0 %v12294_v18, %s8983_s0 }
 0x68e   :  { %3823 = vrot.lane.b32.xlu1 %v12312_v61, %s8983_s0  ;;  %3837 = vrot.lane.b32.xlu0 %v12308_v59, %s8983_s0 }
 0x692   :  { %3839 = vrot.lane.b32.xlu1 %v12320_v21, %s8983_s0  ;;  %3923 = vrot.lane.b32.xlu0 %v12294_v18, %s8984_s19 }
 0x696   :  { %3925 = vrot.lane.b32.xlu1 %v12312_v61, %s8984_s19  ;;  %3939 = vrot.lane.b32.xlu0 %v12308_v59, %s8984_s19 }
 0x69a   :  { %3941 = vrot.lane.b32.xlu1 %v12320_v21, %s8984_s19  ;;  %4041 = vrot.lane.b32.xlu0 %v12294_v18, %s8985_s20 }
 0x69e   :  { %4043 = vrot.lane.b32.xlu1 %v12312_v61, %s8985_s20  ;;  %4057 = vrot.lane.b32.xlu0 %v12308_v59, %s8985_s20 }
 0x6a2   :  { %4059 = vrot.lane.b32.xlu1 %v12320_v21, %s8985_s20  ;;  %4143 = vrot.lane.b32.xlu0 %v12294_v18, %s8986_s21 }
 0x6a6   :  { %4145 = vrot.lane.b32.xlu1 %v12312_v61, %s8986_s21  ;;  %4159 = vrot.lane.b32.xlu0 %v12308_v59, %s8986_s21 }
 0x6aa   :  { %4161 = vrot.lane.b32.xlu1 %v12320_v21, %s8986_s21  ;;  %4245 = vrot.lane.b32.xlu0 %v12294_v18, %s8987_s22 }
 0x6ae   :  { %4247 = vrot.lane.b32.xlu1 %v12312_v61, %s8987_s22  ;;  %4261 = vrot.lane.b32.xlu0 %v12308_v59, %s8987_s22 }
 0x6b2   :  { %4263 = vrot.lane.b32.xlu1 %v12320_v21, %s8987_s22  ;;  %4347 = vrot.lane.b32.xlu0 %v12294_v18, %s8988_s23 }
 0x6b6   :  { %4349 = vrot.lane.b32.xlu1 %v12312_v61, %s8988_s23  ;;  %4363 = vrot.lane.b32.xlu0 %v12308_v59, %s8988_s23 }
 0x6ba   :  { %4365 = vrot.lane.b32.xlu1 %v12320_v21, %s8988_s23  ;;  %3625 = vrot.lane.b32.xlu0 %v12406_v3, %s8981_s13 }
 0x6be   :  { %3627 = vrot.lane.b32.xlu1 %v12418_v28, %s8981_s13  ;;  %3641 = vrot.lane.b32.xlu0 %v12414_v20, %s8981_s13 }
 0x6c2   :  { %3643 = vrot.lane.b32.xlu1 %v12426_v30, %s8981_s13  ;;  %3727 = vrot.lane.b32.xlu0 %v12406_v3, %s8982_s18 }
 0x6c6   :  { %3729 = vrot.lane.b32.xlu1 %v12418_v28, %s8982_s18  ;;  %3743 = vrot.lane.b32.xlu0 %v12414_v20, %s8982_s18 }
 0x6ca   :  { %3745 = vrot.lane.b32.xlu1 %v12426_v30, %s8982_s18  ;;  %3829 = vrot.lane.b32.xlu0 %v12406_v3, %s8983_s0 }
 0x6ce   :  { %3831 = vrot.lane.b32.xlu1 %v12418_v28, %s8983_s0  ;;  %3845 = vrot.lane.b32.xlu0 %v12414_v20, %s8983_s0 }
 0x6d2   :  { %3847 = vrot.lane.b32.xlu1 %v12426_v30, %s8983_s0  ;;  %3931 = vrot.lane.b32.xlu0 %v12406_v3, %s8984_s19 }
 0x6d6   :  { %3933 = vrot.lane.b32.xlu1 %v12418_v28, %s8984_s19  ;;  %3947 = vrot.lane.b32.xlu0 %v12414_v20, %s8984_s19 }
 0x6da   :  { %3949 = vrot.lane.b32.xlu1 %v12426_v30, %s8984_s19  ;;  %4049 = vrot.lane.b32.xlu0 %v12406_v3, %s8985_s20 }
 0x6de   :  { %4051 = vrot.lane.b32.xlu1 %v12418_v28, %s8985_s20  ;;  %4065 = vrot.lane.b32.xlu0 %v12414_v20, %s8985_s20 }
 0x6e2   :  { %4067 = vrot.lane.b32.xlu1 %v12426_v30, %s8985_s20  ;;  %4151 = vrot.lane.b32.xlu0 %v12406_v3, %s8986_s21 }
 0x6e6   :  { %4153 = vrot.lane.b32.xlu1 %v12418_v28, %s8986_s21  ;;  %4167 = vrot.lane.b32.xlu0 %v12414_v20, %s8986_s21 }
 0x6ea   :  { %4169 = vrot.lane.b32.xlu1 %v12426_v30, %s8986_s21  ;;  %4253 = vrot.lane.b32.xlu0 %v12406_v3, %s8987_s22 }
 0x6ec   :  { %v12472_v50 = vpop.permute.xlu0 %3617 }
 0x6ee   :  { %4255 = vrot.lane.b32.xlu1 %v12418_v28, %s8987_s22  ;;  %4269 = vrot.lane.b32.xlu0 %v12414_v20, %s8987_s22 }
 0x6f0   :  { %v12478_v34 = vpop.permute.xlu1 %3619  ;;  %v12480_v1 = vpop.permute.xlu0 %3633 }
 0x6f2   :  { %4271 = vrot.lane.b32.xlu1 %v12426_v30, %s8987_s22  ;;  %4355 = vrot.lane.b32.xlu0 %v12406_v3, %s8988_s23 }
 0x6f4   :  { %v12490_v22 = vpop.permute.xlu1 %3635  ;;  %v12492_v26 = vpop.permute.xlu0 %3719 }
 0x6f6   :  { %4357 = vrot.lane.b32.xlu1 %v12418_v28, %s8988_s23  ;;  %3621 = vrot.lane.b32.xlu0 %v12488_v56, %s8981_s13 }
 0x6f8   :  { %v12506_v33 = vpop.permute.xlu1 %3721  ;;  %v12508_v52 = vpop.permute.xlu0 %3735 }
 0x6fa   :  { %3623 = vrot.lane.b32.xlu1 %v12504_v36, %s8981_s13  ;;  %3637 = vrot.lane.b32.xlu0 %v12500_v44, %s8981_s13 }
 0x6fc   :  { %v12518_v39 = vpop.permute.xlu1 %3737  ;;  %v12520_v31 = vpop.permute.xlu0 %3821 }
 0x6fe   :  { %3639 = vrot.lane.b32.xlu1 %v12516_v49, %s8981_s13  ;;  %3723 = vrot.lane.b32.xlu0 %v12488_v56, %s8982_s18 }
 0x700   :  { %v12526_v43 = vpop.permute.xlu1 %3823  ;;  %v12528_v4 = vpop.permute.xlu0 %3837 }
 0x702   :  { %3725 = vrot.lane.b32.xlu1 %v12504_v36, %s8982_s18  ;;  %3739 = vrot.lane.b32.xlu0 %v12500_v44, %s8982_s18 }
 0x704   :  { %v12534_v6 = vpop.permute.xlu1 %3839  ;;  %v12536_v32 = vpop.permute.xlu0 %3923 }
 0x706   :  { %3741 = vrot.lane.b32.xlu1 %v12516_v49, %s8982_s18  ;;  %3825 = vrot.lane.b32.xlu0 %v12488_v56, %s8983_s0 }
 0x708   :  { %v12542_v47 = vpop.permute.xlu1 %3925  ;;  %v12544_v48 = vpop.permute.xlu0 %3939 }
 0x70a   :  { %3827 = vrot.lane.b32.xlu1 %v12504_v36, %s8983_s0  ;;  %3841 = vrot.lane.b32.xlu0 %v12500_v44, %s8983_s0 }
 0x70c   :  { %v12550_v7 = vpop.permute.xlu1 %3941  ;;  %v12552_v12 = vpop.permute.xlu0 %4041 }
 0x70d   :  { %17479 = vst [vmem:[#allocation94_spill] sm:$0xff] %v12552_v12 }
 0x70e   :  { %3843 = vrot.lane.b32.xlu1 %v12516_v49, %s8983_s0  ;;  %3927 = vrot.lane.b32.xlu0 %v12488_v56, %s8984_s19 }
 0x710   :  { %v12558_v63 = vpop.permute.xlu1 %4043  ;;  %v12560_v16 = vpop.permute.xlu0 %4057 }
 0x711   :  { %17480 = vst [vmem:[#allocation41_spill] sm:$0xff] %v12558_v63  ;;  %17481 = vst [vmem:[#allocation60_spill] sm:$0xff] %v12560_v16 }
 0x712   :  { %3929 = vrot.lane.b32.xlu1 %v12504_v36, %s8984_s19  ;;  %3943 = vrot.lane.b32.xlu0 %v12500_v44, %s8984_s19 }
 0x714   :  { %v12566_v8 = vpop.permute.xlu1 %4059  ;;  %v12568_v27 = vpop.permute.xlu0 %4143 }
 0x715   :  { %17482 = vst [vmem:[#allocation62_spill] sm:$0xff] %v12566_v8  ;;  %17483 = vst [vmem:[#allocation22_spill] sm:$0xff] %v12568_v27 }
 0x716   :  { %3945 = vrot.lane.b32.xlu1 %v12516_v49, %s8984_s19  ;;  %4045 = vrot.lane.b32.xlu0 %v12488_v56, %s8985_s20 }
 0x718   :  { %v12574_v37 = vpop.permute.xlu1 %4145  ;;  %v12576_v57 = vpop.permute.xlu0 %4159 }
 0x719   :  { %17484 = vst [vmem:[#allocation95_spill] sm:$0xff] %v12574_v37  ;;  %17485 = vst [vmem:[#allocation96_spill] sm:$0xff] %v12576_v57 }
 0x71a   :  { %4047 = vrot.lane.b32.xlu1 %v12504_v36, %s8985_s20  ;;  %4061 = vrot.lane.b32.xlu0 %v12500_v44, %s8985_s20 }
 0x71c   :  { %v12582_v13 = vpop.permute.xlu1 %4161  ;;  %v12584_v38 = vpop.permute.xlu0 %4245 }
 0x71d   :  { %17486 = vst [vmem:[#allocation42_spill] sm:$0xff] %v12582_v13  ;;  %17487 = vst [vmem:[#allocation58_spill] sm:$0xff] %v12584_v38 }
 0x71e   :  { %4063 = vrot.lane.b32.xlu1 %v12516_v49, %s8985_s20  ;;  %4147 = vrot.lane.b32.xlu0 %v12488_v56, %s8986_s21 }
 0x720   :  { %v12590_v25 = vpop.permute.xlu1 %4247  ;;  %v12592_v62 = vpop.permute.xlu0 %4261 }
 0x721   :  { %17488 = vst [vmem:[#allocation48_spill] sm:$0xff] %v12590_v25  ;;  %17489 = vst [vmem:[#allocation40_spill] sm:$0xff] %v12592_v62 }
 0x722   :  { %4149 = vrot.lane.b32.xlu1 %v12504_v36, %s8986_s21  ;;  %4163 = vrot.lane.b32.xlu0 %v12500_v44, %s8986_s21 }
 0x724   :  { %v12598_v55 = vpop.permute.xlu1 %4263  ;;  %v12600_v35 = vpop.permute.xlu0 %4347 }
 0x725   :  { %17490 = vst [vmem:[#allocation39_spill] sm:$0xff] %v12598_v55  ;;  %17491 = vst [vmem:[#allocation97_spill] sm:$0xff] %v12600_v35  ;;  %v17506_v55 = vld [vmem:[#allocation6_spill] sm:$0xff] }
 0x726   :  { %4165 = vrot.lane.b32.xlu1 %v12516_v49, %s8986_s21  ;;  %4249 = vrot.lane.b32.xlu0 %v12488_v56, %s8987_s22  ;;  %v12672_v59 = vrot.slane %v3665_v19, %v17506_v55 }
 0x728   :  { %v12606_v17 = vpop.permute.xlu1 %4349  ;;  %v12608_v23 = vpop.permute.xlu0 %4363 }
 0x729   :  { %17492 = vst [vmem:[#allocation80_spill] sm:$0xff] %v12606_v17  ;;  %17493 = vst [vmem:[#allocation28_spill] sm:$0xff] %v12608_v23  ;;  %v12647_v17 = vrot.slane %v3665_v19, %v17502_v2 }
 0x72a   :  { %4251 = vrot.lane.b32.xlu1 %v12504_v36, %s8987_s22  ;;  %4265 = vrot.lane.b32.xlu0 %v12500_v44, %s8987_s22 }
 0x72c   :  { %v12621_v5 = vpop.permute.xlu1 %4365  ;;  %v3626_v0 = vpop.permute.xlu0 %3625 }
 0x72d   :  { %17496 = vst [vmem:[#allocation56_spill] sm:$0xff] %v12621_v5  ;;  %v3657_v24 = vsel %vm62_vm0, %v12472_v50, %v3626_v0  ;;  %v17503_v5 = vld [vmem:[#allocation5_spill] sm:$0xff] }
 0x72e   :  { %4267 = vrot.lane.b32.xlu1 %v12516_v49, %s8987_s22  ;;  %3629 = vrot.lane.b32.xlu0 %v12619_v41, %s8981_s13  ;;  %v3688_v15 = vmul.f32 %v12624_v60, %v3657_v24  ;;  %v12650_v54 = vrot.slane %v3665_v19, %v17503_v5 }
 0x730   :  { %v3628_v53 = vpop.permute.xlu1 %3627  ;;  %v3642_v10 = vpop.permute.xlu0 %3641 }
 0x731   :  { %v3658_v40 = vsel %vm62_vm0, %v12478_v34, %v3628_v53  ;;  %v3649_v58 = vsel %vm62_vm0, %v12480_v1, %v3642_v10  ;;  %v3661_v14 = vsel %vm62_vm0, %v3642_v10, %v12472_v50  ;;  %v3654_v51 = vsel %vm62_vm0, %v3628_v53, %v12490_v22 }
 0x732   :  { %v3692_v11 = vmul.f32 %v12624_v60, %v3658_v40  ;;  %3631 = vrot.lane.b32.xlu1 %v12635_v29, %s8981_s13  ;;  %3645 = vrot.lane.b32.xlu0 %v12639_v42, %s8981_s13  ;;  %v17504_v40 = vld [vmem:[#allocation38_spill] sm:$0xff]  ;;  %v3653_v10 = vsel %vm62_vm0, %v3626_v0, %v12480_v1  ;;  %v3687_v53 = vmul.f32 %v12647_v17, %v3661_v14 }
 0x733   :  { %v12664_v24 = vadd.f32 %v12350_v46, %v17504_v40  ;;  %v3690_v40 = vmul.f32 %v12650_v54, %v3649_v58  ;;  %v3693_v0 = vmul.f32 %v12672_v59, %v3654_v51  ;;  %v3689_v58 = vmul.f32 %v12672_v59, %v3653_v10 }
 0x734   :  { %v3644_v35 = vpop.permute.xlu1 %3643  ;;  %v12669_v23 = vpop.permute.xlu0 %3727  ;;  %v8223_v25 = vpack.c.bf16 %v3692_v11, %v3688_v15 }
 0x735   :  { %17505 = vst [vmem:[#allocation68_spill] sm:$0xff] %v12664_v24  ;;  %v3650_v50 = vsel %vm62_vm0, %v12490_v22, %v3644_v35  ;;  %v3662_v46 = vsel %vm62_vm0, %v3644_v35, %v12478_v34 }
 0x736   :  { %v3691_v11 = vmul.f32 %v12647_v17, %v3662_v46  ;;  %v3694_v15 = vmul.f32 %v12650_v54, %v3650_v50  ;;  %3647 = vrot.lane.b32.xlu1 %v12664_v24, %s8981_s13  ;;  %3731 = vrot.lane.b32.xlu0 %v12619_v41, %s8982_s18  ;;  %v8301_v46 = vpack.c.bf16 %v3693_v0, %v3689_v58 }
 0x737   :  { %8224 = vmatprep.subr.bf16.mxu0 %v8223_v25 }
 0x738   :  { %v8225_v19 = vpack.c.bf16 %v3691_v11, %v3687_v53  ;;  %v12692_v1 = vpop.permute.xlu1 %3729  ;;  %v12694_v35 = vpop.permute.xlu0 %3743  ;;  %v8299_v14 = vpack.c.bf16 %v3694_v15, %v3690_v40 }
 0x73a   :  { %3733 = vrot.lane.b32.xlu1 %v12635_v29, %s8982_s18  ;;  %3747 = vrot.lane.b32.xlu0 %v12639_v42, %s8982_s18 }
 0x73b   :  { %8226 = vmatpush1.bf16.msra.mxu0 %v8225_v19  ;;  %8300 = vmatprep.subr.bf16.mxu1 %v8299_v14 }
 0x73c   :  { %v12701_v51 = vpop.permute.xlu1 %3745  ;;  %v12703_v34 = vpop.permute.xlu0 %3829  ;;  %8302 = vmatpush1.bf16.msra.mxu1 %v8301_v46 }
 0x73e   :  { %3749 = vrot.lane.b32.xlu1 %v12664_v24, %s8982_s18  ;;  %3833 = vrot.lane.b32.xlu0 %v12619_v41, %s8983_s0 }
 0x740   :  { %v12709_v25 = vpop.permute.xlu1 %3831  ;;  %v12711_v22 = vpop.permute.xlu0 %3845 }
 0x742   :  { %3835 = vrot.lane.b32.xlu1 %v12635_v29, %s8983_s0  ;;  %3849 = vrot.lane.b32.xlu0 %v12639_v42, %s8983_s0 }
 0x744   :  { %v12717_v40 = vpop.permute.xlu1 %3847  ;;  %v12719_v10 = vpop.permute.xlu0 %3931 }
 0x746   :  { %3851 = vrot.lane.b32.xlu1 %v12664_v24, %s8983_s0  ;;  %3935 = vrot.lane.b32.xlu0 %v12619_v41, %s8984_s19 }
 0x748   :  { %v12725_v50 = vpop.permute.xlu1 %3933  ;;  %v12727_v53 = vpop.permute.xlu0 %3947 }
 0x74a   :  { %3937 = vrot.lane.b32.xlu1 %v12635_v29, %s8984_s19  ;;  %3951 = vrot.lane.b32.xlu0 %v12639_v42, %s8984_s19 }
 0x74c   :  { %v12733_v11 = vpop.permute.xlu1 %3949  ;;  %v12735_v15 = vpop.permute.xlu0 %4049 }
 0x74d   :  { %17507 = vst [vmem:[#allocation24_spill] sm:$0xff] %v12733_v11  ;;  %17508 = vst [vmem:[#allocation77_spill] sm:$0xff] %v12735_v15 }
 0x74e   :  { %3953 = vrot.lane.b32.xlu1 %v12664_v24, %s8984_s19  ;;  %4371 = vrot.lane.b32.xlu0 %v12414_v20, %s8988_s23  ;;  %v7829_v20 = vld [vmem:[%s16565_s1 + $0x7] ss:$8 sm:$0xf] }
 0x750   :  { %v12741_v0 = vpop.permute.xlu1 %4051  ;;  %v12743_v19 = vpop.permute.xlu0 %4065 }
 0x751   :  { %17509 = vst [vmem:[#allocation76_spill] sm:$0xff] %v12741_v0  ;;  %17510 = vst [vmem:[#allocation81_spill] sm:$0xff] %v12743_v19 }
 0x752   :  { %4373 = vrot.lane.b32.xlu1 %v12426_v30, %s8988_s23  ;;  %4053 = vrot.lane.b32.xlu0 %v12619_v41, %s8985_s20  ;;  %v3756_v30 = vsel %vm105_vm1, %v12692_v1, %v12518_v39 }
 0x754   :  { %v12749_v14 = vpop.permute.xlu1 %4067  ;;  %v12751_v58 = vpop.permute.xlu0 %4151 }
 0x755   :  { %17511 = vst [vmem:[#allocation45_spill] sm:$0xff] %v12749_v14  ;;  %17512 = vst [vmem:[#allocation82_spill] sm:$0xff] %v12751_v58 }
 0x756   :  { %4353 = vrot.lane.b32.xlu1 %v12504_v36, %s8988_s23  ;;  %4069 = vrot.lane.b32.xlu0 %v12639_v42, %s8985_s20 }
 0x758   :  { %v12757_v46 = vpop.permute.xlu1 %4153  ;;  %v12759_v21 = vpop.permute.xlu0 %4167 }
 0x759   :  { %17513 = vst [vmem:[#allocation70_spill] sm:$0xff] %v12757_v46  ;;  %17514 = vst [vmem:[#allocation83_spill] sm:$0xff] %v12759_v21 }
 0x75a   :  { %4055 = vrot.lane.b32.xlu1 %v12635_v29, %s8985_s20  ;;  %4155 = vrot.lane.b32.xlu0 %v12619_v41, %s8986_s21 }
 0x75c   :  { %v12765_v62 = vpop.permute.xlu1 %4169  ;;  %v12767_v38 = vpop.permute.xlu0 %4253 }
 0x75d   :  { %17515 = vst [vmem:[#allocation23_spill] sm:$0xff] %v12765_v62  ;;  %17516 = vst [vmem:[#allocation21_spill] sm:$0xff] %v12767_v38 }
 0x75e   :  { %4071 = vrot.lane.b32.xlu1 %v12664_v24, %s8985_s20  ;;  %4171 = vrot.lane.b32.xlu0 %v12639_v42, %s8986_s21 }
 0x760   :  { %v12773_v18 = vpop.permute.xlu1 %4255  ;;  %v12775_v61 = vpop.permute.xlu0 %4269 }
 0x761   :  { %17517 = vst [vmem:[#allocation63_spill] sm:$0xff] %v12773_v18  ;;  %17518 = vst [vmem:[#allocation59_spill] sm:$0xff] %v12775_v61  ;;  %v4450_v61 = vld [vmem:[%s16570_s6 + $0x8] sm:$0xff] }
 0x762   :  { %4157 = vrot.lane.b32.xlu1 %v12635_v29, %s8986_s21  ;;  %4257 = vrot.lane.b32.xlu0 %v12619_v41, %s8987_s22 }
 0x763   :  { %4689 = vmatprep.mubr.f32.mxu0 %v4450_v61  ;;  %4867 = vmatprep.mubr.f32.mxu1 %v4450_v61 }
 0x764   :  { %v12781_v21 = vpop.permute.xlu1 %4271  ;;  %v12783_v62 = vpop.permute.xlu0 %4355 }
 0x765   :  { %17519 = vst [vmem:[#allocation69_spill] sm:$0xff] %v12781_v21  ;;  %17520 = vst [vmem:[#allocation101_spill] sm:$0xff] %v12783_v62 }
 0x766   :  { %4173 = vrot.lane.b32.xlu1 %v12664_v24, %s8986_s21  ;;  %4273 = vrot.lane.b32.xlu0 %v12639_v42, %s8987_s22 }
 0x768   :  { %v12789_v38 = vpop.permute.xlu1 %4357  ;;  %v12791_v18 = vpop.permute.xlu0 %3621 }
 0x769   :  { %17521 = vst [vmem:[#allocation85_spill] sm:$0xff] %v12789_v38 }
 0x76a   :  { %4259 = vrot.lane.b32.xlu1 %v12635_v29, %s8987_s22  ;;  %4351 = vrot.lane.b32.xlu0 %v12488_v56, %s8988_s23 }
 0x76c   :  { %v12800_v62 = vpop.permute.xlu1 %3623  ;;  %v12802_v21 = vpop.permute.xlu0 %3637 }
 0x76e   :  { %4275 = vrot.lane.b32.xlu1 %v12664_v24, %s8987_s22  ;;  %4359 = vrot.lane.b32.xlu0 %v12619_v41, %s8988_s23 }
 0x770   :  { %v12808_v38 = vpop.permute.xlu1 %3639  ;;  %v12810_v27 = vpop.permute.xlu0 %3723 }
 0x772   :  { %4369 = vrot.lane.b32.xlu1 %v12516_v49, %s8988_s23  ;;  %4367 = vrot.lane.b32.xlu0 %v12500_v44, %s8988_s23 }
 0x774   :  { %v12816_v61 = vpop.permute.xlu1 %3725  ;;  %v12818_v58 = vpop.permute.xlu0 %3739 }
 0x776   :  { %4361 = vrot.lane.b32.xlu1 %v12635_v29, %s8988_s23  ;;  %4375 = vrot.lane.b32.xlu0 %v12639_v42, %s8988_s23 }
 0x778   :  { %v12824_v57 = vpop.permute.xlu1 %3741  ;;  %v12826_v13 = vpop.permute.xlu0 %3825 }
 0x77a   :  { %4377 = vrot.lane.b32.xlu1 %v12664_v24, %s8988_s23 }
 0x77c   :  { %v12830_v37 = vpop.permute.xlu1 %3827  ;;  %v12832_v46 = vpop.permute.xlu0 %3841 }
 0x77d   :  { %17522 = vst [vmem:[#allocation89_spill] sm:$0xff] %v12830_v37  ;;  %17523 = vst [vmem:[#allocation87_spill] sm:$0xff] %v12832_v46 }
 0x780   :  { %v12834_v14 = vpop.permute.xlu1 %3843  ;;  %v12836_v19 = vpop.permute.xlu0 %3927 }
 0x781   :  { %17524 = vst [vmem:[#allocation86_spill] sm:$0xff] %v12834_v14  ;;  %17525 = vst [vmem:[#allocation74_spill] sm:$0xff] %v12836_v19 }
 0x784   :  { %v12838_v63 = vpop.permute.xlu1 %3929  ;;  %v12840_v0 = vpop.permute.xlu0 %3943 }
 0x785   :  { %17526 = vst [vmem:[#allocation71_spill] sm:$0xff] %v12838_v63  ;;  %17527 = vst [vmem:[#allocation73_spill] sm:$0xff] %v12840_v0  ;;  %v7824_v0 = vld [vmem:[%s16565_s1 + $0x1] ss:$8 sm:$0xf]  ;;  %v3759_v63 = vsel %vm105_vm1, %v12492_v26, %v12669_v23 }
 0x786   :  { %v12884_v3 = vrot.slane %v7824_v0, %v17502_v2 }
 0x788   :  { %v12842_v8 = vpop.permute.xlu1 %3945  ;;  %v12844_v12 = vpop.permute.xlu0 %4045 }
 0x789   :  { %17528 = vst [vmem:[#allocation75_spill] sm:$0xff] %v12842_v8  ;;  %17529 = vst [vmem:[#allocation66_spill] sm:$0xff] %v12844_v12  ;;  %v7825_v12 = vld [vmem:[%s16565_s1 + $0x2] ss:$8 sm:$0xf]  ;;  %v12878_v8 = vrot.slane %v7824_v0, %v17497_v45 }
 0x78a   :  { %v12899_v44 = vrot.slane %v7825_v12, %v17497_v45  ;;  %v12902_v49 = vrot.slane %v7825_v12, %v17506_v55  ;;  %v12905_v56 = vrot.slane %v7825_v12, %v17502_v2 }
 0x78c   :  { %v12846_v15 = vpop.permute.xlu1 %4047  ;;  %v12848_v16 = vpop.permute.xlu0 %4061 }
 0x78d   :  { %17530 = vst [vmem:[#allocation99_spill] sm:$0xff] %v12846_v15  ;;  %17531 = vst [vmem:[#allocation47_spill] sm:$0xff] %v12848_v16  ;;  %v12881_v15 = vrot.slane %v7824_v0, %v17506_v55 }
 0x790   :  { %v12850_v11 = vpop.permute.xlu1 %4063  ;;  %v12852_v37 = vpop.permute.xlu0 %4147 }
 0x791   :  { %17532 = vst [vmem:[#allocation103_spill] sm:$0xff] %v12850_v11  ;;  %17533 = vst [vmem:[#allocation104_spill] sm:$0xff] %v12852_v37  ;;  %v7826_v11 = vld [vmem:[%s16565_s1 + $0x3] ss:$8 sm:$0xf] }
 0x792   :  { %v7827_v37 = vld [vmem:[%s16565_s1 + $0x5] ss:$8 sm:$0xf]  ;;  %v12914_v16 = vrot.slane %v7826_v11, %v17497_v45  ;;  %v12920_v36 = vrot.slane %v7826_v11, %v17502_v2  ;;  %v12923_v42 = vrot.slane %v7826_v11, %v17503_v5 }
 0x793   :  { %v12926_v24 = vrot.slane %v7827_v37, %v17502_v2  ;;  %v12929_v29 = vrot.slane %v7827_v37, %v17497_v45  ;;  %v12946_v28 = vrot.slane %v7827_v37, %v17503_v5 }
 0x794   :  { %v12854_v46 = vpop.permute.xlu1 %4149  ;;  %v12856_v14 = vpop.permute.xlu0 %4163 }
 0x795   :  { %17534 = vst [vmem:[#allocation100_spill] sm:$0xff] %v12854_v46  ;;  %17535 = vst [vmem:[#allocation88_spill] sm:$0xff] %v12856_v14  ;;  %v12896_v14 = vrot.slane %v7824_v0, %v17503_v5  ;;  %v12917_v0 = vrot.slane %v7826_v11, %v17506_v55  ;;  %v3760_v11 = vsel %vm105_vm1, %v12506_v33, %v12692_v1 }
 0x796   :  { %17538 = vst [vmem:[#allocation105_spill] sm:$0xff] %v12926_v24  ;;  %17539 = vst [vmem:[#allocation107_spill] sm:$0xff] %v12929_v29 }
 0x797   :  { %17541 = vst [vmem:[#allocation109_spill] sm:$0xff] %v12946_v28 }
 0x798   :  { %v12889_v46 = vpop.permute.xlu1 %4165  ;;  %v12891_v41 = vpop.permute.xlu0 %4249 }
 0x799   :  { %17536 = vst [vmem:[#allocation106_spill] sm:$0xff] %v12889_v46  ;;  %17537 = vst [vmem:[#allocation102_spill] sm:$0xff] %v12891_v41  ;;  %v7828_v46 = vld [vmem:[%s16565_s1 + $0x6] ss:$8 sm:$0xf]  ;;  %v12911_v41 = vrot.slane %v7825_v12, %v17503_v5  ;;  %v12932_v12 = vrot.slane %v7827_v37, %v17506_v55 }
 0x79a   :  { %v12949_v29 = vrot.slane %v7828_v46, %v17502_v2  ;;  %v12960_v19 = vrot.slane %v7828_v46, %v17497_v45  ;;  %v12963_v1 = vrot.slane %v7828_v46, %v17506_v55  ;;  %v12966_v37 = vrot.slane %v7828_v46, %v17503_v5 }
 0x79b   :  { %17540 = vst [vmem:[#allocation108_spill] sm:$0xff] %v12932_v12  ;;  %v12986_v46 = vmul.f32 %v12881_v15, %v3756_v30  ;;  %v3751_v30 = vsel %vm105_vm1, %v12508_v52, %v12694_v35 }
 0x79c   :  { %17542 = vst [vmem:[#allocation110_spill] sm:$0xff] %v12949_v29  ;;  %v12951_v12 = vpop.permute.xlu1 %4251  ;;  %v12953_v24 = vpop.permute.xlu0 %4265  ;;  %17545 = vst [vmem:[#allocation113_spill] sm:$0xff] %v12960_v19  ;;  %v12977_v29 = vrot.slane %v7829_v20, %v17502_v2  ;;  %v12980_v19 = vrot.slane %v7829_v20, %v17497_v45 }
 0x79d   :  { %17543 = vst [vmem:[#allocation111_spill] sm:$0xff] %v12951_v12  ;;  %17544 = vst [vmem:[#allocation112_spill] sm:$0xff] %v12953_v24  ;;  %v3755_v12 = vsel %vm105_vm1, %v12669_v23, %v12508_v52  ;;  %v3764_v24 = vsel %vm105_vm1, %v12701_v51, %v12506_v33  ;;  %v3763_v23 = vsel %vm105_vm1, %v12694_v35, %v12492_v26 }
 0x79e   :  { %17546 = vst [vmem:[#allocation114_spill] sm:$0xff] %v12963_v1  ;;  %17547 = vst [vmem:[#allocation115_spill] sm:$0xff] %v12966_v37  ;;  %v12983_v1 = vmul.f32 %v12878_v8, %v3760_v11  ;;  %v3752_v33 = vsel %vm105_vm1, %v12518_v39, %v12701_v51  ;;  %v13002_v11 = vmul.f32 %v12878_v8, %v3759_v63 }
 0x79f   :  { %17548 = vst [vmem:[#allocation116_spill] sm:$0xff] %v12977_v29  ;;  %17549 = vst [vmem:[#allocation117_spill] sm:$0xff] %v12980_v19  ;;  %v12999_v19 = vld [vmem:[%s16565_s1 + $0x20] ss:$8 sm:$0xf]  ;;  %v13009_v26 = vrot.slane %v7829_v20, %v17506_v55  ;;  %v13012_v29 = vrot.slane %v7829_v20, %v17503_v5  ;;  %v13017_v37 = vmul.f32 %v12881_v15, %v3755_v12 }
 0x7a0   :  { %v13014_v39 = vpop.permute.xlu1 %4267  ;;  %v3630_v51 = vpop.permute.xlu0 %3629  ;;  %v13020_v63 = vmul.f32 %v12884_v3, %v3764_v24  ;;  %v3857_v52 = vsel %vm149_vm2, %v12703_v34, %v12528_v4  ;;  %v3861_v20 = vsel %vm149_vm2, %v12520_v31, %v12703_v34  ;;  %v13031_v35 = vmul.f32 %v12884_v3, %v3763_v23 }
 0x7a1   :  { %17550 = vst [vmem:[#allocation118_spill] sm:$0xff] %v13009_v26  ;;  %17551 = vst [vmem:[#allocation119_spill] sm:$0xff] %v13012_v29  ;;  %v13038_v24 = vrot.slane %v12999_v19, %v17502_v2  ;;  %v13042_v12 = vrot.slane %v12999_v19, %v17497_v45  ;;  %v13047_v26 = vmul.f32 %v12896_v14, %v3751_v30 }
 0x7a2   :  { %17552 = vst [vmem:[#allocation120_spill] sm:$0xff] %v13014_v39  ;;  %v13034_v39 = vmul.f32 %v12896_v14, %v3752_v33  ;;  %v3659_v34 = vsel %vm62_vm0, %v12791_v18, %v3630_v51  ;;  %v8231_v23 = vpack.c.bf16 %v12983_v1, %v13002_v11  ;;  %v13055_v33 = vmul.f32 %v12899_v44, %v3861_v20 }
 0x7a3   :  { %17553 = vst [vmem:[#allocation121_spill] sm:$0xff] %v13038_v24  ;;  %17554 = vst [vmem:[#allocation122_spill] sm:$0xff] %v13042_v12  ;;  %v13058_v2 = vmul.f32 %v12902_v49, %v3857_v52  ;;  %v3858_v29 = vsel %vm149_vm2, %v12709_v25, %v12534_v6  ;;  %v3862_v30 = vsel %vm149_vm2, %v12526_v43, %v12709_v25 }
 0x7a4   :  { %v3632_v45 = vpop.permute.xlu1 %3631  ;;  %v3853_v11 = vsel %vm149_vm2, %v12528_v4, %v12711_v22  ;;  %v3865_v52 = vsel %vm149_vm2, %v12711_v22, %v12520_v31  ;;  %v3646_v24 = vpop.permute.xlu0 %3645  ;;  %v3696_v25 = vmul.f32 %v12624_v60, %v3659_v34  ;;  %v8307_v4 = vpack.c.bf16 %v13034_v39, %v13047_v26 }
 0x7a5   :  { %v3660_v20 = vsel %vm62_vm0, %v12800_v62, %v3632_v45  ;;  %v3656_v1 = vsel %vm62_vm0, %v3632_v45, %v12808_v38  ;;  %v13089_v28 = vmul.f32 %v12899_v44, %v3862_v30  ;;  %v13092_v31 = vmul.f32 %v12902_v49, %v3858_v29 }
 0x7a6   :  { %v3700_v12 = vmul.f32 %v12624_v60, %v3660_v20  ;;  %v3651_v22 = vsel %vm62_vm0, %v12802_v21, %v3646_v24  ;;  %v3663_v34 = vsel %vm62_vm0, %v3646_v24, %v12791_v18  ;;  %v13101_v45 = vmul.f32 %v12905_v56, %v3865_v52 }
 0x7a7   :  { %v13104_v60 = vmul.f32 %v12911_v41, %v3853_v11  ;;  %v3866_v29 = vsel %vm149_vm2, %v12717_v40, %v12526_v43  ;;  %v3655_v30 = vsel %vm62_vm0, %v3630_v51, %v12802_v21  ;;  %v3701_v20 = vmul.f32 %v12672_v59, %v3656_v1 }
 0x7a8   :  { %v3648_v26 = vpop.permute.xlu1 %3647  ;;  %v8227_v39 = vpack.c.bf16 %v3700_v12, %v3696_v25  ;;  %v3732_v11 = vpop.permute.xlu0 %3731  ;;  %v3695_v52 = vmul.f32 %v12647_v17, %v3663_v34  ;;  %v3698_v43 = vmul.f32 %v12650_v54, %v3651_v22  ;;  %v8317_v21 = vpack.c.bf16 %v13092_v31, %v13058_v2 }
 0x7a9   :  { %v3652_v18 = vsel %vm62_vm0, %v12808_v38, %v3648_v26  ;;  %v3664_v24 = vsel %vm62_vm0, %v3648_v26, %v12800_v62  ;;  %v3761_v38 = vsel %vm105_vm1, %v12810_v27, %v3732_v11  ;;  %v8239_v62 = vpack.c.bf16 %v13089_v28, %v13055_v33 }
 0x7aa   :  { %v3699_v12 = vmul.f32 %v12647_v17, %v3664_v24  ;;  %v3702_v25 = vmul.f32 %v12650_v54, %v3652_v18  ;;  %8228 = vmatprep.subr.bf16.mxu0 %v8227_v39  ;;  %v13133_v51 = vrot.slane %v12999_v19, %v17506_v55  ;;  %v3854_v54 = vsel %vm149_vm2, %v12534_v6, %v12717_v40 }
 0x7ab   :  { %v3697_v17 = vmul.f32 %v12672_v59, %v3655_v30  ;;  %v13141_v26 = vmul.f32 %v12905_v56, %v3866_v29  ;;  %v3963_v39 = vsel %vm193_vm3, %v12536_v32, %v12719_v10  ;;  %v13152_v6 = vrot.slane %v12999_v19, %v17503_v5 }
 0x7ac   :  { %v8229_v1 = vpack.c.bf16 %v3699_v12, %v3695_v52  ;;  %v3734_v22 = vpop.permute.xlu1 %3733  ;;  %v8303_v34 = vpack.c.bf16 %v3702_v25, %v3698_v43  ;;  %v3748_v24 = vpop.permute.xlu0 %3747  ;;  %v3798_v40 = vmul.f32 %v12878_v8, %v3761_v38  ;;  %v3898_v52 = vmul.f32 %v12911_v41, %v3854_v54 }
 0x7ad   :  { %v3762_v18 = vsel %vm105_vm1, %v12816_v61, %v3734_v22  ;;  %v8305_v59 = vpack.c.bf16 %v3701_v20, %v3697_v17  ;;  %v3758_v29 = vsel %vm105_vm1, %v3734_v22, %v12824_v57  ;;  %v3753_v43 = vsel %vm105_vm1, %v12818_v58, %v3748_v24 }
 0x7ae   :  { %v3802_v30 = vmul.f32 %v12878_v8, %v3762_v18  ;;  %8230 = vmatpush1.bf16.msra.mxu0 %v8229_v1  ;;  %v3765_v19 = vsel %vm105_vm1, %v3748_v24, %v12810_v27  ;;  %8304 = vmatprep.subr.bf16.mxu1 %v8303_v34  ;;  %v3959_v20 = vsel %vm193_vm3, %v12719_v10, %v12544_v48 }
 0x7af   :  { %8232 = vmatprep.subr.bf16.mxu0 %v8231_v23  ;;  %v13171_v8 = vmul.f32 %v12914_v16, %v3963_v39  ;;  %v3964_v12 = vsel %vm193_vm3, %v12542_v47, %v12725_v50  ;;  %8306 = vmatpush1.bf16.msra.mxu1 %v8305_v59  ;;  %v3757_v27 = vsel %vm105_vm1, %v3732_v11, %v12818_v58 }
 0x7b0   :  { %v3750_v25 = vpop.permute.xlu1 %3749  ;;  %v8235_v38 = vpack.c.bf16 %v3802_v30, %v3798_v40  ;;  %v3803_v23 = vmul.f32 %v12881_v15, %v3758_v29  ;;  %8308 = vmatprep.subr.bf16.mxu1 %v8307_v4  ;;  %v3834_v17 = vpop.permute.xlu0 %3833  ;;  %v3797_v1 = vmul.f32 %v12884_v3, %v3765_v19  ;;  %v3800_v22 = vmul.f32 %v12896_v14, %v3753_v43  ;;  %v17558_v40 = vld [vmem:[#allocation86_spill] sm:$0xff] }
 0x7b1   :  { %v3754_v10 = vsel %vm105_vm1, %v12824_v57, %v3750_v25  ;;  %v3766_v54 = vsel %vm105_vm1, %v3750_v25, %v12816_v61  ;;  %v17555_v11 = vpack.c.bf16 %v13020_v63, %v13031_v35  ;;  %v8241_v57 = vpack.c.bf16 %v13141_v26, %v13101_v45 }
 0x7b2   :  { %v3801_v34 = vmul.f32 %v12884_v3, %v3766_v54  ;;  %v3804_v58 = vmul.f32 %v12896_v14, %v3754_v10  ;;  %v13197_v39 = vmul.f32 %v12917_v0, %v3959_v20  ;;  %v3863_v61 = vsel %vm149_vm2, %v12826_v13, %v3834_v17 }
 0x7b3   :  { %8234 = vmatpush1.bf16.msra.mxu0 %v17555_v11  ;;  %v8315_v4 = vpack.c.bf16 %v3898_v52, %v13104_v60  ;;  %v3960_v3 = vsel %vm193_vm3, %v12725_v50, %v12550_v7  ;;  %v3799_v14 = vmul.f32 %v12881_v15, %v3757_v27  ;;  %v17556_v35 = vpack.c.bf16 %v12986_v46, %v13017_v37  ;;  %v17557_v15 = vld [vmem:[#allocation89_spill] sm:$0xff]  ;;  %v17559_v52 = vld [vmem:[#allocation87_spill] sm:$0xff] }
 0x7b4   :  { %8236 = vmatprep.subr.bf16.mxu0 %v8235_v38  ;;  %v8237_v63 = vpack.c.bf16 %v3801_v34, %v3797_v1  ;;  %v3836_v45 = vpop.permute.xlu1 %3835  ;;  %v8311_v26 = vpack.c.bf16 %v3804_v58, %v3800_v22  ;;  %v3998_v18 = vmul.f32 %v12914_v16, %v3964_v12  ;;  %v3955_v60 = vsel %vm193_vm3, %v12544_v48, %v12727_v53  ;;  %v3850_v37 = vpop.permute.xlu0 %3849  ;;  %v17561_v1 = vld [vmem:[#allocation74_spill] sm:$0xff] }
 0x7b5   :  { %8310 = vmatpush1.bf16.msra.mxu1 %v17556_v35  ;;  %v3967_v50 = vsel %vm193_vm3, %v12727_v53, %v12536_v32  ;;  %v3864_v24 = vsel %vm149_vm2, %v17557_v15, %v3836_v45  ;;  %v8313_v46 = vpack.c.bf16 %v3803_v23, %v3799_v14  ;;  %v3900_v59 = vmul.f32 %v12899_v44, %v3863_v61  ;;  %v17565_v14 = vld [vmem:[#allocation71_spill] sm:$0xff] }
 0x7b6   :  { %v3860_v29 = vsel %vm149_vm2, %v3836_v45, %v17558_v40  ;;  %v3904_v30 = vmul.f32 %v12899_v44, %v3864_v24  ;;  %v13229_v48 = vmul.f32 %v12917_v0, %v3960_v3  ;;  %v3855_v32 = vsel %vm149_vm2, %v17559_v52, %v3850_v37  ;;  %8312 = vmatprep.subr.bf16.mxu1 %v8311_v26  ;;  %v17560_v44 = vld [vmem:[#allocation24_spill] sm:$0xff]  ;;  %v17566_v35 = vld [vmem:[#allocation75_spill] sm:$0xff]  ;;  %v17568_v24 = vld [vmem:[#allocation62_spill] sm:$0xff] }
 0x7b7   :  { %8238 = vmatpush1.bf16.msra.mxu0 %v8237_v63  ;;  %v3867_v53 = vsel %vm149_vm2, %v3850_v37, %v12826_v13  ;;  %v3993_v43 = vmul.f32 %v12920_v36, %v3967_v50  ;;  %v3956_v19 = vsel %vm193_vm3, %v12550_v7, %v17560_v44  ;;  %v3968_v20 = vsel %vm193_vm3, %v17560_v44, %v12542_v47  ;;  %v17569_v37 = vld [vmem:[#allocation76_spill] sm:$0xff] }
 0x7b8   :  { %8240 = vmatprep.subr.bf16.mxu0 %v8239_v62  ;;  %v3852_v12 = vpop.permute.xlu1 %3851  ;;  %v8243_v13 = vpack.c.bf16 %v3904_v30, %v3900_v59  ;;  %v3859_v28 = vsel %vm149_vm2, %v3834_v17, %v17559_v52  ;;  %v3905_v33 = vmul.f32 %v12902_v49, %v3860_v29  ;;  %v3936_v25 = vpop.permute.xlu0 %3935  ;;  %v3899_v47 = vmul.f32 %v12905_v56, %v3867_v53 }
 0x7b9   :  { %8314 = vmatpush1.bf16.msra.mxu1 %v8313_v46  ;;  %v3856_v62 = vsel %vm149_vm2, %v17558_v40, %v3852_v12  ;;  %v3868_v7 = vsel %vm149_vm2, %v3852_v12, %v17557_v15  ;;  %v3902_v38 = vmul.f32 %v12911_v41, %v3855_v32  ;;  %v8325_v10 = vpack.c.bf16 %v13229_v48, %v13197_v39  ;;  %v17563_v39 = vld [vmem:[#allocation77_spill] sm:$0xff] }
 0x7ba   :  { %8316 = vmatprep.subr.bf16.mxu1 %v8315_v4  ;;  %v3903_v27 = vmul.f32 %v12905_v56, %v3868_v7  ;;  %v3906_v23 = vmul.f32 %v12911_v41, %v3856_v62  ;;  %v3996_v54 = vmul.f32 %v12923_v42, %v3955_v60  ;;  %v4000_v17 = vmul.f32 %v12923_v42, %v3956_v19  ;;  %v17564_v4 = vld [vmem:[#allocation94_spill] sm:$0xff]  ;;  %v17567_v60 = vld [vmem:[#allocation73_spill] sm:$0xff] }
 0x7bb   :  { %8242 = vmatpush1.bf16.msra.mxu0 %v8241_v57  ;;  %v3965_v22 = vsel %vm193_vm3, %v17561_v1, %v3936_v25  ;;  %v3997_v34 = vmul.f32 %v12920_v36, %v3968_v20  ;;  %v3901_v58 = vmul.f32 %v12902_v49, %v3859_v28  ;;  %v17562_v57 = vld [vmem:[#allocation60_spill] sm:$0xff]  ;;  %v4081_v3 = vsel %vm241_vm4, %v17564_v4, %v17563_v39  ;;  %v17571_v12 = vld [vmem:[#allocation105_spill] sm:$0xff] }
 0x7bc   :  { %8244 = vmatprep.subr.bf16.mxu0 %v8243_v13  ;;  %v8245_v56 = vpack.c.bf16 %v3903_v27, %v3899_v47  ;;  %v3938_v41 = vpop.permute.xlu1 %3937  ;;  %v8319_v11 = vpack.c.bf16 %v3906_v23, %v3902_v38  ;;  %v4077_v61 = vsel %vm241_vm4, %v17563_v39, %v17562_v57  ;;  %v3952_v63 = vpop.permute.xlu0 %3951  ;;  %v8247_v2 = vpack.c.bf16 %v3998_v18, %v13171_v8  ;;  %v17573_v7 = vld [vmem:[#allocation45_spill] sm:$0xff]  ;;  %v17574_v23 = vld [vmem:[#allocation107_spill] sm:$0xff] }
 0x7bd   :  { %8318 = vmatpush1.bf16.msra.mxu1 %v8317_v21  ;;  %v3966_v49 = vsel %vm193_vm3, %v17565_v14, %v3938_v41  ;;  %v8321_v31 = vpack.c.bf16 %v3905_v33, %v3901_v58  ;;  %v4002_v21 = vmul.f32 %v12914_v16, %v3965_v22  ;;  %v3962_v45 = vsel %vm193_vm3, %v3938_v41, %v17566_v35  ;;  %v17572_v33 = vld [vmem:[#allocation81_spill] sm:$0xff]  ;;  %v17575_v22 = vld [vmem:[#allocation70_spill] sm:$0xff] }
 0x7be   :  { %v4006_v26 = vmul.f32 %v12914_v16, %v3966_v49  ;;  %v3957_v50 = vsel %vm193_vm3, %v17567_v60, %v3952_v63  ;;  %v3969_v15 = vsel %vm193_vm3, %v3952_v63, %v17561_v1  ;;  %8320 = vmatprep.subr.bf16.mxu1 %v8319_v11  ;;  %v8323_v8 = vpack.c.bf16 %v4000_v17, %v3996_v54  ;;  %v17570_v16 = vld [vmem:[#allocation41_spill] sm:$0xff]  ;;  %v17578_v11 = vld [vmem:[#allocation42_spill] sm:$0xff] }
 0x7bf   :  { %8246 = vmatpush1.bf16.msra.mxu0 %v8245_v56  ;;  %v8249_v18 = vpack.c.bf16 %v3997_v34, %v3993_v43  ;;  %v4078_v46 = vsel %vm241_vm4, %v17569_v37, %v17568_v24  ;;  %v4082_v59 = vsel %vm241_vm4, %v17570_v16, %v17569_v37  ;;  %v3961_v30 = vsel %vm193_vm3, %v3936_v25, %v17567_v60  ;;  %v17576_v34 = vld [vmem:[#allocation95_spill] sm:$0xff]  ;;  %v17577_v56 = vld [vmem:[#allocation108_spill] sm:$0xff]  ;;  %v17582_v63 = vld [vmem:[#allocation22_spill] sm:$0xff] }
 0x7c0   :  { %8248 = vmatprep.subr.bf16.mxu0 %v8247_v2  ;;  %v3954_v40 = vpop.permute.xlu1 %3953  ;;  %v8251_v29 = vpack.c.bf16 %v4006_v26, %v4002_v21  ;;  %v4007_v48 = vmul.f32 %v12917_v0, %v3962_v45  ;;  %v13316_v53 = vpop.permute.xlu0 %4371  ;;  %v4001_v43 = vmul.f32 %v12920_v36, %v3969_v15  ;;  %v4004_v44 = vmul.f32 %v12923_v42, %v3957_v50  ;;  %v17584_v21 = vld [vmem:[#allocation43_spill] sm:$0xff]  ;;  %v17586_v60 = vld [vmem:[#allocation110_spill] sm:$0xff] }
 0x7c1   :  { %8322 = vmatpush1.bf16.msra.mxu1 %v8321_v31  ;;  %v3958_v52 = vsel %vm193_vm3, %v17566_v35, %v3954_v40  ;;  %v3970_v32 = vsel %vm193_vm3, %v3954_v40, %v17565_v14  ;;  %v13323_v13 = vmul.f32 %v17571_v12, %v4081_v3  ;;  %v13326_v28 = vmul.f32 %v17571_v12, %v4082_v59  ;;  %v17580_v3 = vld [vmem:[#allocation96_spill] sm:$0xff]  ;;  %v17581_v14 = vld [vmem:[#allocation82_spill] sm:$0xff]  ;;  %v17587_v15 = vld [vmem:[#allocation23_spill] sm:$0xff] }
 0x7c2   :  { %8324 = vmatprep.subr.bf16.mxu1 %v8323_v8  ;;  %v4005_v19 = vmul.f32 %v12920_v36, %v3970_v32  ;;  %v4008_v20 = vmul.f32 %v12923_v42, %v3958_v52  ;;  %v4073_v62 = vsel %vm241_vm4, %v17562_v57, %v17572_v33  ;;  %v4074_v25 = vsel %vm241_vm4, %v17568_v24, %v17573_v7  ;;  %v17583_v31 = vld [vmem:[#allocation44_spill] sm:$0xff]  ;;  %v17588_v24 = vld [vmem:[#allocation113_spill] sm:$0xff]  ;;  %v17590_v40 = vld [vmem:[#allocation27_spill] sm:$0xff] }
 0x7c3   :  { %8250 = vmatpush1.bf16.msra.mxu0 %v8249_v18  ;;  %v4086_v42 = vsel %vm241_vm4, %v17573_v7, %v17570_v16  ;;  %v4003_v36 = vmul.f32 %v12917_v0, %v3961_v30  ;;  %v4112_v54 = vmul.f32 %v17574_v23, %v4077_v61  ;;  %v4116_v17 = vmul.f32 %v17574_v23, %v4078_v46  ;;  %v17579_v61 = vld [vmem:[#allocation109_spill] sm:$0xff]  ;;  %v17589_v46 = vld [vmem:[#allocation83_spill] sm:$0xff] }
 0x7c4   :  { %8252 = vmatprep.subr.bf16.mxu0 %v8251_v29  ;;  %v8253_v47 = vpack.c.bf16 %v4005_v19, %v4001_v43  ;;  %v13341_v38 = vpop.permute.xlu1 %4373  ;;  %v8327_v27 = vpack.c.bf16 %v4008_v20, %v4004_v44  ;;  %v4085_v1 = vsel %vm241_vm4, %v17572_v33, %v17564_v4  ;;  %v4184_v58 = vsel %vm285_vm6, %v17576_v34, %v17575_v22  ;;  %v4054_v0 = vpop.permute.xlu0 %4053  ;;  %v17591_v29 = vld [vmem:[#allocation49_spill] sm:$0xff]  ;;  %v17593_v20 = vld [vmem:[#allocation51_spill] sm:$0xff]  ;;  %v17596_v33 = vld [vmem:[#allocation114_spill] sm:$0xff] }
 0x7c5   :  { %8326 = vmatpush1.bf16.msra.mxu1 %v8325_v10  ;;  %v13354_v10 = vmul.f32 %v17577_v56, %v4073_v62  ;;  %v13357_v41 = vmul.f32 %v17577_v56, %v4074_v25  ;;  %v4180_v57 = vsel %vm285_vm6, %v17575_v22, %v17578_v11  ;;  %v8329_v39 = vpack.c.bf16 %v4007_v48, %v4003_v36  ;;  %v17597_v7 = vld [vmem:[#allocation21_spill] sm:$0xff]  ;;  %v17598_v25 = vld [vmem:[#allocation58_spill] sm:$0xff]  ;;  %v17599_v36 = vld [vmem:[#allocation47_spill] sm:$0xff] }
 0x7c6   :  { %v4118_v4 = vmul.f32 %v17579_v61, %v4086_v42  ;;  %v4179_v49 = vsel %vm285_vm6, %v17581_v14, %v17580_v3  ;;  %v4183_v2 = vsel %vm285_vm6, %v17582_v63, %v17581_v14  ;;  %8328 = vmatprep.subr.bf16.mxu1 %v8327_v27  ;;  %v17585_v35 = vpack.c.bf16 %v17583_v31, %v17584_v21  ;;  %v17600_v27 = vld [vmem:[#allocation19_spill] sm:$0xff] }
 0x7c7   :  { %8254 = vmatpush1.bf16.msra.mxu0 %v8253_v47  ;;  %v8265_v45 = vpack.c.bf16 %v13326_v28, %v13323_v13  ;;  %v4114_v26 = vmul.f32 %v17579_v61, %v4085_v1  ;;  %v13379_v50 = vmul.f32 %v17586_v60, %v4184_v58  ;;  %v4176_v8 = vsel %vm285_vm6, %v17578_v11, %v17587_v15  ;;  %v17594_v13 = vld [vmem:[#allocation72_spill] sm:$0xff]  ;;  %v17603_v58 = vld [vmem:[#allocation115_spill] sm:$0xff] }
 0x7c8   :  { %8256 = vmatprep.subr.bf16.mxu0 %v17585_v35  ;;  %v13385_v18 = vpop.permute.xlu1 %4353  ;;  %v13388_v37 = vmul.f32 %v17588_v24, %v4180_v57  ;;  %v4175_v16 = vsel %vm285_vm6, %v17580_v3, %v17589_v46  ;;  %v4187_v59 = vsel %vm285_vm6, %v17589_v46, %v17582_v63  ;;  %v17592_v30 = vpack.c.bf16 %v17590_v40, %v17591_v29  ;;  %v4070_v48 = vpop.permute.xlu0 %4069  ;;  %v17605_v57 = vld [vmem:[#allocation61_spill] sm:$0xff]  ;;  %v17610_v35 = vld [vmem:[#allocation68_spill] sm:$0xff] }
 0x7c9   :  { %8330 = vmatpush1.bf16.msra.mxu1 %v8329_v39  ;;  %v8263_v52 = vpack.c.bf16 %v4116_v17, %v4112_v54  ;;  %v8341_v32 = vpack.c.bf16 %v13357_v41, %v13354_v10  ;;  %v13404_v43 = vmul.f32 %v17586_v60, %v4183_v2  ;;  %v13407_v44 = vmul.f32 %v17588_v24, %v4179_v49  ;;  %v17601_v54 = vld [vmem:[#allocation26_spill] sm:$0xff]  ;;  %v17604_v41 = vld [vmem:[#allocation40_spill] sm:$0xff]  ;;  %v17606_v39 = vld [vmem:[#allocation53_spill] sm:$0xff] }
 0x7ca   :  { %8332 = vmatprep.subr.bf16.mxu1 %v17592_v30  ;;  %v4188_v19 = vsel %vm285_vm6, %v17587_v15, %v17576_v34  ;;  %v17595_v28 = vpack.c.bf16 %v17593_v20, %v17594_v13  ;;  %v13417_v62 = vmul.f32 %v17596_v33, %v4176_v8  ;;  %v4285_v42 = vsel %vm329_vm5, %v17598_v25, %v17597_v7  ;;  %v17608_v49 = vld [vmem:[#allocation103_spill] sm:$0xff]  ;;  %v17613_v46 = vld [vmem:[#allocation116_spill] sm:$0xff] }
 0x7cb   :  { %v4079_v47 = vsel %vm241_vm4, %v4054_v0, %v17599_v36  ;;  %v17602_v17 = vpack.c.bf16 %v17600_v27, %v17601_v54  ;;  %v8339_v1 = vpack.c.bf16 %v4118_v4, %v4114_v26  ;;  %v8273_v22 = vpack.c.bf16 %v13379_v50, %v13404_v43  ;;  %v17609_v2 = vld [vmem:[#allocation99_spill] sm:$0xff]  ;;  %v17611_v26 = vld [vmem:[#allocation98_spill] sm:$0xff]  ;;  %v17616_v20 = vld [vmem:[#allocation52_spill] sm:$0xff] }
 0x7cc   :  { %8258 = vmatpush1.bf16.msra.mxu0 %v17595_v28  ;;  %v13432_v34 = vmul.f32 %v17596_v33, %v4175_v16  ;;  %v13435_v10 = vmul.f32 %v17603_v58, %v4187_v59  ;;  %v4281_v11 = vsel %vm329_vm5, %v17597_v7, %v17604_v41  ;;  %v17607_v3 = vpack.c.bf16 %v17605_v57, %v17606_v39  ;;  %v4056_v14 = vpop.permute.xlu1 %4055  ;;  %v4156_v21 = vpop.permute.xlu0 %4155  ;;  %v17614_v59 = vld [vmem:[#allocation66_spill] sm:$0xff]  ;;  %v17618_v7 = vld [vmem:[#allocation117_spill] sm:$0xff]  ;;  %v17621_v27 = vld [vmem:[#allocation48_spill] sm:$0xff] }
 0x7cd   :  { %8260 = vmatprep.subr.bf16.mxu0 %v17602_v17  ;;  %v13445_v4 = vmul.f32 %v17603_v58, %v4188_v19  ;;  %v4080_v63 = vsel %vm241_vm4, %v4056_v14, %v17608_v49  ;;  %v4084_v31 = vsel %vm241_vm4, %v17609_v2, %v4056_v14  ;;  %v17612_v15 = vpack.c.bf16 %v17610_v35, %v17611_v26  ;;  %v17615_v19 = vld [vmem:[#allocation93_spill] sm:$0xff]  ;;  %v17637_v50 = vld [vmem:[#allocation56_spill] sm:$0xff] }
 0x7ce   :  { %8334 = vmatpush1.bf16.msra.mxu1 %v17607_v3  ;;  %v8271_v8 = vpack.c.bf16 %v13388_v37, %v13407_v44  ;;  %v13459_v16 = vmul.f32 %v17613_v46, %v4285_v42  ;;  %v4083_v40 = vsel %vm241_vm4, %v17614_v59, %v4054_v0  ;;  %v4120_v29 = vmul.f32 %v17574_v23, %v4079_v47  ;;  %v17620_v42 = vld [vmem:[#allocation63_spill] sm:$0xff]  ;;  %v17623_v57 = vld [vmem:[#allocation25_spill] sm:$0xff] }
 0x7cf   :  { %8336 = vmatprep.subr.bf16.mxu1 %v17612_v15  ;;  %v4124_v30 = vmul.f32 %v17574_v23, %v4080_v63  ;;  %v17617_v13 = vpack.c.bf16 %v17615_v19, %v17616_v20  ;;  %v8349_v28 = vpack.c.bf16 %v13417_v62, %v13432_v34  ;;  %v13472_v37 = vmul.f32 %v17618_v7, %v4281_v11  ;;  %v17619_v23 = vld [vmem:[#allocation39_spill] sm:$0xff]  ;;  %v17627_v19 = vld [vmem:[#allocation118_spill] sm:$0xff]  ;;  %v17638_v43 = vld [vmem:[#allocation85_spill] sm:$0xff] }
 0x7d0   :  { %v4075_v44 = vsel %vm241_vm4, %v17599_v36, %v4070_v48  ;;  %v4087_v0 = vsel %vm241_vm4, %v4070_v48, %v17614_v59  ;;  %v4282_v47 = vsel %vm329_vm5, %v17620_v42, %v17619_v23  ;;  %v4286_v54 = vsel %vm329_vm5, %v17621_v27, %v17620_v42  ;;  %v17622_v11 = vld [vmem:[#allocation67_spill] sm:$0xff]  ;;  %v4072_v39 = vpop.permute.xlu1 %4071  ;;  %v4172_v35 = vpop.permute.xlu0 %4171 }
 0x7d1   :  { %8262 = vmatpush1.bf16.msra.mxu0 %v17617_v13  ;;  %v4123_v17 = vmul.f32 %v17571_v12, %v4084_v31  ;;  %v17624_v36 = vpack.c.bf16 %v17622_v11, %v17623_v57  ;;  %v8267_v3 = vpack.c.bf16 %v4124_v30, %v4120_v29  ;;  %v17625_v48 = vld [vmem:[#allocation59_spill] sm:$0xff]  ;;  %v4119_v14 = vmul.f32 %v17571_v12, %v4083_v40 }
 0x7d2   :  { %8264 = vmatprep.subr.bf16.mxu0 %v8263_v52  ;;  %v4277_v52 = vsel %vm329_vm5, %v17604_v41, %v17625_v48  ;;  %v4076_v63 = vsel %vm241_vm4, %v17608_v49, %v4072_v39  ;;  %v4088_v31 = vsel %vm241_vm4, %v4072_v39, %v17609_v2  ;;  %v4121_v26 = vmul.f32 %v17577_v56, %v4075_v44  ;;  %v17626_v2 = vld [vmem:[#allocation88_spill] sm:$0xff]  ;;  %v17629_v44 = vld [vmem:[#allocation106_spill] sm:$0xff]  ;;  %v17632_v11 = vld [vmem:[#allocation119_spill] sm:$0xff] }
 0x7d3   :  { %8338 = vmatpush1.bf16.msra.mxu1 %v17624_v36  ;;  %v4122_v15 = vmul.f32 %v17579_v61, %v4087_v0  ;;  %v4125_v59 = vmul.f32 %v17577_v56, %v4076_v63  ;;  %v4126_v41 = vmul.f32 %v17579_v61, %v4088_v31  ;;  %v13508_v12 = vmul.f32 %v17613_v46, %v4286_v54 }
 0x7d4   :  { %8340 = vmatprep.subr.bf16.mxu1 %v8339_v1  ;;  %v4289_v49 = vsel %vm329_vm5, %v17625_v48, %v17598_v25  ;;  %v4181_v1 = vsel %vm285_vm6, %v4156_v21, %v17626_v2  ;;  %v8347_v40 = vpack.c.bf16 %v13445_v4, %v13435_v10  ;;  %v13520_v56 = vmul.f32 %v17618_v7, %v4282_v47  ;;  %v4158_v29 = vpop.permute.xlu1 %4157  ;;  %v17628_v25 = vld [vmem:[#allocation69_spill] sm:$0xff]  ;;  %v17630_v4 = vld [vmem:[#allocation100_spill] sm:$0xff]  ;;  %v4258_v42 = vpop.permute.xlu0 %4257 }
 0x7d5   :  { %8266 = vmatpush1.bf16.msra.mxu0 %v8265_v45  ;;  %v8269_v61 = vpack.c.bf16 %v4123_v17, %v4119_v14  ;;  %v8345_v45 = vpack.c.bf16 %v4125_v59, %v4121_v26  ;;  %v8343_v30 = vpack.c.bf16 %v4126_v41, %v4122_v15  ;;  %v13523_v20 = vmul.f32 %v17627_v19, %v4277_v52  ;;  %v17631_v47 = vld [vmem:[#allocation104_spill] sm:$0xff]  ;;  %v17634_v59 = vld [vmem:[#allocation101_spill] sm:$0xff] }
 0x7d6   :  { %8268 = vmatprep.subr.bf16.mxu0 %v8267_v3  ;;  %v4278_v13 = vsel %vm329_vm5, %v17619_v23, %v17628_v25  ;;  %v4182_v10 = vsel %vm285_vm6, %v4158_v29, %v17629_v44  ;;  %v4186_v0 = vsel %vm285_vm6, %v17630_v4, %v4158_v29  ;;  %v4185_v54 = vsel %vm285_vm6, %v17631_v47, %v4156_v21 }
 0x7d7   :  { %8342 = vmatpush1.bf16.msra.mxu1 %v8341_v32  ;;  %v4290_v32 = vsel %vm329_vm5, %v17628_v25, %v17621_v27  ;;  %v4222_v23 = vmul.f32 %v17588_v24, %v4181_v1  ;;  %v4226_v17 = vmul.f32 %v17588_v24, %v4182_v10  ;;  %v4318_v57 = vmul.f32 %v17632_v11, %v4289_v49  ;;  %v17641_v10 = vld [vmem:[#allocation102_spill] sm:$0xff] }
 0x7d8   :  { %v4177_v36 = vsel %vm285_vm6, %v17626_v2, %v4172_v35  ;;  %v4189_v39 = vsel %vm285_vm6, %v4172_v35, %v17631_v47  ;;  %8344 = vmatprep.subr.bf16.mxu1 %v8343_v30  ;;  %v8281_v21 = vpack.c.bf16 %v13508_v12, %v13459_v16  ;;  %v13554_v27 = vmul.f32 %v17627_v19, %v4278_v13  ;;  %v4174_v3 = vpop.permute.xlu1 %4173  ;;  %v4274_v16 = vpop.permute.xlu0 %4273  ;;  %v17635_v12 = vld [vmem:[#allocation97_spill] sm:$0xff]  ;;  %v17636_v2 = vld [vmem:[#allocation112_spill] sm:$0xff] }
 0x7d9   :  { %8270 = vmatpush1.bf16.msra.mxu0 %v8269_v61  ;;  %v4225_v24 = vmul.f32 %v17586_v60, %v4186_v0  ;;  %v8275_v48 = vpack.c.bf16 %v4226_v17, %v4222_v23  ;;  %v4322_v52 = vmul.f32 %v17632_v11, %v4290_v32  ;;  %v4221_v14 = vmul.f32 %v17586_v60, %v4185_v54  ;;  %v17633_v60 = vld [vmem:[#allocation28_spill] sm:$0xff]  ;;  %v17643_v0 = vld [vmem:[#allocation122_spill] sm:$0xff] }
 0x7da   :  { %8272 = vmatprep.subr.bf16.mxu0 %v8271_v8  ;;  %v4178_v63 = vsel %vm285_vm6, %v17629_v44, %v4174_v3  ;;  %v4190_v8 = vsel %vm285_vm6, %v4174_v3, %v17630_v4  ;;  %v4223_v31 = vmul.f32 %v17596_v33, %v4177_v36  ;;  %v4224_v35 = vmul.f32 %v17603_v58, %v4189_v39  ;;  %v17639_v30 = vld [vmem:[#allocation120_spill] sm:$0xff] }
 0x7db   :  { %8346 = vmatpush1.bf16.msra.mxu1 %v8345_v45  ;;  %v4227_v26 = vmul.f32 %v17596_v33, %v4178_v63  ;;  %v4228_v15 = vmul.f32 %v17603_v58, %v4190_v8  ;;  %v4383_v41 = vsel %vm373_vm7, %v17634_v59, %v17633_v60  ;;  %v4387_v49 = vsel %vm373_vm7, %v17635_v12, %v17634_v59  ;;  %v17644_v63 = vld [vmem:[#allocation121_spill] sm:$0xff] }
 0x7dc   :  { %8348 = vmatprep.subr.bf16.mxu1 %v8347_v40  ;;  %v4283_v33 = vsel %vm329_vm5, %v4258_v42, %v17636_v2  ;;  %v8279_v58 = vpack.c.bf16 %v13520_v56, %v13472_v37  ;;  %v8277_v1 = vpack.c.bf16 %v4225_v24, %v4221_v14  ;;  %v4260_v61 = vpop.permute.xlu1 %4259  ;;  %v8357_v29 = vpack.c.bf16 %v13554_v27, %v13523_v20  ;;  %v17640_v56 = vld [vmem:[#allocation111_spill] sm:$0xff]  ;;  %v13600_v13 = vpop.permute.xlu0 %4351  ;;  %v17642_v20 = vld [vmem:[#allocation80_spill] sm:$0xff] }
 0x7dd   :  { %8274 = vmatpush1.bf16.msra.mxu0 %v8273_v22  ;;  %v4384_v22 = vsel %vm373_vm7, %v17638_v43, %v17637_v50  ;;  %v8353_v40 = vpack.c.bf16 %v4227_v26, %v4223_v31  ;;  %v8351_v45 = vpack.c.bf16 %v4228_v15, %v4224_v35  ;;  %v4284_v37 = vsel %vm329_vm5, %v4260_v61, %v17639_v30 }
 0x7de   :  { %8276 = vmatprep.subr.bf16.mxu0 %v8275_v48  ;;  %v4288_v25 = vsel %vm329_vm5, %v17640_v56, %v4260_v61  ;;  %v8355_v44 = vpack.c.bf16 %v4322_v52, %v4318_v57  ;;  %v4287_v62 = vsel %vm329_vm5, %v17641_v10, %v4258_v42  ;;  %v4324_v34 = vmul.f32 %v17618_v7, %v4283_v33 }
 0x7df   :  { %8350 = vmatpush1.bf16.msra.mxu1 %v8349_v28  ;;  %v4328_v28 = vmul.f32 %v17618_v7, %v4284_v37  ;;  %v4388_v4 = vsel %vm373_vm7, %v17642_v20, %v17638_v43  ;;  %v4422_v32 = vmul.f32 %v17643_v0, %v4384_v22  ;;  %v4279_v47 = vsel %vm329_vm5, %v17636_v2, %v4274_v16  ;;  %v4453_v22 = vld [vmem:[%s16570_s6 + $0x20] sm:$0xff] }
 0x7e0   :  { %8352 = vmatprep.subr.bf16.mxu1 %v8351_v45  ;;  %v4291_v42 = vsel %vm329_vm5, %v4274_v16, %v17641_v10  ;;  %v4391_v7 = vsel %vm373_vm7, %v13316_v53, %v17635_v12  ;;  %v4392_v54 = vsel %vm373_vm7, %v13341_v38, %v17642_v20  ;;  %v4327_v23 = vmul.f32 %v17613_v46, %v4288_v25  ;;  %v4276_v17 = vpop.permute.xlu1 %4275  ;;  %v4360_v3 = vpop.permute.xlu0 %4359  ;;  %v4452_v25 = vld [vmem:[%s16570_s6 + $0x18] sm:$0xff] }
 0x7e1   :  { %8278 = vmatpush1.bf16.msra.mxu0 %v8277_v1  ;;  %v8283_v57 = vpack.c.bf16 %v4328_v28, %v4324_v34  ;;  %v4380_v36 = vsel %vm373_vm7, %v17637_v50, %v13341_v38  ;;  %v4323_v39 = vmul.f32 %v17613_v46, %v4287_v62  ;;  %v4280_v27 = vsel %vm329_vm5, %v17639_v30, %v4276_v17  ;;  %v4456_v10 = vld [vmem:[%s16570_s6 + $0x38] sm:$0xff] }
 0x7e2   :  { %8280 = vmatprep.subr.bf16.mxu0 %v8279_v58  ;;  %v4292_v24 = vsel %vm329_vm5, %v4276_v17, %v17640_v56  ;;  %v4325_v48 = vmul.f32 %v17627_v19, %v4279_v47  ;;  %v4326_v52 = vmul.f32 %v17632_v11, %v4291_v42  ;;  %v4329_v14 = vmul.f32 %v17627_v19, %v4280_v27  ;;  %v4455_v42 = vld [vmem:[%s16570_s6 + $0x30] sm:$0xff]  ;;  %v17647_v17 = vld [vmem:[#allocation54_spill] sm:$0xff]  ;;  %v4454_v27 = vld [vmem:[%s16570_s6 + $0x28] sm:$0xff] }
 0x7e3   :  { %8354 = vmatpush1.bf16.msra.mxu1 %v8353_v40  ;;  %v4330_v38 = vmul.f32 %v17632_v11, %v4292_v24  ;;  %v4418_v46 = vmul.f32 %v17643_v0, %v4383_v41  ;;  %v4421_v8 = vmul.f32 %v17644_v63, %v4388_v4  ;;  %v4379_v16 = vsel %vm373_vm7, %v17633_v60, %v13316_v53  ;;  %v4449_v60 = vld [vmem:[%s16570_s6] sm:$0xff] }
 0x7e4   :  { %8356 = vmatprep.subr.bf16.mxu1 %v8355_v44  ;;  %v4424_v31 = vmul.f32 %v13152_v6, %v4392_v54  ;;  %v4423_v35 = vmul.f32 %v13133_v51, %v4380_v36  ;;  %v8285_v26 = vpack.c.bf16 %v4327_v23, %v4323_v39  ;;  %v8361_v15 = vpack.c.bf16 %v4329_v14, %v4325_v48  ;;  %v4370_v19 = vpop.permute.xlu1 %4369  ;;  %v4368_v59 = vpop.permute.xlu0 %4367  ;;  %v17645_v23 = vld [vmem:[#allocation55_spill] sm:$0xff]  ;;  %v4451_v36 = vld [vmem:[%s16570_s6 + $0x10] sm:$0xff]  ;;  %v17649_v39 = vld [vmem:[#allocation20_spill] sm:$0xff] }
 0x7e5   :  { %8282 = vmatpush1.bf16.msra.mxu0 %v8281_v21  ;;  %v8359_v11 = vpack.c.bf16 %v4330_v38, %v4326_v52  ;;  %v4420_v21 = vmul.f32 %v13152_v6, %v4391_v7  ;;  %v8287_v41 = vpack.c.bf16 %v4422_v32, %v4418_v46  ;;  %v4417_v12 = vmul.f32 %v17644_v63, %v4387_v49  ;;  %v4459_v7 = vld [vmem:[%s16570_s6 + $0x50] sm:$0xff]  ;;  %v4457_v24 = vld [vmem:[%s16570_s6 + $0x40] sm:$0xff] }
 0x7e6   :  { %8284 = vmatprep.subr.bf16.mxu0 %v8283_v57  ;;  %v4419_v2 = vmul.f32 %v13133_v51, %v4379_v16  ;;  %v4389_v53 = vsel %vm373_vm7, %v13600_v13, %v4360_v3  ;;  %v4385_v33 = vsel %vm373_vm7, %v4360_v3, %v4368_v59  ;;  %v17648_v57 = vmov 0.0   ;;  %v4460_v3 = vld [vmem:[%s16570_s6 + $0x58] sm:$0xff] }
 0x7e7   :  { %8358 = vmatpush1.bf16.msra.mxu1 %v8357_v29  ;;  %v8363_v58 = vpack.c.bf16 %v4424_v31, %v4420_v21  ;;  %v8289_v50 = vpack.c.bf16 %v4421_v8, %v4417_v12  ;;  %v4425_v1 = vmul.f32 %v17644_v63, %v4389_v53  ;;  %v4426_v29 = vmul.f32 %v17643_v0, %v4385_v33 }
 0x7e8   :  { %8360 = vmatprep.subr.bf16.mxu1 %v8359_v11  ;;  %v8365_v43 = vpack.c.bf16 %v4423_v35, %v4419_v2  ;;  %v4362_v49 = vpop.permute.xlu1 %4361  ;;  %v4376_v45 = vpop.permute.xlu0 %4375 }
 0x7e9   :  { %8286 = vmatpush1.bf16.msra.mxu0 %v8285_v26  ;;  %v4386_v40 = vsel %vm373_vm7, %v4362_v49, %v4370_v19  ;;  %v4390_v61 = vsel %vm373_vm7, %v13385_v18, %v4362_v49  ;;  %v4381_v56 = vsel %vm373_vm7, %v4368_v59, %v4376_v45  ;;  %v4393_v44 = vsel %vm373_vm7, %v4376_v45, %v13600_v13 }
 0x7ea   :  { %8288 = vmatprep.subr.bf16.mxu0 %v8287_v41  ;;  %v4429_v30 = vmul.f32 %v17644_v63, %v4390_v61  ;;  %v4430_v37 = vmul.f32 %v17643_v0, %v4386_v40  ;;  %v4427_v20 = vmul.f32 %v13133_v51, %v4381_v56  ;;  %v4428_v0 = vmul.f32 %v13152_v6, %v4393_v44 }
 0x7eb   :  { %8362 = vmatpush1.bf16.msra.mxu1 %v8361_v15 }
 0x7ec   :  { %8364 = vmatprep.subr.bf16.mxu1 %v8363_v58  ;;  %4690 = vmatmul.mubr.f32.vlgmr.msra.gmra.mrb[24].mxu0 %v4449_v60  ;;  %v8293_v62 = vpack.c.bf16 %v4429_v30, %v4425_v1  ;;  %v4378_v34 = vpop.permute.xlu1 %4377  ;;  %v8291_v28 = vpack.c.bf16 %v4430_v37, %v4426_v29 }
 0x7ed   :  { %8290 = vmatpush1.bf16.msra.mxu0 %v8289_v50  ;;  %4695 = vmatprep.mubr.f32.mxu0 %v4453_v22  ;;  %v4382_v4 = vsel %vm373_vm7, %v4370_v19, %v4378_v34  ;;  %v4394_v13 = vsel %vm373_vm7, %v4378_v34, %v13385_v18 }
 0x7ee   :  { %4868 = vmatmul.mubr.f32.vlgmr.msra.gmra.mrb[24].mxu1 %v4449_v60  ;;  %v4431_v32 = vmul.f32 %v13133_v51, %v4382_v4  ;;  %v4432_v47 = vmul.f32 %v13152_v6, %v4394_v13  ;;  %8292 = vmatprep.subr.bf16.mxu0 %v8291_v28  ;;  %v4458_v51 = vld [vmem:[%s16570_s6 + $0x48] sm:$0xff]  ;;  %v17646_v6 = vld [vmem:[#allocation57_spill] sm:$0xff] }
 0x7ef   :  { %8366 = vmatpush1.bf16.msra.mxu1 %v8365_v43  ;;  %4873 = vmatprep.mubr.f32.mxu1 %v4453_v22 }
 0x7f0   :  { %4696 = vmatmul.mubr.f32.gmra.mrb[26].mxu0 %v4452_v25  ;;  %v8369_v18 = vpack.c.bf16 %v4431_v32, %v4427_v20  ;;  %v8367_v54 = vpack.c.bf16 %v4432_v47, %v4428_v0 }
 0x7f1   :  { %4701 = vmatprep.mubr.f32.mxu0 %v4456_v10  ;;  %8294 = vmatpush1.bf16.msra.mxu0 %v8293_v62 }
 0x7f2   :  { %4874 = vmatmul.mubr.f32.gmra.mrb[26].mxu1 %v4452_v25  ;;  %8296 = vmatprep.subr.bf16.mxu0 %v17645_v23  ;;  %v17681_v23 = vld [vmem:[#allocation4_spill] sm:$0xff] }
 0x7f3   :  { %4879 = vmatprep.mubr.f32.mxu1 %v4456_v10  ;;  %8368 = vmatprep.subr.bf16.mxu1 %v8367_v54  ;;  %v17678_v10 = vld [vmem:[#allocation3_spill] sm:$0xff] }
 0x7f4   :  { %4702 = vmatmul.mubr.f32.gmra.mrb[28].mxu0 %v4455_v42  ;;  %8370 = vmatpush1.bf16.msra.mxu1 %v8369_v18 }
 0x7f5   :  { %4707 = vmatprep.mubr.f32.mxu0 %v4459_v7  ;;  %8298 = vmatpush1.bf16.msra.mxu0 %v17646_v6 }
 0x7f6   :  { %4880 = vmatmul.mubr.f32.gmra.mrb[28].mxu1 %v4455_v42  ;;  %8372 = vmatprep.subr.bf16.mxu1 %v17647_v17 }
 0x7f7   :  { %4885 = vmatprep.mubr.f32.mxu1 %v4459_v7 }
 0x7f8   :  { %4708 = vmatmul.mubr.f32.gmra.mrb[30].mxu0 %v4458_v51  ;;  %8374 = vmatpush1.bf16.msra.mxu1 %v17649_v39 }
 0x7f9   :  { %4778 = vmatprep.mubr.f32.mxu0 %v17648_v57 }
 0x7fa   :  { %4886 = vmatmul.mubr.f32.gmra.mrb[30].mxu1 %v4458_v51 }
 0x7fb   :  { %4956 = vmatprep.mubr.f32.mxu1 %v17648_v57 }
 0x7fc   :  { %7831 = vmatmul.mubr.msk.f32.vlgmr.msra.gmra.mrb[24].mxu0 %vm1772_vm9, %v4451_v36 }
 0x7fd   :  { %4784 = vmatprep.mubr.f32.mxu0 %v17648_v57 }
 0x7fe   :  { %7835 = vmatmul.mubr.msk.f32.vlgmr.msra.gmra.mrb[24].mxu1 %vm1772_vm9, %v4451_v36 }
 0x7ff   :  { %4962 = vmatprep.mubr.f32.mxu1 %v17648_v57 }
 0x800   :  { %7832 = vmatmul.mubr.msk.f32.gmra.mrb[26].mxu0 %vm1772_vm9, %v4454_v27 }
 0x801   :  { %4790 = vmatprep.mubr.f32.mxu0 %v17648_v57 }
 0x802   :  { %7836 = vmatmul.mubr.msk.f32.gmra.mrb[26].mxu1 %vm1772_vm9, %v4454_v27 }
 0x803   :  { %4968 = vmatprep.mubr.f32.mxu1 %v17648_v57 }
 0x804   :  { %7833 = vmatmul.mubr.msk.f32.gmra.mrb[28].mxu0 %vm1772_vm9, %v4457_v24 }
 0x805   :  { %4796 = vmatprep.mubr.f32.mxu0 %v17648_v57 }
 0x806   :  { %7837 = vmatmul.mubr.msk.f32.gmra.mrb[28].mxu1 %vm1772_vm9, %v4457_v24 }
 0x807   :  { %4974 = vmatprep.mubr.f32.mxu1 %v17648_v57 }
 0x808   :  { %7834 = vmatmul.mubr.msk.f32.gmra.mrb[30].mxu0 %vm1772_vm9, %v4460_v3 }
 0x80a   :  { %7838 = vmatmul.mubr.msk.f32.gmra.mrb[30].mxu1 %vm1772_vm9, %v4460_v3 }
 0x8cf   :  { %v4780_v48 = vpop.f32.mrb[24].mxu0 }
 0x8d0   :  { %v7839_v52 = vmul.f32 -1.442695, %v4780_v48  ;;  %v13734_v14 = vpop.f32.mrb[25].mxu0 }
 0x8d1   :  { %v4958_v38 = vpop.f32.mrb[24].mxu1  ;;  %v7840_v62 = vmul.f32 -1.442695, %v13734_v14 }
 0x8d2   :  { %8917 = vpow2.f32 %v7839_v52  ;;  %v7841_v46 = vmul.f32 -1.442695, %v4958_v38  ;;  %v13736_v63 = vpop.f32.mrb[25].mxu1 }
 0x8d3   :  { %v4786_v8 = vpop.f32.mrb[26].mxu0  ;;  %v7842_v34 = vmul.f32 -1.442695, %v13736_v63 }
 0x8d4   :  { %8919 = vpow2.f32 %v7841_v46  ;;  %v7843_v16 = vmul.f32 -1.442695, %v4786_v8  ;;  %v13738_v31 = vpop.f32.mrb[27].mxu0 }
 0x8d5   :  { %v4964_v35 = vpop.f32.mrb[26].mxu1  ;;  %v7844_v28 = vmul.f32 -1.442695, %v13738_v31 }
 0x8d6   :  { %8921 = vpow2.f32 %v7843_v16  ;;  %v7845_v26 = vmul.f32 -1.442695, %v4964_v35  ;;  %v13740_v15 = vpop.f32.mrb[27].mxu1 }
 0x8d7   :  { %v13742_v19 = vpop.f32.mrb[28].mxu0  ;;  %v7846_v20 = vmul.f32 -1.442695, %v13740_v15 }
 0x8d8   :  { %8923 = vpow2.f32 %v7845_v26  ;;  %v13744_v11 = vpop.f32.mrb[29].mxu0 }
 0x8d9   :  { %v13746_v21 = vpop.f32.mrb[28].mxu1 }
 0x8da   :  { %v13748_v59 = vpop.f32.mrb[29].mxu1 }
 0x8db   :  { %v13750_v41 = vpop.f32.mrb[30].mxu0 }
 0x8dc   :  { %v8918_v12 = vpop.eup %8917  ;;  %v13752_v2 = vpop.f32.mrb[31].mxu0  ;;  %v7851_v46 = vmul.f32 -1.442695, %v13750_v41 }
 0x8dd   :  { %v5029_v53 = vadd.f32 1.0, %v8918_v12  ;;  %v13754_v60 = vpop.f32.mrb[30].mxu1 }
 0x8de   :  { %v8920_v33 = vpop.eup %8919  ;;  %v13756_v58 = vpop.f32.mrb[31].mxu1 }
 0x8df   :  { %8925 = vrcp.f32 %v5029_v53  ;;  %v5031_v50 = vadd.f32 1.0, %v8920_v33 }
 0x8e0   :  { %v8922_v43 = vpop.eup %8921 }
 0x8e1   :  { %8927 = vrcp.f32 %v5031_v50  ;;  %v5033_v49 = vadd.f32 1.0, %v8922_v43 }
 0x8e2   :  { %v8924_v22 = vpop.eup %8923 }
 0x8e3   :  { %8929 = vrcp.f32 %v5033_v49  ;;  %v5035_v1 = vadd.f32 1.0, %v8924_v22 }
 0x8e5   :  { %8931 = vrcp.f32 %v5035_v1 }
 0x8e6   :  { %8933 = vpow2.f32 %v7840_v62 }
 0x8e7   :  { %8935 = vpow2.f32 %v7842_v34 }
 0x8e8   :  { %8937 = vpow2.f32 %v7844_v28 }
 0x8e9   :  { %v8926_v40 = vpop.eup %8925  ;;  %8939 = vpow2.f32 %v7846_v20 }
 0x8ea   :  { %v13758_v61 = vmul.f32 %v8926_v40, %v4780_v48 }
 0x8eb   :  { %v8928_v45 = vpop.eup %8927 }
 0x8ec   :  { %17650 = vst [vmem:[#allocation89_spill] sm:$0xff] %v13758_v61  ;;  %5093 = vrot.lane.b32.xlu0 %v13758_v61, %s8981_s13  ;;  %v13762_v30 = vmul.f32 %v8928_v45, %v4958_v38  ;;  %v7849_v38 = vmul.f32 -1.442695, %v13746_v21 }
 0x8ed   :  { %v8930_v29 = vpop.eup %8929 }
 0x8ee   :  { %17651 = vst [vmem:[#allocation86_spill] sm:$0xff] %v13762_v30  ;;  %v13764_v37 = vmul.f32 %v8930_v29, %v4786_v8 }
 0x8ef   :  { %v8932_v56 = vpop.eup %8931 }
 0x8f0   :  { %17652 = vst [vmem:[#allocation87_spill] sm:$0xff] %v13764_v37  ;;  %v13766_v25 = vmul.f32 %v8932_v56, %v4964_v35  ;;  %5095 = vrot.lane.b32.xlu1 %v13764_v37, %s8981_s13  ;;  %5109 = vrot.lane.b32.xlu0 %v13762_v30, %s8981_s13  ;;  %v8934_v4 = vpop.eup %8933 }
 0x8f1   :  { %v8936_v13 = vpop.eup %8935  ;;  %v5030_v0 = vadd.f32 1.0, %v8934_v4 }
 0x8f2   :  { %17653 = vst [vmem:[#allocation24_spill] sm:$0xff] %v13766_v25  ;;  %v8938_v32 = vpop.eup %8937  ;;  %v5032_v47 = vadd.f32 1.0, %v8936_v13 }
 0x8f3   :  { %8941 = vrcp.f32 %v5030_v0  ;;  %v5034_v42 = vadd.f32 1.0, %v8938_v32  ;;  %v8940_v7 = vpop.eup %8939 }
 0x8f4   :  { %5195 = vrot.lane.b32.xlu0 %v13758_v61, %s8982_s18  ;;  %5111 = vrot.lane.b32.xlu1 %v13766_v25, %s8981_s13  ;;  %8943 = vrcp.f32 %v5032_v47  ;;  %v5036_v18 = vadd.f32 1.0, %v8940_v7 }
 0x8f5   :  { %8945 = vrcp.f32 %v5034_v42  ;;  %v7848_v42 = vmul.f32 -1.442695, %v13744_v11 }
 0x8f6   :  { %8947 = vrcp.f32 %v5036_v18 }
 0x8f8   :  { %5211 = vrot.lane.b32.xlu0 %v13762_v30, %s8982_s18  ;;  %5197 = vrot.lane.b32.xlu1 %v13764_v37, %s8982_s18 }
 0x8fc   :  { %5297 = vrot.lane.b32.xlu0 %v13758_v61, %s8983_s0  ;;  %5213 = vrot.lane.b32.xlu1 %v13766_v25, %s8982_s18 }
 0x8fd   :  { %v8942_v54 = vpop.eup %8941 }
 0x8fe   :  { %v8944_v51 = vpop.eup %8943  ;;  %v13837_v36 = vmul.f32 %v8942_v54, %v13734_v14  ;;  %v7847_v14 = vmul.f32 -1.442695, %v13742_v19  ;;  %v7850_v54 = vmul.f32 -1.442695, %v13748_v59 }
 0x8ff   :  { %v8946_v27 = vpop.eup %8945  ;;  %v13844_v24 = vmul.f32 %v8944_v51, %v13736_v63  ;;  %v7853_v63 = vmul.f32 -1.442695, %v13754_v60  ;;  %v7852_v51 = vmul.f32 -1.442695, %v13752_v2 }
 0x900   :  { %5313 = vrot.lane.b32.xlu0 %v13762_v30, %s8983_s0  ;;  %5299 = vrot.lane.b32.xlu1 %v13764_v37, %s8983_s0  ;;  %17654 = vst [vmem:[#allocation74_spill] sm:$0xff] %v13837_v36  ;;  %v13847_v3 = vmul.f32 %v8946_v27, %v13738_v31  ;;  %v8948_v48 = vpop.eup %8947  ;;  %8949 = vpow2.f32 %v7847_v14  ;;  %v7854_v14 = vmul.f32 -1.442695, %v13756_v58 }
 0x901   :  { %17655 = vst [vmem:[#allocation60_spill] sm:$0xff] %v13844_v24  ;;  %v13854_v52 = vmul.f32 %v8948_v48, %v13740_v15  ;;  %8951 = vpow2.f32 %v7849_v38 }
 0x902   :  { %17656 = vst [vmem:[#allocation77_spill] sm:$0xff] %v13847_v3  ;;  %8953 = vpow2.f32 %v7851_v46 }
 0x903   :  { %17657 = vst [vmem:[#allocation94_spill] sm:$0xff] %v13854_v52  ;;  %8955 = vpow2.f32 %v7853_v63 }
 0x904   :  { %5399 = vrot.lane.b32.xlu0 %v13758_v61, %s8984_s19  ;;  %5315 = vrot.lane.b32.xlu1 %v13766_v25, %s8983_s0 }
 0x908   :  { %5415 = vrot.lane.b32.xlu0 %v13762_v30, %s8984_s19  ;;  %5401 = vrot.lane.b32.xlu1 %v13764_v37, %s8984_s19 }
 0x90a   :  { %v8950_v8 = vpop.eup %8949 }
 0x90b   :  { %v8952_v16 = vpop.eup %8951  ;;  %v5037_v31 = vadd.f32 1.0, %v8950_v8 }
 0x90c   :  { %5517 = vrot.lane.b32.xlu0 %v13758_v61, %s8985_s20  ;;  %5417 = vrot.lane.b32.xlu1 %v13766_v25, %s8984_s19  ;;  %v8954_v35 = vpop.eup %8953  ;;  %v5039_v26 = vadd.f32 1.0, %v8952_v16 }
 0x90d   :  { %8957 = vrcp.f32 %v5037_v31  ;;  %v5041_v15 = vadd.f32 1.0, %v8954_v35  ;;  %v8956_v12 = vpop.eup %8955 }
 0x90e   :  { %8959 = vrcp.f32 %v5039_v26  ;;  %v5043_v53 = vadd.f32 1.0, %v8956_v12 }
 0x90f   :  { %8961 = vrcp.f32 %v5041_v15 }
 0x910   :  { %5533 = vrot.lane.b32.xlu0 %v13762_v30, %s8985_s20  ;;  %5519 = vrot.lane.b32.xlu1 %v13764_v37, %s8985_s20  ;;  %8963 = vrcp.f32 %v5043_v53 }
 0x911   :  { %8965 = vpow2.f32 %v7848_v42 }
 0x912   :  { %8967 = vpow2.f32 %v7850_v54 }
 0x913   :  { %8969 = vpow2.f32 %v7852_v51 }
 0x914   :  { %5619 = vrot.lane.b32.xlu0 %v13758_v61, %s8986_s21  ;;  %5535 = vrot.lane.b32.xlu1 %v13766_v25, %s8985_s20  ;;  %8971 = vpow2.f32 %v7854_v14 }
 0x917   :  { %v8958_v49 = vpop.eup %8957 }
 0x918   :  { %5635 = vrot.lane.b32.xlu0 %v13762_v30, %s8986_s21  ;;  %5621 = vrot.lane.b32.xlu1 %v13764_v37, %s8986_s21  ;;  %v8960_v22 = vpop.eup %8959  ;;  %v13919_v1 = vmul.f32 %v8958_v49, %v13742_v19 }
 0x919   :  { %v8962_v29 = vpop.eup %8961  ;;  %v13930_v56 = vmul.f32 %v8960_v22, %v13746_v21 }
 0x91a   :  { %17658 = vst [vmem:[#allocation71_spill] sm:$0xff] %v13919_v1  ;;  %v13933_v62 = vmul.f32 %v8962_v29, %v13750_v41  ;;  %v8964_v28 = vpop.eup %8963 }
 0x91b   :  { %17659 = vst [vmem:[#allocation75_spill] sm:$0xff] %v13930_v56  ;;  %v13944_v20 = vmul.f32 %v8964_v28, %v13754_v60  ;;  %v8966_v63 = vpop.eup %8965 }
 0x91c   :  { %5721 = vrot.lane.b32.xlu0 %v13758_v61, %s8987_s22  ;;  %5637 = vrot.lane.b32.xlu1 %v13766_v25, %s8986_s21  ;;  %17660 = vst [vmem:[#allocation73_spill] sm:$0xff] %v13933_v62  ;;  %v5038_v31 = vadd.f32 1.0, %v8966_v63  ;;  %v8968_v35 = vpop.eup %8967 }
 0x91d   :  { %17661 = vst [vmem:[#allocation62_spill] sm:$0xff] %v13944_v20  ;;  %v8970_v12 = vpop.eup %8969  ;;  %v5040_v53 = vadd.f32 1.0, %v8968_v35  ;;  %v5141_v35 = vld [vmem:[%s16565_s1] ss:$8 sm:$0xf] }
 0x91e   :  { %8973 = vrcp.f32 %v5038_v31  ;;  %v8972_v49 = vpop.eup %8971  ;;  %v5042_v22 = vadd.f32 1.0, %v8970_v12  ;;  %v14055_v44 = vrot.slane %v5141_v35, %v17678_v10 }
 0x91f   :  { %8975 = vrcp.f32 %v5040_v53  ;;  %v5044_v42 = vadd.f32 1.0, %v8972_v49 }
 0x920   :  { %5737 = vrot.lane.b32.xlu0 %v13762_v30, %s8987_s22  ;;  %5723 = vrot.lane.b32.xlu1 %v13764_v37, %s8987_s22  ;;  %8977 = vrcp.f32 %v5042_v22 }
 0x921   :  { %8979 = vrcp.f32 %v5044_v42 }
 0x924   :  { %5823 = vrot.lane.b32.xlu0 %v13758_v61, %s8988_s23  ;;  %5739 = vrot.lane.b32.xlu1 %v13766_v25, %s8987_s22 }
 0x928   :  { %5839 = vrot.lane.b32.xlu0 %v13762_v30, %s8988_s23  ;;  %5825 = vrot.lane.b32.xlu1 %v13764_v37, %s8988_s23  ;;  %v8974_v31 = vpop.eup %8973 }
 0x929   :  { %v14050_v12 = vmul.f32 %v8974_v31, %v13744_v11  ;;  %v8976_v22 = vpop.eup %8975 }
 0x92a   :  { %v8978_v42 = vpop.eup %8977  ;;  %v14065_v11 = vmul.f32 %v8976_v22, %v13748_v59 }
 0x92b   :  { %17676 = vst [vmem:[#allocation44_spill] sm:$0xff] %v14050_v12  ;;  %v8980_v17 = vpop.eup %8979  ;;  %v14068_v6 = vmul.f32 %v8978_v42, %v13752_v2 }
 0x92c   :  { %5101 = vrot.lane.b32.xlu0 %v13837_v36, %s8981_s13  ;;  %5841 = vrot.lane.b32.xlu1 %v13766_v25, %s8988_s23  ;;  %17679 = vst [vmem:[#allocation110_spill] sm:$0xff] %v14065_v11  ;;  %v14095_v42 = vmul.f32 %v8980_v17, %v13756_v58 }
 0x92d   :  { %17680 = vst [vmem:[#allocation23_spill] sm:$0xff] %v14068_v6 }
 0x92e   :  { %17682 = vst [vmem:[#allocation113_spill] sm:$0xff] %v14095_v42 }
 0x930   :  { %5117 = vrot.lane.b32.xlu0 %v13844_v24, %s8981_s13  ;;  %5103 = vrot.lane.b32.xlu1 %v13847_v3, %s8981_s13 }
 0x934   :  { %5203 = vrot.lane.b32.xlu0 %v13837_v36, %s8982_s18  ;;  %5119 = vrot.lane.b32.xlu1 %v13854_v52, %s8981_s13 }
 0x938   :  { %5219 = vrot.lane.b32.xlu0 %v13844_v24, %s8982_s18  ;;  %5205 = vrot.lane.b32.xlu1 %v13847_v3, %s8982_s18 }
 0x93c   :  { %5305 = vrot.lane.b32.xlu0 %v13837_v36, %s8983_s0  ;;  %5221 = vrot.lane.b32.xlu1 %v13854_v52, %s8982_s18 }
 0x940   :  { %5321 = vrot.lane.b32.xlu0 %v13844_v24, %s8983_s0  ;;  %5307 = vrot.lane.b32.xlu1 %v13847_v3, %s8983_s0 }
 0x944   :  { %5407 = vrot.lane.b32.xlu0 %v13837_v36, %s8984_s19  ;;  %5323 = vrot.lane.b32.xlu1 %v13854_v52, %s8983_s0 }
 0x948   :  { %5423 = vrot.lane.b32.xlu0 %v13844_v24, %s8984_s19  ;;  %5409 = vrot.lane.b32.xlu1 %v13847_v3, %s8984_s19 }
 0x94c   :  { %5525 = vrot.lane.b32.xlu0 %v13837_v36, %s8985_s20  ;;  %5425 = vrot.lane.b32.xlu1 %v13854_v52, %s8984_s19 }
 0x950   :  { %5541 = vrot.lane.b32.xlu0 %v13844_v24, %s8985_s20  ;;  %5527 = vrot.lane.b32.xlu1 %v13847_v3, %s8985_s20 }
 0x954   :  { %5627 = vrot.lane.b32.xlu0 %v13837_v36, %s8986_s21  ;;  %5543 = vrot.lane.b32.xlu1 %v13854_v52, %s8985_s20 }
 0x958   :  { %5643 = vrot.lane.b32.xlu0 %v13844_v24, %s8986_s21  ;;  %5629 = vrot.lane.b32.xlu1 %v13847_v3, %s8986_s21 }
 0x95c   :  { %5729 = vrot.lane.b32.xlu0 %v13837_v36, %s8987_s22  ;;  %5645 = vrot.lane.b32.xlu1 %v13854_v52, %s8986_s21 }
 0x95e   :  { %v13904_v33 = vpop.permute.xlu0 %5093 }
 0x960   :  { %5745 = vrot.lane.b32.xlu0 %v13844_v24, %s8987_s22  ;;  %5731 = vrot.lane.b32.xlu1 %v13847_v3, %s8987_s22 }
 0x962   :  { %v13910_v50 = vpop.permute.xlu1 %5095  ;;  %v13912_v43 = vpop.permute.xlu0 %5109 }
 0x964   :  { %5831 = vrot.lane.b32.xlu0 %v13837_v36, %s8988_s23  ;;  %5747 = vrot.lane.b32.xlu1 %v13854_v52, %s8987_s22 }
 0x966   :  { %v13921_v40 = vpop.permute.xlu0 %5195  ;;  %v13923_v45 = vpop.permute.xlu1 %5111 }
 0x968   :  { %5097 = vrot.lane.b32.xlu0 %v13919_v1, %s8981_s13  ;;  %5833 = vrot.lane.b32.xlu1 %v13847_v3, %s8988_s23 }
 0x96a   :  { %v13935_v34 = vpop.permute.xlu0 %5211  ;;  %v13937_v19 = vpop.permute.xlu1 %5197 }
 0x96c   :  { %5099 = vrot.lane.b32.xlu1 %v13933_v62, %s8981_s13  ;;  %5113 = vrot.lane.b32.xlu0 %v13930_v56, %s8981_s13 }
 0x96e   :  { %v13946_v4 = vpop.permute.xlu0 %5297  ;;  %v13948_v21 = vpop.permute.xlu1 %5213 }
 0x970   :  { %5199 = vrot.lane.b32.xlu0 %v13919_v1, %s8982_s18  ;;  %5115 = vrot.lane.b32.xlu1 %v13944_v20, %s8981_s13 }
 0x972   :  { %v13954_v41 = vpop.permute.xlu0 %5313  ;;  %v13956_v13 = vpop.permute.xlu1 %5299 }
 0x974   :  { %5215 = vrot.lane.b32.xlu0 %v13930_v56, %s8982_s18  ;;  %5201 = vrot.lane.b32.xlu1 %v13933_v62, %s8982_s18 }
 0x976   :  { %v13962_v60 = vpop.permute.xlu0 %5399  ;;  %v13964_v0 = vpop.permute.xlu1 %5315 }
 0x978   :  { %5301 = vrot.lane.b32.xlu0 %v13919_v1, %s8983_s0  ;;  %5217 = vrot.lane.b32.xlu1 %v13944_v20, %s8982_s18 }
 0x97a   :  { %v13970_v32 = vpop.permute.xlu0 %5415  ;;  %v13972_v47 = vpop.permute.xlu1 %5401 }
 0x97c   :  { %5317 = vrot.lane.b32.xlu0 %v13930_v56, %s8983_s0  ;;  %5303 = vrot.lane.b32.xlu1 %v13933_v62, %s8983_s0 }
 0x97e   :  { %v13979_v7 = vpop.permute.xlu0 %5517  ;;  %v13981_v18 = vpop.permute.xlu1 %5417 }
 0x97f   :  { %17662 = vst [vmem:[#allocation76_spill] sm:$0xff] %v13979_v7 }
 0x980   :  { %5403 = vrot.lane.b32.xlu0 %v13919_v1, %s8984_s19  ;;  %5319 = vrot.lane.b32.xlu1 %v13944_v20, %s8983_s0 }
 0x982   :  { %v13989_v27 = vpop.permute.xlu0 %5533  ;;  %v13991_v48 = vpop.permute.xlu1 %5519 }
 0x983   :  { %17663 = vst [vmem:[#allocation41_spill] sm:$0xff] %v13991_v48 }
 0x984   :  { %5419 = vrot.lane.b32.xlu0 %v13930_v56, %s8984_s19  ;;  %5405 = vrot.lane.b32.xlu1 %v13933_v62, %s8984_s19 }
 0x986   :  { %v13998_v38 = vpop.permute.xlu0 %5619  ;;  %v14000_v46 = vpop.permute.xlu1 %5535 }
 0x987   :  { %17664 = vst [vmem:[#allocation105_spill] sm:$0xff] %v13998_v38  ;;  %17665 = vst [vmem:[#allocation81_spill] sm:$0xff] %v14000_v46 }
 0x988   :  { %5521 = vrot.lane.b32.xlu0 %v13919_v1, %s8985_s20  ;;  %5421 = vrot.lane.b32.xlu1 %v13944_v20, %s8984_s19 }
 0x98a   :  { %v14006_v8 = vpop.permute.xlu0 %5635  ;;  %v14008_v16 = vpop.permute.xlu1 %5621 }
 0x98b   :  { %17666 = vst [vmem:[#allocation45_spill] sm:$0xff] %v14006_v8  ;;  %17667 = vst [vmem:[#allocation107_spill] sm:$0xff] %v14008_v16 }
 0x98c   :  { %5537 = vrot.lane.b32.xlu0 %v13930_v56, %s8985_s20  ;;  %5523 = vrot.lane.b32.xlu1 %v13933_v62, %s8985_s20 }
 0x98e   :  { %v14014_v26 = vpop.permute.xlu0 %5721  ;;  %v14016_v15 = vpop.permute.xlu1 %5637 }
 0x98f   :  { %17668 = vst [vmem:[#allocation70_spill] sm:$0xff] %v14014_v26  ;;  %17669 = vst [vmem:[#allocation95_spill] sm:$0xff] %v14016_v15 }
 0x990   :  { %5623 = vrot.lane.b32.xlu0 %v13919_v1, %s8986_s21  ;;  %5539 = vrot.lane.b32.xlu1 %v13944_v20, %s8985_s20 }
 0x992   :  { %v14022_v29 = vpop.permute.xlu0 %5737  ;;  %v14024_v28 = vpop.permute.xlu1 %5723 }
 0x993   :  { %17670 = vst [vmem:[#allocation108_spill] sm:$0xff] %v14022_v29  ;;  %17671 = vst [vmem:[#allocation42_spill] sm:$0xff] %v14024_v28 }
 0x994   :  { %5639 = vrot.lane.b32.xlu0 %v13930_v56, %s8986_s21  ;;  %5625 = vrot.lane.b32.xlu1 %v13933_v62, %s8986_s21 }
 0x996   :  { %v14030_v54 = vpop.permute.xlu0 %5823  ;;  %v14032_v51 = vpop.permute.xlu1 %5739 }
 0x997   :  { %17672 = vst [vmem:[#allocation109_spill] sm:$0xff] %v14030_v54  ;;  %17673 = vst [vmem:[#allocation96_spill] sm:$0xff] %v14032_v51 }
 0x998   :  { %5725 = vrot.lane.b32.xlu0 %v13919_v1, %s8987_s22  ;;  %5641 = vrot.lane.b32.xlu1 %v13944_v20, %s8986_s21 }
 0x99a   :  { %v14038_v14 = vpop.permute.xlu0 %5839  ;;  %v14040_v63 = vpop.permute.xlu1 %5825 }
 0x99b   :  { %17674 = vst [vmem:[#allocation82_spill] sm:$0xff] %v14038_v14  ;;  %17675 = vst [vmem:[#allocation22_spill] sm:$0xff] %v14040_v63  ;;  %v14071_v63 = vrot.slane %v5141_v35, %v17681_v23  ;;  %v14078_v14 = vrot.slane %v5141_v35, %v17503_v5 }
 0x99c   :  { %5741 = vrot.lane.b32.xlu0 %v13930_v56, %s8987_s22  ;;  %5727 = vrot.lane.b32.xlu1 %v13933_v62, %s8987_s22 }
 0x99e   :  { %v5102_v53 = vpop.permute.xlu0 %5101  ;;  %v14052_v49 = vpop.permute.xlu1 %5841 }
 0x99f   :  { %17677 = vst [vmem:[#allocation43_spill] sm:$0xff] %v14052_v49  ;;  %v5133_v39 = vsel %vm62_vm0, %v13904_v33, %v5102_v53 }
 0x9a0   :  { %5105 = vrot.lane.b32.xlu0 %v14050_v12, %s8981_s13  ;;  %5743 = vrot.lane.b32.xlu1 %v13944_v20, %s8987_s22  ;;  %v5164_v54 = vmul.f32 %v14055_v44, %v5133_v39 }
 0x9a2   :  { %v5118_v31 = vpop.permute.xlu0 %5117  ;;  %v5104_v57 = vpop.permute.xlu1 %5103 }
 0x9a3   :  { %v5134_v49 = vsel %vm62_vm0, %v13910_v50, %v5104_v57  ;;  %v5137_v59 = vsel %vm62_vm0, %v5118_v31, %v13904_v33  ;;  %v5125_v2 = vsel %vm62_vm0, %v13912_v43, %v5118_v31  ;;  %v5130_v39 = vsel %vm62_vm0, %v5104_v57, %v13923_v45 }
 0x9a4   :  { %v5168_v22 = vmul.f32 %v14055_v44, %v5134_v49  ;;  %5121 = vrot.lane.b32.xlu0 %v14065_v11, %s8981_s13  ;;  %5107 = vrot.lane.b32.xlu1 %v14068_v6, %s8981_s13  ;;  %v14098_v33 = vrot.slane %v5141_v35, %v17506_v55  ;;  %v5129_v31 = vsel %vm62_vm0, %v5102_v53, %v13912_v43 }
 0x9a5   :  { %v5163_v30 = vmul.f32 %v14071_v63, %v5137_v59  ;;  %v5166_v58 = vmul.f32 %v14078_v14, %v5125_v2 }
 0x9a6   :  { %v14100_v49 = vpop.permute.xlu0 %5203  ;;  %v5120_v51 = vpop.permute.xlu1 %5119  ;;  %v8375_v28 = vpack.c.bf16 %v5168_v22, %v5164_v54  ;;  %v5169_v35 = vmul.f32 %v14098_v33, %v5130_v39  ;;  %v5165_v43 = vmul.f32 %v14098_v33, %v5129_v31 }
 0x9a7   :  { %v5126_v57 = vsel %vm62_vm0, %v13923_v45, %v5120_v51  ;;  %v5138_v17 = vsel %vm62_vm0, %v5120_v51, %v13910_v50 }
 0x9a8   :  { %v5167_v54 = vmul.f32 %v14071_v63, %v5138_v17  ;;  %v5170_v22 = vmul.f32 %v14078_v14, %v5126_v57  ;;  %8376 = vmatprep.subr.bf16.mxu0 %v8375_v28  ;;  %5207 = vrot.lane.b32.xlu0 %v14050_v12, %s8982_s18  ;;  %v8453_v59 = vpack.c.bf16 %v5169_v35, %v5165_v43 }
 0x9a9   :  { %5123 = vrot.lane.b32.xlu1 %v14095_v42, %s8981_s13 }
 0x9aa   :  { %v8377_v45 = vpack.c.bf16 %v5167_v54, %v5163_v30  ;;  %v14121_v53 = vpop.permute.xlu0 %5219  ;;  %v14123_v50 = vpop.permute.xlu1 %5205  ;;  %v8451_v51 = vpack.c.bf16 %v5170_v22, %v5166_v58 }
 0x9ac   :  { %8378 = vmatpush1.bf16.msra.mxu0 %v8377_v45  ;;  %8452 = vmatprep.subr.bf16.mxu1 %v8451_v51 }
 0x9ad   :  { %5223 = vrot.lane.b32.xlu0 %v14065_v11, %s8982_s18  ;;  %5209 = vrot.lane.b32.xlu1 %v14068_v6, %s8982_s18 }
 0x9ae   :  { %8454 = vmatpush1.bf16.msra.mxu1 %v8453_v59  ;;  %v14129_v28 = vpop.permute.xlu0 %5305  ;;  %v14131_v2 = vpop.permute.xlu1 %5221 }
 0x9b1   :  { %5309 = vrot.lane.b32.xlu0 %v14050_v12, %s8983_s0  ;;  %5225 = vrot.lane.b32.xlu1 %v14095_v42, %s8982_s18 }
 0x9b2   :  { %v14137_v30 = vpop.permute.xlu0 %5321  ;;  %v14139_v39 = vpop.permute.xlu1 %5307 }
 0x9b5   :  { %5325 = vrot.lane.b32.xlu0 %v14065_v11, %s8983_s0  ;;  %5311 = vrot.lane.b32.xlu1 %v14068_v6, %s8983_s0 }
 0x9b6   :  { %v14145_v31 = vpop.permute.xlu0 %5407  ;;  %v14147_v57 = vpop.permute.xlu1 %5323 }
 0x9b9   :  { %5411 = vrot.lane.b32.xlu0 %v14050_v12, %s8984_s19  ;;  %5327 = vrot.lane.b32.xlu1 %v14095_v42, %s8983_s0 }
 0x9ba   :  { %v14153_v17 = vpop.permute.xlu0 %5423  ;;  %v14155_v58 = vpop.permute.xlu1 %5409 }
 0x9bd   :  { %5427 = vrot.lane.b32.xlu0 %v14065_v11, %s8984_s19  ;;  %5413 = vrot.lane.b32.xlu1 %v14068_v6, %s8984_s19 }
 0x9be   :  { %v14161_v35 = vpop.permute.xlu0 %5525  ;;  %v14163_v54 = vpop.permute.xlu1 %5425 }
 0x9bf   :  { %17683 = vst [vmem:[#allocation83_spill] sm:$0xff] %v14161_v35  ;;  %17684 = vst [vmem:[#allocation27_spill] sm:$0xff] %v14163_v54 }
 0x9c1   :  { %5847 = vrot.lane.b32.xlu0 %v13844_v24, %s8988_s23  ;;  %5429 = vrot.lane.b32.xlu1 %v14095_v42, %s8984_s19 }
 0x9c2   :  { %v14169_v22 = vpop.permute.xlu0 %5541  ;;  %v14171_v43 = vpop.permute.xlu1 %5527 }
 0x9c3   :  { %17685 = vst [vmem:[#allocation49_spill] sm:$0xff] %v14169_v22  ;;  %17686 = vst [vmem:[#allocation51_spill] sm:$0xff] %v14171_v43 }
 0x9c5   :  { %5529 = vrot.lane.b32.xlu0 %v14050_v12, %s8985_s20  ;;  %5849 = vrot.lane.b32.xlu1 %v13854_v52, %s8988_s23 }
 0x9c6   :  { %v14177_v45 = vpop.permute.xlu0 %5627  ;;  %v14179_v51 = vpop.permute.xlu1 %5543 }
 0x9c7   :  { %17687 = vst [vmem:[#allocation72_spill] sm:$0xff] %v14177_v45  ;;  %17688 = vst [vmem:[#allocation114_spill] sm:$0xff] %v14179_v51 }
 0x9c9   :  { %5545 = vrot.lane.b32.xlu0 %v14065_v11, %s8985_s20  ;;  %5829 = vrot.lane.b32.xlu1 %v13933_v62, %s8988_s23 }
 0x9ca   :  { %v14185_v59 = vpop.permute.xlu0 %5643  ;;  %v14187_v25 = vpop.permute.xlu1 %5629 }
 0x9cb   :  { %17689 = vst [vmem:[#allocation21_spill] sm:$0xff] %v14185_v59  ;;  %17690 = vst [vmem:[#allocation58_spill] sm:$0xff] %v14187_v25 }
 0x9cd   :  { %5631 = vrot.lane.b32.xlu0 %v14050_v12, %s8986_s21  ;;  %5531 = vrot.lane.b32.xlu1 %v14068_v6, %s8985_s20 }
 0x9ce   :  { %v14193_v61 = vpop.permute.xlu0 %5729  ;;  %v14195_v37 = vpop.permute.xlu1 %5645 }
 0x9cf   :  { %17691 = vst [vmem:[#allocation47_spill] sm:$0xff] %v14193_v61  ;;  %17692 = vst [vmem:[#allocation19_spill] sm:$0xff] %v14195_v37 }
 0x9d1   :  { %5647 = vrot.lane.b32.xlu0 %v14065_v11, %s8986_s21  ;;  %5547 = vrot.lane.b32.xlu1 %v14095_v42, %s8985_s20 }
 0x9d2   :  { %v14201_v29 = vpop.permute.xlu0 %5745  ;;  %v14203_v26 = vpop.permute.xlu1 %5731 }
 0x9d3   :  { %17693 = vst [vmem:[#allocation26_spill] sm:$0xff] %v14201_v29  ;;  %17694 = vst [vmem:[#allocation115_spill] sm:$0xff] %v14203_v26  ;;  %v5926_v26 = vld [vmem:[%s16571_s7 + $0x8] sm:$0xff] }
 0x9d4   :  { %6165 = vmatprep.mubr.f32.mxu0 %v5926_v26  ;;  %6343 = vmatprep.mubr.f32.mxu1 %v5926_v26 }
 0x9d5   :  { %5733 = vrot.lane.b32.xlu0 %v14050_v12, %s8987_s22  ;;  %5633 = vrot.lane.b32.xlu1 %v14068_v6, %s8986_s21 }
 0x9d6   :  { %v14209_v59 = vpop.permute.xlu0 %5831  ;;  %v14211_v61 = vpop.permute.xlu1 %5747 }
 0x9d7   :  { %17695 = vst [vmem:[#allocation40_spill] sm:$0xff] %v14209_v59  ;;  %17696 = vst [vmem:[#allocation61_spill] sm:$0xff] %v14211_v61 }
 0x9d9   :  { %5749 = vrot.lane.b32.xlu0 %v14065_v11, %s8987_s22  ;;  %5649 = vrot.lane.b32.xlu1 %v14095_v42, %s8986_s21 }
 0x9da   :  { %v14217_v8 = vpop.permute.xlu0 %5097  ;;  %v14219_v29 = vpop.permute.xlu1 %5833 }
 0x9db   :  { %17697 = vst [vmem:[#allocation53_spill] sm:$0xff] %v14219_v29 }
 0x9dd   :  { %5827 = vrot.lane.b32.xlu0 %v13919_v1, %s8988_s23  ;;  %5735 = vrot.lane.b32.xlu1 %v14068_v6, %s8987_s22 }
 0x9de   :  { %v14228_v59 = vpop.permute.xlu1 %5099  ;;  %v14230_v61 = vpop.permute.xlu0 %5113 }
 0x9e1   :  { %5835 = vrot.lane.b32.xlu0 %v14050_v12, %s8988_s23  ;;  %5751 = vrot.lane.b32.xlu1 %v14095_v42, %s8987_s22 }
 0x9e2   :  { %v14236_v29 = vpop.permute.xlu0 %5199  ;;  %v14238_v37 = vpop.permute.xlu1 %5115 }
 0x9e5   :  { %5843 = vrot.lane.b32.xlu0 %v13930_v56, %s8988_s23  ;;  %5845 = vrot.lane.b32.xlu1 %v13944_v20, %s8988_s23 }
 0x9e6   :  { %v14244_v15 = vpop.permute.xlu0 %5215  ;;  %v14246_v38 = vpop.permute.xlu1 %5201 }
 0x9e9   :  { %5851 = vrot.lane.b32.xlu0 %v14065_v11, %s8988_s23  ;;  %5837 = vrot.lane.b32.xlu1 %v14068_v6, %s8988_s23  ;;  %v7860_v6 = vld [vmem:[%s16565_s1 + $0x7] ss:$8 sm:$0xf] }
 0x9ea   :  { %v14252_v26 = vpop.permute.xlu0 %5301  ;;  %v14254_v45 = vpop.permute.xlu1 %5217 }
 0x9eb   :  { %17698 = vst [vmem:[#allocation103_spill] sm:$0xff] %v14252_v26 }
 0x9ed   :  { %5853 = vrot.lane.b32.xlu1 %v14095_v42, %s8988_s23 }
 0x9ee   :  { %v14258_v16 = vpop.permute.xlu0 %5317  ;;  %v14260_v25 = vpop.permute.xlu1 %5303 }
 0x9ef   :  { %17699 = vst [vmem:[#allocation99_spill] sm:$0xff] %v14258_v16  ;;  %17700 = vst [vmem:[#allocation68_spill] sm:$0xff] %v14260_v25 }
 0x9f2   :  { %v14262_v51 = vpop.permute.xlu0 %5403  ;;  %v14264_v46 = vpop.permute.xlu1 %5319 }
 0x9f3   :  { %17701 = vst [vmem:[#allocation98_spill] sm:$0xff] %v14262_v51  ;;  %17702 = vst [vmem:[#allocation116_spill] sm:$0xff] %v14264_v46  ;;  %v7855_v51 = vld [vmem:[%s16565_s1 + $0x1] ss:$8 sm:$0xf] }
 0x9f4   :  { %v14314_v24 = vrot.slane %v7855_v51, %v17681_v23 }
 0x9f6   :  { %v14266_v48 = vpop.permute.xlu0 %5419  ;;  %v14268_v43 = vpop.permute.xlu1 %5405 }
 0x9f7   :  { %17703 = vst [vmem:[#allocation66_spill] sm:$0xff] %v14266_v48  ;;  %17704 = vst [vmem:[#allocation93_spill] sm:$0xff] %v14268_v43 }
 0x9fa   :  { %v14270_v22 = vpop.permute.xlu0 %5521  ;;  %v14272_v26 = vpop.permute.xlu1 %5421 }
 0x9fb   :  { %17705 = vst [vmem:[#allocation52_spill] sm:$0xff] %v14270_v22  ;;  %17706 = vst [vmem:[#allocation117_spill] sm:$0xff] %v14272_v26  ;;  %v7856_v22 = vld [vmem:[%s16565_s1 + $0x2] ss:$8 sm:$0xf] }
 0x9fc   :  { %v14326_v26 = vrot.slane %v7856_v22, %v17506_v55  ;;  %v14329_v56 = vrot.slane %v7856_v22, %v17681_v23  ;;  %v14332_v20 = vrot.slane %v7856_v22, %v17503_v5 }
 0x9fe   :  { %v14274_v54 = vpop.permute.xlu0 %5537  ;;  %v14276_v7 = vpop.permute.xlu1 %5523 }
 0x9ff   :  { %17707 = vst [vmem:[#allocation39_spill] sm:$0xff] %v14274_v54  ;;  %17708 = vst [vmem:[#allocation63_spill] sm:$0xff] %v14276_v7  ;;  %v7857_v7 = vld [vmem:[%s16565_s1 + $0x3] ss:$8 sm:$0xf]  ;;  %v14308_v54 = vrot.slane %v7855_v51, %v17678_v10 }
 0xa00   :  { %v14342_v11 = vrot.slane %v7857_v7, %v17678_v10  ;;  %v14345_v42 = vrot.slane %v7857_v7, %v17506_v55  ;;  %v14348_v12 = vrot.slane %v7857_v7, %v17681_v23 }
 0xa02   :  { %v14278_v35 = vpop.permute.xlu0 %5623  ;;  %v14280_v16 = vpop.permute.xlu1 %5539 }
 0xa03   :  { %17709 = vst [vmem:[#allocation48_spill] sm:$0xff] %v14278_v35  ;;  %17710 = vst [vmem:[#allocation67_spill] sm:$0xff] %v14280_v16  ;;  %v14311_v35 = vrot.slane %v7855_v51, %v17506_v55  ;;  %v14317_v16 = vrot.slane %v7855_v51, %v17503_v5  ;;  %v7859_v51 = vld [vmem:[%s16565_s1 + $0x6] ss:$8 sm:$0xf] }
 0xa04   :  { %v14369_v3 = vrot.slane %v7859_v51, %v17681_v23  ;;  %v14375_v43 = vrot.slane %v7859_v51, %v17506_v55  ;;  %v14378_v25 = vrot.slane %v7859_v51, %v17503_v5 }
 0xa06   :  { %v14285_v46 = vpop.permute.xlu0 %5639  ;;  %v14287_v48 = vpop.permute.xlu1 %5625  ;;  %17718 = vst [vmem:[#allocation104_spill] sm:$0xff] %v14369_v3  ;;  %17720 = vst [vmem:[#allocation28_spill] sm:$0xff] %v14375_v43  ;;  %v14392_v3 = vrot.slane %v7860_v6, %v17681_v23 }
 0xa07   :  { %17711 = vst [vmem:[#allocation25_spill] sm:$0xff] %v14285_v46  ;;  %17712 = vst [vmem:[#allocation59_spill] sm:$0xff] %v14287_v48  ;;  %v7858_v48 = vld [vmem:[%s16565_s1 + $0x5] ss:$8 sm:$0xf]  ;;  %v14323_v46 = vrot.slane %v7856_v22, %v17678_v10  ;;  %v14351_v22 = vrot.slane %v7857_v7, %v17503_v5  ;;  %v14372_v7 = vrot.slane %v7859_v51, %v17678_v10 }
 0xa08   :  { %v14363_v52 = vrot.slane %v7858_v48, %v17506_v55  ;;  %v14366_v36 = vrot.slane %v7858_v48, %v17503_v5  ;;  %17721 = vst [vmem:[#allocation101_spill] sm:$0xff] %v14378_v25  ;;  %17722 = vst [vmem:[#allocation97_spill] sm:$0xff] %v14392_v3  ;;  %v14395_v51 = vrot.slane %v7860_v6, %v17678_v10 }
 0xa09   :  { %17719 = vst [vmem:[#allocation119_spill] sm:$0xff] %v14372_v7  ;;  %v5236_v7 = vsel %vm105_vm1, %v13937_v19, %v14123_v50  ;;  %v14413_v3 = vrot.slane %v7860_v6, %v17503_v5 }
 0xa0a   :  { %v14337_v1 = vpop.permute.xlu0 %5725  ;;  %v14339_v62 = vpop.permute.xlu1 %5641  ;;  %17716 = vst [vmem:[#allocation106_spill] sm:$0xff] %v14363_v52  ;;  %17717 = vst [vmem:[#allocation100_spill] sm:$0xff] %v14366_v36  ;;  %v5235_v36 = vsel %vm105_vm1, %v13921_v40, %v14100_v49  ;;  %v14410_v52 = vrot.slane %v7860_v6, %v17506_v55  ;;  %v5227_v6 = vsel %vm105_vm1, %v13935_v34, %v14121_v53 }
 0xa0b   :  { %17713 = vst [vmem:[#allocation88_spill] sm:$0xff] %v14337_v1  ;;  %17714 = vst [vmem:[#allocation118_spill] sm:$0xff] %v14339_v62  ;;  %v14357_v1 = vrot.slane %v7858_v48, %v17681_v23  ;;  %v14360_v62 = vrot.slane %v7858_v48, %v17678_v10  ;;  %v5232_v48 = vsel %vm105_vm1, %v14123_v50, %v13948_v21 }
 0xa0c   :  { %17723 = vst [vmem:[#allocation112_spill] sm:$0xff] %v14395_v51  ;;  %v5240_v50 = vsel %vm105_vm1, %v14131_v2, %v13937_v19  ;;  %17726 = vst [vmem:[#allocation120_spill] sm:$0xff] %v14413_v3  ;;  %v14438_v3 = vmul.f32 %v14308_v54, %v5236_v7 }
 0xa0d   :  { %17715 = vst [vmem:[#allocation69_spill] sm:$0xff] %v14360_v62  ;;  %v7861_v62 = vld [vmem:[%s16565_s1 + $0x20] ss:$8 sm:$0xf] }
 0xa0e   :  { %v14397_v25 = vpop.permute.xlu0 %5741  ;;  %v14399_v43 = vpop.permute.xlu1 %5727  ;;  %v14424_v51 = vrot.slane %v7861_v62, %v17681_v23  ;;  %v14427_v19 = vrot.slane %v7861_v62, %v17678_v10  ;;  %v5337_v23 = vsel %vm149_vm2, %v13946_v4, %v14129_v28 }
 0xa0f   :  { %17724 = vst [vmem:[#allocation56_spill] sm:$0xff] %v14397_v25  ;;  %17725 = vst [vmem:[#allocation85_spill] sm:$0xff] %v14399_v43  ;;  %v5231_v43 = vsel %vm105_vm1, %v14100_v49, %v13935_v34  ;;  %v5228_v25 = vsel %vm105_vm1, %v13948_v21, %v14131_v2  ;;  %v5239_v49 = vsel %vm105_vm1, %v14121_v53, %v13921_v40 }
 0xa10   :  { %17727 = vst [vmem:[#allocation111_spill] sm:$0xff] %v14424_v51  ;;  %17728 = vst [vmem:[#allocation102_spill] sm:$0xff] %v14427_v19  ;;  %v14441_v21 = vmul.f32 %v14311_v35, %v5232_v48  ;;  %v14444_v2 = vmul.f32 %v14308_v54, %v5235_v36  ;;  %v14451_v34 = vmul.f32 %v14314_v24, %v5240_v50 }
 0xa11   :  { %v5334_v40 = vsel %vm149_vm2, %v14139_v39, %v13964_v0  ;;  %v14460_v48 = vmul.f32 %v14311_v35, %v5231_v43  ;;  %v5333_v36 = vsel %vm149_vm2, %v14129_v28, %v13954_v41  ;;  %v14467_v10 = vmul.f32 %v14317_v16, %v5228_v25 }
 0xa12   :  { %v5106_v53 = vpop.permute.xlu0 %5105  ;;  %v14457_v7 = vpop.permute.xlu1 %5743  ;;  %v5338_v50 = vsel %vm149_vm2, %v13956_v13, %v14139_v39  ;;  %v14474_v51 = vmul.f32 %v14314_v24, %v5239_v49  ;;  %v5329_v43 = vsel %vm149_vm2, %v13954_v41, %v14137_v30  ;;  %v5341_v25 = vsel %vm149_vm2, %v14137_v30, %v13946_v4 }
 0xa13   :  { %17729 = vst [vmem:[#allocation80_spill] sm:$0xff] %v14457_v7  ;;  %v14477_v7 = vmul.f32 %v14317_v16, %v5227_v6  ;;  %v14490_v39 = vmul.f32 %v14323_v46, %v5337_v23  ;;  %v14493_v49 = vmul.f32 %v14326_v26, %v5334_v40  ;;  %v8383_v6 = vpack.c.bf16 %v14438_v3, %v14444_v2 }
 0xa14   :  { %v14498_v19 = vmul.f32 %v14326_v26, %v5333_v36  ;;  %v14503_v4 = vmul.f32 %v14323_v46, %v5338_v50  ;;  %v5135_v23 = vsel %vm62_vm0, %v14217_v8, %v5106_v53  ;;  %v14509_v40 = vmul.f32 %v14329_v56, %v5341_v25 }
 0xa15   :  { %v14512_v28 = vmul.f32 %v14332_v20, %v5329_v43  ;;  %v14517_v36 = vrot.slane %v7861_v62, %v17506_v55  ;;  %v5330_v50 = vsel %vm149_vm2, %v13964_v0, %v14147_v57  ;;  %v5342_v25 = vsel %vm149_vm2, %v14147_v57, %v13956_v13 }
 0xa16   :  { %v5122_v30 = vpop.permute.xlu0 %5121  ;;  %v5108_v3 = vpop.permute.xlu1 %5107  ;;  %v14531_v41 = vrot.slane %v7861_v62, %v17503_v5  ;;  %v5172_v55 = vmul.f32 %v14055_v44, %v5135_v23  ;;  %v5435_v13 = vsel %vm193_vm3, %v14145_v31, %v13970_v32 }
 0xa17   :  { %17730 = vst [vmem:[#allocation122_spill] sm:$0xff] %v14517_v36  ;;  %v5136_v43 = vsel %vm62_vm0, %v14228_v59, %v5108_v3  ;;  %v5139_v0 = vsel %vm62_vm0, %v5122_v30, %v14217_v8  ;;  %v5127_v62 = vsel %vm62_vm0, %v14230_v61, %v5122_v30  ;;  %v5132_v57 = vsel %vm62_vm0, %v5108_v3, %v14238_v37 }
 0xa18   :  { %17731 = vst [vmem:[#allocation121_spill] sm:$0xff] %v14531_v41  ;;  %v5176_v36 = vmul.f32 %v14055_v44, %v5136_v43  ;;  %v5439_v44 = vsel %vm193_vm3, %v13962_v60, %v14145_v31  ;;  %v14557_v8 = vmul.f32 %v14329_v56, %v5342_v25  ;;  %v14560_v43 = vmul.f32 %v14332_v20, %v5330_v50 }
 0xa19   :  { %v5131_v3 = vsel %vm62_vm0, %v5106_v53, %v14230_v61  ;;  %v5171_v23 = vmul.f32 %v14071_v63, %v5139_v0  ;;  %v5174_v50 = vmul.f32 %v14078_v14, %v5127_v62  ;;  %v5177_v25 = vmul.f32 %v14098_v33, %v5132_v57 }
 0xa1a   :  { %v5208_v2 = vpop.permute.xlu0 %5207  ;;  %v8379_v5 = vpack.c.bf16 %v5176_v36, %v5172_v55  ;;  %v14577_v61 = vmul.f32 %v14342_v11, %v5439_v44  ;;  %v14580_v53 = vmul.f32 %v14345_v42, %v5435_v13  ;;  %v8393_v13 = vpack.c.bf16 %v14557_v8, %v14509_v40 }
 0xa1b   :  { %v5124_v30 = vpop.permute.xlu1 %5123 }
 0xa1c   :  { %v5128_v41 = vsel %vm62_vm0, %v14238_v37, %v5124_v30  ;;  %v5140_v31 = vsel %vm62_vm0, %v5124_v30, %v14228_v59  ;;  %8380 = vmatprep.subr.bf16.mxu0 %v8379_v5  ;;  %v5431_v37 = vsel %vm193_vm3, %v13970_v32, %v14153_v17  ;;  %v5443_v59 = vsel %vm193_vm3, %v14153_v17, %v13962_v60 }
 0xa1d   :  { %v5175_v55 = vmul.f32 %v14071_v63, %v5140_v31  ;;  %v5178_v36 = vmul.f32 %v14078_v14, %v5128_v41  ;;  %v5173_v63 = vmul.f32 %v14098_v33, %v5131_v3  ;;  %v5237_v5 = vsel %vm105_vm1, %v14236_v29, %v5208_v2 }
 0xa1e   :  { %v5436_v32 = vsel %vm193_vm3, %v14155_v58, %v13981_v18  ;;  %v5440_v60 = vsel %vm193_vm3, %v13972_v47, %v14155_v58  ;;  %v8467_v17 = vpack.c.bf16 %v14560_v43, %v14512_v28  ;;  %v14607_v62 = vmul.f32 %v14348_v12, %v5443_v59 }
 0xa1f   :  { %v8381_v14 = vpack.c.bf16 %v5175_v55, %v5171_v23  ;;  %v5224_v41 = vpop.permute.xlu0 %5223  ;;  %v8455_v0 = vpack.c.bf16 %v5178_v36, %v5174_v50  ;;  %v5210_v33 = vpop.permute.xlu1 %5209  ;;  %v14610_v57 = vmul.f32 %v14351_v22, %v5431_v37  ;;  %v8457_v23 = vpack.c.bf16 %v5177_v25, %v5173_v63  ;;  %v17733_v37 = vld [vmem:[#allocation76_spill] sm:$0xff] }
 0xa20   :  { %v5238_v44 = vsel %vm105_vm1, %v14246_v38, %v5210_v33  ;;  %v5274_v30 = vmul.f32 %v14308_v54, %v5237_v5  ;;  %v5234_v58 = vsel %vm105_vm1, %v5210_v33, %v14254_v45  ;;  %v14621_v31 = vmul.f32 %v14342_v11, %v5440_v60 }
 0xa21   :  { %8382 = vmatpush1.bf16.msra.mxu0 %v8381_v14  ;;  %v5278_v3 = vmul.f32 %v14308_v54, %v5238_v44  ;;  %8456 = vmatprep.subr.bf16.mxu1 %v8455_v0  ;;  %v14624_v50 = vmul.f32 %v14345_v42, %v5436_v32  ;;  %v5229_v25 = vsel %vm105_vm1, %v14244_v15, %v5224_v41  ;;  %v17732_v54 = vld [vmem:[#allocation83_spill] sm:$0xff] }
 0xa22   :  { %8384 = vmatprep.subr.bf16.mxu0 %v8383_v6  ;;  %v5241_v55 = vsel %vm105_vm1, %v5224_v41, %v14236_v29  ;;  %8458 = vmatpush1.bf16.msra.mxu1 %v8457_v23  ;;  %v5553_v6 = vsel %vm241_vm4, %v17732_v54, %v13989_v27  ;;  %v5557_v59 = vsel %vm241_vm4, %v17733_v37, %v17732_v54  ;;  %v17735_v41 = vld [vmem:[#allocation27_spill] sm:$0xff]  ;;  %v17740_v54 = vld [vmem:[#allocation68_spill] sm:$0xff] }
 0xa23   :  { %v5310_v36 = vpop.permute.xlu0 %5309  ;;  %v5233_v63 = vsel %vm105_vm1, %v5208_v2, %v14244_v15  ;;  %v17734_v5 = vpack.c.bf16 %v14467_v10, %v14477_v7  ;;  %v5226_v29 = vpop.permute.xlu1 %5225  ;;  %v8387_v14 = vpack.c.bf16 %v5278_v3, %v5274_v30  ;;  %v5444_v0 = vsel %vm193_vm3, %v17735_v41, %v13972_v47  ;;  %v17737_v44 = vld [vmem:[#allocation103_spill] sm:$0xff] }
 0xa24   :  { %v5279_v32 = vmul.f32 %v14311_v35, %v5234_v58  ;;  %v5230_v60 = vsel %vm105_vm1, %v14254_v45, %v5226_v29  ;;  %v5242_v15 = vsel %vm105_vm1, %v5226_v29, %v14246_v38  ;;  %v17736_v10 = vpack.c.bf16 %v14451_v34, %v14474_v51  ;;  %v17742_v29 = vld [vmem:[#allocation99_spill] sm:$0xff] }
 0xa25   :  { %8460 = vmatprep.subr.bf16.mxu1 %v17734_v5  ;;  %v5273_v7 = vmul.f32 %v14314_v24, %v5241_v55  ;;  %v5276_v2 = vmul.f32 %v14317_v16, %v5229_v25  ;;  %v5277_v47 = vmul.f32 %v14314_v24, %v5242_v15  ;;  %v5280_v33 = vmul.f32 %v14317_v16, %v5230_v60 }
 0xa26   :  { %8386 = vmatpush1.bf16.msra.mxu0 %v17736_v10  ;;  %v8477_v45 = vpack.c.bf16 %v14624_v50, %v14580_v53  ;;  %v5275_v23 = vmul.f32 %v14311_v35, %v5233_v63  ;;  %v5339_v38 = vsel %vm149_vm2, %v17737_v44, %v5310_v36  ;;  %v17738_v51 = vpack.c.bf16 %v14441_v21, %v14460_v48  ;;  %v17739_v21 = vld [vmem:[#allocation69_spill] sm:$0xff]  ;;  %v17745_v10 = vld [vmem:[#allocation51_spill] sm:$0xff] }
 0xa27   :  { %8388 = vmatprep.subr.bf16.mxu0 %v8387_v14  ;;  %v5326_v34 = vpop.permute.xlu0 %5325  ;;  %v8399_v24 = vpack.c.bf16 %v14621_v31, %v14577_v61  ;;  %v5432_v16 = vsel %vm193_vm3, %v13981_v18, %v17735_v41  ;;  %v14680_v30 = vmul.f32 %v14348_v12, %v5444_v0  ;;  %v8389_v35 = vpack.c.bf16 %v5277_v47, %v5273_v7  ;;  %v5312_v58 = vpop.permute.xlu1 %5311  ;;  %v17741_v18 = vld [vmem:[#allocation116_spill] sm:$0xff]  ;;  %v17746_v7 = vld [vmem:[#allocation41_spill] sm:$0xff]  ;;  %v17761_v53 = vld [vmem:[#allocation19_spill] sm:$0xff] }
 0xa28   :  { %8462 = vmatpush1.bf16.msra.mxu1 %v17738_v51  ;;  %v8463_v3 = vpack.c.bf16 %v5280_v33, %v5276_v2  ;;  %v14683_v25 = vmul.f32 %v14357_v1, %v5557_v59  ;;  %v14686_v48 = vmul.f32 %v17739_v21, %v5553_v6  ;;  %v8465_v55 = vpack.c.bf16 %v5279_v32, %v5275_v23  ;;  %v17744_v32 = vld [vmem:[#allocation49_spill] sm:$0xff]  ;;  %v17747_v23 = vld [vmem:[#allocation98_spill] sm:$0xff] }
 0xa29   :  { %v5340_v61 = vsel %vm149_vm2, %v17740_v54, %v5312_v58  ;;  %v5376_v31 = vmul.f32 %v14323_v46, %v5339_v38  ;;  %v5336_v63 = vsel %vm149_vm2, %v5312_v58, %v17741_v18  ;;  %v5476_v59 = vmul.f32 %v14351_v22, %v5432_v16  ;;  %v17752_v58 = vld [vmem:[#allocation117_spill] sm:$0xff] }
 0xa2a   :  { %v5380_v5 = vmul.f32 %v14323_v46, %v5340_v61  ;;  %8390 = vmatpush1.bf16.msra.mxu0 %v8389_v35  ;;  %8464 = vmatprep.subr.bf16.mxu1 %v8463_v3  ;;  %v5331_v6 = vsel %vm149_vm2, %v17742_v29, %v5326_v34  ;;  %v5343_v14 = vsel %vm149_vm2, %v5326_v34, %v17737_v44  ;;  %v17749_v34 = vld [vmem:[#allocation106_spill] sm:$0xff] }
 0xa2b   :  { %v17743_v41 = vpack.c.bf16 %v14503_v4, %v14490_v39  ;;  %v5412_v0 = vpop.permute.xlu0 %5411  ;;  %v8401_v46 = vpack.c.bf16 %v14680_v30, %v14607_v62  ;;  %v5549_v60 = vsel %vm241_vm4, %v13989_v27, %v17744_v32  ;;  %v5335_v15 = vsel %vm149_vm2, %v5310_v36, %v17742_v29  ;;  %v5328_v39 = vpop.permute.xlu1 %5327  ;;  %v17750_v30 = vld [vmem:[#allocation81_spill] sm:$0xff] }
 0xa2c   :  { %8466 = vmatpush1.bf16.msra.mxu1 %v8465_v55  ;;  %v8395_v4 = vpack.c.bf16 %v5380_v5, %v5376_v31  ;;  %v5558_v62 = vsel %vm241_vm4, %v17746_v7, %v17745_v10  ;;  %v5381_v2 = vmul.f32 %v14326_v26, %v5336_v63  ;;  %v5332_v27 = vsel %vm149_vm2, %v17741_v18, %v5328_v39  ;;  %v17754_v31 = vld [vmem:[#allocation66_spill] sm:$0xff] }
 0xa2d   :  { %8392 = vmatprep.subr.bf16.mxu0 %v17743_v41  ;;  %8468 = vmatprep.subr.bf16.mxu1 %v8467_v17  ;;  %v5344_v36 = vsel %vm149_vm2, %v5328_v39, %v17740_v54  ;;  %v5375_v28 = vmul.f32 %v14329_v56, %v5343_v14  ;;  %v5378_v43 = vmul.f32 %v14332_v20, %v5331_v6  ;;  %v17753_v54 = vld [vmem:[#allocation100_spill] sm:$0xff]  ;;  %v17755_v41 = vld [vmem:[#allocation114_spill] sm:$0xff] }
 0xa2e   :  { %v5379_v17 = vmul.f32 %v14329_v56, %v5344_v36  ;;  %v5382_v47 = vmul.f32 %v14332_v20, %v5332_v27  ;;  %8394 = vmatpush1.bf16.msra.mxu0 %v8393_v13  ;;  %v5377_v33 = vmul.f32 %v14326_v26, %v5335_v15  ;;  %v5441_v44 = vsel %vm193_vm3, %v17747_v23, %v5412_v0  ;;  %v17757_v27 = vld [vmem:[#allocation107_spill] sm:$0xff] }
 0xa2f   :  { %8396 = vmatprep.subr.bf16.mxu0 %v8395_v4  ;;  %v17748_v38 = vpack.c.bf16 %v14493_v49, %v14498_v19  ;;  %v5428_v51 = vpop.permute.xlu0 %5427  ;;  %v8475_v56 = vpack.c.bf16 %v5476_v59, %v14610_v57  ;;  %v5561_v20 = vsel %vm241_vm4, %v17744_v32, %v17733_v37  ;;  %v14749_v40 = vmul.f32 %v14357_v1, %v5558_v62  ;;  %v5414_v8 = vpop.permute.xlu1 %5413  ;;  %v17751_v57 = vld [vmem:[#allocation93_spill] sm:$0xff] }
 0xa30   :  { %v8397_v26 = vpack.c.bf16 %v5379_v17, %v5375_v28  ;;  %v8471_v13 = vpack.c.bf16 %v5382_v47, %v5378_v43  ;;  %v14752_v16 = vmul.f32 %v17749_v34, %v5549_v60  ;;  %v5554_v19 = vsel %vm241_vm4, %v17745_v10, %v17750_v30  ;;  %v17760_v17 = vld [vmem:[#allocation95_spill] sm:$0xff] }
 0xa31   :  { %8470 = vmatpush1.bf16.msra.mxu1 %v17748_v38  ;;  %v8473_v49 = vpack.c.bf16 %v5381_v2, %v5377_v33  ;;  %v5442_v35 = vsel %vm193_vm3, %v17751_v57, %v5414_v8  ;;  %v5478_v37 = vmul.f32 %v14342_v11, %v5441_v44  ;;  %v5438_v3 = vsel %vm193_vm3, %v5414_v8, %v17752_v58  ;;  %v17756_v2 = vld [vmem:[#allocation58_spill] sm:$0xff]  ;;  %v17762_v38 = vld [vmem:[#allocation45_spill] sm:$0xff] }
 0xa32   :  { %v5482_v55 = vmul.f32 %v14342_v11, %v5442_v35  ;;  %8398 = vmatpush1.bf16.msra.mxu0 %v8397_v26  ;;  %8472 = vmatprep.subr.bf16.mxu1 %v8471_v13  ;;  %v14767_v61 = vmul.f32 %v17753_v54, %v5561_v20  ;;  %v5433_v18 = vsel %vm193_vm3, %v17754_v31, %v5428_v51  ;;  %v17763_v20 = vld [vmem:[#allocation104_spill] sm:$0xff]  ;;  %v17764_v8 = vld [vmem:[#allocation21_spill] sm:$0xff]  ;;  %v17767_v35 = vld [vmem:[#allocation74_spill] sm:$0xff] }
 0xa33   :  { %v5445_v63 = vsel %vm193_vm3, %v5428_v51, %v17747_v23  ;;  %8400 = vmatprep.subr.bf16.mxu0 %v8399_v24  ;;  %v14775_v5 = vpop.permute.xlu0 %5847  ;;  %v14778_v59 = vmul.f32 %v17739_v21, %v5554_v19  ;;  %v8417_v11 = vpack.c.bf16 %v14749_v40, %v14683_v25  ;;  %v5437_v29 = vsel %vm193_vm3, %v5412_v0, %v17754_v31  ;;  %v5430_v6 = vpop.permute.xlu1 %5429  ;;  %v17765_v19 = vld [vmem:[#allocation119_spill] sm:$0xff]  ;;  %v17770_v31 = vld [vmem:[#allocation70_spill] sm:$0xff] }
 0xa34   :  { %v8403_v14 = vpack.c.bf16 %v5482_v55, %v5478_v37  ;;  %v5550_v24 = vsel %vm241_vm4, %v17750_v30, %v17755_v41  ;;  %v5483_v32 = vmul.f32 %v14345_v42, %v5438_v3  ;;  %v5434_v60 = vsel %vm193_vm3, %v17752_v58, %v5430_v6  ;;  %v17769_v55 = vld [vmem:[#allocation47_spill] sm:$0xff] }
 0xa35   :  { %8474 = vmatpush1.bf16.msra.mxu1 %v8473_v49  ;;  %v5446_v15 = vsel %vm193_vm3, %v5430_v6, %v17751_v57  ;;  %v5477_v0 = vmul.f32 %v14348_v12, %v5445_v63  ;;  %v5480_v39 = vmul.f32 %v14351_v22, %v5433_v18  ;;  %v5484_v10 = vmul.f32 %v14351_v22, %v5434_v60  ;;  %v17758_v22 = vld [vmem:[#allocation72_spill] sm:$0xff]  ;;  %v17766_v57 = vld [vmem:[#allocation77_spill] sm:$0xff] }
 0xa36   :  { %8476 = vmatprep.subr.bf16.mxu1 %v8475_v56  ;;  %v5481_v4 = vmul.f32 %v14348_v12, %v5446_v15  ;;  %8402 = vmatpush1.bf16.msra.mxu0 %v8401_v46  ;;  %v5562_v62 = vsel %vm241_vm4, %v17755_v41, %v17746_v7  ;;  %v5660_v36 = vsel %vm285_vm6, %v17757_v27, %v17756_v2  ;;  %v17759_v46 = vld [vmem:[#allocation105_spill] sm:$0xff]  ;;  %v17771_v63 = vld [vmem:[#allocation28_spill] sm:$0xff]  ;;  %v17773_v41 = vld [vmem:[#allocation94_spill] sm:$0xff] }
 0xa37   :  { %v5479_v28 = vmul.f32 %v14345_v42, %v5437_v29  ;;  %8404 = vmatprep.subr.bf16.mxu0 %v8403_v14  ;;  %v5530_v12 = vpop.permute.xlu0 %5529  ;;  %v5659_v43 = vsel %vm285_vm6, %v17759_v46, %v17758_v22  ;;  %v5656_v7 = vsel %vm285_vm6, %v17756_v2, %v17760_v17  ;;  %v14820_v33 = vpop.permute.xlu1 %5849  ;;  %v8479_v42 = vpack.c.bf16 %v5484_v10, %v5480_v39  ;;  %v17772_v6 = vld [vmem:[#allocation101_spill] sm:$0xff]  ;;  %v17776_v39 = vld [vmem:[#allocation108_spill] sm:$0xff] }
 0xa38   :  { %v8405_v47 = vpack.c.bf16 %v5481_v4, %v5477_v0  ;;  %v14823_v23 = vmul.f32 %v17749_v34, %v5550_v24  ;;  %v5652_v50 = vsel %vm285_vm6, %v17760_v17, %v17761_v53  ;;  %v5655_v51 = vsel %vm285_vm6, %v17758_v22, %v17762_v38  ;;  %v17774_v24 = vld [vmem:[#allocation60_spill] sm:$0xff]  ;;  %v17781_v17 = vld [vmem:[#allocation39_spill] sm:$0xff] }
 0xa39   :  { %8478 = vmatpush1.bf16.msra.mxu1 %v8477_v45  ;;  %v5664_v45 = vsel %vm285_vm6, %v17761_v53, %v17757_v27  ;;  %v8481_v44 = vpack.c.bf16 %v5483_v32, %v5479_v28  ;;  %v5594_v56 = vmul.f32 %v17753_v54, %v5562_v62  ;;  %v14839_v26 = vmul.f32 %v17763_v20, %v5660_v36  ;;  %v17777_v36 = vld [vmem:[#allocation87_spill] sm:$0xff]  ;;  %v17778_v28 = vld [vmem:[#allocation89_spill] sm:$0xff] }
 0xa3a   :  { %8406 = vmatpush1.bf16.msra.mxu0 %v8405_v47  ;;  %8480 = vmatprep.subr.bf16.mxu1 %v8479_v42  ;;  %v5651_v13 = vsel %vm285_vm6, %v17762_v38, %v17764_v8  ;;  %v5663_v30 = vsel %vm285_vm6, %v17764_v8, %v17759_v46  ;;  %v14850_v49 = vmul.f32 %v17765_v19, %v5656_v7  ;;  %v17780_v46 = vld [vmem:[#allocation97_spill] sm:$0xff]  ;;  %v17783_v7 = vld [vmem:[#allocation44_spill] sm:$0xff] }
 0xa3b   :  { %v17768_v37 = vpack.c.bf16 %v17766_v57, %v17767_v35  ;;  %v5546_v58 = vpop.permute.xlu0 %5545  ;;  %v14856_v3 = vmul.f32 %v17763_v20, %v5659_v43  ;;  %v5761_v18 = vsel %vm329_vm5, %v17770_v31, %v17769_v55  ;;  %v14863_v29 = vmul.f32 %v17771_v63, %v5652_v50  ;;  %v14871_v60 = vpop.permute.xlu1 %5829  ;;  %v17785_v42 = vld [vmem:[#allocation24_spill] sm:$0xff]  ;;  %v17792_v57 = vld [vmem:[#allocation110_spill] sm:$0xff] }
 0xa3c   :  { %v14866_v14 = vmul.f32 %v17772_v6, %v5664_v45  ;;  %v17775_v32 = vpack.c.bf16 %v17773_v41, %v17774_v24  ;;  %v14874_v15 = vmul.f32 %v17765_v19, %v5655_v51  ;;  %v8493_v0 = vpack.c.bf16 %v14823_v23, %v14752_v16  ;;  %v17786_v23 = vld [vmem:[#allocation86_spill] sm:$0xff]  ;;  %v17789_v51 = vld [vmem:[#allocation115_spill] sm:$0xff] }
 0xa3d   :  { %8408 = vmatprep.subr.bf16.mxu0 %v17768_v37  ;;  %8482 = vmatpush1.bf16.msra.mxu1 %v8481_v44  ;;  %v5757_v4 = vsel %vm329_vm5, %v17769_v55, %v17776_v39  ;;  %v8415_v10 = vpack.c.bf16 %v14778_v59, %v14686_v48  ;;  %v14885_v62 = vmul.f32 %v17771_v63, %v5651_v13  ;;  %v17782_v59 = vld [vmem:[#allocation23_spill] sm:$0xff] }
 0xa3e   :  { %8484 = vmatprep.subr.bf16.mxu1 %v17775_v32  ;;  %v14888_v2 = vmul.f32 %v17772_v6, %v5663_v30  ;;  %v8425_v27 = vpack.c.bf16 %v14839_v26, %v14856_v3  ;;  %v17779_v16 = vpack.c.bf16 %v17777_v36, %v17778_v28  ;;  %v8491_v22 = vpack.c.bf16 %v5594_v56, %v14767_v61  ;;  %v17788_v61 = vld [vmem:[#allocation112_spill] sm:$0xff]  ;;  %v17790_v56 = vld [vmem:[#allocation42_spill] sm:$0xff]  ;;  %v17791_v30 = vld [vmem:[#allocation113_spill] sm:$0xff] }
 0xa3f   :  { %v14897_v43 = vmul.f32 %v17780_v46, %v5761_v18  ;;  %v5555_v48 = vsel %vm241_vm4, %v5530_v12, %v17781_v17  ;;  %v17784_v47 = vpack.c.bf16 %v17782_v59, %v17783_v7  ;;  %v17787_v53 = vpack.c.bf16 %v17785_v42, %v17786_v23  ;;  %v5632_v50 = vpop.permute.xlu0 %5631  ;;  %v5532_v13 = vpop.permute.xlu1 %5531  ;;  %v17795_v18 = vld [vmem:[#allocation96_spill] sm:$0xff]  ;;  %v17796_v24 = vld [vmem:[#allocation67_spill] sm:$0xff] }
 0xa40   :  { %8410 = vmatpush1.bf16.msra.mxu0 %v17779_v16  ;;  %v8423_v45 = vpack.c.bf16 %v14850_v49, %v14874_v15  ;;  %v14911_v44 = vmul.f32 %v17788_v61, %v5757_v4  ;;  %v8501_v38 = vpack.c.bf16 %v14863_v29, %v14885_v62  ;;  %v5762_v8 = vsel %vm329_vm5, %v17790_v56, %v17789_v51  ;;  %v17794_v49 = vld [vmem:[#allocation26_spill] sm:$0xff]  ;;  %v17797_v15 = vld [vmem:[#allocation63_spill] sm:$0xff]  ;;  %v17799_v16 = vld [vmem:[#allocation73_spill] sm:$0xff] }
 0xa41   :  { %8412 = vmatprep.subr.bf16.mxu0 %v17784_v47  ;;  %8486 = vmatpush1.bf16.msra.mxu1 %v17787_v53  ;;  %v17793_v35 = vpack.c.bf16 %v17791_v30, %v17792_v57  ;;  %v8499_v37 = vpack.c.bf16 %v14866_v14, %v14888_v2  ;;  %v5753_v55 = vsel %vm329_vm5, %v17776_v39, %v17794_v49  ;;  %v17798_v2 = vld [vmem:[#allocation52_spill] sm:$0xff]  ;;  %v17800_v59 = vld [vmem:[#allocation71_spill] sm:$0xff]  ;;  %v17805_v30 = vld [vmem:[#allocation61_spill] sm:$0xff] }
 0xa42   :  { %v5758_v41 = vsel %vm329_vm5, %v17789_v51, %v17795_v18  ;;  %v5556_v32 = vsel %vm241_vm4, %v5532_v13, %v17796_v24  ;;  %v5560_v4 = vsel %vm241_vm4, %v17797_v15, %v5532_v13  ;;  %v5765_v14 = vsel %vm329_vm5, %v17794_v49, %v17770_v31  ;;  %v17819_v62 = vld [vmem:[#allocation80_spill] sm:$0xff] }
 0xa43   :  { %8488 = vmatprep.subr.bf16.mxu1 %v17793_v35  ;;  %v5559_v39 = vsel %vm241_vm4, %v17798_v2, %v5530_v12  ;;  %v5596_v36 = vmul.f32 %v17739_v21, %v5555_v48  ;;  %v5600_v28 = vmul.f32 %v17739_v21, %v5556_v32  ;;  %v17801_v7 = vpack.c.bf16 %v17799_v16, %v17800_v59  ;;  %v17802_v12 = vld [vmem:[#allocation62_spill] sm:$0xff]  ;;  %v17803_v48 = vld [vmem:[#allocation75_spill] sm:$0xff]  ;;  %v5648_v21 = vpop.permute.xlu0 %5647  ;;  %v5548_v13 = vpop.permute.xlu1 %5547  ;;  %v17807_v32 = vld [vmem:[#allocation25_spill] sm:$0xff] }
 0xa44   :  { %v14951_v47 = vmul.f32 %v17780_v46, %v5762_v8  ;;  %v5551_v42 = vsel %vm241_vm4, %v17781_v17, %v5546_v58  ;;  %v5563_v31 = vsel %vm241_vm4, %v5546_v58, %v17798_v2  ;;  %v17804_v23 = vpack.c.bf16 %v17802_v12, %v17803_v48  ;;  %v17808_v2 = vld [vmem:[#allocation118_spill] sm:$0xff]  ;;  %v17810_v16 = vld [vmem:[#allocation48_spill] sm:$0xff] }
 0xa45   :  { %8414 = vmatpush1.bf16.msra.mxu0 %v17801_v7  ;;  %v14963_v53 = vmul.f32 %v14410_v52, %v5753_v55  ;;  %v14966_v51 = vmul.f32 %v17788_v61, %v5758_v41  ;;  %v5599_v8 = vmul.f32 %v14357_v1, %v5560_v4  ;;  %v8419_v17 = vpack.c.bf16 %v5600_v28, %v5596_v36  ;;  %v17809_v36 = vld [vmem:[#allocation59_spill] sm:$0xff]  ;;  %v17812_v48 = vld [vmem:[#allocation40_spill] sm:$0xff] }
 0xa46   :  { %8416 = vmatprep.subr.bf16.mxu0 %v8415_v10  ;;  %8490 = vmatpush1.bf16.msra.mxu1 %v17804_v23  ;;  %v5754_v58 = vsel %vm329_vm5, %v17795_v18, %v17805_v30  ;;  %v5595_v10 = vmul.f32 %v14357_v1, %v5559_v39  ;;  %v5552_v57 = vsel %vm241_vm4, %v17796_v24, %v5548_v13  ;;  %v17806_v1 = vld [vmem:[#allocation120_spill] sm:$0xff]  ;;  %v17813_v23 = vld [vmem:[#allocation109_spill] sm:$0xff] }
 0xa47   :  { %8492 = vmatprep.subr.bf16.mxu1 %v8491_v22  ;;  %v5564_v35 = vsel %vm241_vm4, %v5548_v13, %v17797_v15  ;;  %v5597_v49 = vmul.f32 %v17749_v34, %v5551_v42  ;;  %v5598_v22 = vmul.f32 %v17753_v54, %v5563_v31  ;;  %v5601_v55 = vmul.f32 %v17749_v34, %v5552_v57  ;;  %v5734_v4 = vpop.permute.xlu0 %5733 }
 0xa48   :  { %v5602_v41 = vmul.f32 %v17753_v54, %v5564_v35  ;;  %v14988_v18 = vmul.f32 %v17806_v1, %v5765_v14  ;;  %v8433_v24 = vpack.c.bf16 %v14951_v47, %v14897_v43  ;;  %v5657_v15 = vsel %vm285_vm6, %v5632_v50, %v17807_v32  ;;  %v5634_v54 = vpop.permute.xlu1 %5633 }
 0xa49   :  { %8418 = vmatpush1.bf16.msra.mxu0 %v8417_v11  ;;  %v5766_v34 = vsel %vm329_vm5, %v17805_v30, %v17790_v56  ;;  %v8421_v25 = vpack.c.bf16 %v5599_v8, %v5595_v10  ;;  %v8497_v40 = vpack.c.bf16 %v5601_v55, %v5597_v49  ;;  %v15000_v14 = vmul.f32 %v14410_v52, %v5754_v58  ;;  %v17816_v55 = vld [vmem:[#allocation56_spill] sm:$0xff] }
 0xa4a   :  { %8420 = vmatprep.subr.bf16.mxu0 %v8419_v17  ;;  %8494 = vmatpush1.bf16.msra.mxu1 %v8493_v0  ;;  %v8495_v11 = vpack.c.bf16 %v5602_v41, %v5598_v22  ;;  %v5658_v39 = vsel %vm285_vm6, %v5634_v54, %v17808_v2  ;;  %v5662_v0 = vsel %vm285_vm6, %v17809_v36, %v5634_v54  ;;  %v17821_v54 = vld [vmem:[#allocation88_spill] sm:$0xff] }
 0xa4b   :  { %v8431_v28 = vpack.c.bf16 %v14966_v51, %v14911_v44  ;;  %v5661_v56 = vsel %vm285_vm6, %v17810_v16, %v5632_v50  ;;  %v5698_v59 = vmul.f32 %v17765_v19, %v5657_v15  ;;  %v5702_v7 = vmul.f32 %v17765_v19, %v5658_v39  ;;  %v5750_v12 = vpop.permute.xlu0 %5749  ;;  %v17811_v50 = vld [vmem:[#allocation82_spill] sm:$0xff] }
 0xa4c   :  { %8496 = vmatprep.subr.bf16.mxu1 %v8495_v11  ;;  %v5798_v42 = vmul.f32 %v17806_v1, %v5766_v34  ;;  %v5653_v31 = vsel %vm285_vm6, %v17807_v32, %v5648_v21  ;;  %v5665_v44 = vsel %vm285_vm6, %v5648_v21, %v17810_v16  ;;  %v5859_v19 = vsel %vm373_vm7, %v17812_v48, %v17811_v50  ;;  %v5650_v13 = vpop.permute.xlu1 %5649  ;;  %v17814_v21 = vld [vmem:[#allocation43_spill] sm:$0xff]  ;;  %v17818_v34 = vld [vmem:[#allocation102_spill] sm:$0xff] }
 0xa4d   :  { %8422 = vmatpush1.bf16.msra.mxu0 %v8421_v25  ;;  %v15030_v51 = vsel %vm373_vm7, %v17813_v23, %v17812_v48  ;;  %v5701_v8 = vmul.f32 %v17763_v20, %v5662_v0  ;;  %v8427_v17 = vpack.c.bf16 %v5702_v7, %v5698_v59  ;;  %v5697_v58 = vmul.f32 %v17763_v20, %v5661_v56 }
 0xa4e   :  { %8424 = vmatprep.subr.bf16.mxu0 %v8423_v45  ;;  %8498 = vmatpush1.bf16.msra.mxu1 %v8497_v40  ;;  %v17815_v45 = vld [vmem:[#allocation53_spill] sm:$0xff]  ;;  %v5654_v10 = vsel %vm285_vm6, %v17808_v2, %v5650_v13  ;;  %v5666_v57 = vsel %vm285_vm6, %v5650_v13, %v17809_v36  ;;  %v5699_v35 = vmul.f32 %v17771_v63, %v5653_v31 }
 0xa4f   :  { %8500 = vmatprep.subr.bf16.mxu1 %v8499_v37  ;;  %v5860_v30 = vsel %vm373_vm7, %v17815_v45, %v17814_v21  ;;  %v5700_v37 = vmul.f32 %v17772_v6, %v5665_v44  ;;  %v5703_v49 = vmul.f32 %v17771_v63, %v5654_v10  ;;  %v5704_v22 = vmul.f32 %v17772_v6, %v5666_v57  ;;  %v15059_v32 = vpop.permute.xlu0 %5827  ;;  %v17817_v6 = vld [vmem:[#allocation22_spill] sm:$0xff] }
 0xa50   :  { %v8509_v20 = vpack.c.bf16 %v15000_v14, %v14963_v53  ;;  %v5759_v41 = vsel %vm329_vm5, %v5734_v4, %v17816_v55  ;;  %v8507_v63 = vpack.c.bf16 %v5798_v42, %v14988_v18  ;;  %v5864_v26 = vsel %vm373_vm7, %v17817_v6, %v17815_v45  ;;  %v5736_v53 = vpop.permute.xlu1 %5735  ;;  %v17820_v18 = vld [vmem:[#allocation85_spill] sm:$0xff] }
 0xa51   :  { %8426 = vmatpush1.bf16.msra.mxu0 %v8425_v27  ;;  %v8429_v3 = vpack.c.bf16 %v5701_v8, %v5697_v58  ;;  %v8505_v27 = vpack.c.bf16 %v5703_v49, %v5699_v35  ;;  %v8503_v15 = vpack.c.bf16 %v5704_v22, %v5700_v37  ;;  %v5898_v25 = vmul.f32 %v17818_v34, %v5860_v30  ;;  %v17822_v42 = vld [vmem:[#allocation121_spill] sm:$0xff]  ;;  %v5925_v35 = vld [vmem:[%s16571_s7] sm:$0xff] }
 0xa52   :  { %8428 = vmatprep.subr.bf16.mxu0 %v8427_v17  ;;  %8502 = vmatpush1.bf16.msra.mxu1 %v8501_v38  ;;  %v5868_v29 = vsel %vm373_vm7, %v14820_v33, %v17817_v6  ;;  %v5760_v38 = vsel %vm329_vm5, %v5736_v53, %v17819_v62  ;;  %v5764_v40 = vsel %vm329_vm5, %v17820_v18, %v5736_v53  ;;  %v5928_v53 = vld [vmem:[%s16571_s7 + $0x18] sm:$0xff] }
 0xa53   :  { %v5763_v11 = vsel %vm329_vm5, %v17821_v54, %v5734_v4  ;;  %v5800_v14 = vmul.f32 %v17788_v61, %v5759_v41  ;;  %v5804_v2 = vmul.f32 %v17788_v61, %v5760_v38  ;;  %8504 = vmatprep.subr.bf16.mxu1 %v8503_v15  ;;  %v5855_v39 = vsel %vm373_vm7, %v17811_v50, %v14775_v5  ;;  %v5836_v4 = vpop.permute.xlu0 %5835 }
 0xa54   :  { %v5755_v36 = vsel %vm329_vm5, %v17816_v55, %v5750_v12  ;;  %v5767_v0 = vsel %vm329_vm5, %v5750_v12, %v17821_v54  ;;  %v5867_v61 = vsel %vm373_vm7, %v14775_v5, %v17813_v23  ;;  %v5856_v16 = vsel %vm373_vm7, %v17814_v21, %v14820_v33  ;;  %v5752_v59 = vpop.permute.xlu1 %5751  ;;  %v17823_v23 = vld [vmem:[#allocation111_spill] sm:$0xff]  ;;  %v17824_v21 = vld [vmem:[#allocation122_spill] sm:$0xff] }
 0xa55   :  { %8430 = vmatpush1.bf16.msra.mxu0 %v8429_v3  ;;  %v5803_v56 = vmul.f32 %v17780_v46, %v5764_v40  ;;  %v8435_v7 = vpack.c.bf16 %v5804_v2, %v5800_v14  ;;  %v5900_v31 = vmul.f32 %v17822_v42, %v5868_v29  ;;  %v5756_v44 = vsel %vm329_vm5, %v17819_v62, %v5752_v59  ;;  %v5931_v14 = vld [vmem:[%s16571_s7 + $0x30] sm:$0xff] }
 0xa56   :  { %8432 = vmatprep.subr.bf16.mxu0 %v8431_v28  ;;  %8506 = vmatpush1.bf16.msra.mxu1 %v8505_v27  ;;  %v5799_v28 = vmul.f32 %v17780_v46, %v5763_v11  ;;  %v5768_v5 = vsel %vm329_vm5, %v5752_v59, %v17820_v18  ;;  %v5801_v12 = vmul.f32 %v14410_v52, %v5755_v36  ;;  %v17825_v36 = vld [vmem:[#allocation55_spill] sm:$0xff]  ;;  %v17829_v59 = vld [vmem:[#allocation20_spill] sm:$0xff] }
 0xa57   :  { %8508 = vmatprep.subr.bf16.mxu1 %v8507_v63  ;;  %v5802_v33 = vmul.f32 %v17806_v1, %v5767_v0  ;;  %v5805_v50 = vmul.f32 %v14410_v52, %v5756_v44  ;;  %v5806_v48 = vmul.f32 %v17806_v1, %v5768_v5  ;;  %v5894_v46 = vmul.f32 %v17818_v34, %v5859_v19  ;;  %v5844_v17 = vpop.permute.xlu0 %5843  ;;  %v5934_v0 = vld [vmem:[%s16571_s7 + $0x48] sm:$0xff]  ;;  %v17831_v5 = vld [vmem:[#allocation11_spill] sm:$0xff] }
 0xa58   :  { %v5897_v8 = vmul.f32 %v17823_v23, %v5864_v26  ;;  %v5896_v13 = vmul.f32 %v17822_v42, %v5867_v61  ;;  %v5899_v45 = vmul.f32 %v17824_v21, %v5856_v16  ;;  %v8437_v30 = vpack.c.bf16 %v5803_v56, %v5799_v28  ;;  %v5846_v52 = vpop.permute.xlu1 %5845  ;;  %v17827_v61 = vld [vmem:[#allocation54_spill] sm:$0xff]  ;;  %v5927_v56 = vld [vmem:[%s16571_s7 + $0x10] sm:$0xff]  ;;  %v17830_v28 = vld [vmem:[#allocation7_spill] sm:$0xff] }
 0xa59   :  { %8434 = vmatpush1.bf16.msra.mxu0 %v8433_v24  ;;  %v8513_v58 = vpack.c.bf16 %v5805_v50, %v5801_v12  ;;  %v8511_v10 = vpack.c.bf16 %v5806_v48, %v5802_v33  ;;  %v5893_v1 = vmul.f32 %v17823_v23, %v15030_v51  ;;  %v5895_v43 = vmul.f32 %v17824_v21, %v5855_v39  ;;  %v17832_v33 = vld [vmem:[#allocation8_spill] sm:$0xff] }
 0xa5a   :  { %8436 = vmatprep.subr.bf16.mxu0 %v8435_v7  ;;  %8510 = vmatpush1.bf16.msra.mxu1 %v8509_v20  ;;  %v8439_v47 = vpack.c.bf16 %v5898_v25, %v5894_v46  ;;  %v5865_v24 = vsel %vm373_vm7, %v15059_v32, %v5836_v4  ;;  %v5861_v19 = vsel %vm373_vm7, %v5836_v4, %v5844_v17  ;;  %v5929_v20 = vld [vmem:[%s16571_s7 + $0x20] sm:$0xff]  ;;  %v17826_v4 = vld [vmem:[#allocation57_spill] sm:$0xff]  ;;  %v17828_v16 = vmov 0.0   ;;  %v5930_v7 = vld [vmem:[%s16571_s7 + $0x28] sm:$0xff] }
 0xa5b   :  { %8512 = vmatprep.subr.bf16.mxu1 %v8511_v10  ;;  %v8515_v57 = vpack.c.bf16 %v5900_v31, %v5896_v13  ;;  %v5852_v51 = vpop.permute.xlu0 %5851  ;;  %v8441_v37 = vpack.c.bf16 %v5897_v8, %v5893_v1  ;;  %v8517_v49 = vpack.c.bf16 %v5899_v45, %v5895_v43  ;;  %v5901_v55 = vmul.f32 %v17823_v23, %v5865_v24  ;;  %v5936_v31 = vld [vmem:[%s16571_s7 + $0x58] sm:$0xff]  ;;  %v17833_v48 = vld [vmem:[#allocation64_spill] sm:$0xff]  ;;  %v17838_v10 = vld [vmem:[#allocation9_spill] sm:$0xff] }
 0xa5c   :  { %v5838_v22 = vpop.permute.xlu1 %5837  ;;  %v5902_v41 = vmul.f32 %v17818_v34, %v5861_v19  ;;  %v5857_v26 = vsel %vm373_vm7, %v5844_v17, %v5852_v51  ;;  %v5869_v15 = vsel %vm373_vm7, %v5852_v51, %v15059_v32  ;;  %v3328_v44 = vadd.f32 nan, %v17830_v28  ;;  %v17835_v13 = vld [vmem:[#allocation78_spill] sm:$0xff]  ;;  %v17840_v19 = vld [vmem:[#allocation13_spill] sm:$0xff] }
 0xa5d   :  { %8438 = vmatpush1.bf16.msra.mxu0 %v8437_v30  ;;  %v5862_v63 = vsel %vm373_vm7, %v5838_v22, %v5846_v52  ;;  %v5866_v6 = vsel %vm373_vm7, %v14871_v60, %v5838_v22  ;;  %v5903_v38 = vmul.f32 %v17824_v21, %v5857_v26  ;;  %v5904_v32 = vmul.f32 %v17822_v42, %v5869_v15  ;;  %v17847_v26 = vld [vmem:[#allocation50_spill] sm:$0xff] }
 0xa5e   :  { %8440 = vmatprep.subr.bf16.mxu0 %v8439_v47  ;;  %8514 = vmatpush1.bf16.msra.mxu1 %v8513_v58  ;;  %v5905_v3 = vmul.f32 %v17823_v23, %v5866_v6  ;;  %v5906_v27 = vmul.f32 %v17818_v34, %v5862_v63  ;;  %v5932_v34 = vld [vmem:[%s16571_s7 + $0x38] sm:$0xff]  ;;  %v3330_v12 = vadd.f32 nan, %v17831_v5  ;;  %v3506_v50 = vadd.f32 nan, %v17832_v33  ;;  %v17834_v23 = vld [vmem:[#allocation12_spill] sm:$0xff] }
 0xa5f   :  { %8516 = vmatprep.subr.bf16.mxu1 %v8515_v57  ;;  %v3417_v46 = vadd.f32 %v17833_v48, %v3328_v44  ;;  %v3508_v8 = vadd.f32 nan, %v17834_v23  ;;  %v17837_v58 = vld [vmem:[#allocation90_spill] sm:$0xff]  ;;  %v3334_v1 = vadd.f32 nan, %v17838_v10  ;;  %v3336_v57 = vadd.f32 nan, %v17840_v19  ;;  %v17866_v19 = vld [vmem:[#allocation92_spill] sm:$0xff] }
 0xa60   :  { %6166 = vmatmul.mubr.f32.vlgmr.msra.gmra.mrb[32].mxu0 %v5925_v35  ;;  %v8445_v25 = vpack.c.bf16 %v5905_v3, %v5901_v55  ;;  %v5854_v29 = vpop.permute.xlu1 %5853  ;;  %v8443_v62 = vpack.c.bf16 %v5906_v27, %v5902_v41  ;;  %v3419_v17 = vadd.f32 %v17835_v13, %v3330_v12  ;;  %v17845_v41 = vld [vmem:[#allocation14_spill] sm:$0xff]  ;;  %v17848_v27 = vld [vmem:[#allocation29_spill] sm:$0xff] }
 0xa61   :  { %8442 = vmatpush1.bf16.msra.mxu0 %v8441_v37  ;;  %6344 = vmatmul.mubr.f32.vlgmr.msra.gmra.mrb[32].mxu1 %v5925_v35  ;;  %v5858_v18 = vsel %vm373_vm7, %v5846_v52, %v5854_v29  ;;  %v5870_v40 = vsel %vm373_vm7, %v5854_v29, %v14871_v60  ;;  %v5935_v60 = vld [vmem:[%s16571_s7 + $0x50] sm:$0xff]  ;;  %v3597_v52 = vadd.f32 %v17837_v58, %v3508_v8  ;;  %v17841_v35 = vld [vmem:[#allocation10_spill] sm:$0xff]  ;;  %v3514_v63 = vadd.f32 nan, %v17845_v41  ;;  %v17862_v8 = vld [vmem:[#allocation16_spill] sm:$0xff] }
 0xa62   :  { %8518 = vmatpush1.bf16.msra.mxu1 %v8517_v49  ;;  %6171 = vmatprep.mubr.f32.mxu0 %v5929_v20  ;;  %v5907_v54 = vmul.f32 %v17824_v21, %v5858_v18  ;;  %v5908_v11 = vmul.f32 %v17822_v42, %v5870_v40  ;;  %v5933_v42 = vld [vmem:[%s16571_s7 + $0x40] sm:$0xff]  ;;  %v17836_v21 = vld [vmem:[#allocation32_spill] sm:$0xff]  ;;  %v3512_v51 = vadd.f32 nan, %v17841_v35  ;;  %v3425_v3 = vadd.f32 %v17847_v26, %v3336_v57  ;;  %v17859_v44 = vld [vmem:[#allocation46_spill] sm:$0xff] }
 0xa63   :  { %6349 = vmatprep.mubr.f32.mxu1 %v5929_v20  ;;  %8444 = vmatprep.subr.bf16.mxu0 %v8443_v62  ;;  %v3595_v45 = vadd.f32 %v17836_v21, %v3506_v50  ;;  %v17844_v20 = vld [vmem:[#allocation30_spill] sm:$0xff]  ;;  %v17850_v62 = vld [vmem:[#allocation15_spill] sm:$0xff]  ;;  %v17860_v12 = vld [vmem:[#allocation33_spill] sm:$0xff]  ;;  %v3346_v13 = vadd.f32 nan, %v17862_v8 }
 0xa64   :  { %6172 = vmatmul.mubr.f32.gmra.mrb[34].mxu0 %v5928_v53  ;;  %v8521_v2 = vpack.c.bf16 %v5907_v54, %v5903_v38  ;;  %v8519_v39 = vpack.c.bf16 %v5908_v11, %v5904_v32  ;;  %v3423_v55 = vadd.f32 %v17844_v20, %v3334_v1  ;;  %v17852_v32 = vld [vmem:[#allocation34_spill] sm:$0xff]  ;;  %v17853_v11 = vld [vmem:[#allocation17_spill] sm:$0xff]  ;;  %v17868_v20 = vld [vmem:[#allocation79_spill] sm:$0xff] }
 0xa65   :  { %6350 = vmatmul.mubr.f32.gmra.mrb[34].mxu1 %v5928_v53  ;;  %8446 = vmatpush1.bf16.msra.mxu0 %v8445_v25  ;;  %v3601_v53 = vadd.f32 %v17848_v27, %v3512_v51  ;;  %v17849_v25 = vld [vmem:[#allocation35_spill] sm:$0xff]  ;;  %v3342_v54 = vadd.f32 nan, %v17852_v32  ;;  %v3435_v57 = vadd.f32 %v17866_v19, %v3346_v13  ;;  %v17867_v35 = vld [vmem:[#allocation38_spill] sm:$0xff] }
 0xa66   :  { %6177 = vmatprep.mubr.f32.mxu0 %v5932_v34  ;;  %6355 = vmatprep.mubr.f32.mxu1 %v5932_v34  ;;  %v3603_v29 = vadd.f32 %v17849_v25, %v3514_v63  ;;  %v3340_v34 = vadd.f32 nan, %v17850_v62  ;;  %v3526_v51 = vadd.f32 nan, %v17867_v35  ;;  %v17869_v41 = vld [vmem:[#allocation31_spill] sm:$0xff] }
 0xa67   :  { %8448 = vmatprep.subr.bf16.mxu0 %v17825_v36  ;;  %8520 = vmatprep.subr.bf16.mxu1 %v8519_v39  ;;  %v3431_v5 = vadd.f32 %v17859_v44, %v3342_v54  ;;  %v7870_v48 = vld [vmem:[%s16565_s1 + $0x1] ss:$8 sm:$0xf] }
 0xa68   :  { %6178 = vmatmul.mubr.f32.gmra.mrb[36].mxu0 %v5931_v14  ;;  %8522 = vmatpush1.bf16.msra.mxu1 %v8521_v2  ;;  %v17875_v36 = vld [vmem:[#allocation5_spill] sm:$0xff] }
 0xa69   :  { %6356 = vmatmul.mubr.f32.gmra.mrb[36].mxu1 %v5931_v14  ;;  %6183 = vmatprep.mubr.f32.mxu0 %v5935_v60  ;;  %v3518_v14 = vadd.f32 nan, %v17853_v11 }
 0xa6a   :  { %8450 = vmatpush1.bf16.msra.mxu0 %v17826_v4  ;;  %6361 = vmatprep.mubr.f32.mxu1 %v5935_v60  ;;  %v17874_v4 = vld [vmem:[#allocation4_spill] sm:$0xff] }
 0xa6b   :  { %8524 = vmatprep.subr.bf16.mxu1 %v17827_v61  ;;  %v3607_v33 = vadd.f32 %v17860_v12, %v3518_v14 }
 0xa6c   :  { %6184 = vmatmul.mubr.f32.gmra.mrb[38].mxu0 %v5934_v0  ;;  %8526 = vmatpush1.bf16.msra.mxu1 %v17829_v59 }
 0xa6d   :  { %6362 = vmatmul.mubr.f32.gmra.mrb[38].mxu1 %v5934_v0  ;;  %6254 = vmatprep.mubr.f32.mxu0 %v17828_v16  ;;  %v17856_v0 = vld [vmem:[#allocation91_spill] sm:$0xff] }
 0xa6e   :  { %6432 = vmatprep.mubr.f32.mxu1 %v17828_v16 }
 0xa70   :  { %7862 = vmatmul.mubr.msk.f32.vlgmr.msra.gmra.mrb[32].mxu0 %vm1772_vm9, %v5927_v56 }
 0xa71   :  { %7866 = vmatmul.mubr.msk.f32.vlgmr.msra.gmra.mrb[32].mxu1 %vm1772_vm9, %v5927_v56  ;;  %6260 = vmatprep.mubr.f32.mxu0 %v17828_v16  ;;  %v3429_v56 = vadd.f32 %v17856_v0, %v3340_v34 }
 0xa72   :  { %6438 = vmatprep.mubr.f32.mxu1 %v17828_v16 }
 0xa74   :  { %7863 = vmatmul.mubr.msk.f32.gmra.mrb[34].mxu0 %vm1772_vm9, %v5930_v7 }
 0xa75   :  { %7867 = vmatmul.mubr.msk.f32.gmra.mrb[34].mxu1 %vm1772_vm9, %v5930_v7  ;;  %6266 = vmatprep.mubr.f32.mxu0 %v17828_v16  ;;  %v17857_v7 = vld [vmem:[#allocation36_spill] sm:$0xff] }
 0xa76   :  { %6444 = vmatprep.mubr.f32.mxu1 %v17828_v16 }
 0xa78   :  { %7864 = vmatmul.mubr.msk.f32.gmra.mrb[36].mxu0 %vm1772_vm9, %v5933_v42 }
 0xa79   :  { %7868 = vmatmul.mubr.msk.f32.gmra.mrb[36].mxu1 %vm1772_vm9, %v5933_v42  ;;  %6272 = vmatprep.mubr.f32.mxu0 %v17828_v16  ;;  %v3520_v42 = vadd.f32 nan, %v17857_v7 }
 0xa7a   :  { %6450 = vmatprep.mubr.f32.mxu1 %v17828_v16 }
 0xa7c   :  { %7865 = vmatmul.mubr.msk.f32.gmra.mrb[38].mxu0 %vm1772_vm9, %v5936_v31 }
 0xa7d   :  { %7869 = vmatmul.mubr.msk.f32.gmra.mrb[38].mxu1 %vm1772_vm9, %v5936_v31 }
 0xb43   :  { %v6256_v30 = vpop.f32.mrb[32].mxu0 }
 0xb44   :  { %v15213_v43 = vadd.f32 %v6256_v30, %v3417_v46  ;;  %v6258_v47 = vpop.f32.mrb[33].mxu0  ;;  %v6434_v24 = vpop.f32.mrb[32].mxu1  ;;  %v17861_v46 = vld [vmem:[#allocation84_spill] sm:$0xff]  ;;  %v17863_v30 = vld [vmem:[#allocation37_spill] sm:$0xff] }
 0xb45   :  { %v15217_v37 = vadd.f32 %v6258_v47, %v3419_v17  ;;  %v15219_v49 = vadd.f32 %v6434_v24, %v3595_v45  ;;  %v6436_v22 = vpop.f32.mrb[33].mxu1  ;;  %v3609_v23 = vadd.f32 %v17861_v46, %v3520_v42  ;;  %v3348_v58 = vadd.f32 nan, %v17863_v30 }
 0xb46   :  { %17839 = vst [vmem:[#allocation83_spill] sm:$0xff] %v15213_v43  ;;  %v15223_v6 = vadd.f32 %v6436_v22, %v3597_v52  ;;  %6457 = vrot.lane.b32.xlu0 %v15213_v43, %s8981_s13  ;;  %v17864_v52 = vld [vmem:[#allocation18_spill] sm:$0xff] }
 0xb47   :  { %17842 = vst [vmem:[#allocation76_spill] sm:$0xff] %v15217_v37  ;;  %17843 = vst [vmem:[#allocation27_spill] sm:$0xff] %v15219_v49  ;;  %v6262_v15 = vpop.f32.mrb[34].mxu0  ;;  %v3524_v10 = vadd.f32 nan, %v17864_v52 }
 0xb48   :  { %17846 = vst [vmem:[#allocation103_spill] sm:$0xff] %v15223_v6  ;;  %v15231_v38 = vadd.f32 %v6262_v15, %v3423_v55  ;;  %v6264_v18 = vpop.f32.mrb[35].mxu0  ;;  %v6440_v40 = vpop.f32.mrb[34].mxu1  ;;  %v3437_v55 = vadd.f32 %v17868_v20, %v3348_v58 }
 0xb49   :  { %v15235_v2 = vadd.f32 %v6264_v18, %v3425_v3  ;;  %v15237_v39 = vadd.f32 %v6440_v40, %v3601_v53  ;;  %v6442_v60 = vpop.f32.mrb[35].mxu1  ;;  %v3613_v63 = vadd.f32 %v17869_v41, %v3524_v10  ;;  %v17870_v3 = vld [vmem:[#allocation65_spill] sm:$0xff] }
 0xb4a   :  { %17851 = vst [vmem:[#allocation69_spill] sm:$0xff] %v15231_v38  ;;  %v15241_v31 = vadd.f32 %v6442_v60, %v3603_v29  ;;  %6459 = vrot.lane.b32.xlu1 %v15231_v38, %s8981_s13  ;;  %6473 = vrot.lane.b32.xlu0 %v15219_v49, %s8981_s13  ;;  %v3615_v27 = vadd.f32 %v17870_v3, %v3526_v51 }
 0xb4b   :  { %17854 = vst [vmem:[#allocation68_spill] sm:$0xff] %v15235_v2  ;;  %17855 = vst [vmem:[#allocation116_spill] sm:$0xff] %v15237_v39  ;;  %v6268_v50 = vpop.f32.mrb[36].mxu0 }
 0xb4c   :  { %17858 = vst [vmem:[#allocation99_spill] sm:$0xff] %v15241_v31  ;;  %v15255_v17 = vadd.f32 %v6268_v50, %v3429_v56  ;;  %v6270_v21 = vpop.f32.mrb[37].mxu0  ;;  %v6446_v45 = vpop.f32.mrb[36].mxu1 }
 0xb4d   :  { %v15259_v1 = vadd.f32 %v6270_v21, %v3431_v5  ;;  %v15261_v47 = vadd.f32 %v6446_v45, %v3607_v33  ;;  %v6448_v24 = vpop.f32.mrb[37].mxu1 }
 0xb4e   :  { %v15265_v22 = vadd.f32 %v6448_v24, %v3609_v23  ;;  %6475 = vrot.lane.b32.xlu1 %v15237_v39, %s8981_s13  ;;  %6559 = vrot.lane.b32.xlu0 %v15213_v43, %s8982_s18 }
 0xb4f   :  { %17865 = vst [vmem:[#allocation49_spill] sm:$0xff] %v15261_v47  ;;  %v6274_v26 = vpop.f32.mrb[38].mxu0 }
 0xb50   :  { %v15274_v53 = vadd.f32 %v6274_v26, %v3435_v57  ;;  %v6276_v15 = vpop.f32.mrb[39].mxu0  ;;  %v6452_v25 = vpop.f32.mrb[38].mxu1  ;;  %v17872_v26 = vld [vmem:[#allocation3_spill] sm:$0xff] }
 0xb51   :  { %v15276_v29 = vadd.f32 %v6276_v15, %v3437_v55  ;;  %v15278_v62 = vadd.f32 %v6452_v25, %v3613_v63  ;;  %v6454_v34 = vpop.f32.mrb[39].mxu1  ;;  %v6505_v55 = vld [vmem:[%s16565_s1] ss:$8 sm:$0xf] }
 0xb52   :  { %v15280_v18 = vadd.f32 %v6454_v34, %v3615_v27  ;;  %6561 = vrot.lane.b32.xlu1 %v15231_v38, %s8982_s18  ;;  %6575 = vrot.lane.b32.xlu0 %v15219_v49, %s8982_s18  ;;  %v15518_v3 = vrot.slane %v6505_v55, %v17872_v26  ;;  %v15536_v61 = vrot.slane %v6505_v55, %v17874_v4 }
 0xb53   :  { %17871 = vst [vmem:[#allocation51_spill] sm:$0xff] %v15278_v62  ;;  %v15539_v16 = vrot.slane %v6505_v55, %v17875_v36 }
 0xb54   :  { %17873 = vst [vmem:[#allocation41_spill] sm:$0xff] %v15518_v3 }
 0xb55   :  { %17876 = vst [vmem:[#allocation98_spill] sm:$0xff] %v15539_v16 }
 0xb56   :  { %6577 = vrot.lane.b32.xlu1 %v15237_v39, %s8982_s18  ;;  %6661 = vrot.lane.b32.xlu0 %v15213_v43, %s8983_s0 }
 0xb5a   :  { %6663 = vrot.lane.b32.xlu1 %v15231_v38, %s8983_s0  ;;  %6677 = vrot.lane.b32.xlu0 %v15219_v49, %s8983_s0 }
 0xb5e   :  { %6679 = vrot.lane.b32.xlu1 %v15237_v39, %s8983_s0  ;;  %6763 = vrot.lane.b32.xlu0 %v15213_v43, %s8984_s19 }
 0xb62   :  { %6765 = vrot.lane.b32.xlu1 %v15231_v38, %s8984_s19  ;;  %6779 = vrot.lane.b32.xlu0 %v15219_v49, %s8984_s19 }
 0xb66   :  { %6781 = vrot.lane.b32.xlu1 %v15237_v39, %s8984_s19  ;;  %6881 = vrot.lane.b32.xlu0 %v15213_v43, %s8985_s20 }
 0xb6a   :  { %6883 = vrot.lane.b32.xlu1 %v15231_v38, %s8985_s20  ;;  %6897 = vrot.lane.b32.xlu0 %v15219_v49, %s8985_s20 }
 0xb6e   :  { %6899 = vrot.lane.b32.xlu1 %v15237_v39, %s8985_s20  ;;  %6983 = vrot.lane.b32.xlu0 %v15213_v43, %s8986_s21 }
 0xb72   :  { %6985 = vrot.lane.b32.xlu1 %v15231_v38, %s8986_s21  ;;  %6999 = vrot.lane.b32.xlu0 %v15219_v49, %s8986_s21 }
 0xb76   :  { %7001 = vrot.lane.b32.xlu1 %v15237_v39, %s8986_s21  ;;  %7085 = vrot.lane.b32.xlu0 %v15213_v43, %s8987_s22 }
 0xb7a   :  { %7087 = vrot.lane.b32.xlu1 %v15231_v38, %s8987_s22  ;;  %7101 = vrot.lane.b32.xlu0 %v15219_v49, %s8987_s22 }
 0xb7e   :  { %7103 = vrot.lane.b32.xlu1 %v15237_v39, %s8987_s22  ;;  %7187 = vrot.lane.b32.xlu0 %v15213_v43, %s8988_s23 }
 0xb82   :  { %7189 = vrot.lane.b32.xlu1 %v15231_v38, %s8988_s23  ;;  %7203 = vrot.lane.b32.xlu0 %v15219_v49, %s8988_s23 }
 0xb86   :  { %7205 = vrot.lane.b32.xlu1 %v15237_v39, %s8988_s23  ;;  %6465 = vrot.lane.b32.xlu0 %v15217_v37, %s8981_s13 }
 0xb8a   :  { %6467 = vrot.lane.b32.xlu1 %v15235_v2, %s8981_s13  ;;  %6481 = vrot.lane.b32.xlu0 %v15223_v6, %s8981_s13 }
 0xb8e   :  { %6483 = vrot.lane.b32.xlu1 %v15241_v31, %s8981_s13  ;;  %6567 = vrot.lane.b32.xlu0 %v15217_v37, %s8982_s18 }
 0xb92   :  { %6569 = vrot.lane.b32.xlu1 %v15235_v2, %s8982_s18  ;;  %6583 = vrot.lane.b32.xlu0 %v15223_v6, %s8982_s18 }
 0xb96   :  { %6585 = vrot.lane.b32.xlu1 %v15241_v31, %s8982_s18  ;;  %6669 = vrot.lane.b32.xlu0 %v15217_v37, %s8983_s0 }
 0xb9a   :  { %6671 = vrot.lane.b32.xlu1 %v15235_v2, %s8983_s0  ;;  %6685 = vrot.lane.b32.xlu0 %v15223_v6, %s8983_s0 }
 0xb9e   :  { %6687 = vrot.lane.b32.xlu1 %v15241_v31, %s8983_s0  ;;  %6771 = vrot.lane.b32.xlu0 %v15217_v37, %s8984_s19 }
 0xba2   :  { %6773 = vrot.lane.b32.xlu1 %v15235_v2, %s8984_s19  ;;  %6787 = vrot.lane.b32.xlu0 %v15223_v6, %s8984_s19 }
 0xba6   :  { %6789 = vrot.lane.b32.xlu1 %v15241_v31, %s8984_s19  ;;  %6889 = vrot.lane.b32.xlu0 %v15217_v37, %s8985_s20 }
 0xbaa   :  { %6891 = vrot.lane.b32.xlu1 %v15235_v2, %s8985_s20  ;;  %6905 = vrot.lane.b32.xlu0 %v15223_v6, %s8985_s20 }
 0xbae   :  { %6907 = vrot.lane.b32.xlu1 %v15241_v31, %s8985_s20  ;;  %6991 = vrot.lane.b32.xlu0 %v15217_v37, %s8986_s21 }
 0xbb2   :  { %6993 = vrot.lane.b32.xlu1 %v15235_v2, %s8986_s21  ;;  %7007 = vrot.lane.b32.xlu0 %v15223_v6, %s8986_s21 }
 0xbb6   :  { %7009 = vrot.lane.b32.xlu1 %v15241_v31, %s8986_s21  ;;  %7093 = vrot.lane.b32.xlu0 %v15217_v37, %s8987_s22 }
 0xbb8   :  { %v15386_v40 = vpop.permute.xlu0 %6457 }
 0xbba   :  { %7095 = vrot.lane.b32.xlu1 %v15235_v2, %s8987_s22  ;;  %7109 = vrot.lane.b32.xlu0 %v15223_v6, %s8987_s22 }
 0xbbc   :  { %v15392_v32 = vpop.permute.xlu1 %6459  ;;  %v15394_v54 = vpop.permute.xlu0 %6473 }
 0xbbe   :  { %7111 = vrot.lane.b32.xlu1 %v15241_v31, %s8987_s22  ;;  %7195 = vrot.lane.b32.xlu0 %v15217_v37, %s8988_s23 }
 0xbc0   :  { %v15400_v11 = vpop.permute.xlu1 %6475  ;;  %v15402_v14 = vpop.permute.xlu0 %6559 }
 0xbc2   :  { %7197 = vrot.lane.b32.xlu1 %v15235_v2, %s8988_s23  ;;  %7211 = vrot.lane.b32.xlu0 %v15223_v6, %s8988_s23 }
 0xbc4   :  { %v15408_v60 = vpop.permute.xlu1 %6561  ;;  %v15410_v0 = vpop.permute.xlu0 %6575 }
 0xbc6   :  { %7213 = vrot.lane.b32.xlu1 %v15241_v31, %s8988_s23  ;;  %6461 = vrot.lane.b32.xlu0 %v15255_v17, %s8981_s13  ;;  %v15558_v31 = vrot.slane %v7870_v48, %v17872_v26 }
 0xbc8   :  { %v15416_v56 = vpop.permute.xlu1 %6577  ;;  %v15418_v7 = vpop.permute.xlu0 %6661 }
 0xbca   :  { %6463 = vrot.lane.b32.xlu1 %v15274_v53, %s8981_s13  ;;  %6477 = vrot.lane.b32.xlu0 %v15261_v47, %s8981_s13 }
 0xbcc   :  { %v15424_v42 = vpop.permute.xlu1 %6663  ;;  %v15426_v44 = vpop.permute.xlu0 %6677 }
 0xbce   :  { %6479 = vrot.lane.b32.xlu1 %v15278_v62, %s8981_s13  ;;  %6563 = vrot.lane.b32.xlu0 %v15255_v17, %s8982_s18 }
 0xbd0   :  { %v15432_v5 = vpop.permute.xlu1 %6679  ;;  %v15434_v12 = vpop.permute.xlu0 %6763 }
 0xbd2   :  { %6565 = vrot.lane.b32.xlu1 %v15274_v53, %s8982_s18  ;;  %6579 = vrot.lane.b32.xlu0 %v15261_v47, %s8982_s18 }
 0xbd4   :  { %v15440_v33 = vpop.permute.xlu1 %6765  ;;  %v15442_v50 = vpop.permute.xlu0 %6779 }
 0xbd6   :  { %6581 = vrot.lane.b32.xlu1 %v15278_v62, %s8982_s18  ;;  %6665 = vrot.lane.b32.xlu0 %v15255_v17, %s8983_s0 }
 0xbd8   :  { %v15448_v46 = vpop.permute.xlu1 %6781  ;;  %v15450_v23 = vpop.permute.xlu0 %6881 }
 0xbda   :  { %6667 = vrot.lane.b32.xlu1 %v15274_v53, %s8983_s0  ;;  %6681 = vrot.lane.b32.xlu0 %v15261_v47, %s8983_s0 }
 0xbdc   :  { %v15456_v8 = vpop.permute.xlu1 %6883  ;;  %v15458_v13 = vpop.permute.xlu0 %6897 }
 0xbde   :  { %6683 = vrot.lane.b32.xlu1 %v15278_v62, %s8983_s0  ;;  %6767 = vrot.lane.b32.xlu0 %v15255_v17, %s8984_s19 }
 0xbe0   :  { %v15464_v21 = vpop.permute.xlu1 %6899  ;;  %v15466_v45 = vpop.permute.xlu0 %6983 }
 0xbe2   :  { %6769 = vrot.lane.b32.xlu1 %v15274_v53, %s8984_s19  ;;  %6783 = vrot.lane.b32.xlu0 %v15261_v47, %s8984_s19 }
 0xbe4   :  { %v15472_v30 = vpop.permute.xlu1 %6985  ;;  %v15474_v58 = vpop.permute.xlu0 %6999 }
 0xbe6   :  { %6785 = vrot.lane.b32.xlu1 %v15278_v62, %s8984_s19  ;;  %6885 = vrot.lane.b32.xlu0 %v15255_v17, %s8985_s20 }
 0xbe8   :  { %v15480_v52 = vpop.permute.xlu1 %7001  ;;  %v15482_v10 = vpop.permute.xlu0 %7085 }
 0xbea   :  { %6887 = vrot.lane.b32.xlu1 %v15274_v53, %s8985_s20  ;;  %6901 = vrot.lane.b32.xlu0 %v15261_v47, %s8985_s20 }
 0xbec   :  { %v15488_v24 = vpop.permute.xlu1 %7087  ;;  %v15490_v19 = vpop.permute.xlu0 %7101 }
 0xbee   :  { %6903 = vrot.lane.b32.xlu1 %v15278_v62, %s8985_s20  ;;  %6987 = vrot.lane.b32.xlu0 %v15255_v17, %s8986_s21 }
 0xbf0   :  { %v15496_v57 = vpop.permute.xlu1 %7103  ;;  %v15498_v35 = vpop.permute.xlu0 %7187 }
 0xbf2   :  { %6989 = vrot.lane.b32.xlu1 %v15274_v53, %s8986_s21  ;;  %7003 = vrot.lane.b32.xlu0 %v15261_v47, %s8986_s21 }
 0xbf4   :  { %v15504_v51 = vpop.permute.xlu1 %7189  ;;  %v15506_v20 = vpop.permute.xlu0 %7203 }
 0xbf6   :  { %7005 = vrot.lane.b32.xlu1 %v15278_v62, %s8986_s21  ;;  %7089 = vrot.lane.b32.xlu0 %v15255_v17, %s8987_s22 }
 0xbf8   :  { %v15515_v41 = vpop.permute.xlu1 %7205  ;;  %v6466_v63 = vpop.permute.xlu0 %6465 }
 0xbf9   :  { %v6497_v27 = vsel %vm62_vm0, %v15386_v40, %v6466_v63 }
 0xbfa   :  { %7091 = vrot.lane.b32.xlu1 %v15274_v53, %s8987_s22  ;;  %7105 = vrot.lane.b32.xlu0 %v15261_v47, %s8987_s22  ;;  %v6528_v28 = vmul.f32 %v15518_v3, %v6497_v27  ;;  %v17877_v27 = vld [vmem:[#allocation6_spill] sm:$0xff] }
 0xbfc   :  { %v6468_v15 = vpop.permute.xlu1 %6467  ;;  %v6482_v25 = vpop.permute.xlu0 %6481 }
 0xbfd   :  { %v6498_v34 = vsel %vm62_vm0, %v15392_v32, %v6468_v15  ;;  %v6489_v49 = vsel %vm62_vm0, %v15394_v54, %v6482_v25  ;;  %v6501_v39 = vsel %vm62_vm0, %v6482_v25, %v15386_v40  ;;  %v6494_v43 = vsel %vm62_vm0, %v6468_v15, %v15400_v11 }
 0xbfe   :  { %v6532_v59 = vmul.f32 %v15518_v3, %v6498_v34  ;;  %7107 = vrot.lane.b32.xlu1 %v15278_v62, %s8987_s22  ;;  %6469 = vrot.lane.b32.xlu0 %v15259_v1, %s8981_s13  ;;  %v15552_v34 = vrot.slane %v6505_v55, %v17877_v27  ;;  %v6493_v40 = vsel %vm62_vm0, %v6466_v63, %v15394_v54 }
 0xbff   :  { %v15570_v15 = vrot.slane %v7870_v48, %v17877_v27  ;;  %v6527_v37 = vmul.f32 %v15536_v61, %v6501_v39  ;;  %v6530_v3 = vmul.f32 %v15539_v16, %v6489_v49 }
 0xc00   :  { %v6484_v38 = vpop.permute.xlu1 %6483  ;;  %v6568_v6 = vpop.permute.xlu0 %6567  ;;  %v8527_v2 = vpack.c.bf16 %v6532_v59, %v6528_v28  ;;  %v6533_v54 = vmul.f32 %v15552_v34, %v6494_v43  ;;  %v6529_v43 = vmul.f32 %v15552_v34, %v6493_v40 }
 0xc01   :  { %v6490_v25 = vsel %vm62_vm0, %v15400_v11, %v6484_v38  ;;  %v6502_v55 = vsel %vm62_vm0, %v6484_v38, %v15392_v32  ;;  %v6595_v38 = vsel %vm105_vm1, %v6568_v6, %v15410_v0  ;;  %v6599_v32 = vsel %vm105_vm1, %v15402_v14, %v6568_v6 }
 0xc02   :  { %v6531_v59 = vmul.f32 %v15536_v61, %v6502_v55  ;;  %v6534_v28 = vmul.f32 %v15539_v16, %v6490_v25  ;;  %6471 = vrot.lane.b32.xlu1 %v15276_v29, %s8981_s13  ;;  %6485 = vrot.lane.b32.xlu0 %v15265_v22, %s8981_s13  ;;  %v15588_v11 = vrot.slane %v7870_v48, %v17874_v4 }
 0xc03   :  { %8528 = vmatprep.subr.bf16.mxu0 %v8527_v2  ;;  %v15598_v16 = vrot.slane %v7870_v48, %v17875_v36  ;;  %v15604_v2 = vmul.f32 %v15570_v15, %v6595_v38  ;;  %v7871_v48 = vld [vmem:[%s16565_s1 + $0x2] ss:$8 sm:$0xf] }
 0xc04   :  { %v8529_v49 = vpack.c.bf16 %v6531_v59, %v6527_v37  ;;  %v6570_v39 = vpop.permute.xlu1 %6569  ;;  %v6584_v63 = vpop.permute.xlu0 %6583  ;;  %v8603_v25 = vpack.c.bf16 %v6534_v28, %v6530_v3  ;;  %v15601_v37 = vmul.f32 %v15558_v31, %v6599_v32  ;;  %v8605_v59 = vpack.c.bf16 %v6533_v54, %v6529_v43 }
 0xc05   :  { %v6596_v55 = vsel %vm105_vm1, %v6570_v39, %v15416_v56  ;;  %v6600_v6 = vsel %vm105_vm1, %v15408_v60, %v6570_v39  ;;  %17878 = vst [vmem:[#allocation106_spill] sm:$0xff] %v15604_v2  ;;  %v6591_v28 = vsel %vm105_vm1, %v15410_v0, %v6584_v63  ;;  %v6603_v38 = vsel %vm105_vm1, %v6584_v63, %v15402_v14 }
 0xc06   :  { %v15607_v3 = vmul.f32 %v15558_v31, %v6600_v6  ;;  %v15610_v40 = vmul.f32 %v15570_v15, %v6596_v55  ;;  %6487 = vrot.lane.b32.xlu1 %v15280_v18, %s8981_s13  ;;  %6571 = vrot.lane.b32.xlu0 %v15259_v1, %s8982_s18  ;;  %v15639_v63 = vrot.slane %v7871_v48, %v17877_v27 }
 0xc07   :  { %8530 = vmatpush1.bf16.msra.mxu0 %v8529_v49  ;;  %8604 = vmatprep.subr.bf16.mxu1 %v8603_v25  ;;  %v15636_v49 = vrot.slane %v7871_v48, %v17872_v26  ;;  %v15642_v25 = vmul.f32 %v15588_v11, %v6603_v38  ;;  %v15645_v43 = vmul.f32 %v15598_v16, %v6591_v28 }
 0xc08   :  { %17879 = vst [vmem:[#allocation81_spill] sm:$0xff] %v15610_v40  ;;  %v6586_v39 = vpop.permute.xlu1 %6585  ;;  %v6670_v55 = vpop.permute.xlu0 %6669  ;;  %8606 = vmatpush1.bf16.msra.mxu1 %v8605_v59  ;;  %17881 = vst [vmem:[#allocation117_spill] sm:$0xff] %v15639_v63  ;;  %v15677_v54 = vrot.slane %v7871_v48, %v17875_v36 }
 0xc09   :  { %v6592_v0 = vsel %vm105_vm1, %v15416_v56, %v6586_v39  ;;  %v6604_v14 = vsel %vm105_vm1, %v6586_v39, %v15408_v60  ;;  %17880 = vst [vmem:[#allocation93_spill] sm:$0xff] %v15636_v49  ;;  %v6697_v60 = vsel %vm149_vm2, %v6670_v55, %v15426_v44  ;;  %v6701_v59 = vsel %vm149_vm2, %v15418_v7, %v6670_v55 }
 0xc0a   :  { %v15648_v6 = vmul.f32 %v15588_v11, %v6604_v14  ;;  %v15651_v56 = vmul.f32 %v15598_v16, %v6592_v0  ;;  %6573 = vrot.lane.b32.xlu1 %v15276_v29, %s8982_s18  ;;  %6587 = vrot.lane.b32.xlu0 %v15265_v22, %s8982_s18  ;;  %v15674_v55 = vrot.slane %v7871_v48, %v17874_v4  ;;  %v7872_v48 = vld [vmem:[%s16565_s1 + $0x3] ss:$8 sm:$0xf] }
 0xc0b   :  { %17883 = vst [vmem:[#allocation66_spill] sm:$0xff] %v15677_v54  ;;  %v15680_v28 = vmul.f32 %v15636_v49, %v6701_v59  ;;  %v15683_v2 = vmul.f32 %v15639_v63, %v6697_v60 }
 0xc0c   :  { %v6672_v38 = vpop.permute.xlu1 %6671  ;;  %v6686_v39 = vpop.permute.xlu0 %6685  ;;  %17882 = vst [vmem:[#allocation100_spill] sm:$0xff] %v15674_v55 }
 0xc0d   :  { %v6698_v14 = vsel %vm149_vm2, %v6672_v38, %v15432_v5  ;;  %v6702_v32 = vsel %vm149_vm2, %v15424_v42, %v6672_v38  ;;  %17884 = vst [vmem:[#allocation114_spill] sm:$0xff] %v15683_v2  ;;  %v6693_v59 = vsel %vm149_vm2, %v15426_v44, %v6686_v39  ;;  %v6705_v60 = vsel %vm149_vm2, %v6686_v39, %v15418_v7 }
 0xc0e   :  { %v15686_v0 = vmul.f32 %v15636_v49, %v6702_v32  ;;  %v15689_v40 = vmul.f32 %v15639_v63, %v6698_v14  ;;  %6589 = vrot.lane.b32.xlu1 %v15280_v18, %s8982_s18  ;;  %6673 = vrot.lane.b32.xlu0 %v15259_v1, %s8983_s0  ;;  %v15715_v7 = vrot.slane %v7872_v48, %v17872_v26 }
 0xc0f   :  { %v15718_v39 = vrot.slane %v7872_v48, %v17877_v27  ;;  %v15721_v32 = vmul.f32 %v15674_v55, %v6705_v60  ;;  %v15724_v2 = vmul.f32 %v15677_v54, %v6693_v59 }
 0xc10   :  { %17885 = vst [vmem:[#allocation58_spill] sm:$0xff] %v15689_v40  ;;  %v6688_v38 = vpop.permute.xlu1 %6687  ;;  %v6772_v14 = vpop.permute.xlu0 %6771  ;;  %17886 = vst [vmem:[#allocation107_spill] sm:$0xff] %v15715_v7 }
 0xc11   :  { %v6694_v49 = vsel %vm149_vm2, %v15432_v5, %v6688_v38  ;;  %v6706_v44 = vsel %vm149_vm2, %v6688_v38, %v15424_v42  ;;  %17887 = vst [vmem:[#allocation72_spill] sm:$0xff] %v15718_v39  ;;  %17888 = vst [vmem:[#allocation105_spill] sm:$0xff] %v15721_v32  ;;  %v6799_v42 = vsel %vm193_vm3, %v6772_v14, %v15442_v50 }
 0xc12   :  { %v15727_v63 = vmul.f32 %v15674_v55, %v6706_v44  ;;  %v15730_v5 = vmul.f32 %v15677_v54, %v6694_v49  ;;  %6675 = vrot.lane.b32.xlu1 %v15276_v29, %s8983_s0  ;;  %v6803_v60 = vsel %vm193_vm3, %v15434_v12, %v6772_v14  ;;  %6689 = vrot.lane.b32.xlu0 %v15265_v22, %s8983_s0 }
 0xc13   :  { %v15753_v14 = vrot.slane %v7872_v48, %v17874_v4  ;;  %v15756_v55 = vrot.slane %v7872_v48, %v17875_v36  ;;  %v15759_v59 = vmul.f32 %v15715_v7, %v6803_v60  ;;  %v15762_v32 = vmul.f32 %v15718_v39, %v6799_v42  ;;  %v7873_v48 = vld [vmem:[%s16565_s1 + $0x5] ss:$8 sm:$0xf] }
 0xc14   :  { %17889 = vst [vmem:[#allocation95_spill] sm:$0xff] %v15727_v63  ;;  %v6774_v38 = vpop.permute.xlu1 %6773  ;;  %v6788_v49 = vpop.permute.xlu0 %6787 }
 0xc15   :  { %v6800_v40 = vsel %vm193_vm3, %v6774_v38, %v15448_v46  ;;  %v6804_v54 = vsel %vm193_vm3, %v15440_v33, %v6774_v38  ;;  %17890 = vst [vmem:[#allocation19_spill] sm:$0xff] %v15753_v14  ;;  %17891 = vst [vmem:[#allocation45_spill] sm:$0xff] %v15756_v55  ;;  %v6795_v60 = vsel %vm193_vm3, %v15442_v50, %v6788_v49 }
 0xc16   :  { %17892 = vst [vmem:[#allocation104_spill] sm:$0xff] %v15762_v32  ;;  %v15765_v44 = vmul.f32 %v15715_v7, %v6804_v54  ;;  %v15768_v63 = vmul.f32 %v15718_v39, %v6800_v40  ;;  %6691 = vrot.lane.b32.xlu1 %v15280_v18, %s8983_s0  ;;  %v6807_v42 = vsel %vm193_vm3, %v6788_v49, %v15434_v12 }
 0xc17   :  { %6775 = vrot.lane.b32.xlu0 %v15259_v1, %s8984_s19  ;;  %v15794_v12 = vrot.slane %v7873_v48, %v17874_v4  ;;  %v15797_v49 = vrot.slane %v7873_v48, %v17872_v26  ;;  %v15800_v40 = vmul.f32 %v15753_v14, %v6807_v42  ;;  %v15803_v32 = vmul.f32 %v15756_v55, %v6795_v60 }
 0xc18   :  { %17893 = vst [vmem:[#allocation21_spill] sm:$0xff] %v15768_v63  ;;  %v6790_v54 = vpop.permute.xlu1 %6789  ;;  %v6890_v38 = vpop.permute.xlu0 %6889 }
 0xc19   :  { %v6796_v7 = vsel %vm193_vm3, %v15448_v46, %v6790_v54  ;;  %v6808_v50 = vsel %vm193_vm3, %v6790_v54, %v15440_v33  ;;  %17894 = vst [vmem:[#allocation119_spill] sm:$0xff] %v15794_v12  ;;  %17895 = vst [vmem:[#allocation77_spill] sm:$0xff] %v15797_v49  ;;  %v6917_v33 = vsel %vm241_vm4, %v6890_v38, %v15458_v13 }
 0xc1a   :  { %17896 = vst [vmem:[#allocation74_spill] sm:$0xff] %v15800_v40  ;;  %v15806_v39 = vmul.f32 %v15753_v14, %v6808_v50  ;;  %v15809_v46 = vmul.f32 %v15756_v55, %v6796_v7  ;;  %6777 = vrot.lane.b32.xlu1 %v15276_v29, %s8984_s19  ;;  %v6921_v42 = vsel %vm241_vm4, %v15450_v23, %v6890_v38 }
 0xc1b   :  { %6791 = vrot.lane.b32.xlu0 %v15265_v22, %s8984_s19  ;;  %v15832_v38 = vrot.slane %v7873_v48, %v17877_v27  ;;  %v15835_v14 = vrot.slane %v7873_v48, %v17875_v36  ;;  %v15838_v60 = vmul.f32 %v15794_v12, %v6921_v42  ;;  %v15841_v40 = vmul.f32 %v15797_v49, %v6917_v33  ;;  %v7874_v48 = vld [vmem:[%s16565_s1 + $0x6] ss:$8 sm:$0xf] }
 0xc1c   :  { %17897 = vst [vmem:[#allocation47_spill] sm:$0xff] %v15806_v39  ;;  %v6892_v54 = vpop.permute.xlu1 %6891  ;;  %v6906_v7 = vpop.permute.xlu0 %6905 }
 0xc1d   :  { %v6918_v63 = vsel %vm241_vm4, %v6892_v54, %v15464_v21  ;;  %v6922_v55 = vsel %vm241_vm4, %v15456_v8, %v6892_v54  ;;  %17898 = vst [vmem:[#allocation70_spill] sm:$0xff] %v15832_v38  ;;  %17899 = vst [vmem:[#allocation28_spill] sm:$0xff] %v15835_v14  ;;  %v6913_v42 = vsel %vm241_vm4, %v15458_v13, %v6906_v7 }
 0xc1e   :  { %17900 = vst [vmem:[#allocation101_spill] sm:$0xff] %v15838_v60  ;;  %17901 = vst [vmem:[#allocation94_spill] sm:$0xff] %v15841_v40  ;;  %v15844_v50 = vmul.f32 %v15794_v12, %v6922_v55  ;;  %v15847_v39 = vmul.f32 %v15797_v49, %v6918_v63  ;;  %6793 = vrot.lane.b32.xlu1 %v15280_v18, %s8984_s19  ;;  %v6925_v33 = vsel %vm241_vm4, %v6906_v7, %v15450_v23 }
 0xc1f   :  { %7191 = vrot.lane.b32.xlu0 %v15255_v17, %s8988_s23  ;;  %v15873_v23 = vrot.slane %v7874_v48, %v17874_v4  ;;  %v15876_v7 = vrot.slane %v7874_v48, %v17872_v26  ;;  %v15879_v63 = vmul.f32 %v15832_v38, %v6913_v42  ;;  %v15882_v60 = vmul.f32 %v15835_v14, %v6925_v33 }
 0xc20   :  { %17902 = vst [vmem:[#allocation60_spill] sm:$0xff] %v15844_v50  ;;  %17903 = vst [vmem:[#allocation108_spill] sm:$0xff] %v15847_v39  ;;  %v6908_v55 = vpop.permute.xlu1 %6907  ;;  %v6992_v54 = vpop.permute.xlu0 %6991 }
 0xc21   :  { %v6914_v49 = vsel %vm241_vm4, %v15464_v21, %v6908_v55  ;;  %v6926_v13 = vsel %vm241_vm4, %v6908_v55, %v15456_v8  ;;  %17904 = vst [vmem:[#allocation87_spill] sm:$0xff] %v15873_v23  ;;  %17905 = vst [vmem:[#allocation89_spill] sm:$0xff] %v15876_v7  ;;  %v7019_v8 = vsel %vm285_vm6, %v6992_v54, %v15474_v58 }
 0xc22   :  { %17906 = vst [vmem:[#allocation97_spill] sm:$0xff] %v15879_v63  ;;  %17907 = vst [vmem:[#allocation39_spill] sm:$0xff] %v15882_v60  ;;  %v15885_v12 = vmul.f32 %v15832_v38, %v6914_v49  ;;  %v15888_v21 = vmul.f32 %v15835_v14, %v6926_v13  ;;  %7193 = vrot.lane.b32.xlu1 %v15274_v53, %s8988_s23  ;;  %v7023_v42 = vsel %vm285_vm6, %v15466_v45, %v6992_v54 }
 0xc23   :  { %6893 = vrot.lane.b32.xlu0 %v15259_v1, %s8985_s20  ;;  %v15911_v54 = vrot.slane %v7874_v48, %v17877_v27  ;;  %v15914_v38 = vrot.slane %v7874_v48, %v17875_v36  ;;  %v15917_v49 = vmul.f32 %v15873_v23, %v7023_v42  ;;  %v15920_v63 = vmul.f32 %v15876_v7, %v7019_v8  ;;  %v7875_v48 = vld [vmem:[%s16565_s1 + $0x7] ss:$8 sm:$0xf] }
 0xc24   :  { %17908 = vst [vmem:[#allocation23_spill] sm:$0xff] %v15885_v12  ;;  %17909 = vst [vmem:[#allocation44_spill] sm:$0xff] %v15888_v21  ;;  %v6994_v33 = vpop.permute.xlu1 %6993  ;;  %v7008_v55 = vpop.permute.xlu0 %7007 }
 0xc25   :  { %v7020_v50 = vsel %vm285_vm6, %v6994_v33, %v15480_v52  ;;  %v7024_v14 = vsel %vm285_vm6, %v15472_v30, %v6994_v33  ;;  %17910 = vst [vmem:[#allocation24_spill] sm:$0xff] %v15911_v54  ;;  %17911 = vst [vmem:[#allocation86_spill] sm:$0xff] %v15914_v38  ;;  %v7015_v42 = vsel %vm285_vm6, %v15474_v58, %v7008_v55 }
 0xc26   :  { %17912 = vst [vmem:[#allocation112_spill] sm:$0xff] %v15917_v49  ;;  %17913 = vst [vmem:[#allocation115_spill] sm:$0xff] %v15920_v63  ;;  %v15923_v13 = vmul.f32 %v15873_v23, %v7024_v14  ;;  %v15926_v12 = vmul.f32 %v15876_v7, %v7020_v50  ;;  %7209 = vrot.lane.b32.xlu1 %v15278_v62, %s8988_s23  ;;  %v7027_v8 = vsel %vm285_vm6, %v7008_v55, %v15466_v45  ;;  %v17954_v62 = vld [vmem:[#allocation98_spill] sm:$0xff] }
 0xc27   :  { %6909 = vrot.lane.b32.xlu0 %v15265_v22, %s8985_s20  ;;  %v15952_v45 = vrot.slane %v7875_v48, %v17874_v4  ;;  %v15955_v55 = vrot.slane %v7875_v48, %v17872_v26  ;;  %v15958_v14 = vmul.f32 %v15911_v54, %v7015_v42  ;;  %v15961_v49 = vmul.f32 %v15914_v38, %v7027_v8 }
 0xc28   :  { %17914 = vst [vmem:[#allocation42_spill] sm:$0xff] %v15923_v13  ;;  %17915 = vst [vmem:[#allocation113_spill] sm:$0xff] %v15926_v12  ;;  %v7010_v50 = vpop.permute.xlu1 %7009  ;;  %v7094_v33 = vpop.permute.xlu0 %7093 }
 0xc29   :  { %v7016_v7 = vsel %vm285_vm6, %v15480_v52, %v7010_v50  ;;  %v7028_v58 = vsel %vm285_vm6, %v7010_v50, %v15472_v30  ;;  %17916 = vst [vmem:[#allocation110_spill] sm:$0xff] %v15952_v45  ;;  %17917 = vst [vmem:[#allocation26_spill] sm:$0xff] %v15955_v55  ;;  %v7121_v30 = vsel %vm329_vm5, %v7094_v33, %v15490_v19 }
 0xc2a   :  { %17918 = vst [vmem:[#allocation96_spill] sm:$0xff] %v15958_v14  ;;  %17919 = vst [vmem:[#allocation67_spill] sm:$0xff] %v15961_v49  ;;  %v15964_v23 = vmul.f32 %v15911_v54, %v7016_v7  ;;  %v15967_v52 = vmul.f32 %v15914_v38, %v7028_v58  ;;  %6895 = vrot.lane.b32.xlu1 %v15276_v29, %s8985_s20  ;;  %v7125_v42 = vsel %vm329_vm5, %v15482_v10, %v7094_v33  ;;  %v7876_v7 = vld [vmem:[%s16565_s1 + $0x20] ss:$8 sm:$0xf] }
 0xc2b   :  { %6995 = vrot.lane.b32.xlu0 %v15259_v1, %s8986_s21  ;;  %v15990_v33 = vrot.slane %v7875_v48, %v17877_v27  ;;  %v15993_v54 = vrot.slane %v7875_v48, %v17875_v36  ;;  %v15999_v58 = vmul.f32 %v15952_v45, %v7125_v42  ;;  %v16002_v14 = vmul.f32 %v15955_v55, %v7121_v30 }
 0xc2c   :  { %17920 = vst [vmem:[#allocation63_spill] sm:$0xff] %v15964_v23  ;;  %17921 = vst [vmem:[#allocation52_spill] sm:$0xff] %v15967_v52  ;;  %v7096_v8 = vpop.permute.xlu1 %7095  ;;  %v7110_v50 = vpop.permute.xlu0 %7109 }
 0xc2d   :  { %v7122_v13 = vsel %vm329_vm5, %v7096_v8, %v15496_v57  ;;  %v7126_v38 = vsel %vm329_vm5, %v15488_v24, %v7096_v8  ;;  %17922 = vst [vmem:[#allocation73_spill] sm:$0xff] %v15990_v33  ;;  %17923 = vst [vmem:[#allocation71_spill] sm:$0xff] %v15993_v54  ;;  %v7117_v48 = vsel %vm329_vm5, %v15490_v19, %v7110_v50 }
 0xc2e   :  { %17924 = vst [vmem:[#allocation62_spill] sm:$0xff] %v15999_v58  ;;  %17925 = vst [vmem:[#allocation75_spill] sm:$0xff] %v16002_v14  ;;  %v16005_v23 = vmul.f32 %v15952_v45, %v7126_v38  ;;  %v16008_v8 = vmul.f32 %v15955_v55, %v7122_v13  ;;  %6911 = vrot.lane.b32.xlu1 %v15280_v18, %s8985_s20  ;;  %v7129_v42 = vsel %vm329_vm5, %v7110_v50, %v15482_v10 }
 0xc2f   :  { %7011 = vrot.lane.b32.xlu0 %v15265_v22, %s8986_s21  ;;  %v16023_v13 = vrot.slane %v7876_v7, %v17874_v4  ;;  %v16034_v50 = vrot.slane %v7876_v7, %v17872_v26  ;;  %v16040_v38 = vmul.f32 %v15990_v33, %v7117_v48  ;;  %v16043_v55 = vmul.f32 %v15993_v54, %v7129_v42 }
 0xc30   :  { %17926 = vst [vmem:[#allocation61_spill] sm:$0xff] %v16005_v23  ;;  %17927 = vst [vmem:[#allocation120_spill] sm:$0xff] %v16008_v8  ;;  %v7112_v30 = vpop.permute.xlu1 %7111  ;;  %v7196_v45 = vpop.permute.xlu0 %7195  ;;  %v16061_v42 = vrot.slane %v7876_v7, %v17877_v27  ;;  %v16072_v23 = vrot.slane %v7876_v7, %v17875_v36 }
 0xc31   :  { %17928 = vst [vmem:[#allocation25_spill] sm:$0xff] %v16023_v13  ;;  %v7118_v19 = vsel %vm329_vm5, %v15496_v57, %v7112_v30  ;;  %v7130_v10 = vsel %vm329_vm5, %v7112_v30, %v15488_v24  ;;  %17929 = vst [vmem:[#allocation118_spill] sm:$0xff] %v16034_v50  ;;  %v7223_v4 = vsel %vm373_vm7, %v7196_v45, %v15506_v20 }
 0xc32   :  { %17930 = vst [vmem:[#allocation59_spill] sm:$0xff] %v16040_v38  ;;  %17931 = vst [vmem:[#allocation48_spill] sm:$0xff] %v16043_v55  ;;  %v16046_v58 = vmul.f32 %v15990_v33, %v7118_v19  ;;  %v16049_v57 = vmul.f32 %v15993_v54, %v7130_v10  ;;  %6997 = vrot.lane.b32.xlu1 %v15276_v29, %s8986_s21  ;;  %v7227_v24 = vsel %vm373_vm7, %v15498_v35, %v7196_v45 }
 0xc33   :  { %7097 = vrot.lane.b32.xlu0 %v15259_v1, %s8987_s22  ;;  %17934 = vst [vmem:[#allocation109_spill] sm:$0xff] %v16061_v42  ;;  %17935 = vst [vmem:[#allocation43_spill] sm:$0xff] %v16072_v23  ;;  %v16078_v26 = vmul.f32 %v16023_v13, %v7227_v24  ;;  %v16081_v19 = vmul.f32 %v16034_v50, %v7223_v4 }
 0xc34   :  { %17932 = vst [vmem:[#allocation82_spill] sm:$0xff] %v16046_v58  ;;  %17933 = vst [vmem:[#allocation40_spill] sm:$0xff] %v16049_v57  ;;  %v7198_v48 = vpop.permute.xlu1 %7197  ;;  %v7212_v30 = vpop.permute.xlu0 %7211 }
 0xc35   :  { %v7224_v10 = vsel %vm373_vm7, %v7198_v48, %v15515_v41  ;;  %v7228_v45 = vsel %vm373_vm7, %v15504_v51, %v7198_v48  ;;  %v7219_v27 = vsel %vm373_vm7, %v15506_v20, %v7212_v30  ;;  %17936 = vst [vmem:[#allocation53_spill] sm:$0xff] %v16078_v26  ;;  %17937 = vst [vmem:[#allocation56_spill] sm:$0xff] %v16081_v19 }
 0xc36   :  { %v16084_v38 = vmul.f32 %v16023_v13, %v7228_v45  ;;  %v16087_v58 = vmul.f32 %v16034_v50, %v7224_v10  ;;  %7013 = vrot.lane.b32.xlu1 %v15280_v18, %s8986_s21  ;;  %v7231_v36 = vsel %vm373_vm7, %v7212_v30, %v15498_v35  ;;  %v16107_v35 = vmul.f32 %v16061_v42, %v7219_v27 }
 0xc37   :  { %7113 = vrot.lane.b32.xlu0 %v15265_v22, %s8987_s22  ;;  %v16110_v30 = vmul.f32 %v16072_v23, %v7231_v36 }
 0xc38   :  { %17938 = vst [vmem:[#allocation22_spill] sm:$0xff] %v16084_v38  ;;  %17939 = vst [vmem:[#allocation102_spill] sm:$0xff] %v16087_v58  ;;  %v7214_v7 = vpop.permute.xlu1 %7213  ;;  %v6462_v4 = vpop.permute.xlu0 %6461 }
 0xc39   :  { %v7220_v48 = vsel %vm373_vm7, %v15515_v41, %v7214_v7  ;;  %v7232_v10 = vsel %vm373_vm7, %v7214_v7, %v15504_v51  ;;  %17940 = vst [vmem:[#allocation80_spill] sm:$0xff] %v16107_v35  ;;  %17941 = vst [vmem:[#allocation85_spill] sm:$0xff] %v16110_v30  ;;  %v16129_v7 = vld [vmem:[%s16572_s8] sm:$0xff] }
 0xc3a   :  { %v16113_v45 = vmul.f32 %v16061_v42, %v7220_v48  ;;  %v16116_v20 = vmul.f32 %v16072_v23, %v7232_v10  ;;  %7099 = vrot.lane.b32.xlu1 %v15276_v29, %s8987_s22  ;;  %17944 = vst [vmem:[#allocation111_spill] sm:$0xff] %v16129_v7  ;;  %v7445_v48 = vcombine.high %v16129_v7, %v16129_v7 }
 0xc3b   :  { %7199 = vrot.lane.b32.xlu0 %v15259_v1, %s8988_s23 }
 0xc3c   :  { %17942 = vst [vmem:[#allocation88_spill] sm:$0xff] %v16113_v45  ;;  %17943 = vst [vmem:[#allocation121_spill] sm:$0xff] %v16116_v20  ;;  %v6464_v41 = vpop.permute.xlu1 %6463  ;;  %v6478_v27 = vpop.permute.xlu0 %6477  ;;  %7513 = vmatprep.mubr.f32.mxu0 %v7445_v48  ;;  %7655 = vmatprep.mubr.f32.mxu1 %v7445_v48 }
 0xc3e   :  { %7115 = vrot.lane.b32.xlu1 %v15280_v18, %s8987_s22 }
 0xc3f   :  { %7207 = vrot.lane.b32.xlu0 %v15261_v47, %s8988_s23 }
 0xc40   :  { %v6480_v10 = vpop.permute.xlu1 %6479  ;;  %v16137_v51 = vpop.permute.xlu0 %6563 }
 0xc42   :  { %7201 = vrot.lane.b32.xlu1 %v15276_v29, %s8988_s23 }
 0xc43   :  { %7215 = vrot.lane.b32.xlu0 %v15265_v22, %s8988_s23 }
 0xc44   :  { %v16143_v36 = vpop.permute.xlu1 %6565  ;;  %v16145_v24 = vpop.permute.xlu0 %6579 }
 0xc46   :  { %7217 = vrot.lane.b32.xlu1 %v15280_v18, %s8988_s23 }
 0xc48   :  { %v16149_v35 = vpop.permute.xlu1 %6581  ;;  %v16151_v45 = vpop.permute.xlu0 %6665 }
 0xc4c   :  { %v16153_v26 = vpop.permute.xlu1 %6667  ;;  %v16155_v48 = vpop.permute.xlu0 %6681 }
 0xc50   :  { %v16157_v38 = vpop.permute.xlu1 %6683  ;;  %v16159_v23 = vpop.permute.xlu0 %6767 }
 0xc54   :  { %v16161_v7 = vpop.permute.xlu1 %6769  ;;  %v16163_v30 = vpop.permute.xlu0 %6783 }
 0xc58   :  { %v16165_v20 = vpop.permute.xlu1 %6785  ;;  %v16167_v42 = vpop.permute.xlu0 %6885 }
 0xc5c   :  { %v16169_v13 = vpop.permute.xlu1 %6887  ;;  %v16171_v19 = vpop.permute.xlu0 %6901 }
 0xc60   :  { %v16173_v58 = vpop.permute.xlu1 %6903  ;;  %v16175_v50 = vpop.permute.xlu0 %6987 }
 0xc61   :  { %17945 = vst [vmem:[#allocation122_spill] sm:$0xff] %v16175_v50 }
 0xc64   :  { %v16177_v54 = vpop.permute.xlu1 %6989  ;;  %v16179_v33 = vpop.permute.xlu0 %7003 }
 0xc65   :  { %17946 = vst [vmem:[#allocation7_spill] sm:$0xff] %v16177_v54  ;;  %17947 = vst [vmem:[#allocation11_spill] sm:$0xff] %v16179_v33  ;;  %v17953_v33 = vld [vmem:[#allocation41_spill] sm:$0xff] }
 0xc68   :  { %v16181_v55 = vpop.permute.xlu1 %7005  ;;  %v16183_v57 = vpop.permute.xlu0 %7089 }
 0xc69   :  { %17948 = vst [vmem:[#allocation8_spill] sm:$0xff] %v16181_v55  ;;  %17949 = vst [vmem:[#allocation64_spill] sm:$0xff] %v16183_v57 }
 0xc6c   :  { %v16185_v14 = vpop.permute.xlu1 %7091  ;;  %v16187_v8 = vpop.permute.xlu0 %7105 }
 0xc6d   :  { %17950 = vst [vmem:[#allocation12_spill] sm:$0xff] %v16185_v14  ;;  %17951 = vst [vmem:[#allocation78_spill] sm:$0xff] %v16187_v8 }
 0xc70   :  { %v16189_v49 = vpop.permute.xlu1 %7107  ;;  %v6470_v52 = vpop.permute.xlu0 %6469 }
 0xc71   :  { %17952 = vst [vmem:[#allocation32_spill] sm:$0xff] %v16189_v49  ;;  %v6499_v63 = vsel %vm62_vm0, %v6462_v4, %v6470_v52  ;;  %v6495_v40 = vsel %vm62_vm0, %v6470_v52, %v6478_v27 }
 0xc72   :  { %v6536_v60 = vmul.f32 %v17953_v33, %v6499_v63  ;;  %v6537_v52 = vmul.f32 %v15552_v34, %v6495_v40 }
 0xc74   :  { %v6472_v12 = vpop.permute.xlu1 %6471  ;;  %v6486_v54 = vpop.permute.xlu0 %6485 }
 0xc75   :  { %v6500_v50 = vsel %vm62_vm0, %v6464_v41, %v6472_v12  ;;  %v6496_v57 = vsel %vm62_vm0, %v6472_v12, %v6480_v10  ;;  %v6491_v8 = vsel %vm62_vm0, %v6478_v27, %v6486_v54  ;;  %v6503_v49 = vsel %vm62_vm0, %v6486_v54, %v6462_v4 }
 0xc76   :  { %v6540_v14 = vmul.f32 %v17953_v33, %v6500_v50  ;;  %v6541_v39 = vmul.f32 %v15552_v34, %v6496_v57  ;;  %v6535_v50 = vmul.f32 %v15536_v61, %v6503_v49  ;;  %v6538_v47 = vmul.f32 %v17954_v62, %v6491_v8 }
 0xc78   :  { %v6488_v55 = vpop.permute.xlu1 %6487  ;;  %v8531_v21 = vpack.c.bf16 %v6540_v14, %v6536_v60  ;;  %v6572_v33 = vpop.permute.xlu0 %6571  ;;  %v8609_v8 = vpack.c.bf16 %v6541_v39, %v6537_v52  ;;  %v17955_v39 = vpack.c.bf16 %v15607_v3, %v15601_v37  ;;  %v17956_v37 = vpack.c.bf16 %v15651_v56, %v15645_v43 }
 0xc79   :  { %v6492_v63 = vsel %vm62_vm0, %v6480_v10, %v6488_v55  ;;  %v6504_v12 = vsel %vm62_vm0, %v6488_v55, %v6464_v41  ;;  %v6601_v14 = vsel %vm105_vm1, %v16137_v51, %v6572_v33 }
 0xc7a   :  { %v6539_v54 = vmul.f32 %v15536_v61, %v6504_v12  ;;  %v6542_v60 = vmul.f32 %v17954_v62, %v6492_v63  ;;  %8532 = vmatprep.subr.bf16.mxu0 %v8531_v21  ;;  %v6638_v61 = vmul.f32 %v15558_v31, %v6601_v14 }
 0xc7c   :  { %v8533_v57 = vpack.c.bf16 %v6539_v54, %v6535_v50  ;;  %v6574_v4 = vpop.permute.xlu1 %6573  ;;  %v8607_v27 = vpack.c.bf16 %v6542_v60, %v6538_v47  ;;  %v6588_v55 = vpop.permute.xlu0 %6587  ;;  %v17958_v54 = vld [vmem:[#allocation81_spill] sm:$0xff]  ;;  %v17959_v60 = vld [vmem:[#allocation106_spill] sm:$0xff] }
 0xc7d   :  { %v6602_v49 = vsel %vm105_vm1, %v16143_v36, %v6574_v4  ;;  %v6598_v62 = vsel %vm105_vm1, %v6574_v4, %v16149_v35  ;;  %v6593_v34 = vsel %vm105_vm1, %v16145_v24, %v6588_v55  ;;  %v6605_v47 = vsel %vm105_vm1, %v6588_v55, %v16137_v51 }
 0xc7e   :  { %v6642_v21 = vmul.f32 %v15558_v31, %v6602_v49  ;;  %8534 = vmatpush1.bf16.msra.mxu0 %v8533_v57  ;;  %8608 = vmatprep.subr.bf16.mxu1 %v8607_v27  ;;  %v6597_v31 = vsel %vm105_vm1, %v6572_v33, %v16145_v24  ;;  %v6643_v10 = vmul.f32 %v15570_v15, %v6598_v62  ;;  %v17961_v57 = vld [vmem:[#allocation93_spill] sm:$0xff] }
 0xc7f   :  { %8536 = vmatprep.subr.bf16.mxu0 %v17955_v39  ;;  %8610 = vmatpush1.bf16.msra.mxu1 %v8609_v8  ;;  %v6637_v12 = vmul.f32 %v15588_v11, %v6605_v47  ;;  %v6640_v50 = vmul.f32 %v15598_v16, %v6593_v34  ;;  %v6639_v43 = vmul.f32 %v15570_v15, %v6597_v31  ;;  %v17963_v34 = vld [vmem:[#allocation117_spill] sm:$0xff]  ;;  %v17966_v31 = vld [vmem:[#allocation66_spill] sm:$0xff] }
 0xc80   :  { %v6590_v40 = vpop.permute.xlu1 %6589  ;;  %v8539_v41 = vpack.c.bf16 %v6642_v21, %v6638_v61  ;;  %8612 = vmatprep.subr.bf16.mxu1 %v17956_v37  ;;  %v6674_v3 = vpop.permute.xlu0 %6673  ;;  %v17960_v14 = vpack.c.bf16 %v17958_v54, %v17959_v60  ;;  %v17962_v8 = vpack.c.bf16 %v15686_v0, %v15680_v28  ;;  %v17964_v28 = vpack.c.bf16 %v15730_v5, %v15724_v2  ;;  %v17968_v37 = vld [vmem:[#allocation105_spill] sm:$0xff] }
 0xc81   :  { %v6594_v63 = vsel %vm105_vm1, %v16149_v35, %v6590_v40  ;;  %v6606_v51 = vsel %vm105_vm1, %v6590_v40, %v16143_v36  ;;  %v17957_v35 = vpack.c.bf16 %v15648_v6, %v15642_v25  ;;  %v6703_v36 = vsel %vm149_vm2, %v16151_v45, %v6674_v3  ;;  %v17965_v40 = vld [vmem:[#allocation100_spill] sm:$0xff] }
 0xc82   :  { %v6641_v24 = vmul.f32 %v15588_v11, %v6606_v51  ;;  %v6644_v33 = vmul.f32 %v15598_v16, %v6594_v63  ;;  %v8617_v6 = vpack.c.bf16 %v6643_v10, %v6639_v43  ;;  %v6740_v4 = vmul.f32 %v17961_v57, %v6703_v36  ;;  %v17967_v51 = vld [vmem:[#allocation95_spill] sm:$0xff] }
 0xc83   :  { %8538 = vmatpush1.bf16.msra.mxu0 %v17957_v35  ;;  %8614 = vmatpush1.bf16.msra.mxu1 %v17960_v14  ;;  %v6699_v21 = vsel %vm149_vm2, %v6674_v3, %v16155_v48  ;;  %v17970_v3 = vld [vmem:[#allocation58_spill] sm:$0xff] }
 0xc84   :  { %8540 = vmatprep.subr.bf16.mxu0 %v8539_v41  ;;  %v8541_v56 = vpack.c.bf16 %v6641_v24, %v6637_v12  ;;  %v6676_v52 = vpop.permute.xlu1 %6675  ;;  %v8615_v11 = vpack.c.bf16 %v6644_v33, %v6640_v50  ;;  %v6690_v25 = vpop.permute.xlu0 %6689  ;;  %v6741_v2 = vmul.f32 %v17963_v34, %v6699_v21  ;;  %v17971_v12 = vld [vmem:[#allocation114_spill] sm:$0xff]  ;;  %v17979_v21 = vld [vmem:[#allocation47_spill] sm:$0xff] }
 0xc85   :  { %v6704_v16 = vsel %vm149_vm2, %v16153_v26, %v6676_v52  ;;  %v6700_v27 = vsel %vm149_vm2, %v6676_v52, %v16157_v38  ;;  %v6695_v49 = vsel %vm149_vm2, %v16155_v48, %v6690_v25  ;;  %v6707_v55 = vsel %vm149_vm2, %v6690_v25, %v16151_v45 }
 0xc86   :  { %v6744_v15 = vmul.f32 %v17961_v57, %v6704_v16  ;;  %8616 = vmatprep.subr.bf16.mxu1 %v8615_v11  ;;  %v6745_v47 = vmul.f32 %v17963_v34, %v6700_v27  ;;  %v6739_v41 = vmul.f32 %v17965_v40, %v6707_v55  ;;  %v6742_v10 = vmul.f32 %v17966_v31, %v6695_v49  ;;  %v17977_v49 = vld [vmem:[#allocation19_spill] sm:$0xff] }
 0xc87   :  { %8542 = vmatpush1.bf16.msra.mxu0 %v8541_v56  ;;  %8618 = vmatpush1.bf16.msra.mxu1 %v8617_v6  ;;  %v17972_v50 = vpack.c.bf16 %v17970_v3, %v17971_v12  ;;  %v17973_v56 = vld [vmem:[#allocation107_spill] sm:$0xff]  ;;  %v17974_v16 = vpack.c.bf16 %v15765_v44, %v15759_v59  ;;  %v17976_v59 = vpack.c.bf16 %v15809_v46, %v15803_v32  ;;  %v17982_v32 = vld [vmem:[#allocation21_spill] sm:$0xff]  ;;  %v17983_v46 = vld [vmem:[#allocation104_spill] sm:$0xff] }
 0xc88   :  { %8544 = vmatprep.subr.bf16.mxu0 %v17962_v8  ;;  %v6692_v61 = vpop.permute.xlu1 %6691  ;;  %v8547_v62 = vpack.c.bf16 %v6744_v15, %v6740_v4  ;;  %8620 = vmatprep.subr.bf16.mxu1 %v17964_v28  ;;  %v8625_v43 = vpack.c.bf16 %v6745_v47, %v6741_v2  ;;  %v17975_v4 = vld [vmem:[#allocation72_spill] sm:$0xff]  ;;  %v17978_v8 = vld [vmem:[#allocation45_spill] sm:$0xff] }
 0xc89   :  { %v6696_v39 = vsel %vm149_vm2, %v16157_v38, %v6692_v61  ;;  %v6708_v45 = vsel %vm149_vm2, %v6692_v61, %v16153_v26  ;;  %v6776_v0 = vpop.permute.xlu0 %6775  ;;  %v17969_v38 = vpack.c.bf16 %v17967_v51, %v17968_v37  ;;  %v17989_v2 = vld [vmem:[#allocation69_spill] sm:$0xff] }
 0xc8a   :  { %v6743_v48 = vmul.f32 %v17965_v40, %v6708_v45  ;;  %v6746_v63 = vmul.f32 %v17966_v31, %v6696_v39  ;;  %v6805_v26 = vsel %vm193_vm3, %v16159_v23, %v6776_v0  ;;  %v6801_v57 = vsel %vm193_vm3, %v6776_v0, %v16163_v30  ;;  %v17985_v40 = vld [vmem:[#allocation76_spill] sm:$0xff] }
 0xc8b   :  { %8546 = vmatpush1.bf16.msra.mxu0 %v17969_v38  ;;  %8622 = vmatpush1.bf16.msra.mxu1 %v17972_v50  ;;  %v6842_v54 = vmul.f32 %v17973_v56, %v6805_v26  ;;  %v17984_v39 = vpack.c.bf16 %v17982_v32, %v17983_v46  ;;  %v8563_v26 = vpack.c.bf16 %v15276_v29, %v15259_v1  ;;  %v18010_v32 = vld [vmem:[#allocation11_spill] sm:$0xff] }
 0xc8c   :  { %8548 = vmatprep.subr.bf16.mxu0 %v8547_v62  ;;  %v8549_v5 = vpack.c.bf16 %v6743_v48, %v6739_v41  ;;  %v6778_v24 = vpop.permute.xlu1 %6777  ;;  %v8623_v33 = vpack.c.bf16 %v6746_v63, %v6742_v10  ;;  %v17986_v41 = vld [vmem:[#allocation68_spill] sm:$0xff]  ;;  %v17987_v48 = vld [vmem:[#allocation103_spill] sm:$0xff]  ;;  %v8639_v50 = vpack.c.bf16 %v15280_v18, %v15265_v22  ;;  %v8565_v1 = vpack.c.bf16 %v15274_v53, %v15255_v17  ;;  %v17995_v18 = vld [vmem:[#allocation77_spill] sm:$0xff] }
 0xc8d   :  { %v6806_v35 = vsel %vm193_vm3, %v16161_v7, %v6778_v24  ;;  %v6792_v36 = vpop.permute.xlu0 %6791  ;;  %v6802_v60 = vsel %vm193_vm3, %v6778_v24, %v16165_v20  ;;  %v8559_v31 = vpack.c.bf16 %v17986_v41, %v17985_v40  ;;  %v17988_v63 = vld [vmem:[#allocation99_spill] sm:$0xff]  ;;  %v17992_v24 = vld [vmem:[#allocation116_spill] sm:$0xff]  ;;  %v17996_v17 = vld [vmem:[#allocation49_spill] sm:$0xff] }
 0xc8e   :  { %v6846_v14 = vmul.f32 %v17973_v56, %v6806_v35  ;;  %v6797_v52 = vsel %vm193_vm3, %v16163_v30, %v6792_v36  ;;  %v6809_v11 = vsel %vm193_vm3, %v6792_v36, %v16159_v23  ;;  %8624 = vmatprep.subr.bf16.mxu1 %v8623_v33  ;;  %v6847_v27 = vmul.f32 %v17975_v4, %v6802_v60  ;;  %v17993_v33 = vld [vmem:[#allocation27_spill] sm:$0xff] }
 0xc8f   :  { %8550 = vmatpush1.bf16.msra.mxu0 %v8549_v5  ;;  %8626 = vmatpush1.bf16.msra.mxu1 %v8625_v43  ;;  %v6841_v55 = vmul.f32 %v17977_v49, %v6809_v11  ;;  %v6844_v30 = vmul.f32 %v17978_v8, %v6797_v52  ;;  %v8635_v51 = vpack.c.bf16 %v17988_v63, %v17987_v48  ;;  %v17990_v5 = vld [vmem:[#allocation83_spill] sm:$0xff] }
 0xc90   :  { %8552 = vmatprep.subr.bf16.mxu0 %v17974_v16  ;;  %v6794_v25 = vpop.permute.xlu1 %6793  ;;  %v8555_v6 = vpack.c.bf16 %v6846_v14, %v6842_v54  ;;  %8628 = vmatprep.subr.bf16.mxu1 %v17976_v59  ;;  %v17991_v3 = vpack.c.bf16 %v17989_v2, %v17990_v5  ;;  %v17994_v35 = vpack.c.bf16 %v17992_v24, %v17993_v33  ;;  %v17997_v53 = vld [vmem:[#allocation51_spill] sm:$0xff]  ;;  %v17998_v16 = vld [vmem:[#allocation108_spill] sm:$0xff]  ;;  %v18017_v5 = vld [vmem:[#allocation89_spill] sm:$0xff] }
 0xc91   :  { %v6798_v15 = vsel %vm193_vm3, %v16165_v20, %v6794_v25  ;;  %v6810_v23 = vsel %vm193_vm3, %v6794_v25, %v16161_v7  ;;  %v16336_v44 = vpop.permute.xlu0 %7191  ;;  %v17980_v20 = vld [vmem:[#allocation74_spill] sm:$0xff]  ;;  %v6843_v7 = vmul.f32 %v17975_v4, %v6801_v57  ;;  %v8641_v14 = vpack.c.bf16 %v17997_v53, %v17996_v17  ;;  %v18001_v57 = vld [vmem:[#allocation119_spill] sm:$0xff]  ;;  %v18018_v33 = vld [vmem:[#allocation113_spill] sm:$0xff] }
 0xc92   :  { %v6845_v61 = vmul.f32 %v17977_v49, %v6810_v23  ;;  %v6848_v62 = vmul.f32 %v17978_v8, %v6798_v15  ;;  %v17981_v34 = vpack.c.bf16 %v17979_v21, %v17980_v20  ;;  %v17999_v25 = vld [vmem:[#allocation94_spill] sm:$0xff]  ;;  %v18002_v49 = vld [vmem:[#allocation44_spill] sm:$0xff]  ;;  %v18015_v63 = vld [vmem:[#allocation7_spill] sm:$0xff] }
 0xc93   :  { %8630 = vmatpush1.bf16.msra.mxu1 %v17984_v39  ;;  %v8633_v10 = vpack.c.bf16 %v6847_v27, %v6843_v7  ;;  %v18007_v7 = vld [vmem:[#allocation60_spill] sm:$0xff]  ;;  %v18023_v53 = vld [vmem:[#allocation67_spill] sm:$0xff] }
 0xc94   :  { %8554 = vmatpush1.bf16.msra.mxu0 %v17981_v34  ;;  %v8557_v47 = vpack.c.bf16 %v6845_v61, %v6841_v55  ;;  %v16349_v45 = vpop.permute.xlu1 %7193  ;;  %v8631_v28 = vpack.c.bf16 %v6848_v62, %v6844_v30  ;;  %v18003_v55 = vld [vmem:[#allocation39_spill] sm:$0xff]  ;;  %v18005_v30 = vld [vmem:[#allocation70_spill] sm:$0xff]  ;;  %v18006_v62 = vld [vmem:[#allocation28_spill] sm:$0xff] }
 0xc95   :  { %8556 = vmatprep.subr.bf16.mxu0 %v8555_v6  ;;  %v6894_v0 = vpop.permute.xlu0 %6893  ;;  %v18000_v6 = vpack.c.bf16 %v17998_v16, %v17999_v25  ;;  %v18004_v8 = vpack.c.bf16 %v18002_v49, %v18003_v55  ;;  %v18022_v17 = vld [vmem:[#allocation52_spill] sm:$0xff]  ;;  %v18026_v16 = vld [vmem:[#allocation86_spill] sm:$0xff]  ;;  %v18031_v49 = vld [vmem:[#allocation63_spill] sm:$0xff] }
 0xc96   :  { %8632 = vmatprep.subr.bf16.mxu1 %v8631_v28  ;;  %v6919_v12 = vsel %vm241_vm4, %v6894_v0, %v16171_v19  ;;  %v6923_v22 = vsel %vm241_vm4, %v16167_v42, %v6894_v0  ;;  %v18011_v28 = vld [vmem:[#allocation23_spill] sm:$0xff]  ;;  %v18012_v0 = vld [vmem:[#allocation97_spill] sm:$0xff]  ;;  %v18032_v55 = vld [vmem:[#allocation96_spill] sm:$0xff] }
 0xc97   :  { %8634 = vmatpush1.bf16.msra.mxu1 %v8633_v10  ;;  %v6960_v54 = vmul.f32 %v17995_v18, %v6919_v12  ;;  %v6959_v23 = vmul.f32 %v18001_v57, %v6923_v22  ;;  %v18013_v40 = vpack.c.bf16 %v18011_v28, %v18012_v0  ;;  %v18014_v10 = vld [vmem:[#allocation8_spill] sm:$0xff] }
 0xc98   :  { %8558 = vmatpush1.bf16.msra.mxu0 %v8557_v47  ;;  %v16355_v37 = vpop.permute.xlu1 %7209  ;;  %8636 = vmatprep.subr.bf16.mxu1 %v8635_v51  ;;  %v18008_v47 = vld [vmem:[#allocation101_spill] sm:$0xff]  ;;  %v18038_v0 = vld [vmem:[#allocation120_spill] sm:$0xff] }
 0xc99   :  { %8560 = vmatprep.subr.bf16.mxu0 %v8559_v31  ;;  %v6910_v38 = vpop.permute.xlu0 %6909 }
 0xc9a   :  { %v6915_v52 = vsel %vm241_vm4, %v16171_v19, %v6910_v38  ;;  %v6927_v11 = vsel %vm241_vm4, %v6910_v38, %v16167_v42 }
 0xc9b   :  { %8638 = vmatpush1.bf16.msra.mxu1 %v17994_v35  ;;  %v6961_v61 = vmul.f32 %v18005_v30, %v6915_v52  ;;  %v6962_v21 = vmul.f32 %v18006_v62, %v6927_v11  ;;  %v18019_v35 = vld [vmem:[#allocation115_spill] sm:$0xff]  ;;  %v18025_v52 = vld [vmem:[#allocation24_spill] sm:$0xff] }
 0xc9c   :  { %8562 = vmatpush1.bf16.msra.mxu0 %v17991_v3  ;;  %v6896_v36 = vpop.permute.xlu1 %6895  ;;  %8640 = vmatprep.subr.bf16.mxu1 %v8639_v50 }
 0xc9d   :  { %8564 = vmatprep.subr.bf16.mxu0 %v8563_v26  ;;  %v6920_v29 = vsel %vm241_vm4, %v6896_v36, %v16173_v58  ;;  %v6924_v43 = vsel %vm241_vm4, %v16169_v13, %v6896_v36  ;;  %v6996_v56 = vpop.permute.xlu0 %6995  ;;  %v18016_v26 = vld [vmem:[#allocation122_spill] sm:$0xff]  ;;  %v18020_v36 = vpack.c.bf16 %v18018_v33, %v18019_v35  ;;  %v18046_v33 = vld [vmem:[#allocation71_spill] sm:$0xff] }
 0xc9e   :  { %v6964_v60 = vmul.f32 %v17995_v18, %v6920_v29  ;;  %v6963_v4 = vmul.f32 %v18001_v57, %v6924_v43  ;;  %v7025_v2 = vsel %vm285_vm6, %v18016_v26, %v6996_v56 }
 0xc9f   :  { %8642 = vmatpush1.bf16.msra.mxu1 %v8641_v14  ;;  %v18024_v14 = vpack.c.bf16 %v18022_v17, %v18023_v53  ;;  %v18051_v17 = vld [vmem:[#allocation59_spill] sm:$0xff] }
 0xca0   :  { %8566 = vmatpush1.bf16.msra.mxu0 %v8565_v1  ;;  %v6912_v27 = vpop.permute.xlu1 %6911  ;;  %v8571_v15 = vpack.c.bf16 %v6964_v60, %v6960_v54  ;;  %8644 = vmatprep.subr.bf16.mxu1 %v18004_v8  ;;  %v8573_v46 = vpack.c.bf16 %v6963_v4, %v6959_v23  ;;  %v18021_v1 = vld [vmem:[#allocation87_spill] sm:$0xff]  ;;  %v18027_v4 = vld [vmem:[#allocation42_spill] sm:$0xff]  ;;  %v18033_v8 = vpack.c.bf16 %v18031_v49, %v18032_v55  ;;  %v18057_v49 = vld [vmem:[#allocation25_spill] sm:$0xff] }
 0xca1   :  { %8568 = vmatprep.subr.bf16.mxu0 %v18000_v6  ;;  %v6916_v59 = vsel %vm241_vm4, %v16173_v58, %v6912_v27  ;;  %v6928_v19 = vsel %vm241_vm4, %v6912_v27, %v16169_v13  ;;  %v7012_v42 = vpop.permute.xlu0 %7011  ;;  %v18009_v58 = vpack.c.bf16 %v18007_v7, %v18008_v47  ;;  %v7021_v13 = vsel %vm285_vm6, %v6996_v56, %v18010_v32  ;;  %v18028_v27 = vld [vmem:[#allocation112_spill] sm:$0xff]  ;;  %v18030_v23 = vld [vmem:[#allocation78_spill] sm:$0xff] }
 0xca2   :  { %v6965_v20 = vmul.f32 %v18005_v30, %v6916_v59  ;;  %v6966_v34 = vmul.f32 %v18006_v62, %v6928_v19  ;;  %v7062_v3 = vmul.f32 %v18017_v5, %v7021_v13  ;;  %v7017_v50 = vsel %vm285_vm6, %v18010_v32, %v7012_v42  ;;  %v18034_v62 = vld [vmem:[#allocation32_spill] sm:$0xff]  ;;  %v18037_v32 = vld [vmem:[#allocation26_spill] sm:$0xff] }
 0xca3   :  { %8646 = vmatpush1.bf16.msra.mxu1 %v18013_v40  ;;  %v7029_v24 = vsel %vm285_vm6, %v7012_v42, %v18016_v26  ;;  %v7061_v22 = vmul.f32 %v18021_v1, %v7025_v2  ;;  %v7063_v11 = vmul.f32 %v18025_v52, %v7017_v50  ;;  %v18036_v47 = vld [vmem:[#allocation64_spill] sm:$0xff]  ;;  %v18039_v40 = vld [vmem:[#allocation75_spill] sm:$0xff]  ;;  %v18045_v50 = vld [vmem:[#allocation73_spill] sm:$0xff] }
 0xca4   :  { %8570 = vmatpush1.bf16.msra.mxu0 %v18009_v58  ;;  %v8649_v39 = vpack.c.bf16 %v6965_v20, %v6961_v61  ;;  %v6998_v41 = vpop.permute.xlu1 %6997  ;;  %v8647_v31 = vpack.c.bf16 %v6966_v34, %v6962_v21  ;;  %v7064_v25 = vmul.f32 %v18026_v16, %v7029_v24  ;;  %v18035_v20 = vld [vmem:[#allocation12_spill] sm:$0xff] }
 0xca5   :  { %8572 = vmatprep.subr.bf16.mxu0 %v8571_v15  ;;  %v7022_v48 = vsel %vm285_vm6, %v6998_v41, %v18014_v10  ;;  %v7026_v51 = vsel %vm285_vm6, %v18015_v63, %v6998_v41  ;;  %v7098_v38 = vpop.permute.xlu0 %7097  ;;  %v18029_v15 = vpack.c.bf16 %v18027_v4, %v18028_v27  ;;  %v18040_v41 = vpack.c.bf16 %v18038_v0, %v18039_v40  ;;  %v18065_v0 = vld [vmem:[#allocation53_spill] sm:$0xff] }
 0xca6   :  { %v7066_v12 = vmul.f32 %v18017_v5, %v7022_v48  ;;  %8648 = vmatprep.subr.bf16.mxu1 %v8647_v31  ;;  %v7065_v29 = vmul.f32 %v18021_v1, %v7026_v51  ;;  %v7123_v59 = vsel %vm329_vm5, %v7098_v38, %v18030_v23  ;;  %v7127_v58 = vsel %vm329_vm5, %v18036_v47, %v7098_v38  ;;  %v18041_v31 = vld [vmem:[#allocation110_spill] sm:$0xff]  ;;  %v18042_v5 = vld [vmem:[#allocation40_spill] sm:$0xff] }
 0xca7   :  { %8650 = vmatpush1.bf16.msra.mxu1 %v8649_v39  ;;  %v7164_v13 = vmul.f32 %v18037_v32, %v7123_v59  ;;  %v7163_v51 = vmul.f32 %v18041_v31, %v7127_v58  ;;  %v18054_v59 = vld [vmem:[#allocation102_spill] sm:$0xff]  ;;  %v18062_v58 = vld [vmem:[#allocation111_spill] sm:$0xff] }
 0xca8   :  { %8574 = vmatpush1.bf16.msra.mxu0 %v8573_v46  ;;  %v7014_v43 = vpop.permute.xlu1 %7013  ;;  %v8579_v56 = vpack.c.bf16 %v7066_v12, %v7062_v3  ;;  %8652 = vmatprep.subr.bf16.mxu1 %v18024_v14  ;;  %v8581_v19 = vpack.c.bf16 %v7065_v29, %v7061_v22  ;;  %v18043_v3 = vld [vmem:[#allocation48_spill] sm:$0xff]  ;;  %v18047_v29 = vld [vmem:[#allocation61_spill] sm:$0xff] }
 0xca9   :  { %8576 = vmatprep.subr.bf16.mxu0 %v18020_v36  ;;  %v7018_v18 = vsel %vm285_vm6, %v18014_v10, %v7014_v43  ;;  %v7030_v54 = vsel %vm285_vm6, %v7014_v43, %v18015_v63  ;;  %v7114_v60 = vpop.permute.xlu0 %7113  ;;  %v18044_v12 = vpack.c.bf16 %v18042_v5, %v18043_v3  ;;  %v18048_v43 = vld [vmem:[#allocation62_spill] sm:$0xff] }
 0xcaa   :  { %v7067_v6 = vmul.f32 %v18025_v52, %v7018_v18  ;;  %v7068_v57 = vmul.f32 %v18026_v16, %v7030_v54  ;;  %v7119_v39 = vsel %vm329_vm5, %v18030_v23, %v7114_v60  ;;  %v7131_v28 = vsel %vm329_vm5, %v7114_v60, %v18036_v47  ;;  %v18050_v60 = vld [vmem:[#allocation82_spill] sm:$0xff] }
 0xcab   :  { %8654 = vmatpush1.bf16.msra.mxu1 %v18033_v8  ;;  %v7165_v24 = vmul.f32 %v18045_v50, %v7119_v39  ;;  %v7166_v35 = vmul.f32 %v18046_v33, %v7131_v28  ;;  %v18052_v53 = vpack.c.bf16 %v18050_v60, %v18051_v17  ;;  %v18064_v28 = vld [vmem:[#allocation22_spill] sm:$0xff] }
 0xcac   :  { %8578 = vmatpush1.bf16.msra.mxu0 %v18029_v15  ;;  %v8657_v42 = vpack.c.bf16 %v7067_v6, %v7063_v11  ;;  %v7100_v30 = vpop.permute.xlu1 %7099  ;;  %v8655_v61 = vpack.c.bf16 %v7068_v57, %v7064_v25  ;;  %v18053_v57 = vld [vmem:[#allocation118_spill] sm:$0xff]  ;;  %v18066_v40 = vpack.c.bf16 %v18064_v28, %v18065_v0 }
 0xcad   :  { %8580 = vmatprep.subr.bf16.mxu0 %v8579_v56  ;;  %v7124_v21 = vsel %vm329_vm5, %v7100_v30, %v18034_v62  ;;  %v7128_v34 = vsel %vm329_vm5, %v18035_v20, %v7100_v30  ;;  %v7200_v7 = vpop.permute.xlu0 %7199  ;;  %v18049_v56 = vpack.c.bf16 %v18047_v29, %v18048_v43 }
 0xcae   :  { %v7168_v46 = vmul.f32 %v18037_v32, %v7124_v21  ;;  %8656 = vmatprep.subr.bf16.mxu1 %v8655_v61  ;;  %v7167_v10 = vmul.f32 %v18041_v31, %v7128_v34  ;;  %v7229_v11 = vsel %vm373_vm7, %v16336_v44, %v7200_v7  ;;  %v18059_v34 = vld [vmem:[#allocation121_spill] sm:$0xff]  ;;  %v18063_v32 = vld [vmem:[#allocation43_spill] sm:$0xff]  ;;  %v18069_v31 = vld [vmem:[#allocation80_spill] sm:$0xff] }
 0xcaf   :  { %8658 = vmatpush1.bf16.msra.mxu1 %v8657_v42  ;;  %v7265_v55 = vmul.f32 %v18057_v49, %v7229_v11 }
 0xcb0   :  { %8582 = vmatpush1.bf16.msra.mxu0 %v8581_v19  ;;  %v7116_v48 = vpop.permute.xlu1 %7115  ;;  %v8587_v63 = vpack.c.bf16 %v7168_v46, %v7164_v13  ;;  %8660 = vmatprep.subr.bf16.mxu1 %v18044_v12  ;;  %v8589_v18 = vpack.c.bf16 %v7167_v10, %v7163_v51  ;;  %v18055_v19 = vld [vmem:[#allocation56_spill] sm:$0xff]  ;;  %v18072_v51 = vld [vmem:[#allocation54_spill] sm:$0xff] }
 0xcb1   :  { %8584 = vmatprep.subr.bf16.mxu0 %v18040_v41  ;;  %v7120_v38 = vsel %vm329_vm5, %v18034_v62, %v7116_v48  ;;  %v7132_v26 = vsel %vm329_vm5, %v7116_v48, %v18035_v20  ;;  %v7208_v2 = vpop.permute.xlu0 %7207  ;;  %v18056_v42 = vpack.c.bf16 %v18054_v59, %v18055_v19  ;;  %v18058_v62 = vld [vmem:[#allocation109_spill] sm:$0xff]  ;;  %v18068_v41 = vld [vmem:[#allocation88_spill] sm:$0xff] }
 0xcb2   :  { %v7169_v36 = vmul.f32 %v18045_v50, %v7120_v38  ;;  %v7170_v1 = vmul.f32 %v18046_v33, %v7132_v26  ;;  %v7225_v22 = vsel %vm373_vm7, %v7200_v7, %v7208_v2  ;;  %v18060_v7 = vld [vmem:[#allocation85_spill] sm:$0xff]  ;;  %v18070_v10 = vpack.c.bf16 %v18068_v41, %v18069_v31  ;;  %v7290_v26 = vld [vmem:[%s16572_s8 + $0x8] sm:$0xf] }
 0xcb3   :  { %8662 = vmatpush1.bf16.msra.mxu1 %v18052_v53  ;;  %v7266_v4 = vmul.f32 %v18053_v57, %v7225_v22  ;;  %v18061_v47 = vpack.c.bf16 %v18059_v34, %v18060_v7  ;;  %v18073_v38 = vld [vmem:[#allocation57_spill] sm:$0xff] }
 0xcb4   :  { %8586 = vmatpush1.bf16.msra.mxu0 %v18049_v56  ;;  %v8665_v54 = vpack.c.bf16 %v7169_v36, %v7165_v24  ;;  %v7202_v14 = vpop.permute.xlu1 %7201  ;;  %v8663_v52 = vpack.c.bf16 %v7170_v1, %v7166_v35 }
 0xcb5   :  { %8588 = vmatprep.subr.bf16.mxu0 %v8587_v63  ;;  %v7226_v16 = vsel %vm373_vm7, %v7202_v14, %v16355_v37  ;;  %v7230_v25 = vsel %vm373_vm7, %v16349_v45, %v7202_v14  ;;  %v7216_v6 = vpop.permute.xlu0 %7215  ;;  %v18071_v63 = vld [vmem:[#allocation55_spill] sm:$0xff] }
 0xcb6   :  { %v7270_v27 = vmul.f32 %v18053_v57, %v7226_v16  ;;  %v7221_v15 = vsel %vm373_vm7, %v7208_v2, %v7216_v6  ;;  %v7233_v23 = vsel %vm373_vm7, %v7216_v6, %v16336_v44  ;;  %8664 = vmatprep.subr.bf16.mxu1 %v8663_v52  ;;  %v7269_v8 = vmul.f32 %v18057_v49, %v7230_v25  ;;  %v18074_v2 = vld [vmem:[#allocation20_spill] sm:$0xff] }
 0xcb7   :  { %8666 = vmatpush1.bf16.msra.mxu1 %v8665_v54  ;;  %v7267_v21 = vmul.f32 %v18058_v62, %v7221_v15  ;;  %v7268_v13 = vmul.f32 %v18063_v32, %v7233_v23 }
 0xcb8   :  { %8590 = vmatpush1.bf16.msra.mxu0 %v8589_v18  ;;  %v7218_v30 = vpop.permute.xlu1 %7217  ;;  %v8595_v61 = vpack.c.bf16 %v7270_v27, %v7266_v4  ;;  %8668 = vmatprep.subr.bf16.mxu1 %v18061_v47  ;;  %v8597_v9 = vpack.c.bf16 %v7269_v8, %v7265_v55 }
 0xcb9   :  { %8592 = vmatprep.subr.bf16.mxu0 %v18056_v42  ;;  %v7222_v20 = vsel %vm373_vm7, %v16355_v37, %v7218_v30  ;;  %v7234_v44 = vsel %vm373_vm7, %v7218_v30, %v16349_v45  ;;  %v18067_v37 = vmov 0.0  }
 0xcba   :  { %v7271_v46 = vmul.f32 %v18058_v62, %v7222_v20  ;;  %v7272_v39 = vmul.f32 %v18063_v32, %v7234_v44  ;;  %7656 = vmatmul.mubr.f32.vlgmr.msra.gmra.mrb[40].mxu1 %v18062_v58 }
 0xcbb   :  { %7514 = vmatmul.mubr.f32.vlgmr.msra.gmra.mrb[40].mxu0 %v18062_v58  ;;  %8670 = vmatpush1.bf16.msra.mxu1 %v18070_v10 }
 0xcbc   :  { %8594 = vmatpush1.bf16.msra.mxu0 %v18066_v40  ;;  %7584 = vmatprep.mubr.f32.mxu0 %v18067_v37  ;;  %v8673_v45 = vpack.c.bf16 %v7271_v46, %v7267_v21  ;;  %v8671_v48 = vpack.c.bf16 %v7272_v39, %v7268_v13 }
 0xcbd   :  { %8596 = vmatprep.subr.bf16.mxu0 %v8595_v61  ;;  %7726 = vmatprep.mubr.f32.mxu1 %v18067_v37 }
 0xcbe   :  { %8672 = vmatprep.subr.bf16.mxu1 %v8671_v48 }
 0xcbf   :  { %8674 = vmatpush1.bf16.msra.mxu1 %v8673_v45 }
 0xcc0   :  { %8598 = vmatpush1.bf16.msra.mxu0 %v8597_v9  ;;  %8676 = vmatprep.subr.bf16.mxu1 %v18072_v51 }
 0xcc1   :  { %8600 = vmatprep.subr.bf16.mxu0 %v18071_v63 }
 0xcc3   :  { %8678 = vmatpush1.bf16.msra.mxu1 %v18074_v2 }
 0xcc4   :  { %8602 = vmatpush1.bf16.msra.mxu0 %v18073_v38 }
 0xcc6   :  { %7878 = vmatmul.mubr.msk.f32.vlgmr.msra.gmra.mrb[40].mxu1 %vm1772_vm9, %v7290_v26 }
 0xcc7   :  { %7877 = vmatmul.mubr.msk.f32.vlgmr.msra.gmra.mrb[40].mxu0 %vm1772_vm9, %v7290_v26 }
 0xd99   :  { %v7728_v50 = vpop.f32.mrb[40].mxu1 }
 0xd9a   :  { %v7586_v5 = vpop.f32.mrb[40].mxu0  ;;  %v7730_v24 = vpop.f32.mrb[41].mxu1 }
 0xd9b   :  { %v7588_v3 = vpop.f32.mrb[41].mxu0  ;;  %v7738_v33 = vcombine.low %v7728_v50, %v7730_v24 }
 0xd9c   :  { %v7737_v12 = vcombine.low %v7586_v5, %v7588_v3 }
 0xd9d   :  { %7742 = vst [vmem:[%s16573_s9 + $0x8] sm:$0xff] %v7738_v33 }
 0xd9e   :  { %7741 = vst [vmem:[%s16573_s9] sm:$0xff] %v7737_v12 }

</bundles_post_ra>
